<compile_context>
chip_gen: v7x
topology: tpu7x:2x2x1
jax: 0.10.0
libtpu: 0.0.40
codegen_flags: <defaults>
</compile_context>

<pallas_src>
import functools
import math

import jax
import jax.numpy as jnp
from jax.experimental import pallas as pl
from jax.experimental.pallas import tpu as pltpu

F32 = jnp.float32
BF16 = jnp.bfloat16

_WHOLE = pl.BlockSpec(memory_space=pltpu.MemorySpace.VMEM)


# ----------------------------- kernels -------------------------------------


def adapt_stats_kernel(x_ref, w_ref, b_ref, res_ref, sum_ref, sq_ref):
    """1x1 channel-adaptation conv + accumulate per-channel BN sum / sum-of-squares."""
    r = jnp.dot(x_ref[...].astype(BF16), w_ref[...],
                preferred_element_type=F32) + b_ref[...]
    res_ref[...] = r

    @pl.when(pl.program_id(0) == 0)
    def _():
        sum_ref[...] = jnp.zeros_like(sum_ref)
        sq_ref[...] = jnp.zeros_like(sq_ref)

    sum_ref[...] += jnp.sum(r, axis=0, keepdims=True)
    sq_ref[...] += jnp.sum(r * r, axis=0, keepdims=True)


def stats_only_kernel(x_ref, sum_ref, sq_ref):
    """Identity channel adaptation: only accumulate BatchNorm statistics."""
    x = x_ref[...].astype(F32)

    @pl.when(pl.program_id(0) == 0)
    def _():
        sum_ref[...] = jnp.zeros_like(sum_ref)
        sq_ref[...] = jnp.zeros_like(sq_ref)

    sum_ref[...] += jnp.sum(x, axis=0, keepdims=True)
    sq_ref[...] += jnp.sum(x * x, axis=0, keepdims=True)


def kv_proj_kernel(a_ref, wap_ref, bap_ref, wk_ref, bk_ref, wv_ref, bv_ref,
                   k_ref, v_ref):
    """action_proj (Linear) fused with the attention K / V input projections."""
    a = jnp.dot(a_ref[...].astype(BF16), wap_ref[...],
                preferred_element_type=F32) + bap_ref[...]
    a16 = a.astype(BF16)
    k_ref[...] = jnp.dot(a16, wk_ref[...], preferred_element_type=F32) + bk_ref[...]
    v_ref[...] = jnp.dot(a16, wv_ref[...], preferred_element_type=F32) + bv_ref[...]


def kv_noproj_kernel(a_ref, wk_ref, bk_ref, wv_ref, bv_ref, k_ref, v_ref):
    """Identity action_proj path: only the attention K / V projections."""
    a16 = a_ref[...].astype(BF16)
    k_ref[...] = jnp.dot(a16, wk_ref[...], preferred_element_type=F32) + bk_ref[...]
    v_ref[...] = jnp.dot(a16, wv_ref[...], preferred_element_type=F32) + bv_ref[...]


def fused_block_kernel(res_ref, sum_ref, sq_ref, bng_ref, bnb_ref,
                       w1_ref, b1_ref, wq_ref, bq_ref,
                       kbd_ref, vbd_ref, hones_ref, wo_ref, bo_ref,
                       lng_ref, lnb_ref, w2_ref, b2_ref,
                       out_ref, pad_ref,
                       *, H, W, n_rows, attn_scale, eps_bn, eps_ln, slope):
    """Per-batch fused: BN-apply, conv1+LeakyReLU, cross-attn, LN, conv2, skip."""
    S, C = res_ref.shape

    # BatchNorm (training-mode batch statistics, biased variance), fused apply.
    inv_n = 1.0 / n_rows
    mean = sum_ref[...] * inv_n                              # (1, C)
    var = sq_ref[...] * inv_n - mean * mean
    scale = bng_ref[...] * jax.lax.rsqrt(var + eps_bn)
    shift = bnb_ref[...] - mean * scale

    res = res_ref[...]                                       # (S, C) f32
    bn = res * scale + shift

    def conv3x3(img_flat, w_ref_, b_ref_):
        # Zero-pad into a VMEM scratch window, build the 9 shifted taps concatenated
        # along channels -> one (S, 9C) @ (9C, C) MXU matmul (bf16 in, f32 acc).
        pad_ref[...] = jnp.zeros(pad_ref.shape, pad_ref.dtype)
        pad_ref[pl.ds(1, H), pl.ds(1, W), :] = img_flat.reshape(H, W, C)
        taps = [pad_ref[pl.ds(dh, H), pl.ds(dw, W), :].reshape(S, C)
                for dh in range(3) for dw in range(3)]
        t = jnp.concatenate(taps, axis=-1).astype(BF16)      # (S, 9C)
        return jnp.dot(t, w_ref_[...], preferred_element_type=F32) + b_ref_[...]

    # conv1 + LeakyReLU
    h1 = conv3x3(bn, w1_ref, b1_ref)
    h1 = jnp.where(h1 >= 0.0, h1, slope * h1)

    # Cross-attention: query = conv1 features; key/value = projected action tokens.
    # Per-head structure lives in the block-diagonal K^T / V operands built in the
    # wrapper, so the MHA core is three plain 2-D MXU matmuls + a segmented softmax.
    q = jnp.dot(h1.astype(BF16), wq_ref[...], preferred_element_type=F32) + bq_ref[...]
    s = jnp.dot(q.astype(BF16), kbd_ref[...], preferred_element_type=F32) * attn_scale
    s = s - jnp.max(s, axis=-1, keepdims=True)   # per-row shift (exact for softmax)
    e = jnp.exp(s)                                           # (S, heads*L)
    num = jnp.dot(e.astype(BF16), vbd_ref[...], preferred_element_type=F32)  # (S, C)
    den = jnp.dot(e, hones_ref[...], preferred_element_type=F32)             # (S, C)
    ctx = num * pl.reciprocal(den, approx=True)
    attn = jnp.dot(ctx.astype(BF16), wo_ref[...],
                   preferred_element_type=F32) + bo_ref[...]

    # residual add + LayerNorm (f32 math)
    y = h1 + attn
    mu = jnp.mean(y, axis=-1, keepdims=True)
    var_y = jnp.mean(jnp.square(y - mu), axis=-1, keepdims=True)
    ln = (y - mu) * jax.lax.rsqrt(var_y + eps_ln) * lng_ref[...] + lnb_ref[...]

    # conv2 + skip connection
    out_ref[...] = conv3x3(ln, w2_ref, b2_ref) + res


# ----------------------------- parameters ----------------------------------


def init_params(key, in_channels, out_channels, action_emb_dim):
    """Synthetic parameters (shapes follow the PyTorch module, matmul weights bf16)."""
    C = out_channels
    ks = jax.random.split(key, 12)

    def w(k, shape, fan_in, dtype=BF16):
        return (jax.random.normal(k, shape, F32) / math.sqrt(fan_in)).astype(dtype)

    def zeros():
        return jnp.zeros((1, C), F32)

    return {
        # channel_adaptation: Conv2d(in, out, 1) as a (Cin, Cout) matmul
        "w_ca": w(ks[0], (in_channels, C), in_channels), "b_ca": zeros(),
        # BatchNorm2d(out)
        "bn_gamma": jnp.ones((1, C), F32), "bn_beta": zeros(),
        # conv1 / conv2: Conv2d(out, out, 3, padding=1) in concatenated-tap layout:
        #   w[(dh*3+dw)*Cin + cin, cout] == torch_weight[cout, cin, dh, dw]
        "w_conv1": w(ks[1], (9 * C, C), 9 * C), "b_conv1": w(ks[2], (1, C), 9 * C, F32),
        "w_conv2": w(ks[3], (9 * C, C), 9 * C), "b_conv2": w(ks[4], (1, C), 9 * C, F32),
        # action_proj: Linear(action_emb_dim, out)
        "w_ap": w(ks[5], (action_emb_dim, C), action_emb_dim),
        "b_ap": w(ks[6], (1, C), action_emb_dim, F32),
        # MultiheadAttention(out, num_heads=4): in/out projections
        "w_q": w(ks[7], (C, C), C), "b_q": zeros(),
        "w_k": w(ks[8], (C, C), C), "b_k": zeros(),
        "w_v": w(ks[9], (C, C), C), "b_v": zeros(),
        "w_o": w(ks[10], (C, C), C), "b_o": zeros(),
        # LayerNorm(out)
        "ln_gamma": jnp.ones((1, C), F32), "ln_beta": zeros(),
    }


# ----------------------------- forward -------------------------------------


def _pick_row_tile(n_rows):
    for cand in (512, 256, 128, 64, 32, 16, 8):
        if cand < n_rows and n_rows % cand == 0:
            return cand
    return n_rows


def residual_block_forward(params, x_nchw, action_token, *, num_heads=4):
    B, Cin, H, W = x_nchw.shape
    C = params["bn_gamma"].shape[-1]
    L, A = action_token.shape[1], action_token.shape[2]
    S = H * W
    n_rows = B * S
    head_dim = C // num_heads

    x_flat = jnp.transpose(x_nchw, (0, 2, 3, 1)).reshape(n_rows, Cin).astype(F32)

    # ---- K1: channel adaptation (1x1 conv) + BatchNorm batch statistics --------
    tile_m = _pick_row_tile(n_rows)
    grid_m = n_rows // tile_m

    def row_spec(c):
        return pl.BlockSpec((tile_m, c), lambda i: (i, 0))

    def const_spec(r, c):
        return pl.BlockSpec((r, c), lambda i: (0, 0))

    stats_shapes = (jax.ShapeDtypeStruct((1, C), F32),
                    jax.ShapeDtypeStruct((1, C), F32))
    cp_reduce = pltpu.CompilerParams(dimension_semantics=("arbitrary",),
                                     vmem_limit_bytes=32 * 1024 * 1024)

    # TODO(synk): nn.BatchNorm2d running_mean / running_var buffer updates (a
    # training-time side effect) are not carried; the normalization itself is exact.
    if Cin != C:
        residual, bn_sum, bn_sq = pl.pallas_call(
            adapt_stats_kernel,
            grid=(grid_m,),
            in_specs=[row_spec(Cin), const_spec(Cin, C), const_spec(1, C)],
            out_specs=(row_spec(C), const_spec(1, C), const_spec(1, C)),
            out_shape=(jax.ShapeDtypeStruct((n_rows, C), F32),) + stats_shapes,
            compiler_params=cp_reduce,
        )(x_flat, params["w_ca"], params["b_ca"])
    else:
        residual = x_flat
        bn_sum, bn_sq = pl.pallas_call(
            stats_only_kernel,
            grid=(grid_m,),
            in_specs=[row_spec(C)],
            out_specs=(const_spec(1, C), const_spec(1, C)),
            out_shape=stats_shapes,
            compiler_params=cp_reduce,
        )(x_flat)

    # ---- K2: action_proj + K/V projections (one tiny call) ---------------------
    act_flat = action_token.reshape(B * L, A).astype(F32)
    kv_out = (jax.ShapeDtypeStruct((B * L, C), F32),
              jax.ShapeDtypeStruct((B * L, C), F32))
    if A != C:
        k_flat, v_flat = pl.pallas_call(
            kv_proj_kernel,
            in_specs=[_WHOLE] * 7,
            out_specs=(_WHOLE, _WHOLE),
            out_shape=kv_out,
        )(act_flat, params["w_ap"], params["b_ap"],
          params["w_k"], params["b_k"], params["w_v"], params["b_v"])
    else:
        k_flat, v_flat = pl.pallas_call(
            kv_noproj_kernel,
            in_specs=[_WHOLE] * 5,
            out_specs=(_WHOLE, _WHOLE),
            out_shape=kv_out,
        )(act_flat, params["w_k"], params["b_k"], params["w_v"], params["b_v"])

    # ---- glue: per-head block-diagonal K^T / V operands (tiny, XLA-side) --------
    eye = jnp.eye(num_heads, dtype=F32)
    kh = k_flat.reshape(B, L, num_heads, head_dim)
    vh = v_flat.reshape(B, L, num_heads, head_dim)
    # k_bd[b, h*D+d, g*L+l] = K[b, l, h*D+d] iff h == g   -> (B, C, heads*L)
    k_bd = jnp.einsum("blhd,hg->bhdgl", kh, eye).reshape(
        B, C, num_heads * L).astype(BF16)
    # v_bd[b, g*L+l, h*D+d] = V[b, l, h*D+d] iff h == g   -> (B, heads*L, C)
    v_bd = jnp.einsum("blhd,hg->bglhd", vh, eye).reshape(
        B, num_heads * L, C).astype(BF16)
    # head_ones[g*L+l, h*D+d] = 1 iff g == h (per-head softmax denom broadcast)
    head_ones = jnp.repeat(jnp.repeat(eye, L, axis=0), head_dim, axis=1)

    # ---- K3: fused BN-apply / conv1 / cross-attn / LayerNorm / conv2 / skip -----
    res_seq = residual.reshape(B, S, C)

    def bspec(shape):                 # grid-invariant (resident) operand
        shape = tuple(shape)
        return pl.BlockSpec(shape, lambda b: (0,) * len(shape))

    def batched(tail):                # (None, *tail) block indexed by the batch axis
        tail = tuple(tail)
        return pl.BlockSpec((None,) + tail, lambda b: (b,) + (0,) * len(tail))

    kernel = functools.partial(
        fused_block_kernel,
        H=H, W=W, n_rows=float(n_rows),
        attn_scale=1.0 / math.sqrt(head_dim),
        eps_bn=1e-5, eps_ln=1e-5, slope=0.01)

    out_seq = pl.pallas_call(
        kernel,
        grid=(B,),
        in_specs=[
            batched((S, C)),                       # residual (per-batch image rows)
            bspec((1, C)), bspec((1, C)),          # BN sum / sum-of-squares
            bspec((1, C)), bspec((1, C)),          # BN gamma / beta
            bspec((9 * C, C)), bspec((1, C)),      # conv1 weight (concat taps) / bias
            bspec((C, C)), bspec((1, C)),          # Q projection
            batched((C, num_heads * L)),           # block-diagonal K^T
            batched((num_heads * L, C)),           # block-diagonal V
            bspec((num_heads * L, C)),             # per-head denominator broadcast
            bspec((C, C)), bspec((1, C)),          # out projection
            bspec((1, C)), bspec((1, C)),          # LayerNorm gamma / beta
            bspec((9 * C, C)), bspec((1, C)),      # conv2 weight / bias
        ],
        out_specs=batched((S, C)),
        out_shape=jax.ShapeDtypeStruct((B, S, C), F32),
        scratch_shapes=[pltpu.VMEM((H + 2, W + 2, C), F32)],
        compiler_params=pltpu.CompilerParams(
            dimension_semantics=("parallel",),
            vmem_limit_bytes=32 * 1024 * 1024),
    )(res_seq, bn_sum, bn_sq, params["bn_gamma"], params["bn_beta"],
      params["w_conv1"], params["b_conv1"], params["w_q"], params["b_q"],
      k_bd, v_bd, head_ones, params["w_o"], params["b_o"],
      params["ln_gamma"], params["ln_beta"], params["w_conv2"], params["b_conv2"])

    # back to NCHW to match the PyTorch module's output layout
    return jnp.transpose(out_seq.reshape(B, H, W, C), (0, 3, 1, 2))


# ------------------------------- main ---------------------------------------

if __name__ == "__main__":
    B, Cin, Cout, H, W = 2, 4, 32, 16, 16       # Cout divisible by num_heads=4
    action_emb_dim, L = 16, 3

    key = jax.random.PRNGKey(0)
    kx, ka, kp = jax.random.split(key, 3)
    x = jax.random.normal(kx, (B, Cin, H, W), F32)             # NCHW like PyTorch
    action_token = jax.random.normal(ka, (B, L, action_emb_dim), F32)
    params = init_params(kp, Cin, Cout, action_emb_dim)

    fwd = jax.jit(functools.partial(residual_block_forward, num_heads=4))
    out = jax.block_until_ready(fwd(params, x, action_token))

    assert out.shape == (B, Cout, H, W), out.shape
    assert bool(jnp.all(jnp.isfinite(out)))
    print("KERNEL_OK")
</pallas_src>

<mosaic_0001>
module attributes {stable_mosaic.version = 11 : i64} {
  func.func @kv_proj_kernel(%arg0: memref<6x16xf32, #tpu.memory_space<vmem>>, %arg1: memref<16x32xbf16, #tpu.memory_space<vmem>>, %arg2: memref<1x32xf32, #tpu.memory_space<vmem>>, %arg3: memref<32x32xbf16, #tpu.memory_space<vmem>>, %arg4: memref<1x32xf32, #tpu.memory_space<vmem>>, %arg5: memref<32x32xbf16, #tpu.memory_space<vmem>>, %arg6: memref<1x32xf32, #tpu.memory_space<vmem>>, %arg7: memref<6x32xf32, #tpu.memory_space<vmem>>, %arg8: memref<6x32xf32, #tpu.memory_space<vmem>>) attributes {dimension_semantics = [], scalar_prefetch = 0 : i64, scratch_operands = 0 : i64, tpu.core_type = #tpu.core_type<tc>} {
    %c0 = arith.constant 0 : index
    %c0_0 = arith.constant 0 : index
    %0 = vector.load %arg0[%c0, %c0_0] : memref<6x16xf32, #tpu.memory_space<vmem>>, vector<6x16xf32>
    %1 = arith.truncf %0 : vector<6x16xf32> to vector<6x16xbf16>
    %c0_1 = arith.constant 0 : index
    %c0_2 = arith.constant 0 : index
    %2 = vector.load %arg1[%c0_1, %c0_2] : memref<16x32xbf16, #tpu.memory_space<vmem>>, vector<16x32xbf16>
    %cst = arith.constant dense<0.000000e+00> : vector<6x32xf32>
    %3 = tpu.matmul %1, %2, %cst {dimension_numbers = #tpu.dot_dimension_numbers<[1], [0], [0], [1], [0, 0, 1, 1], [], []>} : vector<6x16xbf16>, vector<16x32xbf16>, vector<6x32xf32> -> vector<6x32xf32>
    %c0_3 = arith.constant 0 : index
    %c0_4 = arith.constant 0 : index
    %4 = vector.load %arg2[%c0_3, %c0_4] : memref<1x32xf32, #tpu.memory_space<vmem>>, vector<1x32xf32>
    %5 = vector.broadcast %4 : vector<1x32xf32> to vector<6x32xf32>
    %6 = arith.addf %3, %5 : vector<6x32xf32>
    %7 = arith.truncf %6 : vector<6x32xf32> to vector<6x32xbf16>
    %c0_5 = arith.constant 0 : index
    %c0_6 = arith.constant 0 : index
    %8 = vector.load %arg3[%c0_5, %c0_6] : memref<32x32xbf16, #tpu.memory_space<vmem>>, vector<32x32xbf16>
    %cst_7 = arith.constant dense<0.000000e+00> : vector<6x32xf32>
    %9 = tpu.matmul %7, %8, %cst_7 {dimension_numbers = #tpu.dot_dimension_numbers<[1], [0], [0], [1], [0, 0, 1, 1], [], []>} : vector<6x32xbf16>, vector<32x32xbf16>, vector<6x32xf32> -> vector<6x32xf32>
    %c0_8 = arith.constant 0 : index
    %c0_9 = arith.constant 0 : index
    %10 = vector.load %arg4[%c0_8, %c0_9] : memref<1x32xf32, #tpu.memory_space<vmem>>, vector<1x32xf32>
    %11 = vector.broadcast %10 : vector<1x32xf32> to vector<6x32xf32>
    %12 = arith.addf %9, %11 : vector<6x32xf32>
    %c0_10 = arith.constant 0 : index
    %c0_11 = arith.constant 0 : index
    %13 = vector.load %arg7[%c0_10, %c0_11] : memref<6x32xf32, #tpu.memory_space<vmem>>, vector<6x32xf32>
    tpu.vector_store %arg7[%c0_10, %c0_11], %12 {strides = array<i32>} : memref<6x32xf32, #tpu.memory_space<vmem>>, vector<6x32xf32>,
    %c0_12 = arith.constant 0 : index
    %c0_13 = arith.constant 0 : index
    %14 = vector.load %arg5[%c0_12, %c0_13] : memref<32x32xbf16, #tpu.memory_space<vmem>>, vector<32x32xbf16>
    %cst_14 = arith.constant dense<0.000000e+00> : vector<6x32xf32>
    %15 = tpu.matmul %7, %14, %cst_14 {dimension_numbers = #tpu.dot_dimension_numbers<[1], [0], [0], [1], [0, 0, 1, 1], [], []>} : vector<6x32xbf16>, vector<32x32xbf16>, vector<6x32xf32> -> vector<6x32xf32>
    %c0_15 = arith.constant 0 : index
    %c0_16 = arith.constant 0 : index
    %16 = vector.load %arg6[%c0_15, %c0_16] : memref<1x32xf32, #tpu.memory_space<vmem>>, vector<1x32xf32>
    %17 = vector.broadcast %16 : vector<1x32xf32> to vector<6x32xf32>
    %18 = arith.addf %15, %17 : vector<6x32xf32>
    %c0_17 = arith.constant 0 : index
    %c0_18 = arith.constant 0 : index
    %19 = vector.load %arg8[%c0_17, %c0_18] : memref<6x32xf32, #tpu.memory_space<vmem>>, vector<6x32xf32>
    tpu.vector_store %arg8[%c0_17, %c0_18], %18 {strides = array<i32>} : memref<6x32xf32, #tpu.memory_space<vmem>>, vector<6x32xf32>,
    return
  }
}

module attributes {stable_mosaic.version = 11 : i64} {
  func.func @adapt_stats_kernel(%arg0: i32, %arg1: memref<256x4xf32, #tpu.memory_space<vmem>>, %arg2: memref<4x32xbf16, #tpu.memory_space<vmem>>, %arg3: memref<1x32xf32, #tpu.memory_space<vmem>>, %arg4: memref<256x32xf32, #tpu.memory_space<vmem>>, %arg5: memref<1x32xf32, #tpu.memory_space<vmem>>, %arg6: memref<1x32xf32, #tpu.memory_space<vmem>>) attributes {dimension_semantics = [#tpu.dimension_semantics<arbitrary>], iteration_bounds = array<i64: 2>, scalar_prefetch = 0 : i64, scratch_operands = 0 : i64, tpu.core_type = #tpu.core_type<tc>, window_params = [{transform_indices = @transform_0, window_bounds = array<i64: 256, 4>}, {pipeline_mode = #tpu.pipeline_mode<synchronous>, transform_indices = @transform_1, window_bounds = array<i64: 4, 32>}, {pipeline_mode = #tpu.pipeline_mode<synchronous>, transform_indices = @transform_2, window_bounds = array<i64: 1, 32>}, {transform_indices = @transform_3, window_bounds = array<i64: 256, 32>}, {pipeline_mode = #tpu.pipeline_mode<synchronous>, transform_indices = @transform_4, window_bounds = array<i64: 1, 32>}, {pipeline_mode = #tpu.pipeline_mode<synchronous>, transform_indices = @transform_5, window_bounds = array<i64: 1, 32>}]} {
    %c0 = arith.constant 0 : index
    %c0_0 = arith.constant 0 : index
    %0 = vector.load %arg1[%c0, %c0_0] : memref<256x4xf32, #tpu.memory_space<vmem>>, vector<256x4xf32>
    %1 = arith.truncf %0 : vector<256x4xf32> to vector<256x4xbf16>
    %c0_1 = arith.constant 0 : index
    %c0_2 = arith.constant 0 : index
    %2 = vector.load %arg2[%c0_1, %c0_2] : memref<4x32xbf16, #tpu.memory_space<vmem>>, vector<4x32xbf16>
    %cst = arith.constant dense<0.000000e+00> : vector<256x32xf32>
    %3 = tpu.matmul %1, %2, %cst {dimension_numbers = #tpu.dot_dimension_numbers<[1], [0], [0], [1], [0, 0, 1, 1], [], []>} : vector<256x4xbf16>, vector<4x32xbf16>, vector<256x32xf32> -> vector<256x32xf32>
    %c0_3 = arith.constant 0 : index
    %c0_4 = arith.constant 0 : index
    %4 = vector.load %arg3[%c0_3, %c0_4] : memref<1x32xf32, #tpu.memory_space<vmem>>, vector<1x32xf32>
    %5 = vector.broadcast %4 : vector<1x32xf32> to vector<256x32xf32>
    %6 = arith.addf %3, %5 : vector<256x32xf32>
    %c0_5 = arith.constant 0 : index
    %c0_6 = arith.constant 0 : index
    %7 = vector.load %arg4[%c0_5, %c0_6] : memref<256x32xf32, #tpu.memory_space<vmem>>, vector<256x32xf32>
    tpu.vector_store %arg4[%c0_5, %c0_6], %6 {strides = array<i32>} : memref<256x32xf32, #tpu.memory_space<vmem>>, vector<256x32xf32>,
    %c0_i32 = arith.constant 0 : i32
    %8 = arith.cmpi eq, %arg0, %c0_i32 : i32
    %9 = arith.extui %8 : i1 to i32
    %c0_i32_7 = arith.constant 0 : i32
    %10 = arith.cmpi ne, %9, %c0_i32_7 : i32
    scf.if %10 {
      %cst_18 = arith.constant 0.000000e+00 : f32
      %22 = vector.broadcast %cst_18 : f32 to vector<1x32xf32>
      %c0_19 = arith.constant 0 : index
      %c0_20 = arith.constant 0 : index
      %23 = vector.load %arg5[%c0_19, %c0_20] : memref<1x32xf32, #tpu.memory_space<vmem>>, vector<1x32xf32>
      tpu.vector_store %arg5[%c0_19, %c0_20], %22 {strides = array<i32>} : memref<1x32xf32, #tpu.memory_space<vmem>>, vector<1x32xf32>,
      %cst_21 = arith.constant 0.000000e+00 : f32
      %24 = vector.broadcast %cst_21 : f32 to vector<1x32xf32>
      %c0_22 = arith.constant 0 : index
      %c0_23 = arith.constant 0 : index
      %25 = vector.load %arg6[%c0_22, %c0_23] : memref<1x32xf32, #tpu.memory_space<vmem>>, vector<1x32xf32>
      tpu.vector_store %arg6[%c0_22, %c0_23], %24 {strides = array<i32>} : memref<1x32xf32, #tpu.memory_space<vmem>>, vector<1x32xf32>,
    } else {
    }
    %c0_8 = arith.constant 0 : index
    %c0_9 = arith.constant 0 : index
    %11 = vector.load %arg5[%c0_8, %c0_9] : memref<1x32xf32, #tpu.memory_space<vmem>>, vector<1x32xf32>
    %cst_10 = arith.constant dense<0.000000e+00> : vector<32xf32>
    %12 = vector.multi_reduction <add>, %6, %cst_10 [0] : vector<256x32xf32> to vector<32xf32>
    %13 = vector.shape_cast %12 : vector<32xf32> to vector<1x32xf32>
    %14 = arith.addf %11, %13 : vector<1x32xf32>
    %c0_11 = arith.constant 0 : index
    %c0_12 = arith.constant 0 : index
    %15 = vector.load %arg5[%c0_11, %c0_12] : memref<1x32xf32, #tpu.memory_space<vmem>>, vector<1x32xf32>
    tpu.vector_store %arg5[%c0_11, %c0_12], %14 {strides = array<i32>} : memref<1x32xf32, #tpu.memory_space<vmem>>, vector<1x32xf32>,
    %c0_13 = arith.constant 0 : index
    %c0_14 = arith.constant 0 : index
    %16 = vector.load %arg6[%c0_13, %c0_14] : memref<1x32xf32, #tpu.memory_space<vmem>>, vector<1x32xf32>
    %17 = arith.mulf %6, %6 : vector<256x32xf32>
    %cst_15 = arith.constant dense<0.000000e+00> : vector<32xf32>
    %18 = vector.multi_reduction <add>, %17, %cst_15 [0] : vector<256x32xf32> to vector<32xf32>
    %19 = vector.shape_cast %18 : vector<32xf32> to vector<1x32xf32>
    %20 = arith.addf %16, %19 : vector<1x32xf32>
    %c0_16 = arith.constant 0 : index
    %c0_17 = arith.constant 0 : index
    %21 = vector.load %arg6[%c0_16, %c0_17] : memref<1x32xf32, #tpu.memory_space<vmem>>, vector<1x32xf32>
    tpu.vector_store %arg6[%c0_16, %c0_17], %20 {strides = array<i32>} : memref<1x32xf32, #tpu.memory_space<vmem>>, vector<1x32xf32>,
    return
  }
  func.func @transform_0(%arg0: i32) -> (i32, i32) {
    %c0_i32 = arith.constant 0 : i32
    %c0_i32_0 = arith.constant 0 : i32
    return %arg0, %c0_i32 : i32, i32
  }
  func.func @transform_1(%arg0: i32) -> (i32, i32) {
    %c0_i32 = arith.constant 0 : i32
    %c0_i32_0 = arith.constant 0 : i32
    %c0_i32_1 = arith.constant 0 : i32
    return %c0_i32, %c0_i32_0 : i32, i32
  }
  func.func @transform_2(%arg0: i32) -> (i32, i32) {
    %c0_i32 = arith.constant 0 : i32
    %c0_i32_0 = arith.constant 0 : i32
    %c0_i32_1 = arith.constant 0 : i32
    return %c0_i32, %c0_i32_0 : i32, i32
  }
  func.func @transform_3(%arg0: i32) -> (i32, i32) {
    %c0_i32 = arith.constant 0 : i32
    %c0_i32_0 = arith.constant 0 : i32
    return %arg0, %c0_i32 : i32, i32
  }
  func.func @transform_4(%arg0: i32) -> (i32, i32) {
    %c0_i32 = arith.constant 0 : i32
    %c0_i32_0 = arith.constant 0 : i32
    %c0_i32_1 = arith.constant 0 : i32
    return %c0_i32, %c0_i32_0 : i32, i32
  }
  func.func @transform_5(%arg0: i32) -> (i32, i32) {
    %c0_i32 = arith.constant 0 : i32
    %c0_i32_0 = arith.constant 0 : i32
    %c0_i32_1 = arith.constant 0 : i32
    return %c0_i32, %c0_i32_0 : i32, i32
  }
}

module attributes {stable_mosaic.version = 11 : i64} {
  func.func @fused_block_kernel(%arg0: i32, %arg1: memref<1x256x32xf32, #tpu.memory_space<vmem>>, %arg2: memref<1x32xf32, #tpu.memory_space<vmem>>, %arg3: memref<1x32xf32, #tpu.memory_space<vmem>>, %arg4: memref<1x32xf32, #tpu.memory_space<vmem>>, %arg5: memref<1x32xf32, #tpu.memory_space<vmem>>, %arg6: memref<288x32xbf16, #tpu.memory_space<vmem>>, %arg7: memref<1x32xf32, #tpu.memory_space<vmem>>, %arg8: memref<32x32xbf16, #tpu.memory_space<vmem>>, %arg9: memref<1x32xf32, #tpu.memory_space<vmem>>, %arg10: memref<1x32x12xbf16, #tpu.memory_space<vmem>>, %arg11: memref<1x12x32xbf16, #tpu.memory_space<vmem>>, %arg12: memref<12x32xf32, #tpu.memory_space<vmem>>, %arg13: memref<32x32xbf16, #tpu.memory_space<vmem>>, %arg14: memref<1x32xf32, #tpu.memory_space<vmem>>, %arg15: memref<1x32xf32, #tpu.memory_space<vmem>>, %arg16: memref<1x32xf32, #tpu.memory_space<vmem>>, %arg17: memref<288x32xbf16, #tpu.memory_space<vmem>>, %arg18: memref<1x32xf32, #tpu.memory_space<vmem>>, %arg19: memref<1x256x32xf32, #tpu.memory_space<vmem>>, %arg20: memref<18x18x32xf32, #tpu.memory_space<vmem>>) attributes {dimension_semantics = [#tpu.dimension_semantics<parallel>], iteration_bounds = array<i64: 2>, scalar_prefetch = 0 : i64, scratch_operands = 1 : i64, tpu.core_type = #tpu.core_type<tc>, window_params = [{transform_indices = @transform_0, window_bounds = array<i64: 1, 256, 32>}, {pipeline_mode = #tpu.pipeline_mode<synchronous>, transform_indices = @transform_1, window_bounds = array<i64: 1, 32>}, {pipeline_mode = #tpu.pipeline_mode<synchronous>, transform_indices = @transform_2, window_bounds = array<i64: 1, 32>}, {pipeline_mode = #tpu.pipeline_mode<synchronous>, transform_indices = @transform_3, window_bounds = array<i64: 1, 32>}, {pipeline_mode = #tpu.pipeline_mode<synchronous>, transform_indices = @transform_4, window_bounds = array<i64: 1, 32>}, {pipeline_mode = #tpu.pipeline_mode<synchronous>, transform_indices = @transform_5, window_bounds = array<i64: 288, 32>}, {pipeline_mode = #tpu.pipeline_mode<synchronous>, transform_indices = @transform_6, window_bounds = array<i64: 1, 32>}, {pipeline_mode = #tpu.pipeline_mode<synchronous>, transform_indices = @transform_7, window_bounds = array<i64: 32, 32>}, {pipeline_mode = #tpu.pipeline_mode<synchronous>, transform_indices = @transform_8, window_bounds = array<i64: 1, 32>}, {transform_indices = @transform_9, window_bounds = array<i64: 1, 32, 12>}, {transform_indices = @transform_10, window_bounds = array<i64: 1, 12, 32>}, {pipeline_mode = #tpu.pipeline_mode<synchronous>, transform_indices = @transform_11, window_bounds = array<i64: 12, 32>}, {pipeline_mode = #tpu.pipeline_mode<synchronous>, transform_indices = @transform_12, window_bounds = array<i64: 32, 32>}, {pipeline_mode = #tpu.pipeline_mode<synchronous>, transform_indices = @transform_13, window_bounds = array<i64: 1, 32>}, {pipeline_mode = #tpu.pipeline_mode<synchronous>, transform_indices = @transform_14, window_bounds = array<i64: 1, 32>}, {pipeline_mode = #tpu.pipeline_mode<synchronous>, transform_indices = @transform_15, window_bounds = array<i64: 1, 32>}, {pipeline_mode = #tpu.pipeline_mode<synchronous>, transform_indices = @transform_16, window_bounds = array<i64: 288, 32>}, {pipeline_mode = #tpu.pipeline_mode<synchronous>, transform_indices = @transform_17, window_bounds = array<i64: 1, 32>}, {transform_indices = @transform_18, window_bounds = array<i64: 1, 256, 32>}]} {
    %c0 = arith.constant 0 : index
    %c0_0 = arith.constant 0 : index
    %0 = vector.load %arg2[%c0, %c0_0] : memref<1x32xf32, #tpu.memory_space<vmem>>, vector<1x32xf32>
    %cst = arith.constant 0.001953125 : f32
    %1 = vector.broadcast %cst : f32 to vector<1x32xf32>
    %2 = arith.mulf %0, %1 : vector<1x32xf32>
    %c0_1 = arith.constant 0 : index
    %c0_2 = arith.constant 0 : index
    %3 = vector.load %arg3[%c0_1, %c0_2] : memref<1x32xf32, #tpu.memory_space<vmem>>, vector<1x32xf32>
    %cst_3 = arith.constant 0.001953125 : f32
    %4 = vector.broadcast %cst_3 : f32 to vector<1x32xf32>
    %5 = arith.mulf %3, %4 : vector<1x32xf32>
    %6 = arith.mulf %2, %2 : vector<1x32xf32>
    %7 = arith.subf %5, %6 : vector<1x32xf32>
    %c0_4 = arith.constant 0 : index
    %c0_5 = arith.constant 0 : index
    %8 = vector.load %arg4[%c0_4, %c0_5] : memref<1x32xf32, #tpu.memory_space<vmem>>, vector<1x32xf32>
    %cst_6 = arith.constant 9.99999974E-6 : f32
    %9 = vector.broadcast %cst_6 : f32 to vector<1x32xf32>
    %10 = arith.addf %7, %9 : vector<1x32xf32>
    %11 = math.rsqrt %10 : vector<1x32xf32>
    %12 = arith.mulf %8, %11 : vector<1x32xf32>
    %c0_7 = arith.constant 0 : index
    %c0_8 = arith.constant 0 : index
    %13 = vector.load %arg5[%c0_7, %c0_8] : memref<1x32xf32, #tpu.memory_space<vmem>>, vector<1x32xf32>
    %14 = arith.mulf %2, %12 : vector<1x32xf32>
    %15 = arith.subf %13, %14 : vector<1x32xf32>
    %c0_9 = arith.constant 0 : index
    %c0_10 = arith.constant 0 : index
    %c0_11 = arith.constant 0 : index
    %16 = vector.load %arg1[%c0_9, %c0_10, %c0_11] : memref<1x256x32xf32, #tpu.memory_space<vmem>>, vector<1x256x32xf32>
    %17 = vector.shape_cast %16 : vector<1x256x32xf32> to vector<256x32xf32>
    %18 = vector.broadcast %12 : vector<1x32xf32> to vector<256x32xf32>
    %19 = arith.mulf %17, %18 : vector<256x32xf32>
    %20 = vector.broadcast %15 : vector<1x32xf32> to vector<256x32xf32>
    %21 = arith.addf %19, %20 : vector<256x32xf32>
    %cst_12 = arith.constant 0.000000e+00 : f32
    %22 = vector.broadcast %cst_12 : f32 to vector<18x18x32xf32>
    %c0_13 = arith.constant 0 : index
    %c0_14 = arith.constant 0 : index
    %c0_15 = arith.constant 0 : index
    %23 = vector.load %arg20[%c0_13, %c0_14, %c0_15] : memref<18x18x32xf32, #tpu.memory_space<vmem>>, vector<18x18x32xf32>
    tpu.vector_store %arg20[%c0_13, %c0_14, %c0_15], %22 {strides = array<i32>} : memref<18x18x32xf32, #tpu.memory_space<vmem>>, vector<18x18x32xf32>,
    %24 = vector.shape_cast %21 : vector<256x32xf32> to vector<16x16x32xf32>
    %c1 = arith.constant 1 : index
    %c1_16 = arith.constant 1 : index
    %c0_17 = arith.constant 0 : index
    %25 = vector.load %arg20[%c1, %c1_16, %c0_17] : memref<18x18x32xf32, #tpu.memory_space<vmem>>, vector<16x16x32xf32>
    tpu.vector_store %arg20[%c1, %c1_16, %c0_17], %24 {strides = array<i32>} : memref<18x18x32xf32, #tpu.memory_space<vmem>>, vector<16x16x32xf32>,
    %c0_18 = arith.constant 0 : index
    %c0_19 = arith.constant 0 : index
    %c0_20 = arith.constant 0 : index
    %26 = vector.load %arg20[%c0_18, %c0_19, %c0_20] : memref<18x18x32xf32, #tpu.memory_space<vmem>>, vector<16x16x32xf32>
    %27 = vector.shape_cast %26 : vector<16x16x32xf32> to vector<256x32xf32>
    %c0_21 = arith.constant 0 : index
    %c1_22 = arith.constant 1 : index
    %c0_23 = arith.constant 0 : index
    %28 = vector.load %arg20[%c0_21, %c1_22, %c0_23] : memref<18x18x32xf32, #tpu.memory_space<vmem>>, vector<16x16x32xf32>
    %29 = vector.shape_cast %28 : vector<16x16x32xf32> to vector<256x32xf32>
    %c0_24 = arith.constant 0 : index
    %c2 = arith.constant 2 : index
    %c0_25 = arith.constant 0 : index
    %30 = vector.load %arg20[%c0_24, %c2, %c0_25] : memref<18x18x32xf32, #tpu.memory_space<vmem>>, vector<16x16x32xf32>
    %31 = vector.shape_cast %30 : vector<16x16x32xf32> to vector<256x32xf32>
    %c1_26 = arith.constant 1 : index
    %c0_27 = arith.constant 0 : index
    %c0_28 = arith.constant 0 : index
    %32 = vector.load %arg20[%c1_26, %c0_27, %c0_28] : memref<18x18x32xf32, #tpu.memory_space<vmem>>, vector<16x16x32xf32>
    %33 = vector.shape_cast %32 : vector<16x16x32xf32> to vector<256x32xf32>
    %c1_29 = arith.constant 1 : index
    %c1_30 = arith.constant 1 : index
    %c0_31 = arith.constant 0 : index
    %34 = vector.load %arg20[%c1_29, %c1_30, %c0_31] : memref<18x18x32xf32, #tpu.memory_space<vmem>>, vector<16x16x32xf32>
    %35 = vector.shape_cast %34 : vector<16x16x32xf32> to vector<256x32xf32>
    %c1_32 = arith.constant 1 : index
    %c2_33 = arith.constant 2 : index
    %c0_34 = arith.constant 0 : index
    %36 = vector.load %arg20[%c1_32, %c2_33, %c0_34] : memref<18x18x32xf32, #tpu.memory_space<vmem>>, vector<16x16x32xf32>
    %37 = vector.shape_cast %36 : vector<16x16x32xf32> to vector<256x32xf32>
    %c2_35 = arith.constant 2 : index
    %c0_36 = arith.constant 0 : index
    %c0_37 = arith.constant 0 : index
    %38 = vector.load %arg20[%c2_35, %c0_36, %c0_37] : memref<18x18x32xf32, #tpu.memory_space<vmem>>, vector<16x16x32xf32>
    %39 = vector.shape_cast %38 : vector<16x16x32xf32> to vector<256x32xf32>
    %c2_38 = arith.constant 2 : index
    %c1_39 = arith.constant 1 : index
    %c0_40 = arith.constant 0 : index
    %40 = vector.load %arg20[%c2_38, %c1_39, %c0_40] : memref<18x18x32xf32, #tpu.memory_space<vmem>>, vector<16x16x32xf32>
    %41 = vector.shape_cast %40 : vector<16x16x32xf32> to vector<256x32xf32>
    %c2_41 = arith.constant 2 : index
    %c2_42 = arith.constant 2 : index
    %c0_43 = arith.constant 0 : index
    %42 = vector.load %arg20[%c2_41, %c2_42, %c0_43] : memref<18x18x32xf32, #tpu.memory_space<vmem>>, vector<16x16x32xf32>
    %43 = vector.shape_cast %42 : vector<16x16x32xf32> to vector<256x32xf32>
    %44 = tpu.concatenate %27, %29, %31, %33, %35, %37, %39, %41, %43 in 1 : vector<256x32xf32>, vector<256x32xf32>, vector<256x32xf32>, vector<256x32xf32>, vector<256x32xf32>, vector<256x32xf32>, vector<256x32xf32>, vector<256x32xf32>, vector<256x32xf32> -> vector<256x288xf32>
    %45 = arith.truncf %44 : vector<256x288xf32> to vector<256x288xbf16>
    %c0_44 = arith.constant 0 : index
    %c0_45 = arith.constant 0 : index
    %46 = vector.load %arg6[%c0_44, %c0_45] : memref<288x32xbf16, #tpu.memory_space<vmem>>, vector<288x32xbf16>
    %cst_46 = arith.constant dense<0.000000e+00> : vector<256x32xf32>
    %47 = tpu.matmul %45, %46, %cst_46 {dimension_numbers = #tpu.dot_dimension_numbers<[1], [0], [0], [1], [0, 0, 1, 1], [], []>} : vector<256x288xbf16>, vector<288x32xbf16>, vector<256x32xf32> -> vector<256x32xf32>
    %c0_47 = arith.constant 0 : index
    %c0_48 = arith.constant 0 : index
    %48 = vector.load %arg7[%c0_47, %c0_48] : memref<1x32xf32, #tpu.memory_space<vmem>>, vector<1x32xf32>
    %49 = vector.broadcast %48 : vector<1x32xf32> to vector<256x32xf32>
    %50 = arith.addf %47, %49 : vector<256x32xf32>
    %cst_49 = arith.constant 0.000000e+00 : f32
    %51 = vector.broadcast %cst_49 : f32 to vector<256x32xf32>
    %52 = arith.cmpf oge, %50, %51 : vector<256x32xf32>
    %cst_50 = arith.constant 0.00999999977 : f32
    %53 = vector.broadcast %cst_50 : f32 to vector<256x32xf32>
    %54 = arith.mulf %53, %50 : vector<256x32xf32>
    %55 = arith.select %52, %50, %54 : vector<256x32xi1>, vector<256x32xf32>
    %56 = arith.truncf %55 : vector<256x32xf32> to vector<256x32xbf16>
    %c0_51 = arith.constant 0 : index
    %c0_52 = arith.constant 0 : index
    %57 = vector.load %arg8[%c0_51, %c0_52] : memref<32x32xbf16, #tpu.memory_space<vmem>>, vector<32x32xbf16>
    %cst_53 = arith.constant dense<0.000000e+00> : vector<256x32xf32>
    %58 = tpu.matmul %56, %57, %cst_53 {dimension_numbers = #tpu.dot_dimension_numbers<[1], [0], [0], [1], [0, 0, 1, 1], [], []>} : vector<256x32xbf16>, vector<32x32xbf16>, vector<256x32xf32> -> vector<256x32xf32>
    %c0_54 = arith.constant 0 : index
    %c0_55 = arith.constant 0 : index
    %59 = vector.load %arg9[%c0_54, %c0_55] : memref<1x32xf32, #tpu.memory_space<vmem>>, vector<1x32xf32>
    %60 = vector.broadcast %59 : vector<1x32xf32> to vector<256x32xf32>
    %61 = arith.addf %58, %60 : vector<256x32xf32>
    %62 = arith.truncf %61 : vector<256x32xf32> to vector<256x32xbf16>
    %c0_56 = arith.constant 0 : index
    %c0_57 = arith.constant 0 : index
    %c0_58 = arith.constant 0 : index
    %63 = vector.load %arg10[%c0_56, %c0_57, %c0_58] : memref<1x32x12xbf16, #tpu.memory_space<vmem>>, vector<1x32x12xbf16>
    %64 = vector.shape_cast %63 : vector<1x32x12xbf16> to vector<32x12xbf16>
    %cst_59 = arith.constant dense<0.000000e+00> : vector<256x12xf32>
    %65 = tpu.matmul %62, %64, %cst_59 {dimension_numbers = #tpu.dot_dimension_numbers<[1], [0], [0], [1], [0, 0, 1, 1], [], []>} : vector<256x32xbf16>, vector<32x12xbf16>, vector<256x12xf32> -> vector<256x12xf32>
    %cst_60 = arith.constant 0.353553385 : f32
    %66 = vector.broadcast %cst_60 : f32 to vector<256x12xf32>
    %67 = arith.mulf %65, %66 : vector<256x12xf32>
    %cst_61 = arith.constant dense<0xFF800000> : vector<256xf32>
    %68 = vector.multi_reduction <maximumf>, %67, %cst_61 [1] : vector<256x12xf32> to vector<256xf32>
    %69 = vector.shape_cast %68 : vector<256xf32> to vector<256x1xf32>
    %70 = vector.broadcast %69 : vector<256x1xf32> to vector<256x12xf32>
    %71 = arith.subf %67, %70 : vector<256x12xf32>
    %72 = math.exp %71 : vector<256x12xf32>
    %73 = arith.truncf %72 : vector<256x12xf32> to vector<256x12xbf16>
    %c0_62 = arith.constant 0 : index
    %c0_63 = arith.constant 0 : index
    %c0_64 = arith.constant 0 : index
    %74 = vector.load %arg11[%c0_62, %c0_63, %c0_64] : memref<1x12x32xbf16, #tpu.memory_space<vmem>>, vector<1x12x32xbf16>
    %75 = vector.shape_cast %74 : vector<1x12x32xbf16> to vector<12x32xbf16>
    %cst_65 = arith.constant dense<0.000000e+00> : vector<256x32xf32>
    %76 = tpu.matmul %73, %75, %cst_65 {dimension_numbers = #tpu.dot_dimension_numbers<[1], [0], [0], [1], [0, 0, 1, 1], [], []>} : vector<256x12xbf16>, vector<12x32xbf16>, vector<256x32xf32> -> vector<256x32xf32>
    %c0_66 = arith.constant 0 : index
    %c0_67 = arith.constant 0 : index
    %77 = vector.load %arg12[%c0_66, %c0_67] : memref<12x32xf32, #tpu.memory_space<vmem>>, vector<12x32xf32>
    %cst_68 = arith.constant dense<0.000000e+00> : vector<256x32xf32>
    %78 = tpu.matmul %72, %77, %cst_68 {dimension_numbers = #tpu.dot_dimension_numbers<[1], [0], [0], [1], [0, 0, 1, 1], [], []>} : vector<256x12xf32>, vector<12x32xf32>, vector<256x32xf32> -> vector<256x32xf32>
    %79 = tpu.reciprocal %78 {approx = true} : vector<256x32xf32> -> vector<256x32xf32>
    %80 = arith.mulf %76, %79 : vector<256x32xf32>
    %81 = arith.truncf %80 : vector<256x32xf32> to vector<256x32xbf16>
    %c0_69 = arith.constant 0 : index
    %c0_70 = arith.constant 0 : index
    %82 = vector.load %arg13[%c0_69, %c0_70] : memref<32x32xbf16, #tpu.memory_space<vmem>>, vector<32x32xbf16>
    %cst_71 = arith.constant dense<0.000000e+00> : vector<256x32xf32>
    %83 = tpu.matmul %81, %82, %cst_71 {dimension_numbers = #tpu.dot_dimension_numbers<[1], [0], [0], [1], [0, 0, 1, 1], [], []>} : vector<256x32xbf16>, vector<32x32xbf16>, vector<256x32xf32> -> vector<256x32xf32>
    %c0_72 = arith.constant 0 : index
    %c0_73 = arith.constant 0 : index
    %84 = vector.load %arg14[%c0_72, %c0_73] : memref<1x32xf32, #tpu.memory_space<vmem>>, vector<1x32xf32>
    %85 = vector.broadcast %84 : vector<1x32xf32> to vector<256x32xf32>
    %86 = arith.addf %83, %85 : vector<256x32xf32>
    %87 = arith.addf %55, %86 : vector<256x32xf32>
    %cst_74 = arith.constant dense<0.000000e+00> : vector<256xf32>
    %88 = vector.multi_reduction <add>, %87, %cst_74 [1] : vector<256x32xf32> to vector<256xf32>
    %89 = vector.shape_cast %88 : vector<256xf32> to vector<256x1xf32>
    %cst_75 = arith.constant 3.200000e+01 : f32
    %90 = vector.broadcast %cst_75 : f32 to vector<256x1xf32>
    %91 = arith.divf %89, %90 : vector<256x1xf32>
    %92 = vector.broadcast %91 : vector<256x1xf32> to vector<256x32xf32>
    %93 = arith.subf %87, %92 : vector<256x32xf32>
    %94 = arith.mulf %93, %93 : vector<256x32xf32>
    %cst_76 = arith.constant dense<0.000000e+00> : vector<256xf32>
    %95 = vector.multi_reduction <add>, %94, %cst_76 [1] : vector<256x32xf32> to vector<256xf32>
    %96 = vector.shape_cast %95 : vector<256xf32> to vector<256x1xf32>
    %cst_77 = arith.constant 3.200000e+01 : f32
    %97 = vector.broadcast %cst_77 : f32 to vector<256x1xf32>
    %98 = arith.divf %96, %97 : vector<256x1xf32>
    %99 = vector.broadcast %91 : vector<256x1xf32> to vector<256x32xf32>
    %100 = arith.subf %87, %99 : vector<256x32xf32>
    %cst_78 = arith.constant 9.99999974E-6 : f32
    %101 = vector.broadcast %cst_78 : f32 to vector<256x1xf32>
    %102 = arith.addf %98, %101 : vector<256x1xf32>
    %103 = math.rsqrt %102 : vector<256x1xf32>
    %104 = vector.broadcast %103 : vector<256x1xf32> to vector<256x32xf32>
    %105 = arith.mulf %100, %104 : vector<256x32xf32>
    %c0_79 = arith.constant 0 : index
    %c0_80 = arith.constant 0 : index
    %106 = vector.load %arg15[%c0_79, %c0_80] : memref<1x32xf32, #tpu.memory_space<vmem>>, vector<1x32xf32>
    %107 = vector.broadcast %106 : vector<1x32xf32> to vector<256x32xf32>
    %108 = arith.mulf %105, %107 : vector<256x32xf32>
    %c0_81 = arith.constant 0 : index
    %c0_82 = arith.constant 0 : index
    %109 = vector.load %arg16[%c0_81, %c0_82] : memref<1x32xf32, #tpu.memory_space<vmem>>, vector<1x32xf32>
    %110 = vector.broadcast %109 : vector<1x32xf32> to vector<256x32xf32>
    %111 = arith.addf %108, %110 : vector<256x32xf32>
    %cst_83 = arith.constant 0.000000e+00 : f32
    %112 = vector.broadcast %cst_83 : f32 to vector<18x18x32xf32>
    %c0_84 = arith.constant 0 : index
    %c0_85 = arith.constant 0 : index
    %c0_86 = arith.constant 0 : index
    %113 = vector.load %arg20[%c0_84, %c0_85, %c0_86] : memref<18x18x32xf32, #tpu.memory_space<vmem>>, vector<18x18x32xf32>
    tpu.vector_store %arg20[%c0_84, %c0_85, %c0_86], %112 {strides = array<i32>} : memref<18x18x32xf32, #tpu.memory_space<vmem>>, vector<18x18x32xf32>,
    %114 = vector.shape_cast %111 : vector<256x32xf32> to vector<16x16x32xf32>
    %c1_87 = arith.constant 1 : index
    %c1_88 = arith.constant 1 : index
    %c0_89 = arith.constant 0 : index
    %115 = vector.load %arg20[%c1_87, %c1_88, %c0_89] : memref<18x18x32xf32, #tpu.memory_space<vmem>>, vector<16x16x32xf32>
    tpu.vector_store %arg20[%c1_87, %c1_88, %c0_89], %114 {strides = array<i32>} : memref<18x18x32xf32, #tpu.memory_space<vmem>>, vector<16x16x32xf32>,
    %c0_90 = arith.constant 0 : index
    %c0_91 = arith.constant 0 : index
    %c0_92 = arith.constant 0 : index
    %116 = vector.load %arg20[%c0_90, %c0_91, %c0_92] : memref<18x18x32xf32, #tpu.memory_space<vmem>>, vector<16x16x32xf32>
    %117 = vector.shape_cast %116 : vector<16x16x32xf32> to vector<256x32xf32>
    %c0_93 = arith.constant 0 : index
    %c1_94 = arith.constant 1 : index
    %c0_95 = arith.constant 0 : index
    %118 = vector.load %arg20[%c0_93, %c1_94, %c0_95] : memref<18x18x32xf32, #tpu.memory_space<vmem>>, vector<16x16x32xf32>
    %119 = vector.shape_cast %118 : vector<16x16x32xf32> to vector<256x32xf32>
    %c0_96 = arith.constant 0 : index
    %c2_97 = arith.constant 2 : index
    %c0_98 = arith.constant 0 : index
    %120 = vector.load %arg20[%c0_96, %c2_97, %c0_98] : memref<18x18x32xf32, #tpu.memory_space<vmem>>, vector<16x16x32xf32>
    %121 = vector.shape_cast %120 : vector<16x16x32xf32> to vector<256x32xf32>
    %c1_99 = arith.constant 1 : index
    %c0_100 = arith.constant 0 : index
    %c0_101 = arith.constant 0 : index
    %122 = vector.load %arg20[%c1_99, %c0_100, %c0_101] : memref<18x18x32xf32, #tpu.memory_space<vmem>>, vector<16x16x32xf32>
    %123 = vector.shape_cast %122 : vector<16x16x32xf32> to vector<256x32xf32>
    %c1_102 = arith.constant 1 : index
    %c1_103 = arith.constant 1 : index
    %c0_104 = arith.constant 0 : index
    %124 = vector.load %arg20[%c1_102, %c1_103, %c0_104] : memref<18x18x32xf32, #tpu.memory_space<vmem>>, vector<16x16x32xf32>
    %125 = vector.shape_cast %124 : vector<16x16x32xf32> to vector<256x32xf32>
    %c1_105 = arith.constant 1 : index
    %c2_106 = arith.constant 2 : index
    %c0_107 = arith.constant 0 : index
    %126 = vector.load %arg20[%c1_105, %c2_106, %c0_107] : memref<18x18x32xf32, #tpu.memory_space<vmem>>, vector<16x16x32xf32>
    %127 = vector.shape_cast %126 : vector<16x16x32xf32> to vector<256x32xf32>
    %c2_108 = arith.constant 2 : index
    %c0_109 = arith.constant 0 : index
    %c0_110 = arith.constant 0 : index
    %128 = vector.load %arg20[%c2_108, %c0_109, %c0_110] : memref<18x18x32xf32, #tpu.memory_space<vmem>>, vector<16x16x32xf32>
    %129 = vector.shape_cast %128 : vector<16x16x32xf32> to vector<256x32xf32>
    %c2_111 = arith.constant 2 : index
    %c1_112 = arith.constant 1 : index
    %c0_113 = arith.constant 0 : index
    %130 = vector.load %arg20[%c2_111, %c1_112, %c0_113] : memref<18x18x32xf32, #tpu.memory_space<vmem>>, vector<16x16x32xf32>
    %131 = vector.shape_cast %130 : vector<16x16x32xf32> to vector<256x32xf32>
    %c2_114 = arith.constant 2 : index
    %c2_115 = arith.constant 2 : index
    %c0_116 = arith.constant 0 : index
    %132 = vector.load %arg20[%c2_114, %c2_115, %c0_116] : memref<18x18x32xf32, #tpu.memory_space<vmem>>, vector<16x16x32xf32>
    %133 = vector.shape_cast %132 : vector<16x16x32xf32> to vector<256x32xf32>
    %134 = tpu.concatenate %117, %119, %121, %123, %125, %127, %129, %131, %133 in 1 : vector<256x32xf32>, vector<256x32xf32>, vector<256x32xf32>, vector<256x32xf32>, vector<256x32xf32>, vector<256x32xf32>, vector<256x32xf32>, vector<256x32xf32>, vector<256x32xf32> -> vector<256x288xf32>
    %135 = arith.truncf %134 : vector<256x288xf32> to vector<256x288xbf16>
    %c0_117 = arith.constant 0 : index
    %c0_118 = arith.constant 0 : index
    %136 = vector.load %arg17[%c0_117, %c0_118] : memref<288x32xbf16, #tpu.memory_space<vmem>>, vector<288x32xbf16>
    %cst_119 = arith.constant dense<0.000000e+00> : vector<256x32xf32>
    %137 = tpu.matmul %135, %136, %cst_119 {dimension_numbers = #tpu.dot_dimension_numbers<[1], [0], [0], [1], [0, 0, 1, 1], [], []>} : vector<256x288xbf16>, vector<288x32xbf16>, vector<256x32xf32> -> vector<256x32xf32>
    %c0_120 = arith.constant 0 : index
    %c0_121 = arith.constant 0 : index
    %138 = vector.load %arg18[%c0_120, %c0_121] : memref<1x32xf32, #tpu.memory_space<vmem>>, vector<1x32xf32>
    %139 = vector.broadcast %138 : vector<1x32xf32> to vector<256x32xf32>
    %140 = arith.addf %137, %139 : vector<256x32xf32>
    %141 = arith.addf %140, %17 : vector<256x32xf32>
    %c0_122 = arith.constant 0 : index
    %c0_123 = arith.constant 0 : index
    %c0_124 = arith.constant 0 : index
    %142 = vector.load %arg19[%c0_122, %c0_123, %c0_124] : memref<1x256x32xf32, #tpu.memory_space<vmem>>, vector<1x256x32xf32>
    %143 = vector.shape_cast %142 : vector<1x256x32xf32> to vector<256x32xf32>
    %144 = vector.shape_cast %141 : vector<256x32xf32> to vector<1x256x32xf32>
    tpu.vector_store %arg19[%c0_122, %c0_123, %c0_124], %144 {strides = array<i32>} : memref<1x256x32xf32, #tpu.memory_space<vmem>>, vector<1x256x32xf32>,
    return
  }
  func.func @transform_0(%arg0: i32) -> (i32, i32, i32) {
    %c0_i32 = arith.constant 0 : i32
    %c0_i32_0 = arith.constant 0 : i32
    %c0_i32_1 = arith.constant 0 : i32
    return %arg0, %c0_i32, %c0_i32_0 : i32, i32, i32
  }
  func.func @transform_1(%arg0: i32) -> (i32, i32) {
    %c0_i32 = arith.constant 0 : i32
    %c0_i32_0 = arith.constant 0 : i32
    %c0_i32_1 = arith.constant 0 : i32
    return %c0_i32, %c0_i32_0 : i32, i32
  }
  func.func @transform_2(%arg0: i32) -> (i32, i32) {
    %c0_i32 = arith.constant 0 : i32
    %c0_i32_0 = arith.constant 0 : i32
    %c0_i32_1 = arith.constant 0 : i32
    return %c0_i32, %c0_i32_0 : i32, i32
  }
  func.func @transform_3(%arg0: i32) -> (i32, i32) {
    %c0_i32 = arith.constant 0 : i32
    %c0_i32_0 = arith.constant 0 : i32
    %c0_i32_1 = arith.constant 0 : i32
    return %c0_i32, %c0_i32_0 : i32, i32
  }
  func.func @transform_4(%arg0: i32) -> (i32, i32) {
    %c0_i32 = arith.constant 0 : i32
    %c0_i32_0 = arith.constant 0 : i32
    %c0_i32_1 = arith.constant 0 : i32
    return %c0_i32, %c0_i32_0 : i32, i32
  }
  func.func @transform_5(%arg0: i32) -> (i32, i32) {
    %c0_i32 = arith.constant 0 : i32
    %c0_i32_0 = arith.constant 0 : i32
    %c0_i32_1 = arith.constant 0 : i32
    return %c0_i32, %c0_i32_0 : i32, i32
  }
  func.func @transform_6(%arg0: i32) -> (i32, i32) {
    %c0_i32 = arith.constant 0 : i32
    %c0_i32_0 = arith.constant 0 : i32
    %c0_i32_1 = arith.constant 0 : i32
    return %c0_i32, %c0_i32_0 : i32, i32
  }
  func.func @transform_7(%arg0: i32) -> (i32, i32) {
    %c0_i32 = arith.constant 0 : i32
    %c0_i32_0 = arith.constant 0 : i32
    %c0_i32_1 = arith.constant 0 : i32
    return %c0_i32, %c0_i32_0 : i32, i32
  }
  func.func @transform_8(%arg0: i32) -> (i32, i32) {
    %c0_i32 = arith.constant 0 : i32
    %c0_i32_0 = arith.constant 0 : i32
    %c0_i32_1 = arith.constant 0 : i32
    return %c0_i32, %c0_i32_0 : i32, i32
  }
  func.func @transform_9(%arg0: i32) -> (i32, i32, i32) {
    %c0_i32 = arith.constant 0 : i32
    %c0_i32_0 = arith.constant 0 : i32
    %c0_i32_1 = arith.constant 0 : i32
    return %arg0, %c0_i32, %c0_i32_0 : i32, i32, i32
  }
  func.func @transform_10(%arg0: i32) -> (i32, i32, i32) {
    %c0_i32 = arith.constant 0 : i32
    %c0_i32_0 = arith.constant 0 : i32
    %c0_i32_1 = arith.constant 0 : i32
    return %arg0, %c0_i32, %c0_i32_0 : i32, i32, i32
  }
  func.func @transform_11(%arg0: i32) -> (i32, i32) {
    %c0_i32 = arith.constant 0 : i32
    %c0_i32_0 = arith.constant 0 : i32
    %c0_i32_1 = arith.constant 0 : i32
    return %c0_i32, %c0_i32_0 : i32, i32
  }
  func.func @transform_12(%arg0: i32) -> (i32, i32) {
    %c0_i32 = arith.constant 0 : i32
    %c0_i32_0 = arith.constant 0 : i32
    %c0_i32_1 = arith.constant 0 : i32
    return %c0_i32, %c0_i32_0 : i32, i32
  }
  func.func @transform_13(%arg0: i32) -> (i32, i32) {
    %c0_i32 = arith.constant 0 : i32
    %c0_i32_0 = arith.constant 0 : i32
    %c0_i32_1 = arith.constant 0 : i32
    return %c0_i32, %c0_i32_0 : i32, i32
  }
  func.func @transform_14(%arg0: i32) -> (i32, i32) {
    %c0_i32 = arith.constant 0 : i32
    %c0_i32_0 = arith.constant 0 : i32
    %c0_i32_1 = arith.constant 0 : i32
    return %c0_i32, %c0_i32_0 : i32, i32
  }
  func.func @transform_15(%arg0: i32) -> (i32, i32) {
    %c0_i32 = arith.constant 0 : i32
    %c0_i32_0 = arith.constant 0 : i32
    %c0_i32_1 = arith.constant 0 : i32
    return %c0_i32, %c0_i32_0 : i32, i32
  }
  func.func @transform_16(%arg0: i32) -> (i32, i32) {
    %c0_i32 = arith.constant 0 : i32
    %c0_i32_0 = arith.constant 0 : i32
    %c0_i32_1 = arith.constant 0 : i32
    return %c0_i32, %c0_i32_0 : i32, i32
  }
  func.func @transform_17(%arg0: i32) -> (i32, i32) {
    %c0_i32 = arith.constant 0 : i32
    %c0_i32_0 = arith.constant 0 : i32
    %c0_i32_1 = arith.constant 0 : i32
    return %c0_i32, %c0_i32_0 : i32, i32
  }
  func.func @transform_18(%arg0: i32) -> (i32, i32, i32) {
    %c0_i32 = arith.constant 0 : i32
    %c0_i32_0 = arith.constant 0 : i32
    %c0_i32_1 = arith.constant 0 : i32
    return %arg0, %c0_i32, %c0_i32_0 : i32, i32, i32
  }
}

</mosaic_0001>

<bundles_post_ra>
// kernel: residual_block_forward.4
= control target key start
LH: loop header
LB: loop body
LE: loop exit
PB: predicated region body
PF: predicated region fallthrough
CT: control target
= control target key end

     0   :  { %v280_v0 = vmov 0.0   ;;  %vm281_vm0 = vmmov 0   ;;  %vm46_vm1 = vcmask 130048   ;;  %vm114_vm2 = vcmask 261120   ;;  %s363_s1 = inlined_call_operand.vmem [shape: bf16[16,32], index: 1, kind: input, shape index: {}]   ;;  %s364_s0 = inlined_call_operand.vmem [shape: f32[6,16], index: 0, kind: input, shape index: {}]   ;;  %s365_s5 = inlined_call_operand.vmem [shape: bf16[32,32], index: 5, kind: input, shape index: {}]   ;;  %s366_s3 = inlined_call_operand.vmem [shape: bf16[32,32], index: 3, kind: input, shape index: {}]   ;;  %s367_s2 = inlined_call_operand.vmem [shape: f32[1,32], index: 2, kind: input, shape index: {}]   ;;  %s368_s4 = inlined_call_operand.vmem [shape: f32[1,32], index: 4, kind: input, shape index: {}]   ;;  %s369_s6 = inlined_call_operand.vmem [shape: f32[1,32], index: 6, kind: input, shape index: {}]   ;;  %s370_s7 = inlined_call_operand.vmem [shape: f32[6,32], index: 7, kind: output, shape index: {0}]   ;;  %s371_s8 = inlined_call_operand.vmem [shape: f32[6,32], index: 8, kind: output, shape index: {1}]  }
   0x1   :  { %251 = vmatprep.subr.bf16.mxu0 %v280_v0  ;;  %v275_v1 = vld [vmem:[%s363_s1] sm:$0xff]   ;;  %253 = vmatprep.mubr.msk.bf16.mxu0 %vm281_vm0, %v280_v0  ;;  %v278_v6 = vld [vmem:[%s365_s5 + $0x8] sm:$0xff]   ;;  %vm158_vm3 = vcmask 259072  }
   0x2   :  { %v29_v2 = vld [vmem:[%s364_s0] sm:$0x3f]  ;;  %257 = vmatprep.subr.bf16.mxu1 %v280_v0  ;;  %261 = vmatprep.mubr.msk.bf16.mxu1 %vm281_vm0, %v280_v0  ;;  %v279_v7 = vld [vmem:[%s366_s3 + $0x8] sm:$0xff]  }
   0x3   :  { %252 = vmatpush3.bf16.msra.mxu0 %v275_v1  ;;  %v30_v3 = vpack.c.bf16 %v29_v2, %v29_v2  ;;  %v276_v4 = vld [vmem:[%s365_s5] sm:$0xff]  }
   0x4   :  { %265 = vmatprep.subr.bf16.mxu0 %v280_v0  ;;  %v277_v5 = vld [vmem:[%s366_s3] sm:$0xff]  }
   0x5   :  { %258 = vmatpush3.bf16.msra.mxu1 %v277_v5  ;;  %v232_v8 = vld [vmem:[%s367_s2] ss:$0 sm:$0xff] }
   0x6   :  { %254 = vmatmul.mubr.msk.bf16.vlgmr.msra.gmra.mrb[0].mxu0 %vm46_vm1, %v30_v3  ;;  %259 = vmatprep.subr.bf16.mxu1 %v280_v0  ;;  %v235_v15 = vld [vmem:[%s368_s4] ss:$0 sm:$0xff] }
   0x7   :  { %266 = vmatpush3.bf16.msra.mxu0 %v276_v4  ;;  %269 = vmatprep.mubr.msk.bf16.mxu0 %vm281_vm0, %v280_v0  ;;  %v239_v16 = vld [vmem:[%s369_s6] ss:$0 sm:$0xff] }
   0x8   :  { %267 = vmatprep.subr.bf16.mxu0 %v280_v0 }
   0x9   :  { %260 = vmatpush3.bf16.msra.mxu1 %v279_v7 }
   0xb   :  { %268 = vmatpush3.bf16.msra.mxu0 %v278_v6 }
  0xd9   :  { %v84_v9 = vpop.f32.mrb[0].mxu0 }
  0xda   :  { %v85_v10 = vadd.f32 %v232_v8, %v84_v9  ;;  %v255_v11 = vpop.f32.mrb[1].mxu0 }
  0xdb   :  { %v87_v12 = vpop.f32.mrb[2].mxu0 }
  0xdc   :  { %v90_v13 = vpack.c.bf16 %v85_v10, %v85_v10  ;;  %v256_v14 = vpop.f32.mrb[3].mxu0 }
  0xde   :  { %262 = vmatmul.mubr.msk.bf16.vlgmr.msra.gmra.mrb[0].mxu1 %vm114_vm2, %v90_v13  ;;  %270 = vmatmul.mubr.msk.bf16.vlgmr.msra.gmra.mrb[4].mxu0 %vm114_vm2, %v90_v13 }
 0x1b1   :  { %v152_v17 = vpop.f32.mrb[0].mxu1  ;;  %v217_v18 = vpop.f32.mrb[4].mxu0 }
 0x1b2   :  { %v153_v19 = vadd.f32 %v235_v15, %v152_v17  ;;  %v218_v20 = vadd.f32 %v239_v16, %v217_v18  ;;  %v263_v21 = vpop.f32.mrb[1].mxu1  ;;  %v271_v22 = vpop.f32.mrb[5].mxu0 }
 0x1b3   :  { %v155_v23 = vpop.f32.mrb[2].mxu1  ;;  %v220_v24 = vpop.f32.mrb[6].mxu0 }
 0x1b4   :  { %159 = vst.msk [vmem:[%s370_s7] sm:$0x3f] %vm158_vm3, %v153_v19  ;;  %223 = vst.msk [vmem:[%s371_s8] sm:$0x3f] %vm158_vm3, %v218_v20  ;;  %v264_v25 = vpop.f32.mrb[3].mxu1  ;;  %v272_v26 = vpop.f32.mrb[7].mxu0 }

// kernel: residual_block_forward.3
= control target key start
LH: loop header
LB: loop body
LE: loop exit
PB: predicated region body
PF: predicated region fallthrough
CT: control target
= control target key end

     0   :  { %s911_s18 = smov 0   ;;  %s1371_s0 = inlined_call_operand.vmem [shape: f32[512,4], index: 0, kind: input, shape index: {}]   ;;  %s1372_s1 = inlined_call_operand.vmem [shape: bf16[4,32], index: 1, kind: input, shape index: {}]   ;;  %s1373_s2 = inlined_call_operand.vmem [shape: f32[1,32], index: 2, kind: input, shape index: {}]   ;;  %s1374_s3 = inlined_call_operand.vmem [shape: f32[512,32], index: 3, kind: output, shape index: {0}]   ;;  %s1375_s4 = inlined_call_operand.vmem [shape: f32[1,32], index: 4, kind: output, shape index: {1}]   ;;  %s1376_s5 = inlined_call_operand.vmem [shape: f32[1,32], index: 5, kind: output, shape index: {2}]  }
   0x1 LB: > { %s779_s19 = sadd.s32 4294967295, %s878_s18   ;;  %p783_p0 = scmp.ge.s32.totalorder %s878_s18, 1  ;;  %s878_s18 = sphi %s911_s18, %s16_s18  }
   0x2   : > { %p183_p1 = scmp.lt.s32.totalorder %s878_s18, 3 }
   0x4   : > { %p184_p2 = pnand %p783_p0, %p183_p1 }
   0x5   : > { %v272_v0 = vld [vmem:[%s1372_s1] sm:$0x3] (!%p184_p2)  ;;  %vm329_vm0 = vcmask (!%p184_p2), 1041408   ;;  %s784_s22 = sshll.u32 (!%p184_p2), %s779_s19, 5  ;;  %vm280_vm1 = vcmask (!%p184_p2), 31744   ;;  %vm494_vm2 = vcmask (!%p184_p2), 261120  }
   0x6   : > { %187 = sbr.rel (%p184_p2) target bundleno = 346 (0x15a), region = 32  ;;  %861 = vmatprep.subr.msk.bf16.mxu0 (!%p184_p2), %vm329_vm0, %v272_v0  ;;  %862 = vmatprep.subr.msk.bf16.mxu1 (!%p184_p2), %vm329_vm0, %v272_v0  ;;  %v331_v1 = vsel (!%p184_p2), %vm329_vm0, %v272_v0, 0  ;;  %p212_p3 = scmp.lt.s32.totalorder (!%p184_p2), %s784_s22, 63  ;;  %v985_v50 = vld [vmem:[%s1373_s2] ss:$0 sm:$0xff] (!%p184_p2) }
   0x7   : > { %826 = vmatpush3.bf16.msra.mxu0 (!%p184_p2), %v331_v1  ;;  %860 = vmatpush3.bf16.msra.mxu1 (!%p184_p2), %v331_v1  ;;  %p805_p4 = scmp.ne.s32.totalorder (!%p184_p2), %s779_s19, 0 }
   0xd   : > { %s1378_s22 = smov (!%p212_p3, %s784_s22), 63  ;;  %vm531_vm3 = vcmask (!%p805_p4), 253952  }
   0xe   : > { %s785_s23 = sshll.u32 %s1378_s22, 3 }
   0xf   : > { %s932_s26 = scalar_lea.vmem %s1371_s0, %s785_s23  ;;  %s992_s6 = scalar_lea.vmem %s1374_s3, %s785_s23 }
  0x10   : > { %v224_v2 = vld [vmem:[%s932_s26] sm:$0xff]  ;;  %v225_v3 = vld [vmem:[%s932_s26 + $0x8] sm:$0xff]  ;;  %v226_v7 = vld [vmem:[%s932_s26 + $0x10] sm:$0xff] }
  0x11   : > { %v240_v4 = vld [vmem:[%s932_s26 + $0x80] sm:$0xff]  ;;  %v256_v5 = vpack.c.bf16 %v225_v3, %v224_v2  ;;  %v241_v6 = vld [vmem:[%s932_s26 + $0x88] sm:$0xff]  ;;  %v227_v8 = vld [vmem:[%s932_s26 + $0x18] sm:$0xff] }
  0x12   : > { %v264_v9 = vpack.c.bf16 %v241_v6, %v240_v4  ;;  %v257_v10 = vpack.c.bf16 %v227_v8, %v226_v7  ;;  %v242_v11 = vld [vmem:[%s932_s26 + $0x90] sm:$0xff]  ;;  %v243_v12 = vld [vmem:[%s932_s26 + $0x98] sm:$0xff]  ;;  %v228_v13 = vld [vmem:[%s932_s26 + $0x20] sm:$0xff] }
  0x13   : > { %827 = vmatprep.mubr.msk.bf16.mxu0 %vm280_vm1, %v256_v5  ;;  %v265_v14 = vpack.c.bf16 %v243_v12, %v242_v11  ;;  %v229_v15 = vld [vmem:[%s932_s26 + $0x28] sm:$0xff]  ;;  %v244_v16 = vld [vmem:[%s932_s26 + $0xa0] sm:$0xff]  ;;  %v230_v20 = vld [vmem:[%s932_s26 + $0x30] sm:$0xff] }
  0x14   : > { %v245_v17 = vld [vmem:[%s932_s26 + $0xa8] sm:$0xff]  ;;  %843 = vmatprep.mubr.msk.bf16.mxu1 %vm280_vm1, %v264_v9  ;;  %828 = vmatmul.mubr.msk.bf16.vlgmr.msra.gmra.mrb[0].mxu0 %vm280_vm1, %v257_v10  ;;  %v258_v18 = vpack.c.bf16 %v229_v15, %v228_v13  ;;  %v231_v21 = vld [vmem:[%s932_s26 + $0x38] sm:$0xff]  ;;  %v246_v22 = vld [vmem:[%s932_s26 + $0xb0] sm:$0xff] }
  0x15   : > { %v266_v19 = vpack.c.bf16 %v245_v17, %v244_v16  ;;  %844 = vmatmul.mubr.msk.bf16.vlgmr.msra.gmra.mrb[0].mxu1 %vm280_vm1, %v265_v14  ;;  %v247_v23 = vld [vmem:[%s932_s26 + $0xb8] sm:$0xff]  ;;  %v232_v24 = vld [vmem:[%s932_s26 + $0x40] sm:$0xff]  ;;  %v233_v25 = vld [vmem:[%s932_s26 + $0x48] sm:$0xff]  ;;  %v259_v28 = vpack.c.bf16 %v231_v21, %v230_v20 }
  0x16   : > { %831 = vmatprep.mubr.msk.bf16.mxu0 %vm280_vm1, %v258_v18  ;;  %v248_v26 = vld [vmem:[%s932_s26 + $0xc0] sm:$0xff]  ;;  %v249_v27 = vld [vmem:[%s932_s26 + $0xc8] sm:$0xff]  ;;  %v267_v29 = vpack.c.bf16 %v247_v23, %v246_v22  ;;  %v260_v30 = vpack.c.bf16 %v233_v25, %v232_v24  ;;  %v234_v32 = vld [vmem:[%s932_s26 + $0x50] sm:$0xff] }
  0x17   : > { %847 = vmatprep.mubr.msk.bf16.mxu1 %vm280_vm1, %v266_v19  ;;  %v268_v31 = vpack.c.bf16 %v249_v27, %v248_v26  ;;  %v235_v33 = vld [vmem:[%s932_s26 + $0x58] sm:$0xff]  ;;  %v250_v34 = vld [vmem:[%s932_s26 + $0xd0] sm:$0xff]  ;;  %v236_v36 = vld [vmem:[%s932_s26 + $0x60] sm:$0xff] }
  0x18   : > { %v251_v35 = vld [vmem:[%s932_s26 + $0xd8] sm:$0xff]  ;;  %v237_v37 = vld [vmem:[%s932_s26 + $0x68] sm:$0xff]  ;;  %v252_v38 = vld [vmem:[%s932_s26 + $0xe0] sm:$0xff]  ;;  %v261_v40 = vpack.c.bf16 %v235_v33, %v234_v32 }
  0x19   : > { %v253_v39 = vld [vmem:[%s932_s26 + $0xe8] sm:$0xff]  ;;  %v269_v41 = vpack.c.bf16 %v251_v35, %v250_v34  ;;  %v262_v42 = vpack.c.bf16 %v237_v37, %v236_v36  ;;  %v238_v44 = vld [vmem:[%s932_s26 + $0x70] sm:$0xff]  ;;  %v239_v45 = vld [vmem:[%s932_s26 + $0x78] sm:$0xff] }
  0x1a   : > { %v270_v43 = vpack.c.bf16 %v253_v39, %v252_v38  ;;  %v254_v46 = vld [vmem:[%s932_s26 + $0xf0] sm:$0xff]  ;;  %v255_v47 = vld [vmem:[%s932_s26 + $0xf8] sm:$0xff]  ;;  %v263_v48 = vpack.c.bf16 %v239_v45, %v238_v44 }
  0x1b   : > { %v271_v49 = vpack.c.bf16 %v255_v47, %v254_v46 }
  0x1c   : > { %832 = vmatmul.mubr.msk.bf16.gmra.mrb[4].mxu0 %vm280_vm1, %v259_v28 }
  0x1d   : > { %848 = vmatmul.mubr.msk.bf16.gmra.mrb[4].mxu1 %vm280_vm1, %v267_v29  ;;  %835 = vmatprep.mubr.msk.bf16.mxu0 %vm280_vm1, %v260_v30 }
  0x1e   : > { %851 = vmatprep.mubr.msk.bf16.mxu1 %vm280_vm1, %v268_v31 }
  0x24   : > { %836 = vmatmul.mubr.msk.bf16.gmra.mrb[8].mxu0 %vm280_vm1, %v261_v40 }
  0x25   : > { %852 = vmatmul.mubr.msk.bf16.gmra.mrb[8].mxu1 %vm280_vm1, %v269_v41  ;;  %839 = vmatprep.mubr.msk.bf16.mxu0 %vm280_vm1, %v262_v42 }
  0x26   : > { %855 = vmatprep.mubr.msk.bf16.mxu1 %vm280_vm1, %v270_v43 }
  0x2c   : > { %840 = vmatmul.mubr.msk.bf16.gmra.mrb[12].mxu0 %vm280_vm1, %v263_v48 }
  0x2d   : > { %856 = vmatmul.mubr.msk.bf16.gmra.mrb[12].mxu1 %vm280_vm1, %v271_v49 }
  0xe7   : > { %v829_v51 = vpop.f32.mrb[0].mxu0 }
  0xe8   : > { %v995_v52 = vadd.f32 %v829_v51, %v985_v50  ;;  %v845_v53 = vpop.f32.mrb[0].mxu1  ;;  %v367_v54 = vpop.f32.mrb[1].mxu0 }
  0xe9   : > { %v998_v55 = vadd.f32 %v845_v53, %v985_v50  ;;  %v1001_v56 = vadd.f32 %v985_v50, %v367_v54  ;;  %v431_v57 = vpop.f32.mrb[1].mxu1  ;;  %v830_v58 = vpop.f32.mrb[2].mxu0  ;;  %v880_v53 = vmov (!%p805_p4), 0.0  }
  0xea   : > { %497 = vst.msk [vmem:[%s992_s6 + $0x10] sm:$0xff] %vm494_vm2, %v995_v52  ;;  %v1007_v59 = vadd.f32 %v985_v50, %v431_v57  ;;  %v1010_v60 = vadd.f32 %v830_v58, %v985_v50  ;;  %v846_v61 = vpop.f32.mrb[2].mxu1  ;;  %v370_v62 = vpop.f32.mrb[3].mxu0 }
  0xeb   : > { %513 = vst.msk [vmem:[%s992_s6 + $0x90] sm:$0xff] %vm494_vm2, %v998_v55  ;;  %495 = vst.msk [vmem:[%s992_s6] sm:$0xff] %vm494_vm2, %v1001_v56  ;;  %v1019_v63 = vadd.f32 %v846_v61, %v985_v50  ;;  %v1022_v0 = vadd.f32 %v985_v50, %v370_v62  ;;  %v434_v1 = vpop.f32.mrb[3].mxu1 }
  0xec   : > { %511 = vst.msk [vmem:[%s992_s6 + $0x80] sm:$0xff] %vm494_vm2, %v1007_v59  ;;  %498 = vst.msk [vmem:[%s992_s6 + $0x18] sm:$0xff] %vm494_vm2, %v1010_v60  ;;  %v1031_v2 = vadd.f32 %v985_v50, %v434_v1 }
  0xed   : > { %514 = vst.msk [vmem:[%s992_s6 + $0x98] sm:$0xff] %vm494_vm2, %v1019_v63  ;;  %496 = vst.msk [vmem:[%s992_s6 + $0x8] sm:$0xff] %vm494_vm2, %v1022_v0 }
  0xee   : > { %512 = vst.msk [vmem:[%s992_s6 + $0x88] sm:$0xff] %vm494_vm2, %v1031_v2 }
  0xef   : > { %v833_v3 = vpop.f32.mrb[4].mxu0  ;;  %532 = vst.msk [vmem:[%s1375_s4] sm:$0x1] (!%p805_p4), %vm531_vm3, %v880_v53  ;;  %533 = vst.msk [vmem:[%s1376_s5] sm:$0x1] (!%p805_p4), %vm531_vm3, %v880_v53 }
  0xf0   : > { %v1043_v4 = vadd.f32 %v833_v3, %v985_v50  ;;  %v849_v5 = vpop.f32.mrb[4].mxu1  ;;  %v383_v6 = vpop.f32.mrb[5].mxu0 }
  0xf1   : > { %v1046_v7 = vadd.f32 %v849_v5, %v985_v50  ;;  %v1049_v8 = vadd.f32 %v985_v50, %v383_v6  ;;  %v447_v9 = vpop.f32.mrb[5].mxu1  ;;  %v834_v10 = vpop.f32.mrb[6].mxu0 }
  0xf2   : > { %501 = vst.msk [vmem:[%s992_s6 + $0x30] sm:$0xff] %vm494_vm2, %v1043_v4  ;;  %v1055_v11 = vadd.f32 %v985_v50, %v447_v9  ;;  %v1058_v12 = vadd.f32 %v834_v10, %v985_v50  ;;  %v850_v13 = vpop.f32.mrb[6].mxu1  ;;  %v386_v14 = vpop.f32.mrb[7].mxu0 }
  0xf3   : > { %517 = vst.msk [vmem:[%s992_s6 + $0xb0] sm:$0xff] %vm494_vm2, %v1046_v7  ;;  %499 = vst.msk [vmem:[%s992_s6 + $0x20] sm:$0xff] %vm494_vm2, %v1049_v8  ;;  %v1067_v15 = vadd.f32 %v850_v13, %v985_v50  ;;  %v1070_v16 = vadd.f32 %v985_v50, %v386_v14  ;;  %v450_v17 = vpop.f32.mrb[7].mxu1 }
  0xf4   : > { %515 = vst.msk [vmem:[%s992_s6 + $0xa0] sm:$0xff] %vm494_vm2, %v1055_v11  ;;  %502 = vst.msk [vmem:[%s992_s6 + $0x38] sm:$0xff] %vm494_vm2, %v1058_v12  ;;  %v1079_v18 = vadd.f32 %v985_v50, %v450_v17 }
  0xf5   : > { %518 = vst.msk [vmem:[%s992_s6 + $0xb8] sm:$0xff] %vm494_vm2, %v1067_v15  ;;  %500 = vst.msk [vmem:[%s992_s6 + $0x28] sm:$0xff] %vm494_vm2, %v1070_v16 }
  0xf6   : > { %516 = vst.msk [vmem:[%s992_s6 + $0xa8] sm:$0xff] %vm494_vm2, %v1079_v18 }
  0xf7   : > { %v837_v19 = vpop.f32.mrb[8].mxu0 }
  0xf8   : > { %v1091_v20 = vadd.f32 %v837_v19, %v985_v50  ;;  %v853_v21 = vpop.f32.mrb[8].mxu1  ;;  %v399_v22 = vpop.f32.mrb[9].mxu0 }
  0xf9   : > { %v1094_v23 = vadd.f32 %v853_v21, %v985_v50  ;;  %v1097_v24 = vadd.f32 %v985_v50, %v399_v22  ;;  %v463_v25 = vpop.f32.mrb[9].mxu1  ;;  %v838_v26 = vpop.f32.mrb[10].mxu0 }
  0xfa   : > { %505 = vst.msk [vmem:[%s992_s6 + $0x50] sm:$0xff] %vm494_vm2, %v1091_v20  ;;  %v1103_v27 = vadd.f32 %v985_v50, %v463_v25  ;;  %v1106_v28 = vadd.f32 %v838_v26, %v985_v50  ;;  %v854_v29 = vpop.f32.mrb[10].mxu1  ;;  %v402_v30 = vpop.f32.mrb[11].mxu0 }
  0xfb   : > { %521 = vst.msk [vmem:[%s992_s6 + $0xd0] sm:$0xff] %vm494_vm2, %v1094_v23  ;;  %503 = vst.msk [vmem:[%s992_s6 + $0x40] sm:$0xff] %vm494_vm2, %v1097_v24  ;;  %v1115_v31 = vadd.f32 %v854_v29, %v985_v50  ;;  %v1118_v32 = vadd.f32 %v985_v50, %v402_v30  ;;  %v466_v33 = vpop.f32.mrb[11].mxu1 }
  0xfc   : > { %519 = vst.msk [vmem:[%s992_s6 + $0xc0] sm:$0xff] %vm494_vm2, %v1103_v27  ;;  %506 = vst.msk [vmem:[%s992_s6 + $0x58] sm:$0xff] %vm494_vm2, %v1106_v28  ;;  %v1127_v34 = vadd.f32 %v985_v50, %v466_v33 }
  0xfd   : > { %522 = vst.msk [vmem:[%s992_s6 + $0xd8] sm:$0xff] %vm494_vm2, %v1115_v31  ;;  %504 = vst.msk [vmem:[%s992_s6 + $0x48] sm:$0xff] %vm494_vm2, %v1118_v32 }
  0xfe   : > { %520 = vst.msk [vmem:[%s992_s6 + $0xc8] sm:$0xff] %vm494_vm2, %v1127_v34 }
  0xff   : > { %v841_v35 = vpop.f32.mrb[12].mxu0 }
 0x100   : > { %v1139_v36 = vadd.f32 %v841_v35, %v985_v50  ;;  %v857_v37 = vpop.f32.mrb[12].mxu1  ;;  %v415_v38 = vpop.f32.mrb[13].mxu0  ;;  %530 = sbr.rel (%p805_p4) target bundleno = 263 (0x107), region = 36 }
 0x101   : > { %v1142_v39 = vadd.f32 %v857_v37, %v985_v50  ;;  %v1145_v40 = vadd.f32 %v985_v50, %v415_v38  ;;  %v479_v41 = vpop.f32.mrb[13].mxu1  ;;  %v842_v42 = vpop.f32.mrb[14].mxu0 }
 0x102   : > { %509 = vst.msk [vmem:[%s992_s6 + $0x70] sm:$0xff] %vm494_vm2, %v1139_v36  ;;  %v1151_v43 = vadd.f32 %v985_v50, %v479_v41  ;;  %v1154_v44 = vadd.f32 %v842_v42, %v985_v50  ;;  %v858_v45 = vpop.f32.mrb[14].mxu1  ;;  %v418_v46 = vpop.f32.mrb[15].mxu0 }
 0x103   : > { %525 = vst.msk [vmem:[%s992_s6 + $0xf0] sm:$0xff] %vm494_vm2, %v1142_v39  ;;  %507 = vst.msk [vmem:[%s992_s6 + $0x60] sm:$0xff] %vm494_vm2, %v1145_v40  ;;  %v1163_v47 = vadd.f32 %v858_v45, %v985_v50  ;;  %v1166_v48 = vadd.f32 %v985_v50, %v418_v46  ;;  %v482_v49 = vpop.f32.mrb[15].mxu1 }
 0x104   : > { %523 = vst.msk [vmem:[%s992_s6 + $0xe0] sm:$0xff] %vm494_vm2, %v1151_v43  ;;  %510 = vst.msk [vmem:[%s992_s6 + $0x78] sm:$0xff] %vm494_vm2, %v1154_v44  ;;  %v1175_v51 = vadd.f32 %v985_v50, %v482_v49 }
 0x105   : > { %526 = vst.msk [vmem:[%s992_s6 + $0xf8] sm:$0xff] %vm494_vm2, %v1163_v47  ;;  %508 = vst.msk [vmem:[%s992_s6 + $0x68] sm:$0xff] %vm494_vm2, %v1166_v48 }
 0x106   : > { %524 = vst.msk [vmem:[%s992_s6 + $0xe8] sm:$0xff] %vm494_vm2, %v1175_v51 }
 0x107 PF: > { %v535_v50 = vsel %vm494_vm2, %v1001_v56, 0.0  ;;  %v536_v54 = vsel %vm494_vm2, %v1022_v0, 0.0  ;;  %v538_v57 = vsel %vm494_vm2, %v995_v52, 0.0  ;;  %v540_v61 = vsel %vm494_vm2, %v1010_v60, 0.0 }
 0x108   : > { %v537_v58 = vadd.f32 %v536_v54, %v535_v50  ;;  %v542_v1 = vsel %vm494_vm2, %v1049_v8, 0.0  ;;  %v544_v5 = vsel %vm494_vm2, %v1070_v16, 0.0  ;;  %v546_v9 = vsel %vm494_vm2, %v1043_v4, 0.0 }
 0x109   : > { %v548_v13 = vsel %vm494_vm2, %v1058_v12, 0.0  ;;  %v550_v17 = vsel %vm494_vm2, %v1097_v24, 0.0  ;;  %v552_v21 = vsel %vm494_vm2, %v1118_v32, 0.0  ;;  %v608_v22 = vmul.f32 %v1001_v56, %v1001_v56 }
 0x10a   : > { %v539_v62 = vadd.f32 %v538_v57, %v537_v58  ;;  %v609_v25 = vmul.f32 %v1022_v0, %v1022_v0  ;;  %v610_v29 = vmul.f32 %v995_v52, %v995_v52  ;;  %v554_v30 = vsel %vm494_vm2, %v1091_v20, 0.0 }
 0x10b   : > { %v611_v33 = vmul.f32 %v1010_v60, %v1010_v60  ;;  %v556_v37 = vsel %vm494_vm2, %v1106_v28, 0.0  ;;  %v612_v56 = vmul.f32 %v1049_v8, %v1049_v8  ;;  %v640_v38 = vsel %vm494_vm2, %v608_v22, 0.0 }
 0x10c   : > { %v541_v3 = vadd.f32 %v540_v61, %v539_v62  ;;  %v641_v0 = vsel %vm494_vm2, %v609_v25, 0.0  ;;  %v643_v52 = vsel %vm494_vm2, %v610_v29, 0.0  ;;  %v558_v45 = vsel %vm494_vm2, %v1145_v40, 0.0 }
 0x10d   : > { %v642_v42 = vadd.f32 %v641_v0, %v640_v38  ;;  %v613_v60 = vmul.f32 %v1070_v16, %v1070_v16  ;;  %v645_v46 = vsel %vm494_vm2, %v611_v33, 0.0  ;;  %v560_v8 = vsel %vm494_vm2, %v1166_v48, 0.0 }
 0x10e   : > { %v543_v6 = vadd.f32 %v542_v1, %v541_v3  ;;  %v614_v50 = vmul.f32 %v1043_v4, %v1043_v4  ;;  %v647_v54 = vsel %vm494_vm2, %v612_v56, 0.0  ;;  %v562_v61 = vsel %vm494_vm2, %v1139_v36, 0.0 }
 0x10f   : > { %v644_v53 = vadd.f32 %v643_v52, %v642_v42  ;;  %v615_v16 = vmul.f32 %v1058_v12, %v1058_v12  ;;  %v649_v62 = vsel %vm494_vm2, %v613_v60, 0.0  ;;  %v616_v4 = vmul.f32 %v1097_v24, %v1097_v24 }
 0x110   : > { %v545_v10 = vadd.f32 %v544_v5, %v543_v6  ;;  %v564_v5 = vsel %vm494_vm2, %v1154_v44, 0.0  ;;  %v651_v6 = vsel %vm494_vm2, %v614_v50, 0.0  ;;  %v617_v12 = vmul.f32 %v1118_v32, %v1118_v32 }
 0x111   : > { %v646_v58 = vadd.f32 %v645_v46, %v644_v53  ;;  %v618_v24 = vmul.f32 %v1091_v20, %v1091_v20  ;;  %v655_v22 = vsel %vm494_vm2, %v616_v4, 0.0  ;;  %v570_v29 = vsel %vm494_vm2, %v998_v55, 0.0 }
 0x112   : > { %v547_v14 = vadd.f32 %v546_v9, %v545_v10  ;;  %v619_v32 = vmul.f32 %v1106_v28, %v1106_v28  ;;  %v620_v20 = vmul.f32 %v1145_v40, %v1145_v40  ;;  %v621_v28 = vmul.f32 %v1166_v48, %v1166_v48 }
 0x113   : > { %v648_v3 = vadd.f32 %v647_v54, %v646_v58  ;;  %v659_v56 = vsel %vm494_vm2, %v618_v24, 0.0  ;;  %v576_v60 = vsel %vm494_vm2, %v1079_v18, 0.0  ;;  %v622_v40 = vmul.f32 %v1139_v36, %v1139_v36 }
 0x114   : > { %v549_v19 = vadd.f32 %v548_v13, %v547_v14  ;;  %v566_v13 = vsel %vm494_vm2, %v1007_v59, 0.0  ;;  %v653_v14 = vsel %vm494_vm2, %v615_v16, 0.0  ;;  %v661_v42 = vsel %vm494_vm2, %v619_v32, 0.0 }
 0x115   : > { %v650_v10 = vadd.f32 %v649_v62, %v648_v3  ;;  %v663_v46 = vsel %vm494_vm2, %v620_v20, 0.0  ;;  %v623_v48 = vmul.f32 %v1154_v44, %v1154_v44  ;;  %v665_v50 = vsel %vm494_vm2, %v621_v28, 0.0 }
 0x116   : > { %v551_v26 = vadd.f32 %v550_v17, %v549_v19  ;;  %v580_v58 = vsel %vm494_vm2, %v1067_v15, 0.0  ;;  %v624_v36 = vmul.f32 %v1007_v59, %v1007_v59  ;;  %v625_v44 = vmul.f32 %v1031_v2, %v1031_v2 }
 0x117   : > { %v652_v19 = vadd.f32 %v651_v6, %v650_v10  ;;  %v669_v3 = vsel %vm494_vm2, %v623_v48, 0.0  ;;  %v584_v6 = vsel %vm494_vm2, %v1127_v34, 0.0  ;;  %v626_v59 = vmul.f32 %v998_v55, %v998_v55 }
 0x118   : > { %v553_v35 = vadd.f32 %v552_v21, %v551_v26  ;;  %v568_v21 = vsel %vm494_vm2, %v1031_v2, 0.0  ;;  %v627_v2 = vmul.f32 %v1019_v63, %v1019_v63  ;;  %v628_v55 = vmul.f32 %v1055_v11, %v1055_v11 }
 0x119   : > { %v654_v26 = vadd.f32 %v653_v14, %v652_v19  ;;  %v673_v14 = vsel %vm494_vm2, %v625_v44, 0.0  ;;  %v675_v24 = vsel %vm494_vm2, %v626_v59, 0.0  ;;  %v596_v28 = vsel %vm494_vm2, %v1163_v47, 0.0 }
 0x11a   : > { %v555_v41 = vadd.f32 %v554_v30, %v553_v35  ;;  %v657_v30 = vsel %vm494_vm2, %v617_v12, 0.0  ;;  %v586_v12 = vsel %vm494_vm2, %v1094_v23, 0.0  ;;  %vm605_vm4 = vcmask 253952  }
 0x11b   : > { %v656_v35 = vadd.f32 %v655_v22, %v654_v26  ;;  %v590_v26 = vsel %vm494_vm2, %v1151_v43, 0.0 }
 0x11c   : > { %v557_v49 = vadd.f32 %v556_v37, %v555_v41  ;;  %v572_v37 = vsel %vm494_vm2, %v1019_v63, 0.0  ;;  %v574_v41 = vsel %vm494_vm2, %v1055_v11, 0.0  ;;  %v629_v63 = vmul.f32 %v1079_v18, %v1079_v18 }
 0x11d   : > { %v658_v0 = vadd.f32 %v657_v30, %v656_v35  ;;  %v630_v11 = vmul.f32 %v1046_v7, %v1046_v7  ;;  %v679_v35 = vsel %vm494_vm2, %v628_v55, 0.0  ;;  %v631_v18 = vmul.f32 %v1067_v15, %v1067_v15  ;;  %v607_v55 = vld [vmem:[%s1376_s5] sm:$0x1] }
 0x11e   : > { %v559_v57 = vadd.f32 %v558_v45, %v557_v49 }
 0x11f   : > { %v660_v45 = vadd.f32 %v659_v56, %v658_v0  ;;  %v594_v56 = vsel %vm494_vm2, %v1142_v39, 0.0 }
 0x120   : > { %v561_v1 = vadd.f32 %v560_v8, %v559_v57  ;;  %v578_v8 = vsel %vm494_vm2, %v1046_v7, 0.0  ;;  %v632_v7 = vmul.f32 %v1103_v27, %v1103_v27 }
 0x121   : > { %v662_v53 = vadd.f32 %v661_v42, %v660_v45  ;;  %v683_v42 = vsel %vm494_vm2, %v630_v11, 0.0 }
 0x122   : > { %v563_v9 = vadd.f32 %v562_v61, %v561_v1  ;;  %v667_v61 = vsel %vm494_vm2, %v622_v40, 0.0  ;;  %v582_v1 = vsel %vm494_vm2, %v1103_v27, 0.0  ;;  %v685_v40 = vsel %vm494_vm2, %v631_v18, 0.0 }
 0x123   : > { %v664_v57 = vadd.f32 %v663_v46, %v662_v53  ;;  %v687_v53 = vsel %vm494_vm2, %v632_v7, 0.0  ;;  %v635_v27 = vmul.f32 %v1115_v31, %v1115_v31 }
 0x124   : > { %v565_v17 = vadd.f32 %v564_v5, %v563_v9  ;;  %v671_v9 = vsel %vm494_vm2, %v624_v36, 0.0 }
 0x125   : > { %v666_v62 = vadd.f32 %v665_v50, %v664_v57 }
 0x126   : > { %v567_v25 = vadd.f32 %v566_v13, %v565_v17 }
 0x127   : > { %v668_v4 = vadd.f32 %v667_v61, %v666_v62 }
 0x128   : > { %v569_v33 = vadd.f32 %v568_v21, %v567_v25  ;;  %v588_v21 = vsel %vm494_vm2, %v1115_v31, 0.0  ;;  %v638_v31 = vmul.f32 %v1142_v39, %v1142_v39 }
 0x129   : > { %v670_v13 = vadd.f32 %v669_v3, %v668_v4  ;;  %v639_v4 = vmul.f32 %v1163_v47, %v1163_v47 }
 0x12a   : > { %v571_v38 = vadd.f32 %v570_v29, %v569_v33  ;;  %v677_v29 = vsel %vm494_vm2, %v627_v2, 0.0  ;;  %v592_v33 = vsel %vm494_vm2, %v1175_v51, 0.0 }
 0x12b   : > { %v672_v19 = vadd.f32 %v671_v9, %v670_v13  ;;  %v699_v9 = vsel %vm494_vm2, %v638_v31, 0.0  ;;  %v701_v13 = vsel %vm494_vm2, %v639_v4, 0.0 }
 0x12c   : > { %v573_v52 = vadd.f32 %v572_v37, %v571_v38  ;;  %v681_v38 = vsel %vm494_vm2, %v629_v63, 0.0 }
 0x12d   : > { %v674_v25 = vadd.f32 %v673_v14, %v672_v19 }
 0x12e   : > { %v575_v49 = vadd.f32 %v574_v41, %v573_v52 }
 0x12f   : > { %v676_v30 = vadd.f32 %v675_v24, %v674_v25 }
 0x130   : > { %v577_v54 = vadd.f32 %v576_v60, %v575_v49  ;;  %v633_v60 = vmul.f32 %v1127_v34, %v1127_v34  ;;  %v634_v49 = vmul.f32 %v1094_v23, %v1094_v23  ;;  %v636_v34 = vmul.f32 %v1151_v43, %v1151_v43  ;;  %v534_v43 = vld [vmem:[%s1375_s4] sm:$0x1] }
 0x131   : > { %v678_v20 = vadd.f32 %v677_v29, %v676_v30  ;;  %v637_v23 = vmul.f32 %v1175_v51, %v1175_v51 }
 0x132   : > { %v579_v16 = vadd.f32 %v578_v8, %v577_v54  ;;  %v689_v50 = vsel %vm494_vm2, %v633_v60, 0.0  ;;  %v695_v44 = vsel %vm494_vm2, %v636_v34, 0.0 }
 0x133   : > { %v680_v41 = vadd.f32 %v679_v35, %v678_v20  ;;  %v697_v51 = vsel %vm494_vm2, %v637_v23, 0.0 }
 0x134   : > { %v581_v5 = vadd.f32 %v580_v58, %v579_v16  ;;  %v691_v58 = vsel %vm494_vm2, %v634_v49, 0.0  ;;  %v693_v16 = vsel %vm494_vm2, %v635_v27, 0.0 }
 0x135   : > { %v682_v45 = vadd.f32 %v681_v38, %v680_v41 }
 0x136   : > { %v583_v10 = vadd.f32 %v582_v1, %v581_v5 }
 0x137   : > { %v684_v46 = vadd.f32 %v683_v42, %v682_v45 }
 0x138   : > { %v585_v17 = vadd.f32 %v584_v6, %v583_v10 }
 0x139   : > { %v686_v48 = vadd.f32 %v685_v40, %v684_v46 }
 0x13a   : > { %v587_v22 = vadd.f32 %v586_v12, %v585_v17 }
 0x13b   : > { %v688_v57 = vadd.f32 %v687_v53, %v686_v48 }
 0x13c   : > { %v589_v32 = vadd.f32 %v588_v21, %v587_v22 }
 0x13d   : > { %v690_v61 = vadd.f32 %v689_v50, %v688_v57 }
 0x13e   : > { %v591_v37 = vadd.f32 %v590_v26, %v589_v32 }
 0x13f   : > { %v692_v1 = vadd.f32 %v691_v58, %v690_v61 }
 0x140   : > { %v593_v0 = vadd.f32 %v592_v33, %v591_v37 }
 0x141   : > { %v694_v5 = vadd.f32 %v693_v16, %v692_v1 }
 0x142   : > { %v595_v52 = vadd.f32 %v594_v56, %v593_v0 }
 0x143   : > { %v696_v59 = vadd.f32 %v695_v44, %v694_v5 }
 0x144   : > { %v597_v15 = vadd.f32 %v596_v28, %v595_v52 }
 0x145   : > { %v698_v39 = vadd.f32 %v697_v51, %v696_v59 }
 0x146   : > { %v598_v8 = vrot.slane %v597_v15, 4 }
 0x147   : > { %v700_v12 = vadd.f32 %v699_v9, %v698_v39 }
 0x148   : > { %v599_v54 = vadd.f32 %v598_v8, %v597_v15 }
 0x149   : > { %v702_v2 = vadd.f32 %v701_v13, %v700_v12 }
 0x14a   : > { %v600_v36 = vrot.slane %v599_v54, 2 }
 0x14b   : > { %v703_v14 = vrot.slane %v702_v2, 4 }
 0x14c   : > { %v601_v62 = vadd.f32 %v600_v36, %v599_v54 }
 0x14d   : > { %v704_v47 = vadd.f32 %v703_v14, %v702_v2 }
 0x14e   : > { %v602_v3 = vrot.slane %v601_v62, 1 }
 0x14f   : > { %v705_v17 = vrot.slane %v704_v47, 2 }
 0x150   : > { %v603_v6 = vadd.f32 %v602_v3, %v601_v62 }
 0x151   : > { %v706_v19 = vadd.f32 %v705_v17, %v704_v47 }
 0x152   : > { %v604_v10 = vadd.f32 %v603_v6, %v534_v43 }
 0x153   : > { %v707_v21 = vrot.slane %v706_v19, 1 }
 0x154   : > { %606 = vst.msk [vmem:[%s1375_s4] sm:$0x1] %vm605_vm4, %v604_v10 }
 0x155   : > { %v708_v24 = vadd.f32 %v707_v21, %v706_v19 }
 0x157   : > { %v709_v22 = vadd.f32 %v708_v24, %v607_v55 }
 0x159   : > { %710 = vst.msk [vmem:[%s1376_s5] sm:$0x1] %vm605_vm4, %v709_v22 }
 0x15a PF: > { %s16_s18 = sadd.s32 1, %s878_s18  }
 0x15b   : > { %p13_p5 = scmp.ge.s32.totalorder %s16_s18, 4  }
 0x15d   :  { %15 = sbr.rel (!%p13_p5) target bundleno = 1 (0x1), region = 82 }

// kernel: residual_block_forward.5
= control target key start
LH: loop header
LB: loop body
LE: loop exit
PB: predicated region body
PF: predicated region fallthrough
CT: control target
= control target key end

     0   :  { %s12629_s0 = inlined_call_operand.vmem [shape: f32[2,256,32], index: 0, kind: input, shape index: {}]   ;;  %s12630_s1 = inlined_call_operand.vmem [shape: f32[1,32], index: 1, kind: input, shape index: {}]   ;;  %s12631_s2 = inlined_call_operand.vmem [shape: f32[1,32], index: 2, kind: input, shape index: {}]   ;;  %s12632_s3 = inlined_call_operand.vmem [shape: f32[1,32], index: 3, kind: input, shape index: {}]   ;;  %s12633_s4 = inlined_call_operand.vmem [shape: f32[1,32], index: 4, kind: input, shape index: {}]   ;;  %s12634_s5 = inlined_call_operand.vmem [shape: bf16[288,32], index: 5, kind: input, shape index: {}]   ;;  %s12635_s6 = inlined_call_operand.vmem [shape: f32[1,32], index: 6, kind: input, shape index: {}]   ;;  %s12636_s7 = inlined_call_operand.vmem [shape: bf16[32,32], index: 7, kind: input, shape index: {}]   ;;  %s12637_s8 = inlined_call_operand.vmem [shape: f32[1,32], index: 8, kind: input, shape index: {}]   ;;  %s12638_s9 = inlined_call_operand.vmem [shape: bf16[2,32,12], index: 9, kind: input, shape index: {}]   ;;  %s12639_s10 = inlined_call_operand.vmem [shape: bf16[2,12,32], index: 10, kind: input, shape index: {}]   ;;  %s12640_s11 = inlined_call_operand.vmem [shape: f32[12,32], index: 11, kind: input, shape index: {}]   ;;  %s12641_s12 = inlined_call_operand.vmem [shape: bf16[32,32], index: 12, kind: input, shape index: {}]   ;;  %s12642_s13 = inlined_call_operand.vmem [shape: f32[1,32], index: 13, kind: input, shape index: {}]   ;;  %s12643_s14 = inlined_call_operand.vmem [shape: f32[1,32], index: 14, kind: input, shape index: {}]   ;;  %s12644_s15 = inlined_call_operand.vmem [shape: f32[1,32], index: 15, kind: input, shape index: {}]   ;;  %s12645_s16 = inlined_call_operand.vmem [shape: bf16[288,32], index: 16, kind: input, shape index: {}]   ;;  %s12646_s17 = inlined_call_operand.vmem [shape: f32[1,32], index: 17, kind: input, shape index: {}]   ;;  %s12647_s18 = inlined_call_operand.hbm [shape: f32[2,256,32], index: 18, kind: output, shape index: {}]  }
   0x1   :  { %12678 = sst [smem:[#allocation30_spill]] %s12629_s0 }
   0x2   :  { %12679 = sst [smem:[#allocation31_spill]] %s12630_s1 }
   0x3   :  { %12680 = sst [smem:[#allocation32_spill]] %s12631_s2 }
   0x4   :  { %12681 = sst [smem:[#allocation33_spill]] %s12647_s18 }
   0x5   :  { %23 = vsyncpa [#allocation4], 0 }
   0x6   :  { %25 = vsyncpa [#allocation4 + $0x1], 0  ;;  %s9210_s27 = smov 0   ;;  %s9212_s28 = smov 0  }
   0x7   :  { %s9214_s29 = smov 0   ;;  %s9216_s30 = smov 0  }
   0x8 LB: > { %12682 = sst [smem:[#allocation6_spill]] %s9093_s27  ;;  %s9231_s0 = sadd.s32 4294967295, %s9105_s30   ;;  %s9105_s30 = sphi %s9216_s30, %s12778_s30   ;;  %s9101_s29 = sphi %s9214_s29, %s12780_s29   ;;  %s9097_s28 = sphi %s9212_s28, %s12782_s28   ;;  %s9093_s27 = sphi %s9210_s27, %s12781_s27  }
   0x9   : > { %12683 = sst [smem:[#allocation7_spill]] %s9101_s29  ;;  %s6924_s19 = sadd.s32 4294967294, %s9105_s30  }
   0xa   : > { %12684 = sst [smem:[#allocation8_spill]] %s9105_s30  ;;  %s9235_s1 = sadd.s32 1, %s9105_s30  }
   0xb   : > { %12685 = sst [smem:[#allocation9_spill]] %s9235_s1  ;;  %s431_s20 = sadd.s32 1, %s9101_s29 }
   0xc   : > { %s428_s21 = ssub.s32 %s9105_s30, %s9235_s1  ;;  %p441_p0 = scmp.ne.s32.totalorder %s9101_s29, %s9097_s28 }
   0xd   : > { %p429_p1 = scmp.eq.s32.totalorder %s428_s21, 0  ;;  %p442_p2 = scmp.eq.s32.totalorder %s9231_s0, 1 }
   0xe   : > { %p447_p3 = scmp.ne.s32.totalorder %s9097_s28, %s9093_s27  ;;  %p448_p4 = scmp.eq.s32.totalorder %s6924_s19, 1 }
   0xf   : > { %s9246_s22 = scalar_select %p429_p1, %s9101_s29, %s431_s20  }
  0x10   : > { %p9248_p5 = por %p442_p2, %p441_p0  ;;  %p9252_p6 = por %p448_p4, %p447_p3 }
  0x11   : > { %12686 = sst [smem:[#allocation10_spill]] %s9246_s22  ;;  %p6927_p7 = scmp.ge.s32.totalorder %s9105_s30, 1 }
  0x12   : > { %s12687_s2 = scalar_select %p9248_p5, 1, 0 }
  0x13   : > { %s12689_s23 = scalar_select %p9252_p6, 1, 0 }
  0x14   : > { %12688 = sst [smem:[#allocation11_spill]] %s12687_s2  ;;  %p535_p8 = scmp.lt.s32.totalorder %s9105_s30, 3 }
  0x15   : > { %12690 = sst [smem:[#allocation12_spill]] %s12689_s23 }
  0x16   : > { %p536_p9 = pnand %p6927_p7, %p535_p8 }
  0x18   : > { %539 = sbr.rel (%p536_p9) target bundleno = 2540 (0x9ec), region = 92 }
  0x1f   : > { %vm736_vm0 = vcmask 261120   ;;  %vm739_vm1 = vcmask 254976   ;;  %v12661_v0 = vmov 0.0   ;;  %s12691_s26 = sld [smem:[#allocation31_spill]]  ;;  %s12692_s21 = sld [smem:[#allocation32_spill]]  ;;  %v8768_v6 = vld [vmem:[%s12634_s5 + $0x40] sm:$0xff]   ;;  %v661_v16 = vlaneseq }
  0x20   : > { %737 = vst.msk [vmem:[#allocation2] sm:$0xff] %vm736_vm0, %v12661_v0  ;;  %738 = vst.msk [vmem:[#allocation2 + $0x8] sm:$0xff] %vm736_vm0, %v12661_v0  ;;  %p599_p10 = scmp.lt.s32.totalorder %s9231_s0, 1  ;;  %v8769_v8 = vld [vmem:[%s12634_s5] sm:$0xff]   ;;  %7122 = vmatprep.subr.bf16.mxu0 %v8768_v6  ;;  %s12653_s22 = smov 64   ;;  %v8770_v18 = vld [vmem:[%s12634_s5 + $0x48] sm:$0xff]  }
  0x21   : > { %740 = vst.msk [vmem:[#allocation2 + $0x10] sm:$0x3] %vm739_vm1, %v12661_v0  ;;  %743 = vst.msk [vmem:[#allocation2 + $0x28] sm:$0x3] %vm739_vm1, %v12661_v0  ;;  %7123 = vmatpush3.bf16.msra.mxu0 %v8769_v8  ;;  %s12657_s1 = smov 32   ;;  %v662_v17 = vshrl.u32 %v661_v16, 7 }
  0x22   : > { %741 = vst.msk [vmem:[#allocation2 + $0x18] sm:$0xff] %vm736_vm0, %v12661_v0  ;;  %742 = vst.msk [vmem:[#allocation2 + $0x20] sm:$0xff] %vm736_vm0, %v12661_v0  ;;  %s9382_s29 = scalar_select %p599_p10, %s9231_s0, 1  ;;  %v8771_v19 = vld [vmem:[%s12634_s5 + $0x8] sm:$0xff]   ;;  %v8772_v20 = vld [vmem:[%s12634_s5 + $0x50] sm:$0xff]   ;;  %7124 = vmatprep.subr.bf16.mxu0 %v8770_v18  ;;  %vm1914_vm2 = vcmask 523264  }
  0x23   : > { %744 = vst.msk [vmem:[#allocation2 + $0x30] sm:$0xff] %vm736_vm0, %v12661_v0  ;;  %745 = vst.msk [vmem:[#allocation2 + $0x38] sm:$0xff] %vm736_vm0, %v12661_v0  ;;  %s12693_s30 = sld [smem:[#allocation30_spill]]  ;;  %v621_v21 = vld [vmem:[%s12632_s3] sm:$0x1]  ;;  %v8773_v22 = vld [vmem:[%s12634_s5 + $0x10] sm:$0xff]  }
  0x24   : > { %746 = vst.msk [vmem:[#allocation2 + $0x40] sm:$0x3] %vm739_vm1, %v12661_v0  ;;  %749 = vst.msk [vmem:[#allocation2 + $0x58] sm:$0x3] %vm739_vm1, %v12661_v0  ;;  %s7118_s23 = sshll.u32 %s9382_s29, 8  ;;  %v663_v23 = vsub.s32 0, %v662_v17 }
  0x25   : > { %747 = vst.msk [vmem:[#allocation2 + $0x48] sm:$0xff] %vm736_vm0, %v12661_v0  ;;  %748 = vst.msk [vmem:[#allocation2 + $0x50] sm:$0xff] %vm736_vm0, %v12661_v0  ;;  %v615_v1 = vld [vmem:[%s12691_s26] sm:$0x1]  ;;  %7125 = vmatpush3.bf16.msra.mxu0 %v8771_v19  ;;  %v8774_v24 = vld [vmem:[%s12634_s5 + $0x58] sm:$0xff]   ;;  %s12694_s2 = smov 64  }
  0x26   : > { %750 = vst.msk [vmem:[#allocation2 + $0x60] sm:$0xff] %vm736_vm0, %v12661_v0  ;;  %751 = vst.msk [vmem:[#allocation2 + $0x68] sm:$0xff] %vm736_vm0, %v12661_v0  ;;  %v617_v2 = vld [vmem:[%s12692_s21] sm:$0x1]  ;;  %v616_v3 = vmul.f32 0.001953125, %v615_v1  ;;  %7126 = vmatprep.subr.bf16.mxu0 %v8772_v20  ;;  %v8775_v35 = vld [vmem:[%s12634_s5 + $0x18] sm:$0xff]  }
  0x27   : > { %752 = vst.msk [vmem:[#allocation2 + $0x70] sm:$0x3] %vm739_vm1, %v12661_v0  ;;  %755 = vst.msk [vmem:[#allocation2 + $0x88] sm:$0x3] %vm739_vm1, %v12661_v0  ;;  %v618_v4 = vmul.f32 0.001953125, %v617_v2  ;;  %v889_v9 = vld [vmem:[#allocation2 + $0x2] sm:$0xff] }
  0x28   : > { %753 = vst.msk [vmem:[#allocation2 + $0x78] sm:$0xff] %vm736_vm0, %v12661_v0  ;;  %754 = vst.msk [vmem:[#allocation2 + $0x80] sm:$0xff] %vm736_vm0, %v12661_v0  ;;  %v619_v5 = vmul.f32 %v616_v3, %v616_v3  ;;  %v890_v10 = vld [vmem:[#allocation2 + $0xa] sm:$0xff]  ;;  %v857_v11 = vld [vmem:[#allocation2 + $0x1] sm:$0xff]  ;;  %vm1947_vm3 = vcmask 785408   ;;  %s7119_s25 = sshll.u32 %s9382_s29, 4 }
  0x29   : > { %756 = vst.msk [vmem:[#allocation2 + $0x90] sm:$0xff] %vm736_vm0, %v12661_v0  ;;  %757 = vst.msk [vmem:[#allocation2 + $0x98] sm:$0xff] %vm736_vm0, %v12661_v0  ;;  %v7813_v13 = vpack.i.bf16 %v890_v10, %v889_v9  ;;  %v858_v14 = vld [vmem:[#allocation2 + $0x9] sm:$0xff]  ;;  %s9399_s18 = scalar_lea.vmem %s12693_s30, %s7118_s23  ;;  %v625_v26 = vld [vmem:[%s12633_s4] sm:$0x1]  ;;  %7127 = vmatpush3.bf16.msra.mxu0 %v8773_v22  ;;  %s608_s23 = scalar_lea.vmem %s12638_s9, %s7119_s25 }
  0x2a   : > { %758 = vst.msk [vmem:[#allocation2 + $0xa0] sm:$0x3] %vm739_vm1, %v12661_v0  ;;  %761 = vst.msk [vmem:[#allocation2 + $0xb8] sm:$0x3] %vm739_vm1, %v12661_v0  ;;  %v620_v7 = vsub.f32 %v618_v4, %v619_v5  ;;  %v7808_v15 = vpack.i.bf16 %v858_v14, %v857_v11  ;;  %v630_v27 = vld [vmem:[%s9399_s18 + $0x10] sm:$0xff]  ;;  %v631_v28 = vld [vmem:[%s9399_s18 + $0x18] sm:$0xff]  ;;  %7128 = vmatprep.subr.bf16.mxu0 %v8774_v24 }
  0x2b   : > { %759 = vst.msk [vmem:[#allocation2 + $0xa8] sm:$0xff] %vm736_vm0, %v12661_v0  ;;  %760 = vst.msk [vmem:[#allocation2 + $0xb0] sm:$0xff] %vm736_vm0, %v12661_v0  ;;  %7814 = vrot.lane.b32.xlu1 %v7813_v13, %s12653_s22  ;;  %v628_v29 = vld [vmem:[%s9399_s18] sm:$0xff]  ;;  %v629_v31 = vld [vmem:[%s9399_s18 + $0x8] sm:$0xff]  ;;  %s12695_s22 = smov 32   ;;  %s7120_s20 = sshll.u32 %s9382_s29, 3 }
  0x2c   : > { %762 = vst.msk [vmem:[#allocation2 + $0xc0] sm:$0xff] %vm736_vm0, %v12661_v0  ;;  %763 = vst.msk [vmem:[#allocation2 + $0xc8] sm:$0xff] %vm736_vm0, %v12661_v0  ;;  %v622_v12 = vadd.f32 1e-05, %v620_v7  ;;  %7809 = vrot.lane.b32.xlu0 %v7808_v15, %s12657_s1  ;;  %v632_v32 = vld [vmem:[%s9399_s18 + $0x20] sm:$0xff]  ;;  %v633_v33 = vld [vmem:[%s9399_s18 + $0x28] sm:$0xff]  ;;  %s613_s25 = scalar_lea.vmem %s12639_s10, %s7120_s20 }
  0x2d   : > { %764 = vst.msk [vmem:[#allocation2 + $0xd0] sm:$0x3] %vm739_vm1, %v12661_v0  ;;  %767 = vst.msk [vmem:[#allocation2 + $0xe8] sm:$0x3] %vm739_vm1, %v12661_v0  ;;  %v634_v34 = vld [vmem:[%s9399_s18 + $0x30] sm:$0xff]  ;;  %v635_v36 = vld [vmem:[%s9399_s18 + $0x38] sm:$0xff]  ;;  %7129 = vmatpush3.bf16.msra.mxu0 %v8775_v35 }
  0x2e   : > { %765 = vst.msk [vmem:[#allocation2 + $0xd8] sm:$0xff] %vm736_vm0, %v12661_v0  ;;  %766 = vst.msk [vmem:[#allocation2 + $0xe0] sm:$0xff] %vm736_vm0, %v12661_v0  ;;  %8811 = vrsqrt.f32 %v622_v12  ;;  %v636_v37 = vld [vmem:[%s9399_s18 + $0x40] sm:$0xff]  ;;  %v637_v38 = vld [vmem:[%s9399_s18 + $0x48] sm:$0xff]  ;;  %s9110_s1 = smov 96   ;;  %s12774_s21 = sld [smem:[#allocation33_spill]] }
  0x2f   : > { %768 = vst.msk [vmem:[#allocation2 + $0xf0] sm:$0xff] %vm736_vm0, %v12661_v0  ;;  %769 = vst.msk [vmem:[#allocation2 + $0xf8] sm:$0xff] %vm736_vm0, %v12661_v0  ;;  %v8776_v39 = vld [vmem:[%s12634_s5 + $0x60] sm:$0xff]   ;;  %v9429_v40 = vld [vmem:[#allocation2 + $0x8] sm:$0xff] }
  0x30   : > { %770 = vst.msk [vmem:[#allocation2 + $0x100] sm:$0x3] %vm739_vm1, %v12661_v0  ;;  %773 = vst.msk [vmem:[#allocation2 + $0x118] sm:$0x3] %vm739_vm1, %v12661_v0  ;;  %v9431_v41 = vld [vmem:[#allocation2] sm:$0xff]  ;;  %v638_v44 = vld [vmem:[%s9399_s18 + $0x50] sm:$0xff]  ;;  %7130 = vmatprep.subr.bf16.mxu0 %v8776_v39 }
  0x31   : > { %771 = vst.msk [vmem:[#allocation2 + $0x108] sm:$0xff] %vm736_vm0, %v12661_v0  ;;  %772 = vst.msk [vmem:[#allocation2 + $0x110] sm:$0xff] %vm736_vm0, %v12661_v0  ;;  %v639_v45 = vld [vmem:[%s9399_s18 + $0x58] sm:$0xff]  ;;  %v640_v46 = vld [vmem:[%s9399_s18 + $0x60] sm:$0xff] }
  0x32   : > { %774 = vst.msk [vmem:[#allocation2 + $0x120] sm:$0xff] %vm736_vm0, %v12661_v0  ;;  %775 = vst.msk [vmem:[#allocation2 + $0x128] sm:$0xff] %vm736_vm0, %v12661_v0  ;;  %v641_v51 = vld [vmem:[%s9399_s18 + $0x68] sm:$0xff]  ;;  %v8777_v56 = vld [vmem:[%s12634_s5 + $0x20] sm:$0xff]  }
  0x33   : > { %776 = vst.msk [vmem:[#allocation2 + $0x130] sm:$0x3] %vm739_vm1, %v12661_v0  ;;  %779 = vst.msk [vmem:[#allocation2 + $0x148] sm:$0x3] %vm739_vm1, %v12661_v0  ;;  %v8778_v57 = vld [vmem:[%s12634_s5 + $0x68] sm:$0xff]   ;;  %v642_v62 = vld [vmem:[%s9399_s18 + $0x70] sm:$0xff]  ;;  %7131 = vmatpush3.bf16.msra.mxu0 %v8777_v56 }
  0x34   : > { %777 = vst.msk [vmem:[#allocation2 + $0x138] sm:$0xff] %vm736_vm0, %v12661_v0  ;;  %778 = vst.msk [vmem:[#allocation2 + $0x140] sm:$0xff] %vm736_vm0, %v12661_v0  ;;  %v643_v63 = vld [vmem:[%s9399_s18 + $0x78] sm:$0xff]  ;;  %v644_v5 = vld [vmem:[%s9399_s18 + $0x80] sm:$0xff]  ;;  %7132 = vmatprep.subr.bf16.mxu0 %v8778_v57 }
  0x35   : > { %780 = vst.msk [vmem:[#allocation2 + $0x150] sm:$0xff] %vm736_vm0, %v12661_v0  ;;  %781 = vst.msk [vmem:[#allocation2 + $0x158] sm:$0xff] %vm736_vm0, %v12661_v0  ;;  %v645_v6 = vld [vmem:[%s9399_s18 + $0x88] sm:$0xff]  ;;  %v646_v7 = vld [vmem:[%s9399_s18 + $0x90] sm:$0xff] }
  0x36   : > { %782 = vst.msk [vmem:[#allocation2 + $0x160] sm:$0x3] %vm739_vm1, %v12661_v0  ;;  %785 = vst.msk [vmem:[#allocation2 + $0x178] sm:$0x3] %vm739_vm1, %v12661_v0  ;;  %v647_v8 = vld [vmem:[%s9399_s18 + $0x98] sm:$0xff]  ;;  %v648_v13 = vld [vmem:[%s9399_s18 + $0xa0] sm:$0xff] }
  0x37   : > { %783 = vst.msk [vmem:[#allocation2 + $0x168] sm:$0xff] %vm736_vm0, %v12661_v0  ;;  %784 = vst.msk [vmem:[#allocation2 + $0x170] sm:$0xff] %vm736_vm0, %v12661_v0  ;;  %v649_v14 = vld [vmem:[%s9399_s18 + $0xa8] sm:$0xff]  ;;  %v8780_v24 = vld [vmem:[%s12634_s5 + $0x70] sm:$0xff]  }
  0x38   : > { %786 = vst.msk [vmem:[#allocation2 + $0x180] sm:$0xff] %vm736_vm0, %v12661_v0  ;;  %787 = vst.msk [vmem:[#allocation2 + $0x188] sm:$0xff] %vm736_vm0, %v12661_v0  ;;  %v8812_v25 = vpop.eup %8811  ;;  %v8779_v19 = vld [vmem:[%s12634_s5 + $0x28] sm:$0xff]  }
  0x39   : > { %788 = vst.msk [vmem:[#allocation2 + $0x190] sm:$0x3] %vm739_vm1, %v12661_v0  ;;  %791 = vst.msk [vmem:[#allocation2 + $0x1a8] sm:$0x3] %vm739_vm1, %v12661_v0  ;;  %v624_v30 = vmul.f32 %v8812_v25, %v621_v21  ;;  %v650_v25 = vld [vmem:[%s9399_s18 + $0xb0] sm:$0xff]  ;;  %7133 = vmatpush3.bf16.msra.mxu0 %v8779_v19  ;;  %v8785_v56 = vld [vmem:[%s12634_s5 + $0x88] sm:$0xff]  }
  0x3a   : > { %789 = vst.msk [vmem:[#allocation2 + $0x198] sm:$0xff] %vm736_vm0, %v12661_v0  ;;  %790 = vst.msk [vmem:[#allocation2 + $0x1a0] sm:$0xff] %vm736_vm0, %v12661_v0  ;;  %7134 = vmatprep.subr.bf16.mxu0 %v8780_v24 }
  0x3b   : > { %4859 = vst.msk [vmem:[#allocation2 + $0x10] sm:$0x3] %vm739_vm1, %v12661_v0  ;;  %v626_v42 = vmul.f32 %v624_v30, %v616_v3  ;;  %v9433_v43 = vrot.slane %v624_v30, %v663_v23 }
  0x3c   : > { %4857 = vst.msk [vmem:[#allocation2] sm:$0xff] %vm736_vm0, %v12661_v0  ;;  %4858 = vst.msk [vmem:[#allocation2 + $0x8] sm:$0xff] %vm736_vm0, %v12661_v0 }
  0x3d   : > { %v627_v47 = vsub.f32 %v625_v26, %v626_v42  ;;  %v668_v48 = vmul.f32 %v9433_v43, %v630_v27  ;;  %v669_v49 = vmul.f32 %v9433_v43, %v631_v28  ;;  %v666_v50 = vmul.f32 %v9433_v43, %v628_v29  ;;  %v651_v26 = vld [vmem:[%s9399_s18 + $0xb8] sm:$0xff] }
  0x3e   : > { %v667_v52 = vmul.f32 %v9433_v43, %v629_v31  ;;  %v670_v53 = vmul.f32 %v9433_v43, %v632_v32  ;;  %v671_v54 = vmul.f32 %v9433_v43, %v633_v33  ;;  %v672_v55 = vmul.f32 %v9433_v43, %v634_v34  ;;  %v8781_v31 = vld [vmem:[%s12634_s5 + $0x30] sm:$0xff]   ;;  %v652_v32 = vld [vmem:[%s9399_s18 + $0xc0] sm:$0xff] }
  0x3f   : > { %v9456_v58 = vrot.slane %v627_v47, %v663_v23  ;;  %v673_v59 = vmul.f32 %v9433_v43, %v635_v36  ;;  %v674_v60 = vmul.f32 %v9433_v43, %v636_v37  ;;  %v675_v61 = vmul.f32 %v9433_v43, %v637_v38  ;;  %v8783_v37 = vld [vmem:[%s12634_s5 + $0x80] sm:$0xff]   ;;  %v653_v38 = vld [vmem:[%s9399_s18 + $0xc8] sm:$0xff]  ;;  %7135 = vmatpush3.bf16.msra.mxu0 %v8781_v31 }
  0x40   : > { %v676_v1 = vmul.f32 %v9433_v43, %v638_v44  ;;  %v677_v2 = vmul.f32 %v9433_v43, %v639_v45  ;;  %v678_v3 = vmul.f32 %v9433_v43, %v640_v46  ;;  %v679_v4 = vmul.f32 %v9433_v43, %v641_v51  ;;  %v8782_v46 = vld [vmem:[%s12634_s5 + $0x78] sm:$0xff]   ;;  %7487 = vmatprep.subr.bf16.mxu1 %v8783_v37 }
  0x41   : > { %v706_v9 = vadd.f32 %v9456_v58, %v668_v48  ;;  %v707_v10 = vadd.f32 %v9456_v58, %v669_v49  ;;  %v704_v11 = vadd.f32 %v9456_v58, %v666_v50  ;;  %v705_v12 = vadd.f32 %v9456_v58, %v667_v52  ;;  %7488 = vmatpush3.bf16.msra.mxu1 %v8783_v37  ;;  %v654_v37 = vld [vmem:[%s9399_s18 + $0xd0] sm:$0xff] }
  0x42   : > { %v708_v15 = vadd.f32 %v9456_v58, %v670_v53  ;;  %v709_v16 = vadd.f32 %v9456_v58, %v671_v54  ;;  %v710_v17 = vadd.f32 %v9456_v58, %v672_v55  ;;  %v711_v18 = vadd.f32 %v9456_v58, %v673_v59  ;;  %v8784_v55 = vld [vmem:[%s12634_s5 + $0x38] sm:$0xff]   ;;  %7136 = vmatprep.subr.bf16.mxu0 %v8782_v46 }
  0x43   : > { %795 = vst.msk [vmem:[#allocation2 + $0x31] sm:$0xff] %vm736_vm0, %v706_v9  ;;  %796 = vst.msk [vmem:[#allocation2 + $0x39] sm:$0xff] %vm736_vm0, %v707_v10  ;;  %v712_v20 = vadd.f32 %v9456_v58, %v674_v60  ;;  %v713_v21 = vadd.f32 %v9456_v58, %v675_v61  ;;  %v714_v22 = vadd.f32 %v9456_v58, %v676_v1  ;;  %7489 = vmatprep.subr.bf16.mxu1 %v8785_v56 }
  0x44   : > { %793 = vst.msk [vmem:[#allocation2 + $0x19] sm:$0xff] %vm736_vm0, %v704_v11  ;;  %794 = vst.msk [vmem:[#allocation2 + $0x21] sm:$0xff] %vm736_vm0, %v705_v12  ;;  %v715_v23 = vadd.f32 %v9456_v58, %v677_v2  ;;  %v716_v27 = vadd.f32 %v9456_v58, %v678_v3  ;;  %v717_v28 = vadd.f32 %v9456_v58, %v679_v4  ;;  %7137 = vmatpush3.bf16.msra.mxu0 %v8784_v55 }
  0x45   : > { %797 = vst.msk [vmem:[#allocation2 + $0x49] sm:$0xff] %vm736_vm0, %v708_v15  ;;  %798 = vst.msk [vmem:[#allocation2 + $0x51] sm:$0xff] %vm736_vm0, %v709_v16  ;;  %v680_v29 = vmul.f32 %v9433_v43, %v642_v62  ;;  %v681_v30 = vmul.f32 %v9433_v43, %v643_v63  ;;  %v682_v33 = vmul.f32 %v9433_v43, %v644_v5  ;;  %7490 = vmatpush3.bf16.msra.mxu1 %v8785_v56 }
  0x46   : > { %799 = vst.msk [vmem:[#allocation2 + $0x61] sm:$0xff] %vm736_vm0, %v710_v17  ;;  %800 = vst.msk [vmem:[#allocation2 + $0x69] sm:$0xff] %vm736_vm0, %v711_v18  ;;  %v683_v34 = vmul.f32 %v9433_v43, %v645_v6  ;;  %v684_v35 = vmul.f32 %v9433_v43, %v646_v7  ;;  %v685_v36 = vmul.f32 %v9433_v43, %v647_v8 }
  0x47   : > { %801 = vst.msk [vmem:[#allocation2 + $0x79] sm:$0xff] %vm736_vm0, %v712_v20  ;;  %802 = vst.msk [vmem:[#allocation2 + $0x81] sm:$0xff] %vm736_vm0, %v713_v21  ;;  %v718_v39 = vadd.f32 %v9456_v58, %v680_v29  ;;  %v719_v42 = vadd.f32 %v9456_v58, %v681_v30  ;;  %v686_v44 = vmul.f32 %v9433_v43, %v648_v13 }
  0x48   : > { %803 = vst.msk [vmem:[#allocation2 + $0x91] sm:$0xff] %vm736_vm0, %v714_v22  ;;  %804 = vst.msk [vmem:[#allocation2 + $0x99] sm:$0xff] %vm736_vm0, %v715_v23  ;;  %v687_v45 = vmul.f32 %v9433_v43, %v649_v14  ;;  %v720_v47 = vadd.f32 %v9456_v58, %v682_v33  ;;  %v721_v48 = vadd.f32 %v9456_v58, %v683_v34 }
  0x49   : > { %805 = vst.msk [vmem:[#allocation2 + $0xa9] sm:$0xff] %vm736_vm0, %v716_v27  ;;  %806 = vst.msk [vmem:[#allocation2 + $0xb1] sm:$0xff] %vm736_vm0, %v717_v28  ;;  %v722_v49 = vadd.f32 %v9456_v58, %v684_v35  ;;  %v723_v50 = vadd.f32 %v9456_v58, %v685_v36  ;;  %v724_v51 = vadd.f32 %v9456_v58, %v686_v44 }
  0x4a   : > { %807 = vst.msk [vmem:[#allocation2 + $0xc1] sm:$0xff] %vm736_vm0, %v718_v39  ;;  %808 = vst.msk [vmem:[#allocation2 + $0xc9] sm:$0xff] %vm736_vm0, %v719_v42  ;;  %v725_v52 = vadd.f32 %v9456_v58, %v687_v45  ;;  %v688_v53 = vmul.f32 %v9433_v43, %v650_v25  ;;  %v689_v54 = vmul.f32 %v9433_v43, %v651_v26  ;;  %v1018_v60 = vld [vmem:[#allocation2 + $0x30] sm:$0xff]  ;;  %v1019_v61 = vld [vmem:[#allocation2 + $0x38] sm:$0xff] }
  0x4b   : > { %809 = vst.msk [vmem:[#allocation2 + $0xd9] sm:$0xff] %vm736_vm0, %v720_v47  ;;  %810 = vst.msk [vmem:[#allocation2 + $0xe1] sm:$0xff] %vm736_vm0, %v721_v48  ;;  %v690_v57 = vmul.f32 %v9433_v43, %v652_v32  ;;  %v691_v59 = vmul.f32 %v9433_v43, %v653_v38  ;;  %v985_v62 = vld [vmem:[#allocation2 + $0x1a] sm:$0xff]  ;;  %v7823_v2 = vpack.i.bf16 %v1019_v61, %v1018_v60  ;;  %v986_v3 = vld [vmem:[#allocation2 + $0x22] sm:$0xff] }
  0x4c   : > { %811 = vst.msk [vmem:[#allocation2 + $0xf1] sm:$0xff] %vm736_vm0, %v722_v49  ;;  %812 = vst.msk [vmem:[#allocation2 + $0xf9] sm:$0xff] %vm736_vm0, %v723_v50  ;;  %v726_v63 = vadd.f32 %v9456_v58, %v688_v53  ;;  %v727_v1 = vadd.f32 %v9456_v58, %v689_v54  ;;  %v9556_v4 = vld [vmem:[#allocation2 + $0x31] sm:$0xff]  ;;  %v9558_v5 = vld [vmem:[#allocation2 + $0x39] sm:$0xff]  ;;  %v7818_v8 = vpack.i.bf16 %v986_v3, %v985_v62 }
  0x4d   : > { %813 = vst.msk [vmem:[#allocation2 + $0x109] sm:$0xff] %vm736_vm0, %v724_v51  ;;  %814 = vst.msk [vmem:[#allocation2 + $0x111] sm:$0xff] %vm736_vm0, %v725_v52  ;;  %v728_v6 = vadd.f32 %v9456_v58, %v690_v57  ;;  %v729_v7 = vadd.f32 %v9456_v58, %v691_v59  ;;  %v9562_v9 = vld [vmem:[#allocation2 + $0x18] sm:$0xff]  ;;  %v9564_v10 = vld [vmem:[#allocation2 + $0x20] sm:$0xff]  ;;  %7824 = vrot.lane.b32.xlu1 %v7823_v2, %s12694_s2  ;;  %v7828_v16 = vpack.i.bf16 %v9558_v5, %v9556_v4 }
  0x4e   : > { %v987_v11 = vld [vmem:[#allocation2 + $0x32] sm:$0xff]  ;;  %815 = vst.msk [vmem:[#allocation2 + $0x121] sm:$0xff] %vm736_vm0, %v726_v63  ;;  %816 = vst.msk [vmem:[#allocation2 + $0x129] sm:$0xff] %vm736_vm0, %v727_v1  ;;  %v7833_v12 = vpack.i.bf16 %v9564_v10, %v9562_v9  ;;  %v988_v13 = vld [vmem:[#allocation2 + $0x3a] sm:$0xff]  ;;  %7819 = vrot.lane.b32.xlu0 %v7818_v8, %s12695_s22  ;;  %v692_v44 = vmul.f32 %v9433_v43, %v654_v37 }
  0x4f   : > { %v9571_v14 = vld [vmem:[#allocation2 + $0x19] sm:$0xff]  ;;  %v9573_v15 = vld [vmem:[#allocation2 + $0x21] sm:$0xff]  ;;  %817 = vst.msk [vmem:[#allocation2 + $0x139] sm:$0xff] %vm736_vm0, %v728_v6  ;;  %818 = vst.msk [vmem:[#allocation2 + $0x141] sm:$0xff] %vm736_vm0, %v729_v7  ;;  %v2078_v17 = vpack.c.bf16 %v988_v13, %v987_v11  ;;  %v7838_v23 = vpack.i.bf16 %v988_v13, %v987_v11 }
  0x50   : > { %4860 = vst.msk [vmem:[#allocation2 + $0x18] sm:$0xff] %vm736_vm0, %v12661_v0  ;;  %4861 = vst.msk [vmem:[#allocation2 + $0x20] sm:$0xff] %vm736_vm0, %v12661_v0  ;;  %v9588_v18 = vld [vmem:[#allocation2 + $0x51] sm:$0xff]  ;;  %v7843_v22 = vpack.i.bf16 %v9573_v15, %v9571_v14  ;;  %v1020_v24 = vld [vmem:[#allocation2 + $0x48] sm:$0xff]  ;;  %v730_v51 = vadd.f32 %v9456_v58, %v692_v44 }
  0x51   : > { %4862 = vst.msk [vmem:[#allocation2 + $0x28] sm:$0x3] %vm739_vm1, %v12661_v0  ;;  %4865 = vst.msk [vmem:[#allocation2 + $0x40] sm:$0x3] %vm739_vm1, %v12661_v0  ;;  %v989_v19 = vld [vmem:[#allocation2 + $0x4a] sm:$0xff]  ;;  %v990_v20 = vld [vmem:[#allocation2 + $0x52] sm:$0xff]  ;;  %7491 = vmatprep.mubr.msk.bf16.mxu1 %vm736_vm0, %v2078_v17  ;;  %7834 = vrot.lane.b32.xlu1 %v7833_v12, %s9110_s1 }
  0x52   : > { %v2081_v21 = vpack.c.bf16 %v990_v20, %v989_v19  ;;  %4868 = vst.msk [vmem:[#allocation2 + $0x58] sm:$0x3] %vm739_vm1, %v12661_v0  ;;  %7829 = vrot.lane.b32.xlu0 %v7828_v16, %s9110_s1  ;;  %v1021_v25 = vld [vmem:[#allocation2 + $0x50] sm:$0xff]  ;;  %v9611_v29 = vpack.i.bf16 %v990_v20, %v989_v19  ;;  %v1022_v30 = vld [vmem:[#allocation2 + $0x60] sm:$0xff]  ;;  %v1023_v31 = vld [vmem:[#allocation2 + $0x68] sm:$0xff] }
  0x53   : > { %v7848_v26 = vpack.i.bf16 %v1021_v25, %v1020_v24  ;;  %v9600_v27 = vld [vmem:[#allocation2 + $0x49] sm:$0xff]  ;;  %v9616_v32 = vpack.i.bf16 %v1023_v31, %v1022_v30  ;;  %v1054_v34 = vld [vmem:[#allocation2 + $0x61] sm:$0xff]  ;;  %v9620_v36 = vld [vmem:[#allocation2 + $0x38] sm:$0xff]  ;;  %819 = vst.msk [vmem:[#allocation2 + $0x151] sm:$0xff] %vm736_vm0, %v730_v51 }
  0x54   : > { %7492 = vmatmul.mubr.msk.bf16.vlgmr.msra.gmra.mrb[0].mxu1 %vm736_vm0, %v2081_v21  ;;  %v9606_v28 = vpack.i.bf16 %v9588_v18, %v9600_v27  ;;  %v9618_v33 = vld [vmem:[#allocation2 + $0x30] sm:$0xff]  ;;  %4864 = vst.msk [vmem:[#allocation2 + $0x38] sm:$0xff] %vm736_vm0, %v12661_v0  ;;  %v991_v38 = vld [vmem:[#allocation2 + $0x62] sm:$0xff]  ;;  %v655_v42 = vld [vmem:[%s9399_s18 + $0xd8] sm:$0xff] }
  0x55   : > { %7844 = vrot.lane.b32.xlu1 %v7843_v22, %s12695_s22  ;;  %v1055_v35 = vld [vmem:[#allocation2 + $0x69] sm:$0xff]  ;;  %4863 = vst.msk [vmem:[#allocation2 + $0x30] sm:$0xff] %vm736_vm0, %v12661_v0  ;;  %v693_v47 = vmul.f32 %v9433_v43, %v655_v42  ;;  %v1088_v53 = vld [vmem:[#allocation2 + $0x7a] sm:$0xff] }
  0x56   : > { %7839 = vrot.lane.b32.xlu0 %v7838_v23, %s12695_s22  ;;  %v992_v39 = vld [vmem:[#allocation2 + $0x6a] sm:$0xff]  ;;  %v9634_v46 = vpack.i.bf16 %v1055_v35, %v1054_v34  ;;  %v1086_v50 = vld [vmem:[#allocation2 + $0x62] sm:$0xff]  ;;  %v1024_v63 = vld [vmem:[#allocation2 + $0x78] sm:$0xff] }
  0x57   : > { %v9630_v45 = vld [vmem:[#allocation2 + $0x69] sm:$0xff]  ;;  %v1057_v55 = vld [vmem:[#allocation2 + $0x81] sm:$0xff]  ;;  %v731_v56 = vadd.f32 %v9456_v58, %v693_v47  ;;  %v659_v6 = vld [vmem:[%s9399_s18 + $0xf8] sm:$0xff] }
  0x58   : > { %v9637_v48 = vld [vmem:[#allocation2 + $0x48] sm:$0xff]  ;;  %v9639_v49 = vld [vmem:[#allocation2 + $0x50] sm:$0xff]  ;;  %v656_v60 = vld [vmem:[%s9399_s18 + $0xe0] sm:$0xff]  ;;  %v697_v13 = vmul.f32 %v9433_v43, %v659_v6 }
  0x59   : > { %7854 = vrot.lane.b32.xlu1 %v7818_v8, %s12694_s2  ;;  %4866 = vst.msk [vmem:[#allocation2 + $0x48] sm:$0xff] %vm736_vm0, %v12661_v0  ;;  %4867 = vst.msk [vmem:[#allocation2 + $0x50] sm:$0xff] %vm736_vm0, %v12661_v0  ;;  %v1087_v52 = vld [vmem:[#allocation2 + $0x6a] sm:$0xff]  ;;  %v1089_v54 = vld [vmem:[#allocation2 + $0x82] sm:$0xff]  ;;  %v7898_v8 = vpack.i.bf16 %v992_v39, %v991_v38 }
  0x5a   : > { %7849 = vrot.lane.b32.xlu0 %v7848_v26, %s12694_s2  ;;  %v2084_v57 = vpack.c.bf16 %v1087_v52, %v1086_v50  ;;  %4871 = vst.msk [vmem:[#allocation2 + $0x70] sm:$0x3] %vm739_vm1, %v12661_v0  ;;  %v2087_v59 = vpack.c.bf16 %v1089_v54, %v1088_v53  ;;  %v657_v61 = vld [vmem:[%s9399_s18 + $0xe8] sm:$0xff]  ;;  %v658_v62 = vld [vmem:[%s9399_s18 + $0xf0] sm:$0xff]  ;;  %v1025_v1 = vld [vmem:[#allocation2 + $0x80] sm:$0xff]  ;;  %v735_v20 = vadd.f32 %v9456_v58, %v697_v13 }
  0x5b   : > { %v695_v3 = vmul.f32 %v9433_v43, %v657_v61  ;;  %v696_v7 = vmul.f32 %v9433_v43, %v658_v62  ;;  %v994_v11 = vld [vmem:[#allocation2 + $0x82] sm:$0xff]  ;;  %820 = vst.msk [vmem:[#allocation2 + $0x159] sm:$0xff] %vm736_vm0, %v731_v56  ;;  %v1056_v21 = vld [vmem:[#allocation2 + $0x79] sm:$0xff]  ;;  %v9740_v6 = vld [vmem:[#allocation2 + $0xb1] sm:$0xff] }
  0x5c   : > { %7495 = vmatprep.mubr.msk.bf16.mxu1 %vm736_vm0, %v2084_v57  ;;  %v9662_v12 = vld [vmem:[#allocation2 + $0x81] sm:$0xff]  ;;  %824 = vst.msk [vmem:[#allocation2 + $0x189] sm:$0xff] %vm736_vm0, %v735_v20  ;;  %v7918_v24 = vpack.i.bf16 %v1057_v55, %v1056_v21  ;;  %v1027_v35 = vld [vmem:[#allocation2 + $0x98] sm:$0xff]  ;;  %v1060_v13 = vld [vmem:[#allocation2 + $0xa9] sm:$0xff] }
  0x5d   : > { %7864 = vrot.lane.b32.xlu1 %v7823_v2, %s9110_s1  ;;  %v694_v2 = vmul.f32 %v9433_v43, %v656_v60  ;;  %7496 = vmatmul.mubr.msk.bf16.gmra.mrb[4].mxu1 %vm736_vm0, %v2087_v59  ;;  %v733_v17 = vadd.f32 %v9456_v58, %v695_v3  ;;  %4874 = vst.msk [vmem:[#allocation2 + $0x88] sm:$0x3] %vm739_vm1, %v12661_v0  ;;  %v9674_v22 = vld [vmem:[#allocation2 + $0x61] sm:$0xff]  ;;  %v1059_v38 = vld [vmem:[#allocation2 + $0x99] sm:$0xff]  ;;  %v1092_v59 = vld [vmem:[#allocation2 + $0xaa] sm:$0xff] }
  0x5e   : > { %7859 = vrot.lane.b32.xlu0 %v9606_v28, %s9110_s1  ;;  %v734_v19 = vadd.f32 %v9456_v58, %v696_v7  ;;  %v7908_v43 = vpack.i.bf16 %v1025_v1, %v1024_v63  ;;  %v993_v25 = vld [vmem:[#allocation2 + $0x7a] sm:$0xff]  ;;  %v1090_v54 = vld [vmem:[#allocation2 + $0x92] sm:$0xff]  ;;  %v1028_v7 = vld [vmem:[#allocation2 + $0xa8] sm:$0xff] }
  0x5f   : > { %822 = vst.msk [vmem:[#allocation2 + $0x171] sm:$0xff] %vm736_vm0, %v733_v17  ;;  %v7928_v30 = vpack.i.bf16 %v994_v11, %v993_v25  ;;  %v9705_v39 = vld [vmem:[#allocation2 + $0x79] sm:$0xff]  ;;  %v9748_v17 = vld [vmem:[#allocation2 + $0x90] sm:$0xff]  ;;  %v1031_v25 = vld [vmem:[#allocation2 + $0xc8] sm:$0xff] }
  0x60   : > { %823 = vst.msk [vmem:[#allocation2 + $0x181] sm:$0xff] %vm736_vm0, %v734_v19  ;;  %v996_v44 = vld [vmem:[#allocation2 + $0x9a] sm:$0xff]  ;;  %v1093_v60 = vld [vmem:[#allocation2 + $0xb2] sm:$0xff]  ;;  %v997_v21 = vld [vmem:[#allocation2 + $0xaa] sm:$0xff] }
  0x61   : > { %7874 = vrot.lane.b32.xlu1 %v7828_v16, %s12695_s22  ;;  %v732_v16 = vadd.f32 %v9456_v58, %v694_v2  ;;  %v9683_v58 = vld [vmem:[#allocation2 + $0x68] sm:$0xff]  ;;  %v9708_v47 = vld [vmem:[#allocation2 + $0x99] sm:$0xff]  ;;  %v2093_v62 = vpack.c.bf16 %v1093_v60, %v1092_v59  ;;  %v1061_v2 = vld [vmem:[#allocation2 + $0xb1] sm:$0xff] }
  0x62   : > { %7869 = vrot.lane.b32.xlu0 %v9611_v29, %s12695_s22  ;;  %4870 = vst.msk [vmem:[#allocation2 + $0x68] sm:$0xff] %vm736_vm0, %v12661_v0  ;;  %v9714_v52 = vld [vmem:[#allocation2 + $0x78] sm:$0xff]  ;;  %v9716_v53 = vld [vmem:[#allocation2 + $0x80] sm:$0xff]  ;;  %v7978_v20 = vpack.i.bf16 %v1061_v2, %v1060_v13 }
  0x63   : > { %821 = vst.msk [vmem:[#allocation2 + $0x169] sm:$0xff] %vm736_vm0, %v732_v16  ;;  %v9712_v51 = vld [vmem:[#allocation2 + $0x189] sm:$0xff]  ;;  %4872 = vst.msk [vmem:[#allocation2 + $0x78] sm:$0xff] %vm736_vm0, %v12661_v0  ;;  %v995_v63 = vld [vmem:[#allocation2 + $0x92] sm:$0xff] }
  0x64   : > { %4873 = vst.msk [vmem:[#allocation2 + $0x80] sm:$0xff] %vm736_vm0, %v12661_v0  ;;  %v9724_v56 = vld [vmem:[#allocation2 + $0x18a] sm:$0xff]  ;;  %v7958_v1 = vpack.i.bf16 %v996_v44, %v995_v63  ;;  %v998_v3 = vld [vmem:[#allocation2 + $0xb2] sm:$0xff]  ;;  %v1094_v44 = vld [vmem:[#allocation2 + $0xc2] sm:$0xff] }
  0x65   : > { %7884 = vrot.lane.b32.xlu1 %v7838_v23, %s12694_s2  ;;  %v9681_v23 = vld [vmem:[#allocation2 + $0x60] sm:$0xff]  ;;  %4907 = vst.msk [vmem:[#allocation2 + $0x190] sm:$0x3] %vm739_vm1, %v12661_v0  ;;  %4880 = vst.msk [vmem:[#allocation2 + $0xb8] sm:$0x3] %vm739_vm1, %v12661_v0  ;;  %v9746_v16 = vld [vmem:[#allocation2 + $0x91] sm:$0xff] }
  0x66   : > { %7879 = vrot.lane.b32.xlu0 %v9616_v32, %s12694_s2  ;;  %4869 = vst.msk [vmem:[#allocation2 + $0x60] sm:$0xff] %vm736_vm0, %v12661_v0  ;;  %v9750_v19 = vld [vmem:[#allocation2 + $0x98] sm:$0xff]  ;;  %v1065_v63 = vld [vmem:[#allocation2 + $0xe1] sm:$0xff] }
  0x67   : > { %v1046_v31 = vld [vmem:[#allocation2 + $0x180] sm:$0xff]  ;;  %v1047_v34 = vld [vmem:[#allocation2 + $0x188] sm:$0xff] }
  0x68   : > { %v9701_v37 = vpack.i.bf16 %v1047_v34, %v1046_v31  ;;  %v9710_v50 = vld [vmem:[#allocation2 + $0x181] sm:$0xff]  ;;  %v1063_v34 = vld [vmem:[#allocation2 + $0xc9] sm:$0xff] }
  0x69   : > { %7894 = vrot.lane.b32.xlu1 %v7848_v26, %s9110_s1  ;;  %v9694_v26 = vld [vmem:[#allocation2 + $0x171] sm:$0xff]  ;;  %v9722_v55 = vld [vmem:[#allocation2 + $0x182] sm:$0xff] }
  0x6a   : > { %7889 = vrot.lane.b32.xlu0 %v9634_v46, %s9110_s1  ;;  %4905 = vst.msk [vmem:[#allocation2 + $0x180] sm:$0xff] %vm736_vm0, %v12661_v0  ;;  %4906 = vst.msk [vmem:[#allocation2 + $0x188] sm:$0xff] %vm736_vm0, %v12661_v0  ;;  %v1062_v31 = vld [vmem:[#allocation2 + $0xc1] sm:$0xff] }
  0x6b   : > { %v1002_v2 = vld [vmem:[#allocation2 + $0xe2] sm:$0xff] }
  0x6d   : > { %7904 = vrot.lane.b32.xlu1 %v9606_v28, %s12695_s22  ;;  %v9696_v28 = vld [vmem:[#allocation2 + $0x172] sm:$0xff] }
  0x6e   : > { %7899 = vrot.lane.b32.xlu0 %v7898_v8, %s12695_s22  ;;  %4904 = vst.msk [vmem:[#allocation2 + $0x178] sm:$0x3] %vm739_vm1, %v12661_v0 }
  0x71   : > { %7914 = vrot.lane.b32.xlu1 %v9611_v29, %s12694_s2  ;;  %v1026_v29 = vld [vmem:[#allocation2 + $0x90] sm:$0xff] }
  0x72   : > { %7909 = vrot.lane.b32.xlu0 %v7908_v43, %s12694_s2  ;;  %v7938_v42 = vpack.i.bf16 %v1027_v35, %v1026_v29  ;;  %v1000_v35 = vld [vmem:[#allocation2 + $0xca] sm:$0xff] }
  0x75   : > { %7924 = vrot.lane.b32.xlu1 %v9616_v32, %s9110_s1  ;;  %v1058_v32 = vld [vmem:[#allocation2 + $0x91] sm:$0xff] }
  0x76   : > { %7919 = vrot.lane.b32.xlu0 %v7918_v24, %s9110_s1  ;;  %v7948_v61 = vpack.i.bf16 %v1059_v38, %v1058_v32  ;;  %4875 = vst.msk [vmem:[#allocation2 + $0x90] sm:$0xff] %vm736_vm0, %v12661_v0  ;;  %v9764_v32 = vld [vmem:[#allocation2 + $0xc9] sm:$0xff] }
  0x77   : > { %v9766_v38 = vld [vmem:[#allocation2 + $0xa8] sm:$0xff] }
  0x79   : > { %7934 = vrot.lane.b32.xlu1 %v9634_v46, %s12695_s22  ;;  %v1091_v46 = vld [vmem:[#allocation2 + $0x9a] sm:$0xff] }
  0x7a   : > { %7929 = vrot.lane.b32.xlu0 %v7928_v30, %s12695_s22  ;;  %v2090_v57 = vpack.c.bf16 %v1091_v46, %v1090_v54  ;;  %4877 = vst.msk [vmem:[#allocation2 + $0xa0] sm:$0x3] %vm739_vm1, %v12661_v0  ;;  %v1095_v54 = vld [vmem:[#allocation2 + $0xca] sm:$0xff]  ;;  %v1096_v46 = vld [vmem:[#allocation2 + $0xda] sm:$0xff] }
  0x7b   : > { %4876 = vst.msk [vmem:[#allocation2 + $0x98] sm:$0xff] %vm736_vm0, %v12661_v0  ;;  %v2096_v59 = vpack.c.bf16 %v1095_v54, %v1094_v44  ;;  %v1035_v44 = vld [vmem:[#allocation2 + $0xf8] sm:$0xff] }
  0x7c   : > { %7499 = vmatprep.mubr.msk.bf16.mxu1 %vm736_vm0, %v2090_v57  ;;  %v1097_v57 = vld [vmem:[#allocation2 + $0xe2] sm:$0xff]  ;;  %4883 = vst.msk [vmem:[#allocation2 + $0xd0] sm:$0x3] %vm739_vm1, %v12661_v0  ;;  %v1066_v54 = vld [vmem:[#allocation2 + $0xf1] sm:$0xff] }
  0x7d   : > { %7944 = vrot.lane.b32.xlu1 %v7898_v8, %s12694_s2  ;;  %7500 = vmatmul.mubr.msk.bf16.gmra.mrb[8].mxu1 %vm736_vm0, %v2093_v62  ;;  %v1029_v8 = vld [vmem:[#allocation2 + $0xb0] sm:$0xff]  ;;  %v2099_v60 = vpack.c.bf16 %v1097_v57, %v1096_v46  ;;  %v999_v62 = vld [vmem:[#allocation2 + $0xc2] sm:$0xff]  ;;  %v1067_v46 = vld [vmem:[#allocation2 + $0xf9] sm:$0xff] }
  0x7e   : > { %7939 = vrot.lane.b32.xlu0 %v7938_v42, %s12694_s2  ;;  %v7968_v11 = vpack.i.bf16 %v1029_v8, %v1028_v7  ;;  %7503 = vmatprep.mubr.msk.bf16.mxu1 %vm736_vm0, %v2096_v59  ;;  %v1032_v7 = vld [vmem:[#allocation2 + $0xd8] sm:$0xff]  ;;  %v1033_v8 = vld [vmem:[#allocation2 + $0xe0] sm:$0xff] }
  0x7f   : > { %v8028_v13 = vpack.i.bf16 %v1033_v8, %v1032_v7  ;;  %v1004_v59 = vld [vmem:[#allocation2 + $0xfa] sm:$0xff]  ;;  %v1101_v7 = vld [vmem:[#allocation2 + $0x112] sm:$0xff] }
  0x81   : > { %7954 = vrot.lane.b32.xlu1 %v7908_v43, %s9110_s1  ;;  %v7988_v43 = vpack.i.bf16 %v998_v3, %v997_v21  ;;  %v9781_v3 = vld [vmem:[#allocation2 + $0xe1] sm:$0xff]  ;;  %v1064_v21 = vld [vmem:[#allocation2 + $0xd9] sm:$0xff] }
  0x82   : > { %7949 = vrot.lane.b32.xlu0 %v7948_v61, %s9110_s1  ;;  %12696 = vst [vmem:[#allocation13_spill] sm:$0xff] %v9781_v3  ;;  %4886 = vst.msk [vmem:[#allocation2 + $0xe8] sm:$0x3] %vm739_vm1, %v12661_v0  ;;  %v1008_v3 = vld [vmem:[#allocation2 + $0x12a] sm:$0xff] }
  0x85   : > { %7964 = vrot.lane.b32.xlu1 %v7918_v24, %s12695_s22  ;;  %v1030_v24 = vld [vmem:[#allocation2 + $0xc0] sm:$0xff]  ;;  %7504 = vmatmul.mubr.msk.bf16.gmra.mrb[12].mxu1 %vm736_vm0, %v2099_v60 }
  0x86   : > { %7959 = vrot.lane.b32.xlu0 %v7958_v1, %s12695_s22  ;;  %v7998_v29 = vpack.i.bf16 %v1031_v25, %v1030_v24  ;;  %v9788_v24 = vld [vmem:[#allocation2 + $0xc1] sm:$0xff]  ;;  %v9806_v60 = vld [vmem:[#allocation2 + $0xf9] sm:$0xff] }
  0x87   : > { %12697 = vst [vmem:[#allocation14_spill] sm:$0xff] %v9788_v24  ;;  %v9792_v25 = vld [vmem:[#allocation2 + $0xc8] sm:$0xff]  ;;  %12701 = vst [vmem:[#allocation18_spill] sm:$0xff] %v9806_v60  ;;  %v1006_v60 = vld [vmem:[#allocation2 + $0x112] sm:$0xff] }
  0x88   : > { %12699 = vst [vmem:[#allocation16_spill] sm:$0xff] %v9792_v25  ;;  %4882 = vst.msk [vmem:[#allocation2 + $0xc8] sm:$0xff] %vm736_vm0, %v12661_v0  ;;  %v9866_v25 = vld [vmem:[#allocation2 + $0x129] sm:$0xff] }
  0x89   : > { %7974 = vrot.lane.b32.xlu1 %v7928_v30, %s12694_s2  ;;  %v9762_v30 = vld [vmem:[#allocation2 + $0xa9] sm:$0xff]  ;;  %12709 = vst [vmem:[#allocation26_spill] sm:$0xff] %v9866_v25 }
  0x8a   : > { %7969 = vrot.lane.b32.xlu0 %v7968_v11, %s12694_s2  ;;  %4878 = vst.msk [vmem:[#allocation2 + $0xa8] sm:$0xff] %vm736_vm0, %v12661_v0 }
  0x8d   : > { %7984 = vrot.lane.b32.xlu1 %v7938_v42, %s9110_s1  ;;  %v9768_v42 = vld [vmem:[#allocation2 + $0xb0] sm:$0xff] }
  0x8e   : > { %7979 = vrot.lane.b32.xlu0 %v7978_v20, %s9110_s1  ;;  %4879 = vst.msk [vmem:[#allocation2 + $0xb0] sm:$0xff] %vm736_vm0, %v12661_v0 }
  0x91   : > { %7994 = vrot.lane.b32.xlu1 %v7948_v61, %s12695_s22  ;;  %v8008_v61 = vpack.i.bf16 %v1063_v34, %v1062_v31  ;;  %v1001_v31 = vld [vmem:[#allocation2 + $0xda] sm:$0xff] }
  0x92   : > { %7989 = vrot.lane.b32.xlu0 %v7988_v43, %s12695_s22  ;;  %v8048_v34 = vpack.i.bf16 %v1002_v2, %v1001_v31  ;;  %v1100_v2 = vld [vmem:[#allocation2 + $0x10a] sm:$0xff]  ;;  %v8068_v31 = vpack.i.bf16 %v1067_v46, %v1066_v54 }
  0x93   : > { %v1037_v54 = vld [vmem:[#allocation2 + $0x110] sm:$0xff] }
  0x95   : > { %8004 = vrot.lane.b32.xlu1 %v7958_v1, %s12694_s2  ;;  %v8018_v1 = vpack.i.bf16 %v1000_v35, %v999_v62  ;;  %v1034_v35 = vld [vmem:[#allocation2 + $0xf0] sm:$0xff]  ;;  %v9808_v62 = vld [vmem:[#allocation2 + $0xd8] sm:$0xff] }
  0x96   : > { %7999 = vrot.lane.b32.xlu0 %v7998_v29, %s12694_s2  ;;  %v8058_v57 = vpack.i.bf16 %v1035_v44, %v1034_v35  ;;  %12702 = vst [vmem:[#allocation19_spill] sm:$0xff] %v9808_v62  ;;  %v1003_v35 = vld [vmem:[#allocation2 + $0xf2] sm:$0xff] }
  0x97   : > { %v1069_v44 = vld [vmem:[#allocation2 + $0x111] sm:$0xff] }
  0x98   : > { %v9823_v62 = vld [vmem:[#allocation2 + $0x111] sm:$0xff] }
  0x99   : > { %8014 = vrot.lane.b32.xlu1 %v7968_v11, %s9110_s1  ;;  %v9790_v11 = vld [vmem:[#allocation2 + $0xc0] sm:$0xff]  ;;  %12704 = vst [vmem:[#allocation21_spill] sm:$0xff] %v9823_v62  ;;  %4892 = vst.msk [vmem:[#allocation2 + $0x118] sm:$0x3] %vm739_vm1, %v12661_v0 }
  0x9a   : > { %8009 = vrot.lane.b32.xlu0 %v8008_v61, %s9110_s1  ;;  %12698 = vst [vmem:[#allocation15_spill] sm:$0xff] %v9790_v11  ;;  %4881 = vst.msk [vmem:[#allocation2 + $0xc0] sm:$0xff] %vm736_vm0, %v12661_v0  ;;  %v1038_v62 = vld [vmem:[#allocation2 + $0x120] sm:$0xff]  ;;  %v9864_v11 = vld [vmem:[#allocation2 + $0x109] sm:$0xff] }
  0x9b   : > { %12708 = vst [vmem:[#allocation25_spill] sm:$0xff] %v9864_v11 }
  0x9d   : > { %8024 = vrot.lane.b32.xlu1 %v7978_v20, %s12695_s22  ;;  %v8038_v20 = vpack.i.bf16 %v1065_v63, %v1064_v21  ;;  %v1098_v63 = vld [vmem:[#allocation2 + $0xf2] sm:$0xff]  ;;  %v2105_v21 = vpack.c.bf16 %v1101_v7, %v1100_v2 }
  0x9e   : > { %8019 = vrot.lane.b32.xlu0 %v8018_v1, %s12695_s22  ;;  %v9837_v2 = vld [vmem:[#allocation2 + $0xf0] sm:$0xff]  ;;  %v9839_v7 = vld [vmem:[#allocation2 + $0xf8] sm:$0xff] }
  0x9f   : > { %12706 = vst [vmem:[#allocation23_spill] sm:$0xff] %v9837_v2  ;;  %12707 = vst [vmem:[#allocation24_spill] sm:$0xff] %v9839_v7 }
  0xa1   : > { %8034 = vrot.lane.b32.xlu1 %v7988_v43, %s12694_s2  ;;  %v9804_v43 = vld [vmem:[#allocation2 + $0xd9] sm:$0xff] }
  0xa2   : > { %8029 = vrot.lane.b32.xlu0 %v8028_v13, %s12694_s2  ;;  %12700 = vst [vmem:[#allocation17_spill] sm:$0xff] %v9804_v43  ;;  %4884 = vst.msk [vmem:[#allocation2 + $0xd8] sm:$0xff] %vm736_vm0, %v12661_v0  ;;  %v1071_v43 = vld [vmem:[#allocation2 + $0x129] sm:$0xff] }
  0xa5   : > { %8044 = vrot.lane.b32.xlu1 %v7998_v29, %s9110_s1  ;;  %v9810_v29 = vld [vmem:[#allocation2 + $0xe0] sm:$0xff] }
  0xa6   : > { %8039 = vrot.lane.b32.xlu0 %v8038_v20, %s9110_s1  ;;  %12703 = vst [vmem:[#allocation20_spill] sm:$0xff] %v9810_v29  ;;  %4885 = vst.msk [vmem:[#allocation2 + $0xe0] sm:$0xff] %vm736_vm0, %v12661_v0  ;;  %v1070_v29 = vld [vmem:[#allocation2 + $0x121] sm:$0xff] }
  0xa9   : > { %8054 = vrot.lane.b32.xlu1 %v8008_v61, %s12695_s22  ;;  %v1099_v61 = vld [vmem:[#allocation2 + $0xfa] sm:$0xff] }
  0xaa   : > { %8049 = vrot.lane.b32.xlu0 %v8048_v34, %s12695_s22  ;;  %v2102_v8 = vpack.c.bf16 %v1099_v61, %v1098_v63  ;;  %4889 = vst.msk [vmem:[#allocation2 + $0x100] sm:$0x3] %vm739_vm1, %v12661_v0  ;;  %v1036_v63 = vld [vmem:[#allocation2 + $0x108] sm:$0xff]  ;;  %v9835_v61 = vld [vmem:[#allocation2 + $0xf1] sm:$0xff] }
  0xab   : > { %v9833_v46 = vpack.i.bf16 %v1037_v54, %v1036_v63  ;;  %12705 = vst [vmem:[#allocation22_spill] sm:$0xff] %v9835_v61  ;;  %4887 = vst.msk [vmem:[#allocation2 + $0xf0] sm:$0xff] %vm736_vm0, %v12661_v0 }
  0xac   : > { %7507 = vmatprep.mubr.msk.bf16.mxu1 %vm736_vm0, %v2102_v8  ;;  %4888 = vst.msk [vmem:[#allocation2 + $0xf8] sm:$0xff] %vm736_vm0, %v12661_v0 }
  0xad   : > { %8064 = vrot.lane.b32.xlu1 %v8018_v1, %s12694_s2  ;;  %7508 = vmatmul.mubr.msk.bf16.gmra.mrb[16].mxu1 %vm736_vm0, %v2105_v21  ;;  %v9826_v1 = vpack.i.bf16 %v1004_v59, %v1003_v35  ;;  %v7810_v59 = vpop.permute.xlu0 %7809  ;;  %v1005_v21 = vld [vmem:[#allocation2 + $0x10a] sm:$0xff] }
  0xae   : > { %8059 = vrot.lane.b32.xlu0 %v8058_v57, %s12694_s2  ;;  %v7812_v35 = vunpack.i.h.bf16 %v7810_v59  ;;  %v7811_v63 = vunpack.i.l.bf16 %v7810_v59  ;;  %v9853_v54 = vpack.i.bf16 %v1006_v60, %v1005_v21 }
  0xb1   : > { %8074 = vrot.lane.b32.xlu1 %v8028_v13, %s9110_s1  ;;  %v1068_v13 = vld [vmem:[#allocation2 + $0x109] sm:$0xff] }
  0xb2   : > { %8069 = vrot.lane.b32.xlu0 %v8068_v31, %s9110_s1  ;;  %v9848_v8 = vpack.i.bf16 %v1069_v44, %v1068_v13  ;;  %v1883_v44 = vsel %vm736_vm0, %v9429_v40, %v7812_v35  ;;  %v9868_v35 = vpack.i.bf16 %v1071_v43, %v1070_v29  ;;  %v12712_v29 = vmov 0.0  }
  0xb5   : > { %8084 = vrot.lane.b32.xlu1 %v8038_v20, %s12695_s22  ;;  %v7815_v20 = vpop.permute.xlu1 %7814 }
  0xb6   : > { %8079 = vrot.lane.b32.xlu0 %v9826_v1, %s12695_s22  ;;  %v7817_v2 = vunpack.i.h.bf16 %v7815_v20  ;;  %v7816_v7 = vunpack.i.l.bf16 %v7815_v20 }
  0xb8   : > { %v1916_v43 = vsel %vm1914_vm2, %v1883_v44, %v7817_v2 }
  0xb9   : > { %8094 = vrot.lane.b32.xlu1 %v8048_v34, %s12694_s2  ;;  %v1039_v34 = vld [vmem:[#allocation2 + $0x128] sm:$0xff] }
  0xba   : > { %8089 = vrot.lane.b32.xlu0 %v9833_v46, %s12694_s2  ;;  %v9862_v20 = vpack.i.bf16 %v1039_v34, %v1038_v62  ;;  %v1102_v62 = vld [vmem:[#allocation2 + $0x122] sm:$0xff] }
  0xbd   : > { %8104 = vrot.lane.b32.xlu1 %v8058_v57, %s9110_s1  ;;  %v1882_v57 = vsel %vm736_vm0, %v9431_v41, %v7811_v63 }
  0xbe   : > { %8099 = vrot.lane.b32.xlu0 %v9848_v8, %s9110_s1  ;;  %v1915_v25 = vsel %vm1914_vm2, %v1882_v57, %v7816_v7 }
  0xbf   : > { %v7825_v0 = vpop.permute.xlu1 %7824 }
  0xc0   : > { %v7820_v61 = vpop.permute.xlu0 %7819  ;;  %v7827_v60 = vunpack.i.h.bf16 %v7825_v0  ;;  %v7826_v21 = vunpack.i.l.bf16 %v7825_v0 }
  0xc1   : > { %v7822_v13 = vunpack.i.h.bf16 %v7820_v61  ;;  %v7821_v59 = vunpack.i.l.bf16 %v7820_v61  ;;  %8114 = vrot.lane.b32.xlu1 %v8068_v31, %s12695_s22  ;;  %v9874_v31 = vld [vmem:[#allocation2 + $0x108] sm:$0xff]  ;;  %v9876_v61 = vld [vmem:[#allocation2 + $0x110] sm:$0xff] }
  0xc2   : > { %8109 = vrot.lane.b32.xlu0 %v9853_v54, %s12695_s22  ;;  %12710 = vst [vmem:[#allocation27_spill] sm:$0xff] %v9874_v31  ;;  %12711 = vst [vmem:[#allocation28_spill] sm:$0xff] %v9876_v61 }
  0xc3   : > { %v7835_v40 = vpop.permute.xlu1 %7834  ;;  %v1980_v41 = vsel %vm736_vm0, %v9571_v14, %v7821_v59  ;;  %v1981_v0 = vsel %vm736_vm0, %v9573_v15, %v7822_v13  ;;  %4890 = vst.msk [vmem:[#allocation2 + $0x108] sm:$0xff] %vm736_vm0, %v12712_v29  ;;  %4891 = vst.msk [vmem:[#allocation2 + $0x110] sm:$0xff] %vm736_vm0, %v12712_v29  ;;  %v1103_v14 = vld [vmem:[#allocation2 + $0x12a] sm:$0xff]  ;;  %v1104_v15 = vld [vmem:[#allocation2 + $0x13a] sm:$0xff] }
  0xc4   : > { %v7830_v63 = vpop.permute.xlu0 %7829  ;;  %v7837_v34 = vunpack.i.h.bf16 %v7835_v40  ;;  %v7836_v11 = vunpack.i.l.bf16 %v7835_v40  ;;  %v1105_v13 = vld [vmem:[#allocation2 + $0x142] sm:$0xff]  ;;  %v2108_v61 = vpack.c.bf16 %v1103_v14, %v1102_v62  ;;  %4895 = vst.msk [vmem:[#allocation2 + $0x130] sm:$0x3] %vm739_vm1, %v12712_v29  ;;  %v2012_v2 = vsel %vm1914_vm2, %v1980_v41, %v7826_v21 }
  0xc5   : > { %v7832_v59 = vunpack.i.h.bf16 %v7830_v63  ;;  %v7831_v31 = vunpack.i.l.bf16 %v7830_v63  ;;  %8124 = vrot.lane.b32.xlu1 %v9826_v1, %s12694_s2  ;;  %v2111_v7 = vpack.c.bf16 %v1105_v13, %v1104_v15  ;;  %v2013_v44 = vsel %vm1914_vm2, %v1981_v0, %v7827_v60  ;;  %v1007_v14 = vld [vmem:[#allocation2 + $0x122] sm:$0xff] }
  0xc6   : > { %8119 = vrot.lane.b32.xlu0 %v9862_v20, %s12694_s2  ;;  %v1948_v57 = vsel %vm1947_vm3, %v1915_v25, %v7836_v11  ;;  %v1949_v40 = vsel %vm1947_vm3, %v1916_v43, %v7837_v34  ;;  %7511 = vmatprep.mubr.msk.bf16.mxu1 %vm736_vm0, %v2108_v61  ;;  %v1073_v60 = vld [vmem:[#allocation2 + $0x141] sm:$0xff]  ;;  %v9904_v21 = vpack.i.bf16 %v1008_v3, %v1007_v14 }
  0xc7   : > { %v7845_v63 = vpop.permute.xlu1 %7844  ;;  %v2044_v24 = vsel %vm1947_vm3, %v2012_v2, %v7831_v31  ;;  %v2045_v1 = vsel %vm1947_vm3, %v2013_v44, %v7832_v59  ;;  %v2076_v62 = vpack.c.bf16 %v1949_v40, %v1948_v57  ;;  %7512 = vmatmul.mubr.msk.bf16.gmra.mrb[20].mxu1 %vm736_vm0, %v2111_v7  ;;  %v1010_v11 = vld [vmem:[#allocation2 + $0x142] sm:$0xff]  ;;  %v1040_v31 = vld [vmem:[#allocation2 + $0x138] sm:$0xff] }
  0xc8   : > { %v7840_v15 = vpop.permute.xlu0 %7839  ;;  %v2077_v13 = vpack.c.bf16 %v2045_v1, %v2044_v24  ;;  %v9900_v25 = vld [vmem:[#allocation2 + $0x141] sm:$0xff]  ;;  %v7847_v41 = vunpack.i.h.bf16 %v7845_v63  ;;  %v7846_v24 = vunpack.i.l.bf16 %v7845_v63  ;;  %v1072_v59 = vld [vmem:[#allocation2 + $0x139] sm:$0xff] }
  0xc9   : > { %8134 = vrot.lane.b32.xlu1 %v9833_v46, %s9110_s1  ;;  %4898 = vst.msk [vmem:[#allocation2 + $0x148] sm:$0x3] %vm739_vm1, %v12712_v29  ;;  %v1041_v61 = vld [vmem:[#allocation2 + $0x140] sm:$0xff]  ;;  %v7842_v46 = vunpack.i.h.bf16 %v7840_v15  ;;  %v7841_v34 = vunpack.i.l.bf16 %v7840_v15 }
  0xca   : > { %8129 = vrot.lane.b32.xlu0 %v9868_v35, %s9110_s1  ;;  %2355 = vmatprep.mubr.bf16.mxu0 %v2077_v13  ;;  %v9912_v57 = vpack.i.bf16 %v1041_v61, %v1040_v31  ;;  %v1884_v40 = vsel %vm736_vm0, %v9562_v9, %v7846_v24  ;;  %v1885_v63 = vsel %vm736_vm0, %v9564_v10, %v7847_v41  ;;  %v9920_v14 = vld [vmem:[#allocation2 + $0x121] sm:$0xff] }
  0xcb   : > { %2356 = vmatmul.mubr.bf16.vlgmr.msra.gmra.mrb[0].mxu0 %v2076_v62  ;;  %v7855_v0 = vpop.permute.xlu1 %7854  ;;  %v9918_v62 = vpack.i.bf16 %v1073_v60, %v1072_v59  ;;  %v9922_v15 = vld [vmem:[#allocation2 + $0x120] sm:$0xff]  ;;  %v1983_v13 = vsel %vm736_vm0, %v9558_v5, %v7842_v46 }
  0xcc   : > { %v7850_v43 = vpop.permute.xlu0 %7849  ;;  %v7857_v7 = vunpack.i.h.bf16 %v7855_v0  ;;  %v7856_v2 = vunpack.i.l.bf16 %v7855_v0  ;;  %v1982_v0 = vsel %vm736_vm0, %v9556_v4, %v7841_v34  ;;  %4893 = vst.msk [vmem:[#allocation2 + $0x120] sm:$0xff] %vm736_vm0, %v12712_v29 }
  0xcd   : > { %8144 = vrot.lane.b32.xlu1 %v9848_v8, %s12695_s22  ;;  %v7852_v3 = vunpack.i.h.bf16 %v7850_v43  ;;  %v7851_v44 = vunpack.i.l.bf16 %v7850_v43  ;;  %v9924_v8 = vld [vmem:[#allocation2 + $0x128] sm:$0xff] }
  0xce   : > { %8139 = vrot.lane.b32.xlu0 %v9904_v21, %s12695_s22  ;;  %4894 = vst.msk [vmem:[#allocation2 + $0x128] sm:$0xff] %vm736_vm0, %v12712_v29  ;;  %v1917_v41 = vsel %vm1914_vm2, %v1884_v40, %v7856_v2  ;;  %v1918_v5 = vsel %vm1914_vm2, %v1885_v63, %v7857_v7  ;;  %v1009_v2 = vld [vmem:[#allocation2 + $0x13a] sm:$0xff] }
  0xcf   : > { %v7865_v1 = vpop.permute.xlu1 %7864  ;;  %v2014_v4 = vsel %vm1914_vm2, %v1982_v0, %v7851_v44  ;;  %v2015_v61 = vsel %vm1914_vm2, %v1983_v13, %v7852_v3  ;;  %v9950_v3 = vpack.i.bf16 %v1010_v11, %v1009_v2  ;;  %v1042_v44 = vld [vmem:[#allocation2 + $0x150] sm:$0xff] }
  0xd0   : > { %v7860_v31 = vpop.permute.xlu0 %7859  ;;  %v7867_v9 = vunpack.i.h.bf16 %v7865_v1  ;;  %v7866_v24 = vunpack.i.l.bf16 %v7865_v1 }
  0xd1   : > { %v7862_v10 = vunpack.i.h.bf16 %v7860_v31  ;;  %v7861_v60 = vunpack.i.l.bf16 %v7860_v31  ;;  %8154 = vrot.lane.b32.xlu1 %v9853_v54, %s12694_s2 }
  0xd2   : > { %8149 = vrot.lane.b32.xlu0 %v9912_v57, %s12694_s2  ;;  %v1950_v46 = vsel %vm1947_vm3, %v1917_v41, %v7866_v24  ;;  %v1951_v34 = vsel %vm1947_vm3, %v1918_v5, %v7867_v9  ;;  %v1043_v24 = vld [vmem:[#allocation2 + $0x158] sm:$0xff] }
  0xd3   : > { %v7875_v43 = vpop.permute.xlu1 %7874  ;;  %v2046_v59 = vsel %vm1947_vm3, %v2014_v4, %v7861_v60  ;;  %v2047_v54 = vsel %vm1947_vm3, %v2015_v61, %v7862_v10  ;;  %v2079_v1 = vpack.c.bf16 %v1951_v34, %v1950_v46  ;;  %v1074_v10 = vld [vmem:[#allocation2 + $0x151] sm:$0xff]  ;;  %v1075_v60 = vld [vmem:[#allocation2 + $0x159] sm:$0xff]  ;;  %v9956_v11 = vpack.i.bf16 %v1043_v24, %v1042_v44 }
  0xd4   : > { %v7870_v40 = vpop.permute.xlu0 %7869  ;;  %v2080_v7 = vpack.c.bf16 %v2047_v54, %v2046_v59  ;;  %v7877_v0 = vunpack.i.h.bf16 %v7875_v43  ;;  %v7876_v31 = vunpack.i.l.bf16 %v7875_v43  ;;  %v9958_v46 = vpack.i.bf16 %v1075_v60, %v1074_v10  ;;  %v1012_v34 = vld [vmem:[#allocation2 + $0x15a] sm:$0xff]  ;;  %v1106_v44 = vld [vmem:[#allocation2 + $0x152] sm:$0xff] }
  0xd5   : > { %8164 = vrot.lane.b32.xlu1 %v9862_v20, %s9110_s1  ;;  %v7872_v63 = vunpack.i.h.bf16 %v7870_v40  ;;  %v7871_v13 = vunpack.i.l.bf16 %v7870_v40  ;;  %v9960_v43 = vld [vmem:[#allocation2 + $0x139] sm:$0xff] }
  0xd6   : > { %8159 = vrot.lane.b32.xlu0 %v9918_v62, %s9110_s1  ;;  %2363 = vmatprep.mubr.bf16.mxu0 %v2080_v7  ;;  %v9970_v40 = vld [vmem:[#allocation2 + $0x138] sm:$0xff]  ;;  %v9972_v7 = vld [vmem:[#allocation2 + $0x140] sm:$0xff] }
  0xd7   : > { %2364 = vmatmul.mubr.bf16.gmra.mrb[4].mxu0 %v2079_v1  ;;  %v7885_v9 = vpop.permute.xlu1 %7884  ;;  %v1985_v59 = vsel %vm736_vm0, %v9588_v18, %v7872_v63  ;;  %v1984_v54 = vsel %vm736_vm0, %v9600_v27, %v7871_v13  ;;  %v1886_v1 = vsel %vm736_vm0, %v9618_v33, %v7876_v31  ;;  %v9976_v27 = vld [vmem:[#allocation2 + $0x16a] sm:$0xff]  ;;  %v9978_v13 = vld [vmem:[#allocation2 + $0x159] sm:$0xff]  ;;  %4896 = vst.msk [vmem:[#allocation2 + $0x138] sm:$0xff] %vm736_vm0, %v12712_v29  ;;  %4897 = vst.msk [vmem:[#allocation2 + $0x140] sm:$0xff] %vm736_vm0, %v12712_v29 }
  0xd8   : > { %v7880_v41 = vpop.permute.xlu0 %7879  ;;  %v7887_v5 = vunpack.i.h.bf16 %v7885_v9  ;;  %v7886_v4 = vunpack.i.l.bf16 %v7885_v9  ;;  %12713 = vst [vmem:[#allocation29_spill] sm:$0xff] %v9978_v13  ;;  %v1107_v33 = vld [vmem:[#allocation2 + $0x15a] sm:$0xff]  ;;  %v2117_v60 = vpack.c.bf16 %v9696_v28, %v9976_v27 }
  0xd9   : > { %8174 = vrot.lane.b32.xlu1 %v9868_v35, %s12695_s22  ;;  %v7882_v20 = vunpack.i.h.bf16 %v7880_v41  ;;  %v7881_v61 = vunpack.i.l.bf16 %v7880_v41  ;;  %v1887_v35 = vsel %vm736_vm0, %v9620_v36, %v7877_v0  ;;  %v2114_v31 = vpack.c.bf16 %v1107_v33, %v1106_v44  ;;  %4901 = vst.msk [vmem:[#allocation2 + $0x160] sm:$0x3] %vm739_vm1, %v12712_v29 }
  0xda   : > { %8169 = vrot.lane.b32.xlu0 %v9950_v3, %s12695_s22  ;;  %v1919_v18 = vsel %vm1914_vm2, %v1886_v1, %v7886_v4  ;;  %v1920_v63 = vsel %vm1914_vm2, %v1887_v35, %v7887_v5 }
  0xdb   : > { %v7895_v2 = vpop.permute.xlu1 %7894  ;;  %v2016_v41 = vsel %vm1914_vm2, %v1984_v54, %v7881_v61  ;;  %v2017_v5 = vsel %vm1914_vm2, %v1985_v59, %v7882_v20  ;;  %7515 = vmatprep.mubr.msk.bf16.mxu1 %vm736_vm0, %v2114_v31 }
  0xdc   : > { %v7890_v9 = vpop.permute.xlu0 %7889  ;;  %v7897_v24 = vunpack.i.h.bf16 %v7895_v2  ;;  %v7896_v10 = vunpack.i.l.bf16 %v7895_v2  ;;  %7516 = vmatmul.mubr.msk.bf16.gmra.mrb[24].mxu1 %vm736_vm0, %v2117_v60 }
  0xdd   : > { %v7892_v36 = vunpack.i.h.bf16 %v7890_v9  ;;  %v7891_v0 = vunpack.i.l.bf16 %v7890_v9  ;;  %8184 = vrot.lane.b32.xlu1 %v9904_v21, %s12694_s2  ;;  %v1011_v9 = vld [vmem:[#allocation2 + $0x152] sm:$0xff] }
  0xde   : > { %8179 = vrot.lane.b32.xlu0 %v9956_v11, %s12694_s2  ;;  %v1952_v4 = vsel %vm1947_vm3, %v1919_v18, %v7896_v10  ;;  %v1953_v35 = vsel %vm1947_vm3, %v1920_v63, %v7897_v24  ;;  %v10004_v20 = vpack.i.bf16 %v1012_v34, %v1011_v9  ;;  %v1044_v24 = vld [vmem:[#allocation2 + $0x168] sm:$0xff]  ;;  %v1045_v10 = vld [vmem:[#allocation2 + $0x170] sm:$0xff] }
  0xdf   : > { %v7905_v1 = vpop.permute.xlu1 %7904  ;;  %v2048_v21 = vsel %vm1947_vm3, %v2016_v41, %v7891_v0  ;;  %v2049_v2 = vsel %vm1947_vm3, %v2017_v5, %v7892_v36  ;;  %v2082_v44 = vpack.c.bf16 %v1953_v35, %v1952_v4  ;;  %v10006_v0 = vld [vmem:[#allocation2 + $0x169] sm:$0xff]  ;;  %v10012_v34 = vpack.i.bf16 %v1045_v10, %v1044_v24 }
  0xe0   : > { %v7900_v33 = vpop.permute.xlu0 %7899  ;;  %v2083_v13 = vpack.c.bf16 %v2049_v2, %v2048_v21  ;;  %v7907_v61 = vunpack.i.h.bf16 %v7905_v1  ;;  %v7906_v59 = vunpack.i.l.bf16 %v7905_v1  ;;  %v10020_v35 = vpack.i.bf16 %v9694_v26, %v10006_v0  ;;  %v10022_v1 = vld [vmem:[#allocation2 + $0x151] sm:$0xff] }
  0xe1   : > { %8194 = vrot.lane.b32.xlu1 %v9912_v57, %s9110_s1  ;;  %v7902_v18 = vunpack.i.h.bf16 %v7900_v33  ;;  %v7901_v63 = vunpack.i.l.bf16 %v7900_v33  ;;  %v10026_v21 = vld [vmem:[#allocation2 + $0x158] sm:$0xff] }
  0xe2   : > { %8189 = vrot.lane.b32.xlu0 %v9958_v46, %s9110_s1  ;;  %2371 = vmatprep.mubr.bf16.mxu0 %v2083_v13  ;;  %v1889_v41 = vsel %vm736_vm0, %v9639_v49, %v7907_v61  ;;  %v1888_v5 = vsel %vm736_vm0, %v9637_v48, %v7906_v59  ;;  %4900 = vst.msk [vmem:[#allocation2 + $0x158] sm:$0xff] %vm736_vm0, %v12712_v29 }
  0xe3   : > { %2372 = vmatmul.mubr.bf16.gmra.mrb[8].mxu0 %v2082_v44  ;;  %v7915_v54 = vpop.permute.xlu1 %7914  ;;  %v1987_v2 = vsel %vm736_vm0, %v9630_v45, %v7902_v18  ;;  %v1986_v49 = vsel %vm736_vm0, %v9674_v22, %v7901_v63 }
  0xe4   : > { %v7910_v36 = vpop.permute.xlu0 %7909  ;;  %v7917_v31 = vunpack.i.h.bf16 %v7915_v54  ;;  %v7916_v60 = vunpack.i.l.bf16 %v7915_v54 }
  0xe5   : > { %8204 = vrot.lane.b32.xlu1 %v9918_v62, %s12695_s22  ;;  %v7912_v57 = vunpack.i.h.bf16 %v7910_v36  ;;  %v7911_v13 = vunpack.i.l.bf16 %v7910_v36  ;;  %v10024_v62 = vld [vmem:[#allocation2 + $0x150] sm:$0xff] }
  0xe6   : > { %8199 = vrot.lane.b32.xlu0 %v10004_v20, %s12695_s22  ;;  %4899 = vst.msk [vmem:[#allocation2 + $0x150] sm:$0xff] %vm736_vm0, %v12712_v29  ;;  %v1921_v59 = vsel %vm1914_vm2, %v1888_v5, %v7916_v60  ;;  %v1922_v45 = vsel %vm1914_vm2, %v1889_v41, %v7917_v31 }
  0xe7   : > { %v7925_v4 = vpop.permute.xlu1 %7924  ;;  %v2018_v22 = vsel %vm1914_vm2, %v1986_v49, %v7911_v13  ;;  %v2019_v54 = vsel %vm1914_vm2, %v1987_v2, %v7912_v57  ;;  %v10054_v57 = vpack.i.bf16 %v9696_v28, %v9976_v27  ;;  %v8248_v28 = vpack.i.bf16 %v9712_v51, %v9710_v50  ;;  %v10064_v27 = vld [vmem:[#allocation2 + $0x198] sm:$0xff] }
  0xe8   : > { %v7920_v44 = vpop.permute.xlu0 %7919  ;;  %v7927_v9 = vunpack.i.h.bf16 %v7925_v4  ;;  %v7926_v48 = vunpack.i.l.bf16 %v7925_v4 }
  0xe9   : > { %v7922_v33 = vunpack.i.h.bf16 %v7920_v44  ;;  %v7921_v61 = vunpack.i.l.bf16 %v7920_v44  ;;  %8214 = vrot.lane.b32.xlu1 %v9950_v3, %s12694_s2 }
  0xea   : > { %8209 = vrot.lane.b32.xlu0 %v10012_v34, %s12694_s2  ;;  %v1954_v24 = vsel %vm1947_vm3, %v1921_v59, %v7926_v48  ;;  %v1955_v10 = vsel %vm1947_vm3, %v1922_v45, %v7927_v9 }
  0xeb   : > { %v7935_v18 = vpop.permute.xlu1 %7934  ;;  %v2050_v63 = vsel %vm1947_vm3, %v2018_v22, %v7921_v61  ;;  %v2051_v3 = vsel %vm1947_vm3, %v2019_v54, %v7922_v33  ;;  %v2085_v36 = vpack.c.bf16 %v1955_v10, %v1954_v24  ;;  %v10066_v61 = vld [vmem:[#allocation2 + $0x1a0] sm:$0xff]  ;;  %v10077_v24 = vld [vmem:[#allocation2 + $0x168] sm:$0xff]  ;;  %v10079_v10 = vld [vmem:[#allocation2 + $0x170] sm:$0xff] }
  0xec   : > { %v7930_v60 = vpop.permute.xlu0 %7929  ;;  %v2086_v5 = vpack.c.bf16 %v2051_v3, %v2050_v63  ;;  %v7936_v31 = vunpack.i.l.bf16 %v7935_v18  ;;  %v7937_v4 = vunpack.i.h.bf16 %v7935_v18  ;;  %v10075_v54 = vld [vmem:[#allocation2 + $0x199] sm:$0xff]  ;;  %4902 = vst.msk [vmem:[#allocation2 + $0x168] sm:$0xff] %vm736_vm0, %v12712_v29  ;;  %4903 = vst.msk [vmem:[#allocation2 + $0x170] sm:$0xff] %vm736_vm0, %v12712_v29 }
  0xed   : > { %8224 = vrot.lane.b32.xlu1 %v9956_v11, %s9110_s1  ;;  %v7932_v13 = vunpack.i.h.bf16 %v7930_v60  ;;  %v7931_v41 = vunpack.i.l.bf16 %v7930_v60  ;;  %v1113_v60 = vld [vmem:[#allocation2 + $0x1a2] sm:$0xff] }
  0xee   : > { %8219 = vrot.lane.b32.xlu0 %v10020_v35, %s9110_s1  ;;  %2379 = vmatprep.mubr.bf16.mxu0 %v2086_v5  ;;  %v1890_v11 = vsel %vm736_vm0, %v9681_v23, %v7936_v31  ;;  %v1891_v23 = vsel %vm736_vm0, %v9683_v58, %v7937_v4  ;;  %v2120_v58 = vpack.c.bf16 %v9724_v56, %v9722_v55 }
  0xef   : > { %2380 = vmatmul.mubr.bf16.gmra.mrb[12].mxu0 %v2085_v36  ;;  %v7945_v2 = vpop.permute.xlu1 %7944  ;;  %v1989_v59 = vsel %vm736_vm0, %v9662_v12, %v7932_v13  ;;  %v10082_v36 = vld [vmem:[#allocation2 + $0x1a1] sm:$0xff] }
  0xf0   : > { %v7940_v49 = vpop.permute.xlu0 %7939  ;;  %v7947_v44 = vunpack.i.h.bf16 %v7945_v2  ;;  %v7946_v9 = vunpack.i.l.bf16 %v7945_v2  ;;  %4910 = vst.msk [vmem:[#allocation2 + $0x1a8] sm:$0x3] %vm739_vm1, %v12712_v29  ;;  %7519 = vmatprep.mubr.msk.bf16.mxu1 %vm736_vm0, %v2120_v58 }
  0xf1   : > { %v7941_v48 = vunpack.i.l.bf16 %v7940_v49  ;;  %8234 = vrot.lane.b32.xlu1 %v9958_v46, %s12695_s22  ;;  %v7942_v33 = vunpack.i.h.bf16 %v7940_v49  ;;  %v1988_v46 = vsel %vm736_vm0, %v9705_v39, %v7931_v41  ;;  %v1112_v39 = vld [vmem:[#allocation2 + $0x19a] sm:$0xff] }
  0xf2   : > { %8229 = vrot.lane.b32.xlu0 %v10054_v57, %s12695_s22  ;;  %v1923_v22 = vsel %vm1914_vm2, %v1890_v11, %v7946_v9  ;;  %v1924_v12 = vsel %vm1914_vm2, %v1891_v23, %v7947_v44  ;;  %v2123_v41 = vpack.c.bf16 %v1113_v60, %v1112_v39  ;;  %4908 = vst.msk [vmem:[#allocation2 + $0x198] sm:$0xff] %vm736_vm0, %v12712_v29  ;;  %4909 = vst.msk [vmem:[#allocation2 + $0x1a0] sm:$0xff] %vm736_vm0, %v12712_v29 }
  0xf3   : > { %v7955_v45 = vpop.permute.xlu1 %7954  ;;  %v2020_v13 = vsel %vm1914_vm2, %v1988_v46, %v7941_v48  ;;  %v2021_v4 = vsel %vm1914_vm2, %v1989_v59, %v7942_v33  ;;  %v8258_v33 = vpack.i.bf16 %v9724_v56, %v9722_v55  ;;  %v8278_v39 = vpack.i.bf16 %v10082_v36, %v10075_v54 }
  0xf4   : > { %v7950_v18 = vpop.permute.xlu0 %7949  ;;  %v7957_v63 = vunpack.i.h.bf16 %v7955_v45  ;;  %v7956_v3 = vunpack.i.l.bf16 %v7955_v45  ;;  %7520 = vmatmul.mubr.msk.bf16.gmra.mrb[28].mxu1 %vm736_vm0, %v2123_v41 }
  0xf5   : > { %v7952_v5 = vunpack.i.h.bf16 %v7950_v18  ;;  %v7951_v31 = vunpack.i.l.bf16 %v7950_v18  ;;  %8244 = vrot.lane.b32.xlu1 %v10004_v20, %s12694_s2 }
  0xf6   : > { %8239 = vrot.lane.b32.xlu0 %v9701_v37, %s12694_s2  ;;  %v1956_v2 = vsel %vm1947_vm3, %v1923_v22, %v7956_v3  ;;  %v1957_v20 = vsel %vm1947_vm3, %v1924_v12, %v7957_v63 }
  0xf7   : > { %v7965_v49 = vpop.permute.xlu1 %7964  ;;  %v2052_v44 = vsel %vm1947_vm3, %v2020_v13, %v7951_v31  ;;  %v2053_v9 = vsel %vm1947_vm3, %v2021_v4, %v7952_v5  ;;  %v2088_v48 = vpack.c.bf16 %v1957_v20, %v1956_v2 }
  0xf8   : > { %v7960_v29 = vpop.permute.xlu0 %7959  ;;  %v2089_v11 = vpack.c.bf16 %v2053_v9, %v2052_v44  ;;  %v7967_v59 = vunpack.i.h.bf16 %v7965_v49  ;;  %v7966_v46 = vunpack.i.l.bf16 %v7965_v49 }
  0xf9   : > { %8254 = vrot.lane.b32.xlu1 %v10012_v34, %s9110_s1  ;;  %v7962_v45 = vunpack.i.h.bf16 %v7960_v29  ;;  %v7961_v22 = vunpack.i.l.bf16 %v7960_v29 }
  0xfa   : > { %8249 = vrot.lane.b32.xlu0 %v8248_v28, %s9110_s1  ;;  %2387 = vmatprep.mubr.bf16.mxu0 %v2089_v11  ;;  %v8268_v28 = vpack.i.bf16 %v10066_v61, %v10064_v27  ;;  %v1893_v55 = vsel %vm736_vm0, %v9716_v53, %v7967_v59  ;;  %v1892_v56 = vsel %vm736_vm0, %v9714_v52, %v7966_v46 }
  0xfb   : > { %2388 = vmatmul.mubr.bf16.gmra.mrb[16].mxu0 %v2088_v48  ;;  %v7975_v23 = vpop.permute.xlu1 %7974  ;;  %v1990_v60 = vsel %vm736_vm0, %v9746_v16, %v7961_v22 }
  0xfc   : > { %v7970_v18 = vpop.permute.xlu0 %7969  ;;  %v7977_v63 = vunpack.i.h.bf16 %v7975_v23  ;;  %v7976_v3 = vunpack.i.l.bf16 %v7975_v23 }
  0xfd   : > { %8264 = vrot.lane.b32.xlu1 %v10020_v35, %s12695_s22  ;;  %v7972_v12 = vunpack.i.h.bf16 %v7970_v18  ;;  %v7971_v34 = vunpack.i.l.bf16 %v7970_v18  ;;  %v1991_v35 = vsel %vm736_vm0, %v9708_v47, %v7962_v45 }
  0xfe   : > { %8259 = vrot.lane.b32.xlu0 %v8258_v33, %s12695_s22  ;;  %v1925_v52 = vsel %vm1914_vm2, %v1892_v56, %v7976_v3  ;;  %v1926_v53 = vsel %vm1914_vm2, %v1893_v55, %v7977_v63 }
  0xff   : > { %v7985_v58 = vpop.permute.xlu1 %7984  ;;  %v2022_v54 = vsel %vm1914_vm2, %v1990_v60, %v7971_v34  ;;  %v2023_v47 = vsel %vm1914_vm2, %v1991_v35, %v7972_v12 }
 0x100   : > { %v7980_v5 = vpop.permute.xlu0 %7979  ;;  %v7987_v31 = vunpack.i.h.bf16 %v7985_v58  ;;  %v7986_v13 = vunpack.i.l.bf16 %v7985_v58 }
 0x101   : > { %v7982_v27 = vunpack.i.h.bf16 %v7980_v5  ;;  %v7981_v61 = vunpack.i.l.bf16 %v7980_v5  ;;  %8274 = vrot.lane.b32.xlu1 %v10054_v57, %s12694_s2 }
 0x102   : > { %8269 = vrot.lane.b32.xlu0 %v8268_v28, %s12694_s2  ;;  %v1958_v16 = vsel %vm1947_vm3, %v1925_v52, %v7986_v13  ;;  %v1959_v36 = vsel %vm1947_vm3, %v1926_v53, %v7987_v31 }
 0x103   : > { %v7995_v41 = vpop.permute.xlu1 %7994  ;;  %v2054_v4 = vsel %vm1947_vm3, %v2022_v54, %v7981_v61  ;;  %v2055_v2 = vsel %vm1947_vm3, %v2023_v47, %v7982_v27  ;;  %v2091_v57 = vpack.c.bf16 %v1959_v36, %v1958_v16 }
 0x104   : > { %v7990_v20 = vpop.permute.xlu0 %7989  ;;  %v2092_v49 = vpack.c.bf16 %v2055_v2, %v2054_v4  ;;  %v7997_v44 = vunpack.i.h.bf16 %v7995_v41  ;;  %v7996_v9 = vunpack.i.l.bf16 %v7995_v41 }
 0x105   : > { %8284 = vrot.lane.b32.xlu1 %v9701_v37, %s9110_s1  ;;  %v7992_v29 = vunpack.i.h.bf16 %v7990_v20  ;;  %v7991_v11 = vunpack.i.l.bf16 %v7990_v20 }
 0x106   : > { %8279 = vrot.lane.b32.xlu0 %v8278_v39, %s9110_s1  ;;  %2395 = vmatprep.mubr.bf16.mxu0 %v2092_v49  ;;  %v1895_v22 = vsel %vm736_vm0, %v9750_v19, %v7997_v44  ;;  %v1894_v37 = vsel %vm736_vm0, %v9748_v17, %v7996_v9  ;;  %v12714_v9 = vld [vmem:[#allocation14_spill] sm:$0xff] }
 0x107   : > { %2396 = vmatmul.mubr.bf16.gmra.mrb[20].mxu0 %v2091_v57  ;;  %v8005_v48 = vpop.permute.xlu1 %8004  ;;  %v1993_v63 = vsel %vm736_vm0, %v9740_v6, %v7992_v29  ;;  %v1992_v3 = vsel %vm736_vm0, %v9762_v30, %v7991_v11 }
 0x108   : > { %v8000_v33 = vpop.permute.xlu0 %7999  ;;  %v8007_v59 = vunpack.i.h.bf16 %v8005_v48  ;;  %v8006_v46 = vunpack.i.l.bf16 %v8005_v48 }
 0x109   : > { %v8002_v23 = vunpack.i.h.bf16 %v8000_v33  ;;  %v8001_v45 = vunpack.i.l.bf16 %v8000_v33 }
 0x10a   : > { %v1927_v58 = vsel %vm1914_vm2, %v1894_v37, %v8006_v46  ;;  %v1928_v39 = vsel %vm1914_vm2, %v1895_v22, %v8007_v59 }
 0x10b   : > { %v8015_v18 = vpop.permute.xlu1 %8014  ;;  %v2024_v19 = vsel %vm1914_vm2, %v1992_v3, %v8001_v45  ;;  %v2025_v17 = vsel %vm1914_vm2, %v1993_v63, %v8002_v23 }
 0x10c   : > { %v8010_v12 = vpop.permute.xlu0 %8009  ;;  %v8017_v34 = vunpack.i.h.bf16 %v8015_v18  ;;  %v8016_v28 = vunpack.i.l.bf16 %v8015_v18 }
 0x10d   : > { %v8012_v55 = vunpack.i.h.bf16 %v8010_v12  ;;  %v8011_v56 = vunpack.i.l.bf16 %v8010_v12 }
 0x10e   : > { %v1960_v35 = vsel %vm1947_vm3, %v1927_v58, %v8016_v28  ;;  %v1961_v6 = vsel %vm1947_vm3, %v1928_v39, %v8017_v34 }
 0x10f   : > { %v8025_v60 = vpop.permute.xlu1 %8024  ;;  %v2056_v30 = vsel %vm1947_vm3, %v2024_v19, %v8011_v56  ;;  %v2057_v5 = vsel %vm1947_vm3, %v2025_v17, %v8012_v55  ;;  %v2094_v31 = vpack.c.bf16 %v1961_v6, %v1960_v35 }
 0x110   : > { %v8020_v13 = vpop.permute.xlu0 %8019  ;;  %v2095_v27 = vpack.c.bf16 %v2057_v5, %v2056_v30  ;;  %v8027_v61 = vunpack.i.h.bf16 %v8025_v60  ;;  %v8026_v52 = vunpack.i.l.bf16 %v8025_v60  ;;  %v12715_v30 = vld [vmem:[#allocation16_spill] sm:$0xff] }
 0x111   : > { %v8022_v54 = vunpack.i.h.bf16 %v8020_v13  ;;  %v8021_v47 = vunpack.i.l.bf16 %v8020_v13 }
 0x112   : > { %2403 = vmatprep.mubr.bf16.mxu0 %v2095_v27  ;;  %v1897_v57 = vsel %vm736_vm0, %v9768_v42, %v8027_v61  ;;  %v1896_v20 = vsel %vm736_vm0, %v9766_v38, %v8026_v52  ;;  %v12717_v61 = vld [vmem:[#allocation13_spill] sm:$0xff] }
 0x113   : > { %2404 = vmatmul.mubr.bf16.gmra.mrb[24].mxu0 %v2094_v31  ;;  %v8035_v53 = vpop.permute.xlu1 %8034  ;;  %v1995_v44 = vsel %vm736_vm0, %v9764_v32, %v8022_v54  ;;  %v1994_v48 = vsel %vm736_vm0, %v12714_v9, %v8021_v47  ;;  %v12716_v31 = vld [vmem:[#allocation15_spill] sm:$0xff] }
 0x114   : > { %v8030_v16 = vpop.permute.xlu0 %8029  ;;  %v8037_v36 = vunpack.i.h.bf16 %v8035_v53  ;;  %v8036_v41 = vunpack.i.l.bf16 %v8035_v53  ;;  %v12718_v53 = vld [vmem:[#allocation17_spill] sm:$0xff] }
 0x115   : > { %v8032_v4 = vunpack.i.h.bf16 %v8030_v16  ;;  %v8031_v2 = vunpack.i.l.bf16 %v8030_v16 }
 0x116   : > { %v1929_v23 = vsel %vm1914_vm2, %v1896_v20, %v8036_v41  ;;  %v1930_v45 = vsel %vm1914_vm2, %v1897_v57, %v8037_v36 }
 0x117   : > { %v8045_v49 = vpop.permute.xlu1 %8044  ;;  %v2026_v42 = vsel %vm1914_vm2, %v1994_v48, %v8031_v2  ;;  %v2027_v38 = vsel %vm1914_vm2, %v1995_v44, %v8032_v4 }
 0x118   : > { %v8040_v29 = vpop.permute.xlu0 %8039  ;;  %v8047_v11 = vunpack.i.h.bf16 %v8045_v49  ;;  %v8046_v33 = vunpack.i.l.bf16 %v8045_v49 }
 0x119   : > { %v8042_v59 = vunpack.i.h.bf16 %v8040_v29  ;;  %v8041_v46 = vunpack.i.l.bf16 %v8040_v29 }
 0x11a   : > { %v1962_v22 = vsel %vm1947_vm3, %v1929_v23, %v8046_v33  ;;  %v1963_v32 = vsel %vm1947_vm3, %v1930_v45, %v8047_v11 }
 0x11b   : > { %v8055_v37 = vpop.permute.xlu1 %8054  ;;  %v2058_v18 = vsel %vm1947_vm3, %v2026_v42, %v8041_v46  ;;  %v2059_v63 = vsel %vm1947_vm3, %v2027_v38, %v8042_v59  ;;  %v2097_v3 = vpack.c.bf16 %v1963_v32, %v1962_v22 }
 0x11c   : > { %v8050_v12 = vpop.permute.xlu0 %8049  ;;  %v2098_v34 = vpack.c.bf16 %v2059_v63, %v2058_v18  ;;  %v8057_v28 = vunpack.i.h.bf16 %v8055_v37  ;;  %v8056_v55 = vunpack.i.l.bf16 %v8055_v37 }
 0x11d   : > { %v8052_v58 = vunpack.i.h.bf16 %v8050_v12  ;;  %v8051_v39 = vunpack.i.l.bf16 %v8050_v12 }
 0x11e   : > { %2411 = vmatprep.mubr.bf16.mxu0 %v2098_v34  ;;  %v1899_v5 = vsel %vm736_vm0, %v12715_v30, %v8057_v28  ;;  %v1898_v13 = vsel %vm736_vm0, %v12716_v31, %v8056_v55  ;;  %v12722_v30 = vld [vmem:[#allocation22_spill] sm:$0xff] }
 0x11f   : > { %2412 = vmatmul.mubr.bf16.gmra.mrb[28].mxu0 %v2097_v3  ;;  %v8065_v56 = vpop.permute.xlu1 %8064  ;;  %v1997_v52 = vsel %vm736_vm0, %v12717_v61, %v8052_v58  ;;  %v1996_v54 = vsel %vm736_vm0, %v12718_v53, %v8051_v39  ;;  %v12720_v39 = vld [vmem:[#allocation19_spill] sm:$0xff] }
 0x120   : > { %v8060_v19 = vpop.permute.xlu0 %8059  ;;  %v8067_v17 = vunpack.i.h.bf16 %v8065_v56  ;;  %v8066_v35 = vunpack.i.l.bf16 %v8065_v56  ;;  %v12719_v56 = vld [vmem:[#allocation20_spill] sm:$0xff] }
 0x121   : > { %v8062_v6 = vunpack.i.h.bf16 %v8060_v19  ;;  %v8061_v60 = vunpack.i.l.bf16 %v8060_v19 }
 0x122   : > { %v1931_v2 = vsel %vm1914_vm2, %v1898_v13, %v8066_v35  ;;  %v1932_v57 = vsel %vm1914_vm2, %v1899_v5, %v8067_v17  ;;  %v8786_v35 = vld [vmem:[%s12636_s7] sm:$0xff]  }
 0x123   : > { %v8075_v27 = vpop.permute.xlu1 %8074  ;;  %v2028_v49 = vsel %vm1914_vm2, %v1996_v54, %v8061_v60  ;;  %v2029_v44 = vsel %vm1914_vm2, %v1997_v52, %v8062_v6  ;;  %v12721_v6 = vld [vmem:[#allocation18_spill] sm:$0xff]  ;;  %7523 = vmatprep.subr.bf16.mxu1 %v8786_v35 }
 0x124   : > { %v8070_v47 = vpop.permute.xlu0 %8069  ;;  %v8077_v16 = vunpack.i.h.bf16 %v8075_v27  ;;  %v8076_v36 = vunpack.i.l.bf16 %v8075_v27  ;;  %7524 = vmatpush3.bf16.msra.mxu1 %v8786_v35 }
 0x125   : > { %v8072_v41 = vunpack.i.h.bf16 %v8070_v47  ;;  %v8071_v4 = vunpack.i.l.bf16 %v8070_v47 }
 0x126   : > { %v1964_v9 = vsel %vm1947_vm3, %v1931_v2, %v8076_v36  ;;  %v1965_v48 = vsel %vm1947_vm3, %v1932_v57, %v8077_v16 }
 0x127   : > { %v10184_v20 = vpop.f32.mrb[0].mxu1  ;;  %v8085_v11 = vpop.permute.xlu1 %8084  ;;  %v2060_v33 = vsel %vm1947_vm3, %v2028_v49, %v8071_v4  ;;  %v2061_v59 = vsel %vm1947_vm3, %v2029_v44, %v8072_v41  ;;  %v2100_v46 = vpack.c.bf16 %v1965_v48, %v1964_v9  ;;  %v8787_v44 = vld [vmem:[%s12636_s7 + $0x8] sm:$0xff]  }
 0x128   : > { %v10190_v29 = vpop.f32.mrb[1].mxu1  ;;  %v8080_v45 = vpop.permute.xlu0 %8079  ;;  %v2101_v42 = vpack.c.bf16 %v2061_v59, %v2060_v33  ;;  %v8087_v22 = vunpack.i.h.bf16 %v8085_v11  ;;  %v8086_v32 = vunpack.i.l.bf16 %v8085_v11  ;;  %7525 = vmatprep.subr.bf16.mxu1 %v8787_v44 }
 0x129   : > { %v10194_v23 = vpop.f32.mrb[2].mxu1  ;;  %v8082_v18 = vunpack.i.h.bf16 %v8080_v45  ;;  %v8081_v63 = vunpack.i.l.bf16 %v8080_v45  ;;  %7526 = vmatpush3.bf16.msra.mxu1 %v8787_v44 }
 0x12a   : > { %v10196_v38 = vpop.f32.mrb[3].mxu1  ;;  %2419 = vmatprep.mubr.bf16.mxu0 %v2101_v42  ;;  %v1901_v58 = vsel %vm736_vm0, %v12719_v56, %v8087_v22  ;;  %v1900_v19 = vsel %vm736_vm0, %v12720_v39, %v8086_v32 }
 0x12b   : > { %2420 = vmatmul.mubr.bf16.gmra.mrb[32].mxu0 %v2100_v46  ;;  %v8095_v37 = vpop.permute.xlu1 %8094  ;;  %v1999_v60 = vsel %vm736_vm0, %v12721_v6, %v8082_v18  ;;  %v1998_v5 = vsel %vm736_vm0, %v12722_v30, %v8081_v63  ;;  %v12723_v63 = vld [vmem:[#allocation24_spill] sm:$0xff] }
 0x12c   : > { %v8090_v3 = vpop.permute.xlu0 %8089  ;;  %v8097_v12 = vunpack.i.h.bf16 %v8095_v37  ;;  %v8096_v34 = vunpack.i.l.bf16 %v8095_v37 }
 0x12d   : > { %v8092_v28 = vunpack.i.h.bf16 %v8090_v3  ;;  %v8091_v55 = vunpack.i.l.bf16 %v8090_v3 }
 0x12e   : > { %v1933_v53 = vsel %vm1914_vm2, %v1900_v19, %v8096_v34  ;;  %v1934_v54 = vsel %vm1914_vm2, %v1901_v58, %v8097_v12  ;;  %v12724_v12 = vld [vmem:[#allocation23_spill] sm:$0xff]  ;;  %v12726_v58 = vld [vmem:[#allocation25_spill] sm:$0xff] }
 0x12f   : > { %v8105_v17 = vpop.permute.xlu1 %8104  ;;  %v2030_v47 = vsel %vm1914_vm2, %v1998_v5, %v8091_v55  ;;  %v2031_v16 = vsel %vm1914_vm2, %v1999_v60, %v8092_v28  ;;  %v12725_v55 = vld [vmem:[#allocation21_spill] sm:$0xff] }
 0x130   : > { %v8100_v31 = vpop.permute.xlu0 %8099  ;;  %v8107_v13 = vunpack.i.h.bf16 %v8105_v17  ;;  %v8106_v27 = vunpack.i.l.bf16 %v8105_v17 }
 0x131   : > { %v8102_v61 = vunpack.i.h.bf16 %v8100_v31  ;;  %v8101_v52 = vunpack.i.l.bf16 %v8100_v31 }
 0x132   : > { %v1966_v36 = vsel %vm1947_vm3, %v1933_v53, %v8106_v27  ;;  %v1967_v41 = vsel %vm1947_vm3, %v1934_v54, %v8107_v13 }
 0x133   : > { %v8115_v4 = vpop.permute.xlu1 %8114  ;;  %v2062_v2 = vsel %vm1947_vm3, %v2030_v47, %v8101_v52  ;;  %v2063_v57 = vsel %vm1947_vm3, %v2031_v16, %v8102_v61  ;;  %v2103_v49 = vpack.c.bf16 %v1967_v41, %v1966_v36  ;;  %v10234_v52 = vpop.f32.mrb[4].mxu1 }
 0x134   : > { %v8110_v9 = vpop.permute.xlu0 %8109  ;;  %v2104_v48 = vpack.c.bf16 %v2063_v57, %v2062_v2  ;;  %v8117_v11 = vunpack.i.h.bf16 %v8115_v4  ;;  %v8116_v33 = vunpack.i.l.bf16 %v8115_v4  ;;  %v10238_v36 = vpop.f32.mrb[5].mxu1 }
 0x135   : > { %v8112_v46 = vunpack.i.h.bf16 %v8110_v9  ;;  %v8111_v45 = vunpack.i.l.bf16 %v8110_v9  ;;  %v10240_v2 = vpop.f32.mrb[6].mxu1 }
 0x136   : > { %2427 = vmatprep.mubr.bf16.mxu0 %v2104_v48  ;;  %v1903_v3 = vsel %vm736_vm0, %v12723_v63, %v8117_v11  ;;  %v1902_v34 = vsel %vm736_vm0, %v12724_v12, %v8116_v33  ;;  %v10242_v57 = vpop.f32.mrb[7].mxu1 }
 0x137   : > { %2428 = vmatmul.mubr.bf16.gmra.mrb[36].mxu0 %v2103_v49  ;;  %v8125_v59 = vpop.permute.xlu1 %8124  ;;  %v2001_v56 = vsel %vm736_vm0, %v12725_v55, %v8112_v46  ;;  %v2000_v39 = vsel %vm736_vm0, %v12726_v58, %v8111_v45 }
 0x138   : > { %v8120_v42 = vpop.permute.xlu0 %8119  ;;  %v8127_v22 = vunpack.i.h.bf16 %v8125_v59  ;;  %v8126_v32 = vunpack.i.l.bf16 %v8125_v59 }
 0x139   : > { %v8122_v37 = vunpack.i.h.bf16 %v8120_v42  ;;  %v8121_v18 = vunpack.i.l.bf16 %v8120_v42 }
 0x13a   : > { %v1935_v30 = vsel %vm1914_vm2, %v1902_v34, %v8126_v32  ;;  %v1936_v5 = vsel %vm1914_vm2, %v1903_v3, %v8127_v22  ;;  %v12727_v22 = vld [vmem:[#allocation28_spill] sm:$0xff]  ;;  %v12729_v3 = vld [vmem:[#allocation26_spill] sm:$0xff] }
 0x13b   : > { %v8135_v28 = vpop.permute.xlu1 %8134  ;;  %v2032_v31 = vsel %vm1914_vm2, %v2000_v39, %v8121_v18  ;;  %v2033_v13 = vsel %vm1914_vm2, %v2001_v56, %v8122_v37  ;;  %v12728_v37 = vld [vmem:[#allocation27_spill] sm:$0xff] }
 0x13c   : > { %v8130_v19 = vpop.permute.xlu0 %8129  ;;  %v8137_v17 = vunpack.i.h.bf16 %v8135_v28  ;;  %v8136_v35 = vunpack.i.l.bf16 %v8135_v28 }
 0x13d   : > { %v8132_v6 = vunpack.i.h.bf16 %v8130_v19  ;;  %v8131_v60 = vunpack.i.l.bf16 %v8130_v19 }
 0x13e   : > { %v1968_v27 = vsel %vm1947_vm3, %v1935_v30, %v8136_v35  ;;  %v1969_v61 = vsel %vm1947_vm3, %v1936_v5, %v8137_v17 }
 0x13f   : > { %v8145_v53 = vpop.permute.xlu1 %8144  ;;  %v2064_v54 = vsel %vm1947_vm3, %v2032_v31, %v8131_v60  ;;  %v2065_v47 = vsel %vm1947_vm3, %v2033_v13, %v8132_v6  ;;  %v2106_v16 = vpack.c.bf16 %v1969_v61, %v1968_v27 }
 0x140   : > { %v8140_v41 = vpop.permute.xlu0 %8139  ;;  %v2107_v4 = vpack.c.bf16 %v2065_v47, %v2064_v54  ;;  %v8147_v49 = vunpack.i.h.bf16 %v8145_v53  ;;  %v8146_v44 = vunpack.i.l.bf16 %v8145_v53 }
 0x141   : > { %v8142_v48 = vunpack.i.h.bf16 %v8140_v41  ;;  %v8141_v11 = vunpack.i.l.bf16 %v8140_v41 }
 0x142   : > { %2435 = vmatprep.mubr.bf16.mxu0 %v2107_v4  ;;  %v1905_v32 = vsel %vm736_vm0, %v12727_v22, %v8147_v49  ;;  %v1904_v18 = vsel %vm736_vm0, %v12728_v37, %v8146_v44 }
 0x143   : > { %2436 = vmatmul.mubr.bf16.gmra.mrb[40].mxu0 %v2106_v16  ;;  %v8155_v9 = vpop.permute.xlu1 %8154  ;;  %v2003_v12 = vsel %vm736_vm0, %v12729_v3, %v8142_v48  ;;  %v2002_v34 = vsel %vm736_vm0, %v9920_v14, %v8141_v11 }
 0x144   : > { %v8150_v33 = vpop.permute.xlu0 %8149  ;;  %v8157_v59 = vunpack.i.h.bf16 %v8155_v9  ;;  %v8156_v46 = vunpack.i.l.bf16 %v8155_v9 }
 0x145   : > { %v8152_v45 = vunpack.i.h.bf16 %v8150_v33  ;;  %v8151_v42 = vunpack.i.l.bf16 %v8150_v33 }
 0x146   : > { %v1937_v19 = vsel %vm1914_vm2, %v1904_v18, %v8156_v46  ;;  %v1938_v17 = vsel %vm1914_vm2, %v1905_v32, %v8157_v59 }
 0x147   : > { %v8165_v63 = vpop.permute.xlu1 %8164  ;;  %v2034_v35 = vsel %vm1914_vm2, %v2002_v34, %v8151_v42  ;;  %v2035_v6 = vsel %vm1914_vm2, %v2003_v12, %v8152_v45 }
 0x148   : > { %v8160_v28 = vpop.permute.xlu0 %8159  ;;  %v8167_v55 = vunpack.i.h.bf16 %v8165_v63  ;;  %v8166_v56 = vunpack.i.l.bf16 %v8165_v63 }
 0x149   : > { %v8162_v58 = vunpack.i.h.bf16 %v8160_v28  ;;  %v8161_v39 = vunpack.i.l.bf16 %v8160_v28 }
 0x14a   : > { %v1970_v60 = vsel %vm1947_vm3, %v1937_v19, %v8166_v56  ;;  %v1971_v30 = vsel %vm1947_vm3, %v1938_v17, %v8167_v55 }
 0x14b   : > { %v8175_v5 = vpop.permute.xlu1 %8174  ;;  %v2066_v14 = vsel %vm1947_vm3, %v2034_v35, %v8161_v39  ;;  %v2067_v31 = vsel %vm1947_vm3, %v2035_v6, %v8162_v58  ;;  %v2109_v13 = vpack.c.bf16 %v1971_v30, %v1970_v60 }
 0x14c   : > { %v8170_v27 = vpop.permute.xlu0 %8169  ;;  %v2110_v61 = vpack.c.bf16 %v2067_v31, %v2066_v14  ;;  %v8177_v53 = vunpack.i.h.bf16 %v8175_v5  ;;  %v8176_v54 = vunpack.i.l.bf16 %v8175_v5 }
 0x14d   : > { %v8172_v16 = vunpack.i.h.bf16 %v8170_v27  ;;  %v8171_v41 = vunpack.i.l.bf16 %v8170_v27 }
 0x14e   : > { %2443 = vmatprep.mubr.bf16.mxu0 %v2110_v61  ;;  %v1907_v11 = vsel %vm736_vm0, %v9924_v8, %v8177_v53  ;;  %v1906_v33 = vsel %vm736_vm0, %v9922_v15, %v8176_v54 }
 0x14f   : > { %2444 = vmatmul.mubr.bf16.gmra.mrb[44].mxu0 %v2109_v13  ;;  %v8185_v47 = vpop.permute.xlu1 %8184  ;;  %v2005_v45 = vsel %vm736_vm0, %v9900_v25, %v8172_v16  ;;  %v2004_v42 = vsel %vm736_vm0, %v9960_v43, %v8171_v41  ;;  %v12730_v41 = vld [vmem:[#allocation29_spill] sm:$0xff] }
 0x150   : > { %v8180_v4 = vpop.permute.xlu0 %8179  ;;  %v8187_v49 = vunpack.i.h.bf16 %v8185_v47  ;;  %v8186_v44 = vunpack.i.l.bf16 %v8185_v47  ;;  %v10264_v46 = vpop.f32.mrb[8].mxu1 }
 0x151   : > { %v8182_v9 = vunpack.i.h.bf16 %v8180_v4  ;;  %v8181_v48 = vunpack.i.l.bf16 %v8180_v4  ;;  %v10270_v18 = vpop.f32.mrb[9].mxu1 }
 0x152   : > { %v1939_v8 = vsel %vm1914_vm2, %v1906_v33, %v8186_v44  ;;  %v1940_v15 = vsel %vm1914_vm2, %v1907_v11, %v8187_v49  ;;  %v10274_v12 = vpop.f32.mrb[10].mxu1 }
 0x153   : > { %v8195_v59 = vpop.permute.xlu1 %8194  ;;  %v2036_v34 = vsel %vm1914_vm2, %v2004_v42, %v8181_v48  ;;  %v2037_v25 = vsel %vm1914_vm2, %v2005_v45, %v8182_v9  ;;  %v10280_v55 = vpop.f32.mrb[11].mxu1 }
 0x154   : > { %v8190_v22 = vpop.permute.xlu0 %8189  ;;  %v8197_v32 = vunpack.i.h.bf16 %v8195_v59  ;;  %v8196_v37 = vunpack.i.l.bf16 %v8195_v59 }
 0x155   : > { %v8192_v63 = vunpack.i.h.bf16 %v8190_v22  ;;  %v8191_v3 = vunpack.i.l.bf16 %v8190_v22 }
 0x156   : > { %v1972_v28 = vsel %vm1947_vm3, %v1939_v8, %v8196_v37  ;;  %v1973_v43 = vsel %vm1947_vm3, %v1940_v15, %v8197_v32 }
 0x157   : > { %v8205_v56 = vpop.permute.xlu1 %8204  ;;  %v2068_v58 = vsel %vm1947_vm3, %v2036_v34, %v8191_v3  ;;  %v2069_v39 = vsel %vm1947_vm3, %v2037_v25, %v8192_v63  ;;  %v2112_v19 = vpack.c.bf16 %v1973_v43, %v1972_v28 }
 0x158   : > { %v8200_v17 = vpop.permute.xlu0 %8199  ;;  %v2113_v35 = vpack.c.bf16 %v2069_v39, %v2068_v58  ;;  %v8207_v6 = vunpack.i.h.bf16 %v8205_v56  ;;  %v8206_v60 = vunpack.i.l.bf16 %v8205_v56 }
 0x159   : > { %v8202_v5 = vunpack.i.h.bf16 %v8200_v17  ;;  %v8201_v14 = vunpack.i.l.bf16 %v8200_v17 }
 0x15a   : > { %2451 = vmatprep.mubr.bf16.mxu0 %v2113_v35  ;;  %v1909_v54 = vsel %vm736_vm0, %v9972_v7, %v8207_v6  ;;  %v1908_v47 = vsel %vm736_vm0, %v9970_v40, %v8206_v60 }
 0x15b   : > { %2452 = vmatmul.mubr.bf16.gmra.mrb[48].mxu0 %v2112_v19  ;;  %v8215_v30 = vpop.permute.xlu1 %8214  ;;  %v2007_v4 = vsel %vm736_vm0, %v12730_v41, %v8202_v5  ;;  %v2006_v49 = vsel %vm736_vm0, %v10022_v1, %v8201_v14 }
 0x15c   : > { %v8210_v31 = vpop.permute.xlu0 %8209  ;;  %v8217_v13 = vunpack.i.h.bf16 %v8215_v30  ;;  %v8216_v27 = vunpack.i.l.bf16 %v8215_v30  ;;  %v10304_v30 = vpop.f32.mrb[12].mxu1 }
 0x15d   : > { %v8212_v61 = vunpack.i.h.bf16 %v8210_v31  ;;  %v8211_v53 = vunpack.i.l.bf16 %v8210_v31 }
 0x15e   : > { %v1941_v59 = vsel %vm1914_vm2, %v1908_v47, %v8216_v27  ;;  %v1942_v45 = vsel %vm1914_vm2, %v1909_v54, %v8217_v13 }
 0x15f   : > { %v8225_v16 = vpop.permute.xlu1 %8224  ;;  %v2038_v7 = vsel %vm1914_vm2, %v2006_v49, %v8211_v53  ;;  %v2039_v40 = vsel %vm1914_vm2, %v2007_v4, %v8212_v61  ;;  %v10310_v61 = vpop.f32.mrb[13].mxu1 }
 0x160   : > { %v8220_v44 = vpop.permute.xlu0 %8219  ;;  %v8227_v9 = vunpack.i.h.bf16 %v8225_v16  ;;  %v8226_v48 = vunpack.i.l.bf16 %v8225_v16  ;;  %v10314_v47 = vpop.f32.mrb[14].mxu1 }
 0x161   : > { %v8222_v11 = vunpack.i.h.bf16 %v8220_v44  ;;  %v8221_v33 = vunpack.i.l.bf16 %v8220_v44  ;;  %v10320_v4 = vpop.f32.mrb[15].mxu1 }
 0x162   : > { %v1974_v42 = vsel %vm1947_vm3, %v1941_v59, %v8226_v48  ;;  %v1975_v22 = vsel %vm1947_vm3, %v1942_v45, %v8227_v9 }
 0x163   : > { %v8235_v32 = vpop.permute.xlu1 %8234  ;;  %v2070_v1 = vsel %vm1947_vm3, %v2038_v7, %v8221_v33  ;;  %v2071_v37 = vsel %vm1947_vm3, %v2039_v40, %v8222_v11  ;;  %v2115_v63 = vpack.c.bf16 %v1975_v22, %v1974_v42 }
 0x164   : > { %v8230_v3 = vpop.permute.xlu0 %8229  ;;  %v2116_v8 = vpack.c.bf16 %v2071_v37, %v2070_v1  ;;  %v8237_v15 = vunpack.i.h.bf16 %v8235_v32  ;;  %v8236_v34 = vunpack.i.l.bf16 %v8235_v32 }
 0x165   : > { %v8232_v28 = vunpack.i.h.bf16 %v8230_v3  ;;  %v8231_v43 = vunpack.i.l.bf16 %v8230_v3 }
 0x166   : > { %2459 = vmatprep.mubr.bf16.mxu0 %v2116_v8  ;;  %v1911_v35 = vsel %vm736_vm0, %v10026_v21, %v8237_v15  ;;  %v1910_v6 = vsel %vm736_vm0, %v10024_v62, %v8236_v34 }
 0x167   : > { %2460 = vmatmul.mubr.bf16.gmra.mrb[52].mxu0 %v2115_v63  ;;  %v8245_v25 = vpop.permute.xlu1 %8244  ;;  %v2009_v5 = vsel %vm736_vm0, %v9694_v26, %v8232_v28  ;;  %v2008_v14 = vsel %vm736_vm0, %v10006_v0, %v8231_v43 }
 0x168   : > { %v8240_v56 = vpop.permute.xlu0 %8239  ;;  %v8247_v58 = vunpack.i.h.bf16 %v8245_v25  ;;  %v8246_v39 = vunpack.i.l.bf16 %v8245_v25 }
 0x169   : > { %v8242_v19 = vunpack.i.h.bf16 %v8240_v56  ;;  %v8241_v17 = vunpack.i.l.bf16 %v8240_v56 }
 0x16a   : > { %v1943_v21 = vsel %vm1914_vm2, %v1910_v6, %v8246_v39  ;;  %v1944_v62 = vsel %vm1914_vm2, %v1911_v35, %v8247_v58 }
 0x16b   : > { %v8255_v60 = vpop.permute.xlu1 %8254  ;;  %v2040_v16 = vsel %vm1914_vm2, %v2008_v14, %v8241_v17  ;;  %v2041_v26 = vsel %vm1914_vm2, %v2009_v5, %v8242_v19 }
 0x16c   : > { %v8250_v31 = vpop.permute.xlu0 %8249  ;;  %v8257_v13 = vunpack.i.h.bf16 %v8255_v60  ;;  %v8256_v27 = vunpack.i.l.bf16 %v8255_v60 }
 0x16d   : > { %v8252_v53 = vunpack.i.h.bf16 %v8250_v31  ;;  %v8251_v54 = vunpack.i.l.bf16 %v8250_v31 }
 0x16e   : > { %v1976_v41 = vsel %vm1947_vm3, %v1943_v21, %v8256_v27  ;;  %v1977_v0 = vsel %vm1947_vm3, %v1944_v62, %v8257_v13 }
 0x16f   : > { %v8265_v49 = vpop.permute.xlu1 %8264  ;;  %v2072_v44 = vsel %vm1947_vm3, %v2040_v16, %v8251_v54  ;;  %v2073_v9 = vsel %vm1947_vm3, %v2041_v26, %v8252_v53  ;;  %v2118_v48 = vpack.c.bf16 %v1977_v0, %v1976_v41  ;;  %v10359_v41 = vld [vmem:[%s12635_s6] ss:$0 sm:$0xff] }
 0x170   : > { %v8260_v11 = vpop.permute.xlu0 %8259  ;;  %v2119_v33 = vpack.c.bf16 %v2073_v9, %v2072_v44  ;;  %v8267_v59 = vunpack.i.h.bf16 %v8265_v49  ;;  %v8266_v45 = vunpack.i.l.bf16 %v8265_v49 }
 0x171   : > { %v8262_v40 = vunpack.i.h.bf16 %v8260_v11  ;;  %v8261_v42 = vunpack.i.l.bf16 %v8260_v11 }
 0x172   : > { %2467 = vmatprep.mubr.bf16.mxu0 %v2119_v33  ;;  %v1913_v3 = vsel %vm736_vm0, %v10079_v10, %v8267_v59  ;;  %v1912_v8 = vsel %vm736_vm0, %v10077_v24, %v8266_v45 }
 0x173   : > { %2468 = vmatmul.mubr.bf16.gmra.mrb[56].mxu0 %v2118_v48  ;;  %v8275_v7 = vpop.permute.xlu1 %8274  ;;  %v2011_v34 = vsel %vm736_vm0, %v9712_v51, %v8262_v40  ;;  %v2010_v25 = vsel %vm736_vm0, %v9710_v50, %v8261_v42 }
 0x174   : > { %v8270_v22 = vpop.permute.xlu0 %8269  ;;  %v8277_v32 = vunpack.i.h.bf16 %v8275_v7  ;;  %v8276_v1 = vunpack.i.l.bf16 %v8275_v7 }
 0x175   : > { %v8272_v37 = vunpack.i.h.bf16 %v8270_v22  ;;  %v8271_v63 = vunpack.i.l.bf16 %v8270_v22 }
 0x176   : > { %v1945_v19 = vsel %vm1914_vm2, %v1912_v8, %v8276_v1  ;;  %v1946_v17 = vsel %vm1914_vm2, %v1913_v3, %v8277_v32 }
 0x177   : > { %v8285_v15 = vpop.permute.xlu1 %8284  ;;  %v2042_v10 = vsel %vm1914_vm2, %v2010_v25, %v8271_v63  ;;  %v2043_v24 = vsel %vm1914_vm2, %v2011_v34, %v8272_v37 }
 0x178   : > { %v8280_v28 = vpop.permute.xlu0 %8279  ;;  %v8287_v43 = vunpack.i.h.bf16 %v8285_v15  ;;  %v8286_v56 = vunpack.i.l.bf16 %v8285_v15 }
 0x179   : > { %v8282_v58 = vunpack.i.h.bf16 %v8280_v28  ;;  %v8281_v39 = vunpack.i.l.bf16 %v8280_v28 }
 0x17a   : > { %v1978_v35 = vsel %vm1947_vm3, %v1945_v19, %v8286_v56  ;;  %v1979_v51 = vsel %vm1947_vm3, %v1946_v17, %v8287_v43 }
 0x17b   : > { %v2074_v6 = vsel %vm1947_vm3, %v2042_v10, %v8281_v39  ;;  %v2075_v50 = vsel %vm1947_vm3, %v2043_v24, %v8282_v58  ;;  %v2121_v60 = vpack.c.bf16 %v1979_v51, %v1978_v35 }
 0x17c   : > { %v2122_v5 = vpack.c.bf16 %v2075_v50, %v2074_v6 }
 0x17e   : > { %2475 = vmatprep.mubr.bf16.mxu0 %v2122_v5 }
 0x17f   : > { %2476 = vmatmul.mubr.bf16.gmra.mrb[60].mxu0 %v2121_v60 }
 0x180   : > { %v10340_v14 = vpop.f32.mrb[16].mxu1 }
 0x181   : > { %v10342_v31 = vpop.f32.mrb[17].mxu1 }
 0x182   : > { %v10344_v13 = vpop.f32.mrb[18].mxu1 }
 0x183   : > { %v10346_v27 = vpop.f32.mrb[19].mxu1 }
 0x19a   : > { %v10348_v53 = vpop.f32.mrb[20].mxu1 }
 0x19b   : > { %v10350_v54 = vpop.f32.mrb[21].mxu1 }
 0x19c   : > { %v10352_v21 = vpop.f32.mrb[22].mxu1 }
 0x19d   : > { %v10354_v16 = vpop.f32.mrb[23].mxu1 }
 0x19e   : > { %v7138_v62 = vpop.f32.mrb[0].mxu0 }
 0x19f   : > { %v7139_v26 = vpop.f32.mrb[1].mxu0 }
 0x1a0   : > { %v7140_v0 = vadd.f32 %v7139_v26, %v7138_v62  ;;  %v7141_v49 = vpop.f32.mrb[2].mxu0 }
 0x1a1   : > { %v7142_v44 = vpop.f32.mrb[3].mxu0 }
 0x1a2   : > { %v7143_v9 = vadd.f32 %v7142_v44, %v7141_v49  ;;  %v2358_v48 = vadd.f32 %v7140_v0, %v10359_v41 }
 0x1a4   : > { %v2519_v11 = vadd.f32 %v10190_v29, %v2358_v48  ;;  %v2361_v33 = vadd.f32 %v7143_v9, %v10359_v41 }
 0x1a6   : > { %v2677_v59 = vmul.f32 0.01, %v2519_v11  ;;  %v2522_v45 = vadd.f32 %v10196_v38, %v2361_v33  ;;  %vm2645_vm4 = vcmp.ge.f32.partialorder %v2519_v11, 0.0 }
 0x1a8   : > { %vm2646_vm5 = vcmp.ge.f32.partialorder %v2522_v45, 0.0  ;;  %v2678_v7 = vmul.f32 0.01, %v2522_v45  ;;  %v10365_v40 = vsel %vm2645_vm4, %v2519_v11, %v2677_v59 }
 0x1aa   : > { %v10367_v42 = vsel %vm2646_vm5, %v2522_v45, %v2678_v7  ;;  %v7144_v22 = vpop.f32.mrb[4].mxu0 }
 0x1ab   : > { %v2741_v32 = vpack.c.bf16 %v10367_v42, %v10365_v40  ;;  %v7145_v1 = vpop.f32.mrb[5].mxu0 }
 0x1ac   : > { %v7146_v37 = vadd.f32 %v7145_v1, %v7144_v22  ;;  %v7147_v63 = vpop.f32.mrb[6].mxu0 }
 0x1ad   : > { %v7148_v29 = vpop.f32.mrb[7].mxu0  ;;  %7527 = vmatprep.mubr.msk.bf16.mxu1 %vm736_vm0, %v2741_v32 }
 0x1ae   : > { %v2366_v3 = vadd.f32 %v7146_v37, %v10359_v41  ;;  %v7149_v38 = vadd.f32 %v7148_v29, %v7147_v63 }
 0x1af   : > { %v10376_v28 = vpop.f32.mrb[24].mxu1 }
 0x1b0   : > { %v2527_v8 = vadd.f32 %v10184_v20, %v2366_v3  ;;  %v2369_v15 = vadd.f32 %v7149_v38, %v10359_v41  ;;  %v10378_v56 = vpop.f32.mrb[25].mxu1 }
 0x1b1   : > { %v10380_v58 = vpop.f32.mrb[26].mxu1 }
 0x1b2   : > { %v2679_v34 = vmul.f32 0.01, %v2527_v8  ;;  %v2530_v25 = vadd.f32 %v10194_v23, %v2369_v15  ;;  %vm2647_vm6 = vcmp.ge.f32.partialorder %v2527_v8, 0.0  ;;  %v10386_v20 = vpop.f32.mrb[27].mxu1 }
 0x1b4   : > { %vm2648_vm7 = vcmp.ge.f32.partialorder %v2530_v25, 0.0  ;;  %v2680_v43 = vmul.f32 0.01, %v2530_v25  ;;  %v10382_v39 = vsel %vm2647_vm6, %v2527_v8, %v2679_v34 }
 0x1b6   : > { %v10384_v19 = vsel %vm2648_vm7, %v2530_v25, %v2680_v43  ;;  %v7150_v17 = vpop.f32.mrb[8].mxu0 }
 0x1b7   : > { %v2742_v10 = vpack.c.bf16 %v10384_v19, %v10382_v39  ;;  %v7151_v23 = vpop.f32.mrb[9].mxu0 }
 0x1b8   : > { %v7152_v24 = vadd.f32 %v7151_v23, %v7150_v17  ;;  %v7153_v35 = vpop.f32.mrb[10].mxu0 }
 0x1b9   : > { %v7154_v51 = vpop.f32.mrb[11].mxu0  ;;  %7528 = vmatmul.mubr.msk.bf16.vlgmr.msra.gmra.mrb[32].mxu1 %vm736_vm0, %v2742_v10 }
 0x1ba   : > { %v7155_v6 = vadd.f32 %v7154_v51, %v7153_v35  ;;  %v2374_v50 = vadd.f32 %v7152_v24, %v10359_v41 }
 0x1bc   : > { %v2535_v60 = vadd.f32 %v10238_v36, %v2374_v50  ;;  %v2377_v5 = vadd.f32 %v7155_v6, %v10359_v41 }
 0x1be   : > { %v2681_v62 = vmul.f32 0.01, %v2535_v60  ;;  %v2538_v26 = vadd.f32 %v10242_v57, %v2377_v5  ;;  %vm2649_vm8 = vcmp.ge.f32.partialorder %v2535_v60, 0.0 }
 0x1c0   : > { %vm2650_vm9 = vcmp.ge.f32.partialorder %v2538_v26, 0.0  ;;  %v2682_v0 = vmul.f32 0.01, %v2538_v26  ;;  %v10395_v49 = vsel %vm2649_vm8, %v2535_v60, %v2681_v62 }
 0x1c2   : > { %v10397_v44 = vsel %vm2650_vm9, %v2538_v26, %v2682_v0  ;;  %v7156_v9 = vpop.f32.mrb[12].mxu0 }
 0x1c3   : > { %v2743_v48 = vpack.c.bf16 %v10397_v44, %v10395_v49  ;;  %v7157_v11 = vpop.f32.mrb[13].mxu0 }
 0x1c4   : > { %v7158_v33 = vadd.f32 %v7157_v11, %v7156_v9  ;;  %v7159_v59 = vpop.f32.mrb[14].mxu0 }
 0x1c5   : > { %v7160_v36 = vpop.f32.mrb[15].mxu0  ;;  %7531 = vmatprep.mubr.msk.bf16.mxu1 %vm736_vm0, %v2743_v48 }
 0x1c6   : > { %v2382_v45 = vadd.f32 %v7158_v33, %v10359_v41  ;;  %v7161_v57 = vadd.f32 %v7160_v36, %v7159_v59 }
 0x1c7   : > { %v10406_v37 = vpop.f32.mrb[28].mxu1 }
 0x1c8   : > { %v2543_v7 = vadd.f32 %v10234_v52, %v2382_v45  ;;  %v2385_v22 = vadd.f32 %v7161_v57, %v10359_v41  ;;  %v10408_v63 = vpop.f32.mrb[29].mxu1 }
 0x1c9   : > { %v10410_v3 = vpop.f32.mrb[30].mxu1 }
 0x1ca   : > { %v2683_v32 = vmul.f32 0.01, %v2543_v7  ;;  %v2546_v1 = vadd.f32 %v10240_v2, %v2385_v22  ;;  %vm2651_vm10 = vcmp.ge.f32.partialorder %v2543_v7, 0.0  ;;  %v10412_v38 = vpop.f32.mrb[31].mxu1 }
 0x1cc   : > { %vm2652_vm11 = vcmp.ge.f32.partialorder %v2546_v1, 0.0  ;;  %v2684_v29 = vmul.f32 0.01, %v2546_v1  ;;  %v10414_v15 = vsel %vm2651_vm10, %v2543_v7, %v2683_v32 }
 0x1ce   : > { %v7162_v8 = vpop.f32.mrb[16].mxu0  ;;  %v10416_v52 = vsel %vm2652_vm11, %v2546_v1, %v2684_v29 }
 0x1cf   : > { %v7163_v34 = vpop.f32.mrb[17].mxu0  ;;  %v2744_v2 = vpack.c.bf16 %v10416_v52, %v10414_v15 }
 0x1d0   : > { %v7164_v25 = vadd.f32 %v7163_v34, %v7162_v8  ;;  %v7165_v43 = vpop.f32.mrb[18].mxu0 }
 0x1d1   : > { %v7166_v17 = vpop.f32.mrb[19].mxu0  ;;  %7532 = vmatmul.mubr.msk.bf16.gmra.mrb[36].mxu1 %vm736_vm0, %v2744_v2 }
 0x1d2   : > { %v7167_v10 = vadd.f32 %v7166_v17, %v7165_v43  ;;  %v2390_v23 = vadd.f32 %v7164_v25, %v10359_v41 }
 0x1d4   : > { %v2551_v24 = vadd.f32 %v10270_v18, %v2390_v23  ;;  %v2393_v35 = vadd.f32 %v7167_v10, %v10359_v41 }
 0x1d6   : > { %v2685_v51 = vmul.f32 0.01, %v2551_v24  ;;  %v2554_v6 = vadd.f32 %v10280_v55, %v2393_v35  ;;  %vm2653_vm12 = vcmp.ge.f32.partialorder %v2551_v24, 0.0 }
 0x1d8   : > { %vm2654_vm13 = vcmp.ge.f32.partialorder %v2554_v6, 0.0  ;;  %v2686_v50 = vmul.f32 0.01, %v2554_v6  ;;  %v10425_v60 = vsel %vm2653_vm12, %v2551_v24, %v2685_v51 }
 0x1da   : > { %v10427_v5 = vsel %vm2654_vm13, %v2554_v6, %v2686_v50  ;;  %v7168_v62 = vpop.f32.mrb[20].mxu0 }
 0x1db   : > { %v2745_v26 = vpack.c.bf16 %v10427_v5, %v10425_v60  ;;  %v7169_v0 = vpop.f32.mrb[21].mxu0 }
 0x1dc   : > { %v7170_v9 = vadd.f32 %v7169_v0, %v7168_v62  ;;  %v7171_v48 = vpop.f32.mrb[22].mxu0 }
 0x1dd   : > { %v7172_v18 = vpop.f32.mrb[23].mxu0  ;;  %7535 = vmatprep.mubr.msk.bf16.mxu1 %vm736_vm0, %v2745_v26 }
 0x1de   : > { %v2398_v11 = vadd.f32 %v7170_v9, %v10359_v41  ;;  %v7173_v55 = vadd.f32 %v7172_v18, %v7171_v48 }
 0x1e0   : > { %v2559_v33 = vadd.f32 %v10264_v46, %v2398_v11  ;;  %v2401_v59 = vadd.f32 %v7173_v55, %v10359_v41 }
 0x1e2   : > { %v2687_v36 = vmul.f32 0.01, %v2559_v33  ;;  %v2562_v45 = vadd.f32 %v10274_v12, %v2401_v59  ;;  %vm2655_vm14 = vcmp.ge.f32.partialorder %v2559_v33, 0.0 }
 0x1e4   : > { %vm2656_vm15 = vcmp.ge.f32.partialorder %v2562_v45, 0.0  ;;  %v2688_v57 = vmul.f32 0.01, %v2562_v45  ;;  %v10436_v22 = vsel %vm2655_vm14, %v2559_v33, %v2687_v36 }
 0x1e6   : > { %v7174_v7 = vpop.f32.mrb[24].mxu0  ;;  %v10438_v32 = vsel %vm2656_vm15, %v2562_v45, %v2688_v57 }
 0x1e7   : > { %v7175_v1 = vpop.f32.mrb[25].mxu0  ;;  %v2746_v29 = vpack.c.bf16 %v10438_v32, %v10436_v22 }
 0x1e8   : > { %v7176_v8 = vadd.f32 %v7175_v1, %v7174_v7  ;;  %v7177_v34 = vpop.f32.mrb[26].mxu0 }
 0x1e9   : > { %v7178_v46 = vpop.f32.mrb[27].mxu0  ;;  %7536 = vmatmul.mubr.msk.bf16.gmra.mrb[40].mxu1 %vm736_vm0, %v2746_v29 }
 0x1ea   : > { %v7179_v2 = vadd.f32 %v7178_v46, %v7177_v34  ;;  %v2406_v12 = vadd.f32 %v7176_v8, %v10359_v41 }
 0x1ec   : > { %v2567_v25 = vadd.f32 %v10310_v61, %v2406_v12  ;;  %v2409_v43 = vadd.f32 %v7179_v2, %v10359_v41 }
 0x1ee   : > { %v2689_v17 = vmul.f32 0.01, %v2567_v25  ;;  %v2570_v10 = vadd.f32 %v10320_v4, %v2409_v43  ;;  %vm2657_vm1 = vcmp.ge.f32.partialorder %v2567_v25, 0.0 }
 0x1f0   : > { %vm2658_vm4 = vcmp.ge.f32.partialorder %v2570_v10, 0.0  ;;  %v2690_v23 = vmul.f32 0.01, %v2570_v10  ;;  %v10447_v24 = vsel %vm2657_vm1, %v2567_v25, %v2689_v17 }
 0x1f2   : > { %v10449_v35 = vsel %vm2658_vm4, %v2570_v10, %v2690_v23  ;;  %v7180_v51 = vpop.f32.mrb[28].mxu0  ;;  %v8788_v23 = vld [vmem:[%s608_s23] sm:$0xff]  }
 0x1f3   : > { %v2747_v6 = vpack.c.bf16 %v10449_v35, %v10447_v24  ;;  %v7181_v50 = vpop.f32.mrb[29].mxu0  ;;  %7559 = vmatprep.subr.bf16.mxu1 %v8788_v23 }
 0x1f4   : > { %v7182_v62 = vadd.f32 %v7181_v50, %v7180_v51  ;;  %v7183_v26 = vpop.f32.mrb[30].mxu0  ;;  %7560 = vmatpush3.bf16.msra.mxu1 %v8788_v23 }
 0x1f5   : > { %v7184_v61 = vpop.f32.mrb[31].mxu0  ;;  %7539 = vmatprep.mubr.msk.bf16.mxu1 %vm736_vm0, %v2747_v6 }
 0x1f6   : > { %v2414_v0 = vadd.f32 %v7182_v62, %v10359_v41  ;;  %v7185_v4 = vadd.f32 %v7184_v61, %v7183_v26  ;;  %v8789_v26 = vld [vmem:[%s608_s23 + $0x8] sm:$0xff]   ;;  %s7121_s23 = sshll.u32 %s9231_s0, 12 }
 0x1f7   : > { %7561 = vmatprep.subr.bf16.mxu1 %v8789_v26  ;;  %s12577_s24 = scalar_lea.hbm %s12774_s21, %s7121_s23 }
 0x1f8   : > { %v2575_v9 = vadd.f32 %v10304_v30, %v2414_v0  ;;  %v2417_v48 = vadd.f32 %v7185_v4, %v10359_v41  ;;  %7562 = vmatpush3.bf16.msra.mxu1 %v8789_v26 }
 0x1fa   : > { %v2691_v18 = vmul.f32 0.01, %v2575_v9  ;;  %v2578_v11 = vadd.f32 %v10314_v47, %v2417_v48  ;;  %vm2659_vm5 = vcmp.ge.f32.partialorder %v2575_v9, 0.0 }
 0x1fc   : > { %vm2660_vm6 = vcmp.ge.f32.partialorder %v2578_v11, 0.0  ;;  %v2692_v55 = vmul.f32 0.01, %v2578_v11  ;;  %v10458_v59 = vsel %vm2659_vm5, %v2575_v9, %v2691_v18 }
 0x1fe   : > { %v7186_v33 = vpop.f32.mrb[32].mxu0  ;;  %v10460_v36 = vsel %vm2660_vm6, %v2578_v11, %v2692_v55 }
 0x1ff   : > { %v7187_v45 = vpop.f32.mrb[33].mxu0  ;;  %v2748_v57 = vpack.c.bf16 %v10460_v36, %v10458_v59 }
 0x200   : > { %v7188_v7 = vadd.f32 %v7187_v45, %v7186_v33  ;;  %v7189_v30 = vpop.f32.mrb[34].mxu0 }
 0x201   : > { %v7190_v1 = vpop.f32.mrb[35].mxu0  ;;  %7540 = vmatmul.mubr.msk.bf16.gmra.mrb[44].mxu1 %vm736_vm0, %v2748_v57 }
 0x202   : > { %v7191_v29 = vadd.f32 %v7190_v1, %v7189_v30  ;;  %v2422_v47 = vadd.f32 %v7188_v7, %v10359_v41 }
 0x204   : > { %v2583_v8 = vadd.f32 %v10342_v31, %v2422_v47  ;;  %v2425_v34 = vadd.f32 %v7191_v29, %v10359_v41 }
 0x206   : > { %v2693_v46 = vmul.f32 0.01, %v2583_v8  ;;  %v2586_v2 = vadd.f32 %v10346_v27, %v2425_v34  ;;  %vm2661_vm7 = vcmp.ge.f32.partialorder %v2583_v8, 0.0 }
 0x208   : > { %vm2662_vm8 = vcmp.ge.f32.partialorder %v2586_v2, 0.0  ;;  %v2694_v12 = vmul.f32 0.01, %v2586_v2  ;;  %v10470_v25 = vsel %vm2661_vm7, %v2583_v8, %v2693_v46 }
 0x209   : > { %12731 = vst [vmem:[#allocation14_spill] sm:$0xff] %v10470_v25 }
 0x20a   : > { %v10472_v43 = vsel %vm2662_vm8, %v2586_v2, %v2694_v12  ;;  %v7192_v17 = vpop.f32.mrb[36].mxu0 }
 0x20b   : > { %12732 = vst [vmem:[#allocation16_spill] sm:$0xff] %v10472_v43  ;;  %v2749_v31 = vpack.c.bf16 %v10472_v43, %v10470_v25  ;;  %v7193_v10 = vpop.f32.mrb[37].mxu0 }
 0x20c   : > { %v7194_v51 = vadd.f32 %v7193_v10, %v7192_v17  ;;  %v7195_v27 = vpop.f32.mrb[38].mxu0 }
 0x20d   : > { %v7196_v6 = vpop.f32.mrb[39].mxu0  ;;  %7543 = vmatprep.mubr.msk.bf16.mxu1 %vm736_vm0, %v2749_v31 }
 0x20e   : > { %v2430_v50 = vadd.f32 %v7194_v51, %v10359_v41  ;;  %v7197_v62 = vadd.f32 %v7196_v6, %v7195_v27 }
 0x210   : > { %v2591_v61 = vadd.f32 %v10340_v14, %v2430_v50  ;;  %v2433_v0 = vadd.f32 %v7197_v62, %v10359_v41 }
 0x212   : > { %v2695_v4 = vmul.f32 0.01, %v2591_v61  ;;  %v2594_v9 = vadd.f32 %v10344_v13, %v2433_v0  ;;  %vm2663_vm9 = vcmp.ge.f32.partialorder %v2591_v61, 0.0 }
 0x214   : > { %vm2664_vm10 = vcmp.ge.f32.partialorder %v2594_v9, 0.0  ;;  %v2696_v48 = vmul.f32 0.01, %v2594_v9  ;;  %v10484_v11 = vsel %vm2663_vm9, %v2591_v61, %v2695_v4 }
 0x216   : > { %v7198_v18 = vpop.f32.mrb[40].mxu0  ;;  %v10486_v55 = vsel %vm2664_vm10, %v2594_v9, %v2696_v48  ;;  %vm3262_vm10 = vcmask 97280  }
 0x217   : > { %12733 = vst [vmem:[#allocation15_spill] sm:$0xff] %v10486_v55  ;;  %v7199_v33 = vpop.f32.mrb[41].mxu0  ;;  %v2750_v45 = vpack.c.bf16 %v10486_v55, %v10484_v11 }
 0x218   : > { %v7200_v14 = vadd.f32 %v7199_v33, %v7198_v18  ;;  %v7201_v57 = vpop.f32.mrb[42].mxu0 }
 0x219   : > { %v7202_v7 = vpop.f32.mrb[43].mxu0  ;;  %7544 = vmatmul.mubr.msk.bf16.gmra.mrb[48].mxu1 %vm736_vm0, %v2750_v45 }
 0x21a   : > { %v7203_v30 = vadd.f32 %v7202_v7, %v7201_v57  ;;  %v2438_v13 = vadd.f32 %v7200_v14, %v10359_v41 }
 0x21c   : > { %v2599_v1 = vadd.f32 %v10350_v54, %v2438_v13  ;;  %v2441_v29 = vadd.f32 %v7203_v30, %v10359_v41 }
 0x21e   : > { %v2697_v47 = vmul.f32 0.01, %v2599_v1  ;;  %v2602_v8 = vadd.f32 %v10354_v16, %v2441_v29  ;;  %vm2665_vm11 = vcmp.ge.f32.partialorder %v2599_v1, 0.0 }
 0x220   : > { %vm2666_vm12 = vcmp.ge.f32.partialorder %v2602_v8, 0.0  ;;  %v2698_v34 = vmul.f32 0.01, %v2602_v8  ;;  %v10495_v46 = vsel %vm2665_vm11, %v2599_v1, %v2697_v47  ;;  %vm3526_vm11 = vcmask 1045504  }
 0x221   : > { %12734 = vst [vmem:[#allocation13_spill] sm:$0xff] %v10495_v46 }
 0x222   : > { %v10497_v2 = vsel %vm2666_vm12, %v2602_v8, %v2698_v34  ;;  %v7204_v12 = vpop.f32.mrb[44].mxu0  ;;  %vm3789_vm12 = vcmask 1043456  }
 0x223   : > { %12735 = vst [vmem:[#allocation17_spill] sm:$0xff] %v10497_v2  ;;  %v2751_v17 = vpack.c.bf16 %v10497_v2, %v10495_v46  ;;  %v7205_v31 = vpop.f32.mrb[45].mxu0 }
 0x224   : > { %v7206_v10 = vadd.f32 %v7205_v31, %v7204_v12  ;;  %v7207_v23 = vpop.f32.mrb[46].mxu0 }
 0x225   : > { %v7208_v54 = vpop.f32.mrb[47].mxu0  ;;  %7547 = vmatprep.mubr.msk.bf16.mxu1 %vm736_vm0, %v2751_v17 }
 0x226   : > { %v2446_v51 = vadd.f32 %v7206_v10, %v10359_v41  ;;  %v7209_v16 = vadd.f32 %v7208_v54, %v7207_v23 }
 0x228   : > { %v2607_v27 = vadd.f32 %v10348_v53, %v2446_v51  ;;  %v2449_v6 = vadd.f32 %v7209_v16, %v10359_v41 }
 0x22a   : > { %v2699_v50 = vmul.f32 0.01, %v2607_v27  ;;  %v2610_v62 = vadd.f32 %v10352_v21, %v2449_v6  ;;  %vm2667_vm13 = vcmp.ge.f32.partialorder %v2607_v27, 0.0 }
 0x22c   : > { %vm2668_vm14 = vcmp.ge.f32.partialorder %v2610_v62, 0.0  ;;  %v2700_v26 = vmul.f32 0.01, %v2610_v62  ;;  %v10506_v0 = vsel %vm2667_vm13, %v2607_v27, %v2699_v50  ;;  %vm9111_vm13 = vmmov 1  }
 0x22d   : > { %12736 = vst [vmem:[#allocation20_spill] sm:$0xff] %v10506_v0 }
 0x22e   : > { %v7210_v61 = vpop.f32.mrb[48].mxu0  ;;  %v10508_v4 = vsel %vm2668_vm14, %v2610_v62, %v2700_v26  ;;  %vm10682_vm14 = vmpackc.low %vm3789_vm12, %vm9111_vm13 }
 0x22f   : > { %12737 = vst [vmem:[#allocation19_spill] sm:$0xff] %v10508_v4  ;;  %v7211_v9 = vpop.f32.mrb[49].mxu0  ;;  %v2752_v48 = vpack.c.bf16 %v10508_v4, %v10506_v0 }
 0x230   : > { %v7212_v18 = vadd.f32 %v7211_v9, %v7210_v61  ;;  %v7213_v33 = vpop.f32.mrb[50].mxu0 }
 0x231   : > { %v7214_v53 = vpop.f32.mrb[51].mxu0  ;;  %7548 = vmatmul.mubr.msk.bf16.gmra.mrb[52].mxu1 %vm736_vm0, %v2752_v48 }
 0x232   : > { %v7215_v45 = vadd.f32 %v7214_v53, %v7213_v33  ;;  %v2454_v21 = vadd.f32 %v7212_v18, %v10359_v41 }
 0x234   : > { %v2615_v14 = vadd.f32 %v10378_v56, %v2454_v21  ;;  %v2457_v57 = vadd.f32 %v7215_v45, %v10359_v41 }
 0x236   : > { %v2701_v7 = vmul.f32 0.01, %v2615_v14  ;;  %v2618_v30 = vadd.f32 %v10386_v20, %v2457_v57  ;;  %vm2669_vm15 = vcmp.ge.f32.partialorder %v2615_v14, 0.0 }
 0x238   : > { %vm2670_vm1 = vcmp.ge.f32.partialorder %v2618_v30, 0.0  ;;  %v2702_v13 = vmul.f32 0.01, %v2618_v30  ;;  %v10517_v1 = vsel %vm2669_vm15, %v2615_v14, %v2701_v7 }
 0x239   : > { %12738 = vst [vmem:[#allocation18_spill] sm:$0xff] %v10517_v1 }
 0x23a   : > { %v10519_v29 = vsel %vm2670_vm1, %v2618_v30, %v2702_v13  ;;  %v7216_v47 = vpop.f32.mrb[52].mxu0 }
 0x23b   : > { %12739 = vst [vmem:[#allocation22_spill] sm:$0xff] %v10519_v29  ;;  %v2753_v8 = vpack.c.bf16 %v10519_v29, %v10517_v1  ;;  %v7217_v34 = vpop.f32.mrb[53].mxu0 }
 0x23c   : > { %v7218_v12 = vadd.f32 %v7217_v34, %v7216_v47  ;;  %v7219_v17 = vpop.f32.mrb[54].mxu0 }
 0x23d   : > { %v7220_v56 = vpop.f32.mrb[55].mxu0  ;;  %7551 = vmatprep.mubr.msk.bf16.mxu1 %vm736_vm0, %v2753_v8 }
 0x23e   : > { %v2462_v31 = vadd.f32 %v7218_v12, %v10359_v41  ;;  %v7221_v20 = vadd.f32 %v7220_v56, %v7219_v17 }
 0x240   : > { %v2623_v10 = vadd.f32 %v10376_v28, %v2462_v31  ;;  %v2465_v23 = vadd.f32 %v7221_v20, %v10359_v41 }
 0x242   : > { %v2703_v54 = vmul.f32 0.01, %v2623_v10  ;;  %v2626_v51 = vadd.f32 %v10380_v58, %v2465_v23  ;;  %vm2671_vm4 = vcmp.ge.f32.partialorder %v2623_v10, 0.0 }
 0x244   : > { %vm2672_vm5 = vcmp.ge.f32.partialorder %v2626_v51, 0.0  ;;  %v2704_v16 = vmul.f32 0.01, %v2626_v51  ;;  %v10528_v6 = vsel %vm2671_vm4, %v2623_v10, %v2703_v54 }
 0x245   : > { %12740 = vst [vmem:[#allocation24_spill] sm:$0xff] %v10528_v6 }
 0x246   : > { %v7222_v27 = vpop.f32.mrb[56].mxu0  ;;  %v10530_v50 = vsel %vm2672_vm5, %v2626_v51, %v2704_v16 }
 0x247   : > { %12741 = vst [vmem:[#allocation23_spill] sm:$0xff] %v10530_v50  ;;  %v7223_v62 = vpop.f32.mrb[57].mxu0  ;;  %v2754_v26 = vpack.c.bf16 %v10530_v50, %v10528_v6 }
 0x248   : > { %v7224_v61 = vadd.f32 %v7223_v62, %v7222_v27  ;;  %v7225_v9 = vpop.f32.mrb[58].mxu0 }
 0x249   : > { %v7226_v28 = vpop.f32.mrb[59].mxu0  ;;  %7552 = vmatmul.mubr.msk.bf16.gmra.mrb[56].mxu1 %vm736_vm0, %v2754_v26 }
 0x24a   : > { %v7227_v48 = vadd.f32 %v7226_v28, %v7225_v9  ;;  %v2470_v58 = vadd.f32 %v7224_v61, %v10359_v41 }
 0x24c   : > { %v2631_v18 = vadd.f32 %v10408_v63, %v2470_v58  ;;  %v2473_v33 = vadd.f32 %v7227_v48, %v10359_v41 }
 0x24e   : > { %v2705_v53 = vmul.f32 0.01, %v2631_v18  ;;  %v2634_v45 = vadd.f32 %v10412_v38, %v2473_v33  ;;  %vm2673_vm6 = vcmp.ge.f32.partialorder %v2631_v18, 0.0 }
 0x250   : > { %vm2674_vm7 = vcmp.ge.f32.partialorder %v2634_v45, 0.0  ;;  %v2706_v21 = vmul.f32 0.01, %v2634_v45  ;;  %v10539_v14 = vsel %vm2673_vm6, %v2631_v18, %v2705_v53 }
 0x251   : > { %12742 = vst [vmem:[#allocation21_spill] sm:$0xff] %v10539_v14 }
 0x252   : > { %v10541_v57 = vsel %vm2674_vm7, %v2634_v45, %v2706_v21  ;;  %v7228_v7 = vpop.f32.mrb[60].mxu0 }
 0x253   : > { %12743 = vst [vmem:[#allocation25_spill] sm:$0xff] %v10541_v57  ;;  %v2755_v30 = vpack.c.bf16 %v10541_v57, %v10539_v14  ;;  %v7229_v13 = vpop.f32.mrb[61].mxu0 }
 0x254   : > { %v7230_v47 = vadd.f32 %v7229_v13, %v7228_v7  ;;  %v7231_v8 = vpop.f32.mrb[62].mxu0 }
 0x255   : > { %v7232_v63 = vpop.f32.mrb[63].mxu0  ;;  %7555 = vmatprep.mubr.msk.bf16.mxu1 %vm736_vm0, %v2755_v30 }
 0x256   : > { %v2478_v34 = vadd.f32 %v7230_v47, %v10359_v41  ;;  %v7233_v38 = vadd.f32 %v7232_v63, %v7231_v8 }
 0x258   : > { %v2639_v12 = vadd.f32 %v10406_v37, %v2478_v34  ;;  %v2481_v17 = vadd.f32 %v7233_v38, %v10359_v41  ;;  %v10560_v41 = vld [vmem:[%s12637_s8] ss:$0 sm:$0xff] }
 0x25a   : > { %v2707_v56 = vmul.f32 0.01, %v2639_v12  ;;  %v2642_v31 = vadd.f32 %v10410_v3, %v2481_v17  ;;  %vm2675_vm8 = vcmp.ge.f32.partialorder %v2639_v12, 0.0 }
 0x25c   : > { %vm2676_vm9 = vcmp.ge.f32.partialorder %v2642_v31, 0.0  ;;  %v2708_v20 = vmul.f32 0.01, %v2642_v31  ;;  %v10550_v10 = vsel %vm2675_vm8, %v2639_v12, %v2707_v56 }
 0x25d   : > { %12744 = vst [vmem:[#allocation28_spill] sm:$0xff] %v10550_v10 }
 0x25e   : > { %v10552_v23 = vsel %vm2676_vm9, %v2642_v31, %v2708_v20 }
 0x25f   : > { %12745 = vst [vmem:[#allocation27_spill] sm:$0xff] %v10552_v23  ;;  %v2756_v54 = vpack.c.bf16 %v10552_v23, %v10550_v10 }
 0x261   : > { %7556 = vmatmul.mubr.msk.bf16.gmra.mrb[60].mxu1 %vm736_vm0, %v2756_v54 }
 0x28c   : > { %v7529_v51 = vpop.f32.mrb[32].mxu1 }
 0x28d   : > { %v2862_v37 = vpop.f32.mrb[33].mxu1  ;;  %v2871_v16 = vadd.f32 %v7529_v51, %v10560_v41 }
 0x28e   : > { %v7530_v3 = vpop.f32.mrb[34].mxu1  ;;  %v2863_v26 = vadd.f32 %v10560_v41, %v2862_v37 }
 0x28f   : > { %v2874_v27 = vadd.f32 %v7530_v3, %v10560_v41  ;;  %v2865_v62 = vpop.f32.mrb[35].mxu1 }
 0x290   : > { %v2866_v61 = vadd.f32 %v10560_v41, %v2865_v62 }
 0x291   : > { %v2990_v9 = vpack.c.bf16 %v2874_v27, %v2871_v16 }
 0x292   : > { %v2989_v28 = vpack.c.bf16 %v2866_v61, %v2863_v26 }
 0x294   : > { %7563 = vmatprep.mubr.msk.bf16.mxu1 %vm736_vm0, %v2989_v28 }
 0x295   : > { %7564 = vmatmul.mubr.msk.bf16.vlgmr.msra.gmra.mrb[64].mxu1 %vm736_vm0, %v2990_v9 }
 0x2a4   : > { %v7533_v48 = vpop.f32.mrb[36].mxu1 }
 0x2a5   : > { %v2878_v58 = vpop.f32.mrb[37].mxu1  ;;  %v2887_v33 = vadd.f32 %v7533_v48, %v10560_v41 }
 0x2a6   : > { %v7534_v18 = vpop.f32.mrb[38].mxu1  ;;  %v2879_v21 = vadd.f32 %v10560_v41, %v2878_v58 }
 0x2a7   : > { %v2890_v53 = vadd.f32 %v7534_v18, %v10560_v41  ;;  %v2881_v45 = vpop.f32.mrb[39].mxu1 }
 0x2a8   : > { %v2882_v7 = vadd.f32 %v10560_v41, %v2881_v45 }
 0x2a9   : > { %v2992_v30 = vpack.c.bf16 %v2890_v53, %v2887_v33 }
 0x2aa   : > { %v2991_v13 = vpack.c.bf16 %v2882_v7, %v2879_v21 }
 0x2ac   : > { %7567 = vmatprep.mubr.msk.bf16.mxu1 %vm736_vm0, %v2991_v13 }
 0x2ad   : > { %7568 = vmatmul.mubr.msk.bf16.gmra.mrb[68].mxu1 %vm736_vm0, %v2992_v30 }
 0x2bc   : > { %v7537_v47 = vpop.f32.mrb[40].mxu1 }
 0x2bd   : > { %v2894_v8 = vpop.f32.mrb[41].mxu1  ;;  %v2903_v34 = vadd.f32 %v7537_v47, %v10560_v41 }
 0x2be   : > { %v7538_v63 = vpop.f32.mrb[42].mxu1  ;;  %v2895_v17 = vadd.f32 %v10560_v41, %v2894_v8 }
 0x2bf   : > { %v2906_v38 = vadd.f32 %v7538_v63, %v10560_v41  ;;  %v2897_v12 = vpop.f32.mrb[43].mxu1 }
 0x2c0   : > { %v2898_v56 = vadd.f32 %v10560_v41, %v2897_v12 }
 0x2c1   : > { %v2994_v31 = vpack.c.bf16 %v2906_v38, %v2903_v34 }
 0x2c2   : > { %v2993_v20 = vpack.c.bf16 %v2898_v56, %v2895_v17 }
 0x2c4   : > { %7571 = vmatprep.mubr.msk.bf16.mxu1 %vm736_vm0, %v2993_v20 }
 0x2c5   : > { %7572 = vmatmul.mubr.msk.bf16.gmra.mrb[72].mxu1 %vm736_vm0, %v2994_v31 }
 0x2d4   : > { %v7541_v54 = vpop.f32.mrb[44].mxu1 }
 0x2d5   : > { %v2910_v51 = vpop.f32.mrb[45].mxu1  ;;  %v2919_v3 = vadd.f32 %v7541_v54, %v10560_v41 }
 0x2d6   : > { %v7542_v37 = vpop.f32.mrb[46].mxu1  ;;  %v2911_v62 = vadd.f32 %v10560_v41, %v2910_v51 }
 0x2d7   : > { %v2922_v16 = vadd.f32 %v7542_v37, %v10560_v41  ;;  %v2913_v27 = vpop.f32.mrb[47].mxu1 }
 0x2d8   : > { %v2914_v26 = vadd.f32 %v10560_v41, %v2913_v27 }
 0x2d9   : > { %v2996_v61 = vpack.c.bf16 %v2922_v16, %v2919_v3 }
 0x2da   : > { %v2995_v9 = vpack.c.bf16 %v2914_v26, %v2911_v62 }
 0x2dc   : > { %7575 = vmatprep.mubr.msk.bf16.mxu1 %vm736_vm0, %v2995_v9 }
 0x2dd   : > { %7576 = vmatmul.mubr.msk.bf16.gmra.mrb[76].mxu1 %vm736_vm0, %v2996_v61 }
 0x2ec   : > { %v7545_v28 = vpop.f32.mrb[48].mxu1 }
 0x2ed   : > { %v2926_v48 = vpop.f32.mrb[49].mxu1  ;;  %v2935_v18 = vadd.f32 %v7545_v28, %v10560_v41 }
 0x2ee   : > { %v7546_v58 = vpop.f32.mrb[50].mxu1  ;;  %v2927_v45 = vadd.f32 %v10560_v41, %v2926_v48 }
 0x2ef   : > { %v2938_v33 = vadd.f32 %v7546_v58, %v10560_v41  ;;  %v2929_v53 = vpop.f32.mrb[51].mxu1 }
 0x2f0   : > { %v2930_v21 = vadd.f32 %v10560_v41, %v2929_v53 }
 0x2f1   : > { %v2998_v7 = vpack.c.bf16 %v2938_v33, %v2935_v18 }
 0x2f2   : > { %v2997_v30 = vpack.c.bf16 %v2930_v21, %v2927_v45 }
 0x2f4   : > { %7579 = vmatprep.mubr.msk.bf16.mxu1 %vm736_vm0, %v2997_v30 }
 0x2f5   : > { %7580 = vmatmul.mubr.msk.bf16.gmra.mrb[80].mxu1 %vm736_vm0, %v2998_v7 }
 0x304   : > { %v7549_v13 = vpop.f32.mrb[52].mxu1 }
 0x305   : > { %v2942_v47 = vpop.f32.mrb[53].mxu1  ;;  %v2951_v63 = vadd.f32 %v7549_v13, %v10560_v41 }
 0x306   : > { %v7550_v8 = vpop.f32.mrb[54].mxu1  ;;  %v2943_v12 = vadd.f32 %v10560_v41, %v2942_v47 }
 0x307   : > { %v2954_v34 = vadd.f32 %v7550_v8, %v10560_v41  ;;  %v2945_v38 = vpop.f32.mrb[55].mxu1 }
 0x308   : > { %v2946_v17 = vadd.f32 %v10560_v41, %v2945_v38 }
 0x309   : > { %v3000_v56 = vpack.c.bf16 %v2954_v34, %v2951_v63 }
 0x30a   : > { %v2999_v31 = vpack.c.bf16 %v2946_v17, %v2943_v12 }
 0x30c   : > { %7583 = vmatprep.mubr.msk.bf16.mxu1 %vm736_vm0, %v2999_v31 }
 0x30d   : > { %7584 = vmatmul.mubr.msk.bf16.gmra.mrb[84].mxu1 %vm736_vm0, %v3000_v56 }
 0x31c   : > { %v7553_v20 = vpop.f32.mrb[56].mxu1 }
 0x31d   : > { %v2958_v54 = vpop.f32.mrb[57].mxu1  ;;  %v2967_v37 = vadd.f32 %v7553_v20, %v10560_v41 }
 0x31e   : > { %v7554_v51 = vpop.f32.mrb[58].mxu1  ;;  %v2959_v27 = vadd.f32 %v10560_v41, %v2958_v54 }
 0x31f   : > { %v2970_v3 = vadd.f32 %v7554_v51, %v10560_v41  ;;  %v2961_v16 = vpop.f32.mrb[59].mxu1 }
 0x320   : > { %v2962_v62 = vadd.f32 %v10560_v41, %v2961_v16 }
 0x321   : > { %v3002_v26 = vpack.c.bf16 %v2970_v3, %v2967_v37 }
 0x322   : > { %v3001_v61 = vpack.c.bf16 %v2962_v62, %v2959_v27 }
 0x324   : > { %7587 = vmatprep.mubr.msk.bf16.mxu1 %vm736_vm0, %v3001_v61 }
 0x325   : > { %7588 = vmatmul.mubr.msk.bf16.gmra.mrb[88].mxu1 %vm736_vm0, %v3002_v26 }
 0x334   : > { %v7557_v9 = vpop.f32.mrb[60].mxu1 }
 0x335   : > { %v2974_v28 = vpop.f32.mrb[61].mxu1  ;;  %v2983_v58 = vadd.f32 %v7557_v9, %v10560_v41  ;;  %v8790_v9 = vld [vmem:[%s613_s25] sm:$0x3f]  }
 0x336   : > { %v7558_v48 = vpop.f32.mrb[62].mxu1  ;;  %v2975_v53 = vadd.f32 %v10560_v41, %v2974_v28  ;;  %7761 = vmatprep.subr.msk.bf16.mxu0 %vm3526_vm11, %v8790_v9 }
 0x337   : > { %v2986_v18 = vadd.f32 %v7558_v48, %v10560_v41  ;;  %v2977_v33 = vpop.f32.mrb[63].mxu1  ;;  %v3528_v48 = vsel %vm3526_vm11, %v8790_v9, 0  ;;  %v3691_v9 = vld [vmem:[%s12640_s11] sm:$0xff] }
 0x338   : > { %v2978_v45 = vadd.f32 %v10560_v41, %v2977_v33  ;;  %7596 = vmatpush3.bf16.msra.mxu0 %v3528_v48 }
 0x339   : > { %v3004_v21 = vpack.c.bf16 %v2986_v18, %v2983_v58 }
 0x33a   : > { %v3003_v7 = vpack.c.bf16 %v2978_v45, %v2975_v53 }
 0x33c   : > { %7591 = vmatprep.mubr.msk.bf16.mxu1 %vm736_vm0, %v3003_v7 }
 0x33d   : > { %7592 = vmatmul.mubr.msk.bf16.gmra.mrb[92].mxu1 %vm736_vm0, %v3004_v21 }
 0x368   : > { %v7565_v30 = vpop.f32.mrb[64].mxu1 }
 0x369   : > { %v3103_v13 = vpop.f32.mrb[65].mxu1  ;;  %v10612_v34 = vmul.f32 0.35355338, %v7565_v30 }
 0x36a   : > { %v10610_v47 = vmul.f32 0.35355338, %v3103_v13  ;;  %v7566_v8 = vpop.f32.mrb[66].mxu1 }
 0x36b   : > { %v3106_v63 = vpop.f32.mrb[67].mxu1  ;;  %v10620_v17 = vmul.f32 0.35355338, %v7566_v8  ;;  %v3269_v56 = vsel %vm3262_vm10, %v10612_v34, -inf }
 0x36c   : > { %v10614_v38 = vmul.f32 0.35355338, %v3106_v63  ;;  %v3263_v41 = vsel %vm3262_vm10, %v10610_v47, -inf }
 0x36d   : > { %3264 = vmax.xlane.f32.xlu0 %v3263_v41  ;;  %v3272_v31 = vsel %vm3262_vm10, %v10620_v17, -inf }
 0x36e   : > { %v3266_v12 = vsel %vm3262_vm10, %v10614_v38, -inf }
 0x36f   : > { %3267 = vmax.xlane.f32.xlu1 %v3266_v12 }
 0x371   : > { %3270 = vmax.xlane.f32.xlu0 %v3269_v56 }
 0x375   : > { %3273 = vmax.xlane.f32.xlu0 %v3272_v31 }
 0x380   : > { %v7569_v20 = vpop.f32.mrb[68].mxu1 }
 0x381   : > { %v3119_v54 = vpop.f32.mrb[69].mxu1  ;;  %v10629_v16 = vmul.f32 0.35355338, %v7569_v20 }
 0x382   : > { %v10626_v51 = vmul.f32 0.35355338, %v3119_v54  ;;  %v7570_v37 = vpop.f32.mrb[70].mxu1 }
 0x383   : > { %v3122_v3 = vpop.f32.mrb[71].mxu1  ;;  %v10638_v26 = vmul.f32 0.35355338, %v7570_v37  ;;  %v3281_v28 = vsel %vm3262_vm10, %v10629_v16, -inf }
 0x384   : > { %v10631_v27 = vmul.f32 0.35355338, %v3122_v3  ;;  %v3275_v62 = vsel %vm3262_vm10, %v10626_v51, -inf }
 0x385   : > { %3276 = vmax.xlane.f32.xlu1 %v3275_v62  ;;  %v3284_v58 = vsel %vm3262_vm10, %v10638_v26, -inf }
 0x386   : > { %v3278_v61 = vsel %vm3262_vm10, %v10631_v27, -inf }
 0x387   : > { %3279 = vmax.xlane.f32.xlu0 %v3278_v61 }
 0x389   : > { %3282 = vmax.xlane.f32.xlu1 %v3281_v28  ;;  %v3692_v28 = vld [vmem:[%s12640_s11 + $0x8] sm:$0xf] }
 0x38b   : > { %3285 = vmax.xlane.f32.xlu0 %v3284_v58 }
 0x398   : > { %v7573_v18 = vpop.f32.mrb[72].mxu1 }
 0x399   : > { %v3135_v33 = vpop.f32.mrb[73].mxu1  ;;  %v10648_v7 = vmul.f32 0.35355338, %v7573_v18  ;;  %v10680_v18 = vpack.c.bf16 %v3692_v28, %v3691_v9 }
 0x39a   : > { %v10646_v53 = vmul.f32 0.35355338, %v3135_v33  ;;  %v7574_v45 = vpop.f32.mrb[74].mxu1 }
 0x39b   : > { %v3138_v21 = vpop.f32.mrb[75].mxu1  ;;  %v10654_v8 = vmul.f32 0.35355338, %v7574_v45  ;;  %v3293_v41 = vsel %vm3262_vm10, %v10648_v7, -inf  ;;  %7759 = vmatprep.subr.msk.bf16.mxu1 %vm10682_vm14, %v10680_v18  ;;  %7755 = vmatprep.subr.msk.bf16.mxu0 %vm10682_vm14, %v10680_v18 }
 0x39c   : > { %v10650_v30 = vmul.f32 0.35355338, %v3138_v21  ;;  %v3287_v13 = vsel %vm3262_vm10, %v10646_v53, -inf  ;;  %7760 = vmatpush3.bf16.msk.msra.mxu1 %vm10682_vm14, %v10680_v18 }
 0x39d   : > { %3288 = vmax.xlane.f32.xlu1 %v3287_v13  ;;  %v3296_v12 = vsel %vm3262_vm10, %v10654_v8, -inf }
 0x39e   : > { %v3290_v63 = vsel %vm3262_vm10, %v10650_v30, -inf }
 0x39f   : > { %3291 = vmax.xlane.f32.xlu0 %v3290_v63 }
 0x3a1   : > { %3294 = vmax.xlane.f32.xlu1 %v3293_v41 }
 0x3a3   : > { %3297 = vmax.xlane.f32.xlu0 %v3296_v12 }
 0x3b0   : > { %v7577_v56 = vpop.f32.mrb[76].mxu1 }
 0x3b1   : > { %v3151_v31 = vpop.f32.mrb[77].mxu1  ;;  %v10664_v3 = vmul.f32 0.35355338, %v7577_v56 }
 0x3b2   : > { %v10662_v20 = vmul.f32 0.35355338, %v3151_v31  ;;  %v7578_v54 = vpop.f32.mrb[78].mxu1 }
 0x3b3   : > { %v3154_v37 = vpop.f32.mrb[79].mxu1  ;;  %v10676_v48 = vmul.f32 0.35355338, %v7578_v54  ;;  %v3305_v45 = vsel %vm3262_vm10, %v10664_v3, -inf }
 0x3b4   : > { %v10666_v62 = vmul.f32 0.35355338, %v3154_v37  ;;  %v3299_v61 = vsel %vm3262_vm10, %v10662_v20, -inf }
 0x3b5   : > { %3300 = vmax.xlane.f32.xlu1 %v3299_v61  ;;  %v3308_v21 = vsel %vm3262_vm10, %v10676_v48, -inf }
 0x3b6   : > { %v3302_v58 = vsel %vm3262_vm10, %v10666_v62, -inf }
 0x3b7   : > { %3303 = vmax.xlane.f32.xlu0 %v3302_v58 }
 0x3b9   : > { %3306 = vmax.xlane.f32.xlu1 %v3305_v45 }
 0x3bb   : > { %3309 = vmax.xlane.f32.xlu0 %v3308_v21 }
 0x3c8   : > { %v7581_v13 = vpop.f32.mrb[80].mxu1 }
 0x3c9   : > { %v3167_v63 = vpop.f32.mrb[81].mxu1  ;;  %v10701_v31 = vmul.f32 0.35355338, %v7581_v13 }
 0x3ca   : > { %v10699_v41 = vmul.f32 0.35355338, %v3167_v63  ;;  %v7582_v12 = vpop.f32.mrb[82].mxu1 }
 0x3cb   : > { %v3170_v56 = vpop.f32.mrb[83].mxu1  ;;  %v10707_v61 = vmul.f32 0.35355338, %v7582_v12  ;;  %v3317_v28 = vsel %vm3262_vm10, %v10701_v31, -inf }
 0x3cc   : > { %v10703_v54 = vmul.f32 0.35355338, %v3170_v56  ;;  %v3311_v37 = vsel %vm3262_vm10, %v10699_v41, -inf }
 0x3cd   : > { %3312 = vmax.xlane.f32.xlu1 %v3311_v37  ;;  %v3320_v58 = vsel %vm3262_vm10, %v10707_v61, -inf }
 0x3ce   : > { %v3314_v9 = vsel %vm3262_vm10, %v10703_v54, -inf }
 0x3cf   : > { %3315 = vmax.xlane.f32.xlu0 %v3314_v9 }
 0x3d1   : > { %3318 = vmax.xlane.f32.xlu1 %v3317_v28 }
 0x3d3   : > { %3321 = vmax.xlane.f32.xlu0 %v3320_v58 }
 0x3e0   : > { %v7585_v45 = vpop.f32.mrb[84].mxu1 }
 0x3e1   : > { %v3183_v21 = vpop.f32.mrb[85].mxu1  ;;  %v10717_v12 = vmul.f32 0.35355338, %v7585_v45 }
 0x3e2   : > { %v10715_v13 = vmul.f32 0.35355338, %v3183_v21  ;;  %v7586_v63 = vpop.f32.mrb[86].mxu1 }
 0x3e3   : > { %v3186_v56 = vpop.f32.mrb[87].mxu1  ;;  %v10723_v57 = vmul.f32 0.35355338, %v7586_v63  ;;  %v3329_v58 = vsel %vm3262_vm10, %v10717_v12, -inf }
 0x3e4   : > { %v10719_v37 = vmul.f32 0.35355338, %v3186_v56  ;;  %v3323_v9 = vsel %vm3262_vm10, %v10715_v13, -inf }
 0x3e5   : > { %3324 = vmax.xlane.f32.xlu1 %v3323_v9  ;;  %v3332_v45 = vsel %vm3262_vm10, %v10723_v57, -inf }
 0x3e6   : > { %v3326_v28 = vsel %vm3262_vm10, %v10719_v37, -inf }
 0x3e7   : > { %3327 = vmax.xlane.f32.xlu0 %v3326_v28 }
 0x3e9   : > { %3330 = vmax.xlane.f32.xlu1 %v3329_v58 }
 0x3eb   : > { %3333 = vmax.xlane.f32.xlu0 %v3332_v45 }
 0x3f8   : > { %v7589_v21 = vpop.f32.mrb[88].mxu1 }
 0x3f9   : > { %v3199_v56 = vpop.f32.mrb[89].mxu1  ;;  %v10734_v29 = vmul.f32 0.35355338, %v7589_v21 }
 0x3fa   : > { %v10731_v23 = vmul.f32 0.35355338, %v3199_v56  ;;  %v3265_v14 = vpop.xlane.xlu0 %3264  ;;  %v7590_v9 = vpop.f32.mrb[90].mxu1 }
 0x3fb   : > { %v3359_v63 = vsub.f32 %v10610_v47, %v3265_v14  ;;  %v3202_v10 = vpop.f32.mrb[91].mxu1  ;;  %v10741_v6 = vmul.f32 0.35355338, %v7590_v9 }
 0x3fc   : > { %v10736_v28 = vmul.f32 0.35355338, %v3202_v10  ;;  %v3268_v50 = vpop.xlane.xlu1 %3267  ;;  %v3335_v58 = vsel %vm3262_vm10, %v10731_v23, -inf  ;;  %v3341_v10 = vsel %vm3262_vm10, %v10734_v29, -inf }
 0x3fd   : > { %v3391_v1 = vmul.f32 1.442695, %v3359_v63  ;;  %v3360_v45 = vsub.f32 %v10614_v38, %v3268_v50  ;;  %3336 = vmax.xlane.f32.xlu1 %v3335_v58  ;;  %v3344_v50 = vsel %vm3262_vm10, %v10741_v6, -inf }
 0x3fe   : > { %v3271_v56 = vpop.xlane.xlu0 %3270  ;;  %v3338_v2 = vsel %vm3262_vm10, %v10736_v28, -inf }
 0x3ff   : > { %v3393_v14 = vmul.f32 1.442695, %v3360_v45  ;;  %v3361_v47 = vsub.f32 %v10612_v34, %v3271_v56  ;;  %3339 = vmax.xlane.f32.xlu0 %v3338_v2  ;;  %8813 = vpow2.f32 %v3391_v1 }
 0x401   : > { %8815 = vpow2.f32 %v3393_v14  ;;  %3342 = vmax.xlane.f32.xlu1 %v3341_v10  ;;  %v3395_v21 = vmul.f32 1.442695, %v3361_v47 }
 0x402   : > { %v3274_v63 = vpop.xlane.xlu0 %3273 }
 0x403   : > { %v3362_v38 = vsub.f32 %v10620_v17, %v3274_v63  ;;  %3345 = vmax.xlane.f32.xlu0 %v3344_v50  ;;  %8817 = vpow2.f32 %v3395_v21 }
 0x405   : > { %v3397_v9 = vmul.f32 1.442695, %v3362_v38 }
 0x407   : > { %8819 = vpow2.f32 %v3397_v9 }
 0x409   : > { %v10751_v58 = vpop.eup %8813 }
 0x40b   : > { %v10753_v2 = vpop.eup %8815 }
 0x40c   : > { %v3455_v1 = vpack.c.bf16 %v10753_v2, %v10751_v58 }
 0x40d   : > { %v10758_v34 = vpop.eup %8817 }
 0x40e   : > { %7597 = vmatprep.mubr.msk.bf16.mxu0 %vm3262_vm10, %v3455_v1 }
 0x410   : > { %v7593_v45 = vpop.f32.mrb[92].mxu1 }
 0x411   : > { %v10760_v56 = vpop.eup %8819  ;;  %v3215_v14 = vpop.f32.mrb[93].mxu1  ;;  %v10767_v38 = vmul.f32 0.35355338, %v7593_v45 }
 0x412   : > { %v3456_v17 = vpack.c.bf16 %v10760_v56, %v10758_v34  ;;  %v10764_v47 = vmul.f32 0.35355338, %v3215_v14  ;;  %v3277_v10 = vpop.xlane.xlu1 %3276  ;;  %v7594_v21 = vpop.f32.mrb[94].mxu1 }
 0x413   : > { %v3363_v63 = vsub.f32 %v10626_v51, %v3277_v10  ;;  %v3218_v50 = vpop.f32.mrb[95].mxu1  ;;  %v10778_v51 = vmul.f32 0.35355338, %v7594_v21 }
 0x414   : > { %v10769_v9 = vmul.f32 0.35355338, %v3218_v50  ;;  %7598 = vmatmul.mubr.msk.bf16.vlgmr.msra.gmra.mrb[64].mxu0 %vm3262_vm10, %v3456_v17  ;;  %v3280_v1 = vpop.xlane.xlu0 %3279  ;;  %v3347_v4 = vsel %vm3262_vm10, %v10764_v47, -inf }
 0x415   : > { %v3399_v46 = vmul.f32 1.442695, %v3363_v63  ;;  %v3364_v0 = vsub.f32 %v10631_v27, %v3280_v1  ;;  %3348 = vmax.xlane.f32.xlu1 %v3347_v4  ;;  %7758 = vmatpush3.bf16.msk.msra.mxu0 %vm10682_vm14, %v10680_v18  ;;  %v3353_v27 = vsel %vm3262_vm10, %v10767_v38, -inf  ;;  %v3356_v18 = vsel %vm3262_vm10, %v10778_v51, -inf }
 0x416   : > { %v3283_v45 = vpop.xlane.xlu1 %3282  ;;  %v3350_v14 = vsel %vm3262_vm10, %v10769_v9, -inf }
 0x417   : > { %v3401_v10 = vmul.f32 1.442695, %v3364_v0  ;;  %v3365_v17 = vsub.f32 %v10629_v16, %v3283_v45  ;;  %3351 = vmax.xlane.f32.xlu0 %v3350_v14  ;;  %8821 = vpow2.f32 %v3399_v46 }
 0x418   : > { %v3286_v50 = vpop.xlane.xlu0 %3285 }
 0x419   : > { %8823 = vpow2.f32 %v3401_v10  ;;  %v3403_v4 = vmul.f32 1.442695, %v3365_v17  ;;  %v3366_v33 = vsub.f32 %v10638_v26, %v3286_v50  ;;  %3354 = vmax.xlane.f32.xlu1 %v3353_v27 }
 0x41b   : > { %v3405_v21 = vmul.f32 1.442695, %v3366_v33  ;;  %3357 = vmax.xlane.f32.xlu0 %v3356_v18  ;;  %8825 = vpow2.f32 %v3403_v4 }
 0x41d   : > { %8827 = vpow2.f32 %v3405_v21 }
 0x421   : > { %v10788_v0 = vpop.eup %8821 }
 0x423   : > { %v10790_v16 = vpop.eup %8823 }
 0x424   : > { %v3457_v46 = vpack.c.bf16 %v10790_v16, %v10788_v0 }
 0x425   : > { %v10794_v63 = vpop.eup %8825 }
 0x426   : > { %7601 = vmatprep.mubr.msk.bf16.mxu0 %vm3262_vm10, %v3457_v46 }
 0x427   : > { %v10797_v26 = vpop.eup %8827 }
 0x428   : > { %v3458_v1 = vpack.c.bf16 %v10797_v26, %v10794_v63 }
 0x42a   : > { %7602 = vmatmul.mubr.msk.bf16.gmra.mrb[68].mxu0 %vm3262_vm10, %v3458_v1  ;;  %v3289_v45 = vpop.xlane.xlu1 %3288 }
 0x42b   : > { %v3367_v14 = vsub.f32 %v10646_v53, %v3289_v45 }
 0x42c   : > { %v3292_v10 = vpop.xlane.xlu0 %3291 }
 0x42d   : > { %v3407_v17 = vmul.f32 1.442695, %v3367_v14  ;;  %v3368_v50 = vsub.f32 %v10650_v30, %v3292_v10 }
 0x42e   : > { %v3295_v27 = vpop.xlane.xlu1 %3294 }
 0x42f   : > { %v3409_v4 = vmul.f32 1.442695, %v3368_v50  ;;  %v3369_v33 = vsub.f32 %v10648_v7, %v3295_v27  ;;  %8829 = vpow2.f32 %v3407_v17 }
 0x430   : > { %v3298_v18 = vpop.xlane.xlu0 %3297 }
 0x431   : > { %8831 = vpow2.f32 %v3409_v4  ;;  %v3411_v21 = vmul.f32 1.442695, %v3369_v33  ;;  %v3370_v46 = vsub.f32 %v10654_v8, %v3298_v18 }
 0x433   : > { %8833 = vpow2.f32 %v3411_v21  ;;  %v3413_v43 = vmul.f32 1.442695, %v3370_v46 }
 0x435   : > { %8835 = vpow2.f32 %v3413_v43 }
 0x439   : > { %v10806_v1 = vpop.eup %8829 }
 0x43b   : > { %v10808_v53 = vpop.eup %8831 }
 0x43c   : > { %v3459_v30 = vpack.c.bf16 %v10808_v53, %v10806_v1 }
 0x43d   : > { %v8834_v45 = vpop.eup %8833 }
 0x43e   : > { %7605 = vmatprep.mubr.msk.bf16.mxu0 %vm3262_vm10, %v3459_v30  ;;  %7648 = vmatprep.mubr.msk.f32.mxu1 %vm3262_vm10, %v8834_v45 }
 0x43f   : > { %v8836_v7 = vpop.eup %8835 }
 0x440   : > { %7649 = vmatmul.mubr.msk.f32.vlgmr.msra.gmra.mrb[96].mxu1 %vm3262_vm10, %v8836_v7  ;;  %v3460_v14 = vpack.c.bf16 %v8836_v7, %v8834_v45 }
 0x442   : > { %7606 = vmatmul.mubr.msk.bf16.gmra.mrb[72].mxu0 %vm3262_vm10, %v3460_v14  ;;  %v3301_v8 = vpop.xlane.xlu1 %3300 }
 0x443   : > { %v3371_v43 = vsub.f32 %v10662_v20, %v3301_v8 }
 0x444   : > { %v3304_v10 = vpop.xlane.xlu0 %3303 }
 0x445   : > { %v3415_v17 = vmul.f32 1.442695, %v3371_v43  ;;  %v3372_v50 = vsub.f32 %v10666_v62, %v3304_v10 }
 0x446   : > { %v3307_v27 = vpop.xlane.xlu1 %3306 }
 0x447   : > { %8837 = vpow2.f32 %v3415_v17  ;;  %v3417_v4 = vmul.f32 1.442695, %v3372_v50  ;;  %v3373_v33 = vsub.f32 %v10664_v3, %v3307_v27 }
 0x448   : > { %v3310_v18 = vpop.xlane.xlu0 %3309 }
 0x449   : > { %8839 = vpow2.f32 %v3417_v4  ;;  %v3419_v21 = vmul.f32 1.442695, %v3373_v33  ;;  %v3374_v46 = vsub.f32 %v10676_v48, %v3310_v18 }
 0x44b   : > { %8841 = vpow2.f32 %v3419_v21  ;;  %v3421_v30 = vmul.f32 1.442695, %v3374_v46 }
 0x44d   : > { %8843 = vpow2.f32 %v3421_v30 }
 0x451   : > { %v8838_v45 = vpop.eup %8837 }
 0x452   : > { %7651 = vmatprep.mubr.msk.f32.mxu1 %vm3262_vm10, %v8838_v45 }
 0x453   : > { %v8840_v20 = vpop.eup %8839 }
 0x454   : > { %7652 = vmatmul.mubr.msk.f32.gmra.mrb[98].mxu1 %vm3262_vm10, %v8840_v20  ;;  %v3461_v62 = vpack.c.bf16 %v8840_v20, %v8838_v45 }
 0x455   : > { %v8842_v7 = vpop.eup %8841 }
 0x456   : > { %7609 = vmatprep.mubr.msk.bf16.mxu0 %vm3262_vm10, %v3461_v62  ;;  %7654 = vmatprep.mubr.msk.f32.mxu1 %vm3262_vm10, %v8842_v7 }
 0x457   : > { %v8844_v3 = vpop.eup %8843 }
 0x458   : > { %7655 = vmatmul.mubr.msk.f32.gmra.mrb[100].mxu1 %vm3262_vm10, %v8844_v3  ;;  %v3462_v14 = vpack.c.bf16 %v8844_v3, %v8842_v7 }
 0x45a   : > { %7610 = vmatmul.mubr.msk.bf16.gmra.mrb[76].mxu0 %vm3262_vm10, %v3462_v14  ;;  %v3313_v48 = vpop.xlane.xlu1 %3312 }
 0x45b   : > { %v3375_v8 = vsub.f32 %v10699_v41, %v3313_v48 }
 0x45c   : > { %v3316_v43 = vpop.xlane.xlu0 %3315 }
 0x45d   : > { %v3423_v10 = vmul.f32 1.442695, %v3375_v8  ;;  %v3376_v17 = vsub.f32 %v10703_v54, %v3316_v43 }
 0x45e   : > { %v3319_v50 = vpop.xlane.xlu1 %3318 }
 0x45f   : > { %8845 = vpow2.f32 %v3423_v10  ;;  %v3425_v27 = vmul.f32 1.442695, %v3376_v17  ;;  %v3377_v4 = vsub.f32 %v10701_v31, %v3319_v50 }
 0x460   : > { %v3322_v33 = vpop.xlane.xlu0 %3321 }
 0x461   : > { %8847 = vpow2.f32 %v3425_v27  ;;  %v3427_v18 = vmul.f32 1.442695, %v3377_v4  ;;  %v3378_v21 = vsub.f32 %v10707_v61, %v3322_v33 }
 0x463   : > { %8849 = vpow2.f32 %v3427_v18  ;;  %v3429_v46 = vmul.f32 1.442695, %v3378_v21 }
 0x465   : > { %8851 = vpow2.f32 %v3429_v46 }
 0x469   : > { %v8846_v30 = vpop.eup %8845 }
 0x46a   : > { %7657 = vmatprep.mubr.msk.f32.mxu1 %vm3262_vm10, %v8846_v30 }
 0x46b   : > { %v8848_v41 = vpop.eup %8847 }
 0x46c   : > { %7658 = vmatmul.mubr.msk.f32.gmra.mrb[102].mxu1 %vm3262_vm10, %v8848_v41  ;;  %v3463_v54 = vpack.c.bf16 %v8848_v41, %v8846_v30 }
 0x46d   : > { %v8850_v45 = vpop.eup %8849 }
 0x46e   : > { %7613 = vmatprep.mubr.msk.bf16.mxu0 %vm3262_vm10, %v3463_v54  ;;  %7660 = vmatprep.mubr.msk.f32.mxu1 %vm3262_vm10, %v8850_v45 }
 0x46f   : > { %v8852_v31 = vpop.eup %8851 }
 0x470   : > { %7661 = vmatmul.mubr.msk.f32.gmra.mrb[104].mxu1 %vm3262_vm10, %v8852_v31  ;;  %v3464_v20 = vpack.c.bf16 %v8852_v31, %v8850_v45 }
 0x472   : > { %7614 = vmatmul.mubr.msk.bf16.gmra.mrb[80].mxu0 %vm3262_vm10, %v3464_v20  ;;  %v3325_v61 = vpop.xlane.xlu1 %3324 }
 0x473   : > { %v3379_v62 = vsub.f32 %v10715_v13, %v3325_v61 }
 0x474   : > { %v3328_v7 = vpop.xlane.xlu0 %3327 }
 0x475   : > { %v3431_v3 = vmul.f32 1.442695, %v3379_v62  ;;  %v3380_v14 = vsub.f32 %v10719_v37, %v3328_v7 }
 0x476   : > { %v3331_v48 = vpop.xlane.xlu1 %3330 }
 0x477   : > { %8853 = vpow2.f32 %v3431_v3  ;;  %v3433_v8 = vmul.f32 1.442695, %v3380_v14  ;;  %v3381_v43 = vsub.f32 %v10717_v12, %v3331_v48 }
 0x478   : > { %v3334_v10 = vpop.xlane.xlu0 %3333 }
 0x479   : > { %8855 = vpow2.f32 %v3433_v8  ;;  %v3435_v17 = vmul.f32 1.442695, %v3381_v43  ;;  %v3382_v50 = vsub.f32 %v10723_v57, %v3334_v10 }
 0x47b   : > { %8857 = vpow2.f32 %v3435_v17  ;;  %v3437_v27 = vmul.f32 1.442695, %v3382_v50 }
 0x47d   : > { %8859 = vpow2.f32 %v3437_v27 }
 0x481   : > { %v8854_v4 = vpop.eup %8853 }
 0x482   : > { %7663 = vmatprep.mubr.msk.f32.mxu1 %vm3262_vm10, %v8854_v4 }
 0x483   : > { %v8856_v13 = vpop.eup %8855 }
 0x484   : > { %7664 = vmatmul.mubr.msk.f32.gmra.mrb[106].mxu1 %vm3262_vm10, %v8856_v13  ;;  %v3465_v37 = vpack.c.bf16 %v8856_v13, %v8854_v4 }
 0x485   : > { %v8858_v33 = vpop.eup %8857 }
 0x486   : > { %7617 = vmatprep.mubr.msk.bf16.mxu0 %vm3262_vm10, %v3465_v37  ;;  %7666 = vmatprep.mubr.msk.f32.mxu1 %vm3262_vm10, %v8858_v33 }
 0x487   : > { %v8860_v12 = vpop.eup %8859 }
 0x488   : > { %7667 = vmatmul.mubr.msk.f32.gmra.mrb[108].mxu1 %vm3262_vm10, %v8860_v12  ;;  %v3466_v18 = vpack.c.bf16 %v8860_v12, %v8858_v33 }
 0x48a   : > { %7618 = vmatmul.mubr.msk.bf16.gmra.mrb[84].mxu0 %vm3262_vm10, %v3466_v18  ;;  %v3337_v57 = vpop.xlane.xlu1 %3336 }
 0x48b   : > { %v3383_v21 = vsub.f32 %v10731_v23, %v3337_v57 }
 0x48c   : > { %v3340_v46 = vpop.xlane.xlu0 %3339 }
 0x48d   : > { %v3439_v30 = vmul.f32 1.442695, %v3383_v21  ;;  %v3384_v41 = vsub.f32 %v10736_v28, %v3340_v46 }
 0x48e   : > { %v3343_v54 = vpop.xlane.xlu1 %3342 }
 0x48f   : > { %8861 = vpow2.f32 %v3439_v30  ;;  %v3441_v45 = vmul.f32 1.442695, %v3384_v41  ;;  %v3385_v31 = vsub.f32 %v10734_v29, %v3343_v54  ;;  %v8791_v54 = vld [vmem:[%s12641_s12] sm:$0xff]  }
 0x490   : > { %v3346_v20 = vpop.xlane.xlu0 %3345  ;;  %7681 = vmatprep.subr.bf16.mxu0 %v8791_v54 }
 0x491   : > { %8863 = vpow2.f32 %v3441_v45  ;;  %v3443_v61 = vmul.f32 1.442695, %v3385_v31  ;;  %v3386_v62 = vsub.f32 %v10741_v6, %v3346_v20 }
 0x493   : > { %8865 = vpow2.f32 %v3443_v61  ;;  %v3445_v7 = vmul.f32 1.442695, %v3386_v62 }
 0x495   : > { %8867 = vpow2.f32 %v3445_v7  ;;  %v8792_v7 = vld [vmem:[%s12641_s12 + $0x8] sm:$0xff]  }
 0x499   : > { %v8862_v3 = vpop.eup %8861 }
 0x49a   : > { %7669 = vmatprep.mubr.msk.f32.mxu1 %vm3262_vm10, %v8862_v3 }
 0x49b   : > { %v8864_v23 = vpop.eup %8863 }
 0x49c   : > { %7670 = vmatmul.mubr.msk.f32.gmra.mrb[110].mxu1 %vm3262_vm10, %v8864_v23  ;;  %v3467_v28 = vpack.c.bf16 %v8864_v23, %v8862_v3 }
 0x49d   : > { %v8866_v14 = vpop.eup %8865 }
 0x49e   : > { %7621 = vmatprep.mubr.msk.bf16.mxu0 %vm3262_vm10, %v3467_v28  ;;  %7672 = vmatprep.mubr.msk.f32.mxu1 %vm3262_vm10, %v8866_v14 }
 0x49f   : > { %v8868_v29 = vpop.eup %8867 }
 0x4a0   : > { %7673 = vmatmul.mubr.msk.f32.gmra.mrb[112].mxu1 %vm3262_vm10, %v8868_v29  ;;  %v3468_v48 = vpack.c.bf16 %v8868_v29, %v8866_v14 }
 0x4a2   : > { %7622 = vmatmul.mubr.msk.bf16.gmra.mrb[88].mxu0 %vm3262_vm10, %v3468_v48  ;;  %v3349_v6 = vpop.xlane.xlu1 %3348 }
 0x4a3   : > { %v3387_v8 = vsub.f32 %v10764_v47, %v3349_v6 }
 0x4a4   : > { %v3352_v43 = vpop.xlane.xlu0 %3351 }
 0x4a5   : > { %v3447_v10 = vmul.f32 1.442695, %v3387_v8  ;;  %v3388_v17 = vsub.f32 %v10769_v9, %v3352_v43 }
 0x4a6   : > { %v3355_v50 = vpop.xlane.xlu1 %3354 }
 0x4a7   : > { %8869 = vpow2.f32 %v3447_v10  ;;  %v3449_v27 = vmul.f32 1.442695, %v3388_v17  ;;  %v3389_v4 = vsub.f32 %v10767_v38, %v3355_v50 }
 0x4a8   : > { %v3358_v13 = vpop.xlane.xlu0 %3357 }
 0x4a9   : > { %8871 = vpow2.f32 %v3449_v27  ;;  %v3451_v37 = vmul.f32 1.442695, %v3389_v4  ;;  %v3390_v33 = vsub.f32 %v10778_v51, %v3358_v13 }
 0x4ab   : > { %8873 = vpow2.f32 %v3451_v37  ;;  %v3453_v12 = vmul.f32 1.442695, %v3390_v33 }
 0x4ad   : > { %8875 = vpow2.f32 %v3453_v12 }
 0x4b1   : > { %v8870_v18 = vpop.eup %8869 }
 0x4b2   : > { %7675 = vmatprep.mubr.msk.f32.mxu1 %vm3262_vm10, %v8870_v18 }
 0x4b3   : > { %v8872_v47 = vpop.eup %8871 }
 0x4b4   : > { %7676 = vmatmul.mubr.msk.f32.gmra.mrb[114].mxu1 %vm3262_vm10, %v8872_v47  ;;  %v3469_v9 = vpack.c.bf16 %v8872_v47, %v8870_v18 }
 0x4b5   : > { %v8874_v57 = vpop.eup %8873 }
 0x4b6   : > { %7625 = vmatprep.mubr.msk.bf16.mxu0 %vm3262_vm10, %v3469_v9  ;;  %7678 = vmatprep.mubr.msk.f32.mxu1 %vm3262_vm10, %v8874_v57 }
 0x4b7   : > { %v8876_v38 = vpop.eup %8875 }
 0x4b8   : > { %7679 = vmatmul.mubr.msk.f32.gmra.mrb[116].mxu1 %vm3262_vm10, %v8876_v38  ;;  %v3470_v21 = vpack.c.bf16 %v8876_v38, %v8874_v57 }
 0x4ba   : > { %7626 = vmatmul.mubr.msk.bf16.gmra.mrb[92].mxu0 %vm3262_vm10, %v3470_v21 }
 0x4bb   : > { %7633 = vmatprep.mubr.msk.f32.mxu0 %vm3262_vm10, %v10751_v58 }
 0x4c2   : > { %7634 = vmatmul.mubr.msk.f32.vlgmr.msra.gmra.mrb[96].mxu0 %vm3262_vm10, %v10753_v2 }
 0x4c3   : > { %7636 = vmatprep.mubr.msk.f32.mxu0 %vm3262_vm10, %v10758_v34  ;;  %7682 = vmatpush3.bf16.msra.mxu0 %v8791_v54 }
 0x4c4   : > { %7683 = vmatprep.subr.bf16.mxu0 %v8792_v7 }
 0x4c6   : > { %7637 = vmatmul.mubr.msk.f32.gmra.mrb[98].mxu0 %vm3262_vm10, %v10760_v56 }
 0x4c7   : > { %7639 = vmatprep.mubr.msk.f32.mxu0 %vm3262_vm10, %v10788_v0  ;;  %7684 = vmatpush3.bf16.msra.mxu0 %v8792_v7 }
 0x4ca   : > { %7640 = vmatmul.mubr.msk.f32.gmra.mrb[100].mxu0 %vm3262_vm10, %v10790_v16 }
 0x4cb   : > { %7642 = vmatprep.mubr.msk.f32.mxu0 %vm3262_vm10, %v10794_v63 }
 0x4ce   : > { %7643 = vmatmul.mubr.msk.f32.gmra.mrb[102].mxu0 %vm3262_vm10, %v10797_v26 }
 0x4cf   : > { %7645 = vmatprep.mubr.msk.f32.mxu0 %vm3262_vm10, %v10806_v1 }
 0x4d2   : > { %7646 = vmatmul.mubr.msk.f32.gmra.mrb[104].mxu0 %vm3262_vm10, %v10808_v53 }
 0x4e7   : > { %v10886_v58 = vpop.f32.mrb[64].mxu0 }
 0x4e8   : > { %v10888_v2 = vpop.f32.mrb[65].mxu0 }
 0x4e9   : > { %v10890_v34 = vpop.f32.mrb[66].mxu0 }
 0x4ea   : > { %v10892_v56 = vpop.f32.mrb[67].mxu0 }
 0x4fd   : > { %v10894_v51 = vpop.f32.mrb[68].mxu0 }
 0x4fe   : > { %v10896_v0 = vpop.f32.mrb[69].mxu0 }
 0x4ff   : > { %v10898_v16 = vpop.f32.mrb[70].mxu0 }
 0x500   : > { %v10900_v63 = vpop.f32.mrb[71].mxu0 }
 0x513   : > { %v7650_v26 = vpop.f32.mrb[96].mxu1 }
 0x514   : > { %8877 = vrcp.f32 %v7650_v26  ;;  %v3909_v1 = vpop.f32.mrb[97].mxu1 }
 0x515   : > { %8879 = vrcp.f32 %v3909_v1  ;;  %v7607_v53 = vpop.f32.mrb[72].mxu0 }
 0x516   : > { %v10902_v46 = vpop.f32.mrb[73].mxu0 }
 0x517   : > { %v7608_v30 = vpop.f32.mrb[74].mxu0 }
 0x518   : > { %v10904_v41 = vpop.f32.mrb[75].mxu0 }
 0x51e   : > { %v8878_v45 = vpop.eup %8877 }
 0x51f   : > { %v8880_v31 = vpop.eup %8879  ;;  %v10909_v20 = vmul.f32 %v8878_v45, %v7608_v30 }
 0x520   : > { %v10911_v61 = vmul.f32 %v8880_v31, %v7607_v53 }
 0x527   : > { %v7653_v3 = vpop.f32.mrb[98].mxu1 }
 0x528   : > { %8881 = vrcp.f32 %v7653_v3  ;;  %v3919_v23 = vpop.f32.mrb[99].mxu1 }
 0x529   : > { %8883 = vrcp.f32 %v3919_v23 }
 0x52b   : > { %v7656_v28 = vpop.f32.mrb[100].mxu1 }
 0x52c   : > { %8885 = vrcp.f32 %v7656_v28  ;;  %v3929_v14 = vpop.f32.mrb[101].mxu1 }
 0x52d   : > { %8887 = vrcp.f32 %v3929_v14  ;;  %v7611_v29 = vpop.f32.mrb[76].mxu0 }
 0x52e   : > { %v3612_v48 = vpop.f32.mrb[77].mxu0 }
 0x52f   : > { %v7612_v6 = vpop.f32.mrb[78].mxu0 }
 0x530   : > { %v3615_v8 = vpop.f32.mrb[79].mxu0 }
 0x532   : > { %v8882_v43 = vpop.eup %8881 }
 0x533   : > { %v8884_v10 = vpop.eup %8883  ;;  %v10918_v17 = vmul.f32 %v8882_v43, %v3615_v8 }
 0x534   : > { %v10920_v50 = vmul.f32 %v8884_v10, %v3612_v48 }
 0x536   : > { %v8886_v27 = vpop.eup %8885 }
 0x537   : > { %v8888_v13 = vpop.eup %8887  ;;  %v10924_v37 = vmul.f32 %v8886_v27, %v7612_v6 }
 0x538   : > { %v10926_v33 = vmul.f32 %v8888_v13, %v7611_v29 }
 0x53f   : > { %v7659_v18 = vpop.f32.mrb[102].mxu1 }
 0x540   : > { %8889 = vrcp.f32 %v7659_v18  ;;  %v3939_v47 = vpop.f32.mrb[103].mxu1 }
 0x541   : > { %8891 = vrcp.f32 %v3939_v47  ;;  %v5007_v47 = vld [vmem:[#allocation2 + $0x2] sm:$0xff] }
 0x543   : > { %v7662_v9 = vpop.f32.mrb[104].mxu1 }
 0x544   : > { %8893 = vrcp.f32 %v7662_v9  ;;  %v3949_v57 = vpop.f32.mrb[105].mxu1  ;;  %v5008_v9 = vld [vmem:[#allocation2 + $0xa] sm:$0xff] }
 0x545   : > { %8895 = vrcp.f32 %v3949_v57  ;;  %v7615_v38 = vpop.f32.mrb[80].mxu0  ;;  %v4975_v57 = vld [vmem:[#allocation2 + $0x1] sm:$0xff] }
 0x546   : > { %v3628_v21 = vpop.f32.mrb[81].mxu0 }
 0x547   : > { %v7616_v26 = vpop.f32.mrb[82].mxu0 }
 0x548   : > { %v3631_v1 = vpop.f32.mrb[83].mxu0 }
 0x54a   : > { %v8890_v53 = vpop.eup %8889 }
 0x54b   : > { %v8892_v30 = vpop.eup %8891  ;;  %v10930_v54 = vmul.f32 %v8890_v53, %v3631_v1  ;;  %v4976_v1 = vld [vmem:[#allocation2 + $0x9] sm:$0xff] }
 0x54c   : > { %v10932_v45 = vmul.f32 %v8892_v30, %v3628_v21  ;;  %v8288_v30 = vpack.i.bf16 %v4976_v1, %v4975_v57 }
 0x54e   : > { %v8894_v31 = vpop.eup %8893  ;;  %8289 = vrot.lane.b32.xlu0 %v8288_v30, %s12695_s22 }
 0x54f   : > { %v8896_v3 = vpop.eup %8895  ;;  %v10936_v23 = vmul.f32 %v8894_v31, %v7616_v26  ;;  %v8293_v26 = vpack.i.bf16 %v5008_v9, %v5007_v47 }
 0x550   : > { %v10938_v28 = vmul.f32 %v8896_v3, %v7615_v38 }
 0x551   : > { %8294 = vrot.lane.b32.xlu1 %v8293_v26, %s12694_s2 }
 0x557   : > { %v7665_v29 = vpop.f32.mrb[106].mxu1 }
 0x558   : > { %8897 = vrcp.f32 %v7665_v29  ;;  %v3959_v48 = vpop.f32.mrb[107].mxu1 }
 0x559   : > { %8899 = vrcp.f32 %v3959_v48 }
 0x55b   : > { %v7668_v6 = vpop.f32.mrb[108].mxu1 }
 0x55c   : > { %8901 = vrcp.f32 %v7668_v6  ;;  %v3969_v8 = vpop.f32.mrb[109].mxu1 }
 0x55d   : > { %8903 = vrcp.f32 %v3969_v8  ;;  %v7619_v43 = vpop.f32.mrb[84].mxu0 }
 0x55e   : > { %v3644_v10 = vpop.f32.mrb[85].mxu0 }
 0x55f   : > { %v7620_v27 = vpop.f32.mrb[86].mxu0 }
 0x560   : > { %v3647_v13 = vpop.f32.mrb[87].mxu0 }
 0x562   : > { %v8898_v18 = vpop.eup %8897 }
 0x563   : > { %v8900_v38 = vpop.eup %8899  ;;  %v10942_v21 = vmul.f32 %v8898_v18, %v3647_v13 }
 0x564   : > { %v10944_v53 = vmul.f32 %v8900_v38, %v3644_v10 }
 0x566   : > { %v8902_v31 = vpop.eup %8901 }
 0x567   : > { %v8904_v29 = vpop.eup %8903  ;;  %v10950_v48 = vmul.f32 %v8902_v31, %v7620_v27 }
 0x568   : > { %v10952_v6 = vmul.f32 %v8904_v29, %v7619_v43 }
 0x56f   : > { %v7671_v13 = vpop.f32.mrb[110].mxu1 }
 0x570   : > { %8905 = vrcp.f32 %v7671_v13  ;;  %v3979_v10 = vpop.f32.mrb[111].mxu1 }
 0x571   : > { %8907 = vrcp.f32 %v3979_v10 }
 0x573   : > { %v7674_v18 = vpop.f32.mrb[112].mxu1 }
 0x574   : > { %8909 = vrcp.f32 %v7674_v18  ;;  %v3989_v47 = vpop.f32.mrb[113].mxu1 }
 0x575   : > { %8911 = vrcp.f32 %v3989_v47  ;;  %v7623_v9 = vpop.f32.mrb[88].mxu0 }
 0x576   : > { %v3660_v57 = vpop.f32.mrb[89].mxu0 }
 0x577   : > { %v7624_v38 = vpop.f32.mrb[90].mxu0 }
 0x578   : > { %v3663_v26 = vpop.f32.mrb[91].mxu0 }
 0x57a   : > { %v8906_v1 = vpop.eup %8905 }
 0x57b   : > { %v8908_v27 = vpop.eup %8907  ;;  %v10956_v30 = vmul.f32 %v8906_v1, %v3663_v26 }
 0x57c   : > { %v10958_v43 = vmul.f32 %v8908_v27, %v3660_v57 }
 0x57e   : > { %v8910_v31 = vpop.eup %8909 }
 0x57f   : > { %v8912_v13 = vpop.eup %8911  ;;  %v10962_v10 = vmul.f32 %v8910_v31, %v7624_v38 }
 0x580   : > { %v10964_v18 = vmul.f32 %v8912_v13, %v7623_v9 }
 0x587   : > { %v7677_v8 = vpop.f32.mrb[114].mxu1 }
 0x588   : > { %8913 = vrcp.f32 %v7677_v8  ;;  %v3999_v3 = vpop.f32.mrb[115].mxu1 }
 0x589   : > { %8915 = vrcp.f32 %v3999_v3 }
 0x58b   : > { %v7680_v26 = vpop.f32.mrb[116].mxu1 }
 0x58c   : > { %8917 = vrcp.f32 %v7680_v26  ;;  %v4009_v57 = vpop.f32.mrb[117].mxu1 }
 0x58d   : > { %8919 = vrcp.f32 %v4009_v57  ;;  %v7627_v1 = vpop.f32.mrb[92].mxu0 }
 0x58e   : > { %v3676_v27 = vpop.f32.mrb[93].mxu0 }
 0x58f   : > { %v7628_v14 = vpop.f32.mrb[94].mxu0 }
 0x590   : > { %v3679_v29 = vpop.f32.mrb[95].mxu0 }
 0x592   : > { %v8914_v7 = vpop.eup %8913 }
 0x593   : > { %v8916_v38 = vpop.eup %8915  ;;  %v10968_v31 = vmul.f32 %v8914_v7, %v3679_v29 }
 0x594   : > { %v10970_v9 = vmul.f32 %v8916_v38, %v3676_v27 }
 0x595   : > { %v7635_v13 = vpop.f32.mrb[96].mxu0 }
 0x596   : > { %v8918_v47 = vpop.eup %8917  ;;  %8921 = vrcp.f32 %v7635_v13  ;;  %v3859_v3 = vpop.f32.mrb[97].mxu0 }
 0x597   : > { %v8920_v26 = vpop.eup %8919  ;;  %v4081_v12 = vmul.f32 %v8918_v47, %v7628_v14  ;;  %8923 = vrcp.f32 %v3859_v3 }
 0x598   : > { %v4080_v57 = vmul.f32 %v8920_v26, %v7627_v1 }
 0x599   : > { %v7638_v4 = vpop.f32.mrb[98].mxu0 }
 0x59a   : > { %v4097_v62 = vpack.c.bf16 %v4081_v12, %v4080_v57  ;;  %8925 = vrcp.f32 %v7638_v4  ;;  %v3869_v55 = vpop.f32.mrb[99].mxu0 }
 0x59b   : > { %8927 = vrcp.f32 %v3869_v55 }
 0x59d   : > { %v7641_v7 = vpop.f32.mrb[100].mxu0 }
 0x59e   : > { %8929 = vrcp.f32 %v7641_v7  ;;  %v3879_v29 = vpop.f32.mrb[101].mxu0 }
 0x59f   : > { %8931 = vrcp.f32 %v3879_v29 }
 0x5a0   : > { %v8922_v27 = vpop.eup %8921 }
 0x5a1   : > { %v8924_v38 = vpop.eup %8923  ;;  %v7644_v25 = vpop.f32.mrb[102].mxu0  ;;  %v4051_v8 = vmul.f32 %v8922_v27, %v10892_v56 }
 0x5a2   : > { %8933 = vrcp.f32 %v7644_v25  ;;  %v3889_v13 = vpop.f32.mrb[103].mxu0  ;;  %v4050_v14 = vmul.f32 %v8924_v38, %v10888_v2 }
 0x5a3   : > { %8935 = vrcp.f32 %v3889_v13 }
 0x5a4   : > { %v8926_v47 = vpop.eup %8925  ;;  %v4082_v1 = vpack.c.bf16 %v4051_v8, %v4050_v14 }
 0x5a5   : > { %v8928_v12 = vpop.eup %8927  ;;  %v4053_v4 = vmul.f32 %v8926_v47, %v10890_v34  ;;  %v7647_v55 = vpop.f32.mrb[104].mxu0 }
 0x5a6   : > { %v4052_v3 = vmul.f32 %v8928_v12, %v10886_v58  ;;  %8937 = vrcp.f32 %v7647_v55  ;;  %v3899_v26 = vpop.f32.mrb[105].mxu0  ;;  %7685 = vmatprep.mubr.msk.bf16.mxu0 %vm736_vm0, %v4082_v1 }
 0x5a7   : > { %8939 = vrcp.f32 %v3899_v26 }
 0x5a8   : > { %v8930_v57 = vpop.eup %8929  ;;  %v4083_v56 = vpack.c.bf16 %v4053_v4, %v4052_v3 }
 0x5a9   : > { %v8932_v25 = vpop.eup %8931  ;;  %v4055_v7 = vmul.f32 %v8930_v57, %v10900_v63 }
 0x5aa   : > { %7686 = vmatmul.mubr.msk.bf16.vlgmr.msra.gmra.mrb[108].mxu0 %vm736_vm0, %v4083_v56  ;;  %v4054_v2 = vmul.f32 %v8932_v25, %v10896_v0  ;;  %v12748_v0 = vpack.c.bf16 %v10909_v20, %v10911_v61  ;;  %v12753_v20 = vpack.c.bf16 %v10942_v21, %v10944_v53  ;;  %v12754_v61 = vpack.c.bf16 %v10950_v48, %v10952_v6 }
 0x5ac   : > { %v8934_v8 = vpop.eup %8933  ;;  %v4084_v29 = vpack.c.bf16 %v4055_v7, %v4054_v2 }
 0x5ad   : > { %v8936_v34 = vpop.eup %8935  ;;  %v4057_v27 = vmul.f32 %v8934_v8, %v10898_v16  ;;  %v12750_v16 = vpack.c.bf16 %v10924_v37, %v10926_v33  ;;  %v12757_v37 = vpack.c.bf16 %v10968_v31, %v10970_v9  ;;  %v11033_v33 = vld [vmem:[%s12642_s13] ss:$0 sm:$0xff] }
 0x5ae   : > { %7689 = vmatprep.mubr.msk.bf16.mxu0 %vm736_vm0, %v4084_v29  ;;  %v4056_v58 = vmul.f32 %v8936_v34, %v10894_v51  ;;  %v12749_v51 = vpack.c.bf16 %v10918_v17, %v10920_v50  ;;  %v12755_v17 = vpack.c.bf16 %v10956_v30, %v10958_v43  ;;  %v12756_v50 = vpack.c.bf16 %v10962_v10, %v10964_v18 }
 0x5b0   : > { %v8938_v38 = vpop.eup %8937  ;;  %v4085_v13 = vpack.c.bf16 %v4057_v27, %v4056_v58 }
 0x5b1   : > { %v8940_v14 = vpop.eup %8939  ;;  %v4059_v47 = vmul.f32 %v8938_v38, %v10904_v41  ;;  %v12752_v41 = vpack.c.bf16 %v10936_v23, %v10938_v28 }
 0x5b2   : > { %7690 = vmatmul.mubr.msk.bf16.gmra.mrb[112].mxu0 %vm736_vm0, %v4085_v13  ;;  %v4058_v63 = vmul.f32 %v8940_v14, %v10902_v46  ;;  %v12751_v46 = vpack.c.bf16 %v10930_v54, %v10932_v45 }
 0x5b4   : > { %v4086_v1 = vpack.c.bf16 %v4059_v47, %v4058_v63 }
 0x5b6   : > { %7693 = vmatprep.mubr.msk.bf16.mxu0 %vm736_vm0, %v4086_v1 }
 0x5ba   : > { %7694 = vmatmul.mubr.msk.bf16.gmra.mrb[116].mxu0 %vm736_vm0, %v12748_v0 }
 0x5bb   : > { %7697 = vmatprep.mubr.msk.bf16.mxu0 %vm736_vm0, %v12749_v51 }
 0x5c2   : > { %7698 = vmatmul.mubr.msk.bf16.gmra.mrb[120].mxu0 %vm736_vm0, %v12750_v16 }
 0x5c3   : > { %7701 = vmatprep.mubr.msk.bf16.mxu0 %vm736_vm0, %v12751_v46 }
 0x5ca   : > { %7702 = vmatmul.mubr.msk.bf16.gmra.mrb[124].mxu0 %vm736_vm0, %v12752_v41 }
 0x5cb   : > { %7705 = vmatprep.mubr.msk.bf16.mxu0 %vm736_vm0, %v12753_v20 }
 0x5d2   : > { %7706 = vmatmul.mubr.msk.bf16.gmra.mrb[128].mxu0 %vm736_vm0, %v12754_v61 }
 0x5d3   : > { %7709 = vmatprep.mubr.msk.bf16.mxu0 %vm736_vm0, %v12755_v17 }
 0x5da   : > { %7710 = vmatmul.mubr.msk.bf16.gmra.mrb[132].mxu0 %vm736_vm0, %v12756_v50 }
 0x5db   : > { %7713 = vmatprep.mubr.msk.bf16.mxu0 %vm736_vm0, %v12757_v37 }
 0x5e2   : > { %7714 = vmatmul.mubr.msk.bf16.gmra.mrb[136].mxu0 %vm736_vm0, %v4097_v62 }
 0x67d   : > { %v7687_v54 = vpop.f32.mrb[108].mxu0 }
 0x67e   : > { %v4212_v45 = vadd.f32 %v7687_v54, %v11033_v33  ;;  %v4203_v23 = vpop.f32.mrb[109].mxu0 }
 0x67f   : > { %v4204_v28 = vadd.f32 %v11033_v33, %v4203_v23  ;;  %v7688_v21 = vpop.f32.mrb[110].mxu0 }
 0x680   : > { %v11038_v53 = vadd.f32 %v4212_v45, %v10382_v39  ;;  %v4215_v48 = vadd.f32 %v7688_v21, %v11033_v33  ;;  %v4206_v6 = vpop.f32.mrb[111].mxu0 }
 0x681   : > { %v4207_v62 = vadd.f32 %v11033_v33, %v4206_v6  ;;  %v11043_v30 = vadd.f32 %v4204_v28, %v10365_v40 }
 0x682   : > { %v11046_v43 = vadd.f32 %v4215_v48, %v10384_v19  ;;  %v4368_v10 = vsel %vm736_vm0, %v11038_v53, 0.0 }
 0x683   : > { %4369 = vadd.xlane.f32.xlu1 %v4368_v10  ;;  %v11051_v18 = vadd.f32 %v4207_v62, %v10367_v42  ;;  %v4362_v40 = vsel %vm736_vm0, %v11043_v30, 0.0 }
 0x684   : > { %v4371_v39 = vsel %vm736_vm0, %v11046_v43, 0.0 }
 0x685   : > { %4372 = vadd.xlane.f32.xlu0 %v4371_v39  ;;  %v7691_v31 = vpop.f32.mrb[112].mxu0  ;;  %v4365_v26 = vsel %vm736_vm0, %v11051_v18, 0.0 }
 0x686   : > { %v4228_v9 = vadd.f32 %v7691_v31, %v11033_v33  ;;  %v4219_v12 = vpop.f32.mrb[113].mxu0 }
 0x687   : > { %v4220_v19 = vadd.f32 %v11033_v33, %v4219_v12  ;;  %v7692_v4 = vpop.f32.mrb[114].mxu0  ;;  %4363 = vadd.xlane.f32.xlu1 %v4362_v40  ;;  %v12759_v40 = vld [vmem:[#allocation15_spill] sm:$0xff] }
 0x688   : > { %v11060_v55 = vadd.f32 %v4228_v9, %v10414_v15  ;;  %v4231_v42 = vadd.f32 %v7692_v4, %v11033_v33  ;;  %v4222_v3 = vpop.f32.mrb[115].mxu0  ;;  %v12758_v9 = vld [vmem:[#allocation14_spill] sm:$0xff] }
 0x689   : > { %v4223_v57 = vadd.f32 %v11033_v33, %v4222_v3  ;;  %4366 = vadd.xlane.f32.xlu0 %v4365_v26  ;;  %v11067_v56 = vadd.f32 %v4220_v19, %v10395_v49 }
 0x68a   : > { %v11070_v25 = vadd.f32 %v4231_v42, %v10416_v52  ;;  %v4380_v7 = vsel %vm736_vm0, %v11060_v55, 0.0 }
 0x68b   : > { %4381 = vadd.xlane.f32.xlu1 %v4380_v7  ;;  %v11075_v15 = vadd.f32 %v4223_v57, %v10397_v44  ;;  %v4374_v49 = vsel %vm736_vm0, %v11067_v56, 0.0 }
 0x68c   : > { %v4383_v2 = vsel %vm736_vm0, %v11070_v25, 0.0 }
 0x68d   : > { %4384 = vadd.xlane.f32.xlu0 %v4383_v2  ;;  %v7695_v8 = vpop.f32.mrb[116].mxu0  ;;  %v4377_v13 = vsel %vm736_vm0, %v11075_v15, 0.0 }
 0x68e   : > { %v4244_v29 = vadd.f32 %v7695_v8, %v11033_v33  ;;  %v4235_v34 = vpop.f32.mrb[117].mxu0 }
 0x68f   : > { %v4236_v52 = vadd.f32 %v11033_v33, %v4235_v34  ;;  %4375 = vadd.xlane.f32.xlu1 %v4374_v49  ;;  %v7696_v27 = vpop.f32.mrb[118].mxu0  ;;  %v12761_v34 = vld [vmem:[#allocation20_spill] sm:$0xff] }
 0x690   : > { %v11084_v58 = vadd.f32 %v4244_v29, %v10436_v22  ;;  %v4247_v44 = vadd.f32 %v7696_v27, %v11033_v33  ;;  %v4238_v38 = vpop.f32.mrb[119].mxu0 }
 0x691   : > { %v4239_v14 = vadd.f32 %v11033_v33, %v4238_v38  ;;  %4378 = vadd.xlane.f32.xlu0 %v4377_v13  ;;  %v11091_v47 = vadd.f32 %v4236_v52, %v10425_v60  ;;  %v12762_v13 = vld [vmem:[#allocation13_spill] sm:$0xff] }
 0x692   : > { %v11094_v63 = vadd.f32 %v4247_v44, %v10438_v32  ;;  %v4392_v1 = vsel %vm736_vm0, %v11084_v58, 0.0 }
 0x693   : > { %4393 = vadd.xlane.f32.xlu1 %v4392_v1  ;;  %v11099_v22 = vadd.f32 %v4239_v14, %v10427_v5  ;;  %v4386_v60 = vsel %vm736_vm0, %v11091_v47, 0.0  ;;  %v12763_v1 = vld [vmem:[#allocation19_spill] sm:$0xff] }
 0x694   : > { %v4395_v0 = vsel %vm736_vm0, %v11094_v63, 0.0 }
 0x695   : > { %4396 = vadd.xlane.f32.xlu0 %v4395_v0  ;;  %v7699_v51 = vpop.f32.mrb[120].mxu0  ;;  %v4389_v17 = vsel %vm736_vm0, %v11099_v22, 0.0 }
 0x696   : > { %v4260_v16 = vadd.f32 %v7699_v51, %v11033_v33  ;;  %v4251_v46 = vpop.f32.mrb[121].mxu0 }
 0x697   : > { %v4252_v32 = vadd.f32 %v11033_v33, %v4251_v46  ;;  %v7700_v41 = vpop.f32.mrb[122].mxu0  ;;  %4387 = vadd.xlane.f32.xlu1 %v4386_v60 }
 0x698   : > { %v11108_v20 = vadd.f32 %v4260_v16, %v10458_v59  ;;  %v4263_v5 = vadd.f32 %v7700_v41, %v11033_v33  ;;  %v4254_v61 = vpop.f32.mrb[123].mxu0  ;;  %v12764_v16 = vld [vmem:[#allocation17_spill] sm:$0xff] }
 0x699   : > { %v4255_v50 = vadd.f32 %v11033_v33, %v4254_v61  ;;  %4390 = vadd.xlane.f32.xlu0 %v4389_v17  ;;  %v11115_v37 = vadd.f32 %v4252_v32, %v10447_v24 }
 0x69a   : > { %v11118_v54 = vadd.f32 %v4263_v5, %v10460_v36  ;;  %v4404_v45 = vsel %vm736_vm0, %v11108_v20, 0.0 }
 0x69b   : > { %4405 = vadd.xlane.f32.xlu1 %v4404_v45  ;;  %v11123_v59 = vadd.f32 %v4255_v50, %v10449_v35  ;;  %v4398_v24 = vsel %vm736_vm0, %v11115_v37, 0.0  ;;  %v12765_v45 = vld [vmem:[#allocation24_spill] sm:$0xff] }
 0x69c   : > { %v4407_v23 = vsel %vm736_vm0, %v11118_v54, 0.0 }
 0x69d   : > { %v7703_v28 = vpop.f32.mrb[124].mxu0  ;;  %4408 = vadd.xlane.f32.xlu0 %v4407_v23  ;;  %v4401_v39 = vsel %vm736_vm0, %v11123_v59, 0.0 }
 0x69e   : > { %v4276_v21 = vadd.f32 %v7703_v28, %v11033_v33  ;;  %v4267_v48 = vpop.f32.mrb[125].mxu0 }
 0x69f   : > { %v4268_v36 = vadd.f32 %v11033_v33, %v4267_v48  ;;  %v7704_v6 = vpop.f32.mrb[126].mxu0  ;;  %4399 = vadd.xlane.f32.xlu1 %v4398_v24 }
 0x6a0   : > { %v11132_v62 = vadd.f32 %v4276_v21, %v10484_v11  ;;  %v4279_v35 = vadd.f32 %v7704_v6, %v11033_v33  ;;  %v4270_v10 = vpop.f32.mrb[127].mxu0  ;;  %v12760_v11 = vld [vmem:[#allocation16_spill] sm:$0xff] }
 0x6a1   : > { %v4271_v31 = vadd.f32 %v11033_v33, %v4270_v10  ;;  %4402 = vadd.xlane.f32.xlu0 %v4401_v39  ;;  %v11139_v12 = vadd.f32 %v4268_v36, %v12758_v9  ;;  %v12766_v36 = vld [vmem:[#allocation18_spill] sm:$0xff] }
 0x6a2   : > { %v11142_v19 = vadd.f32 %v4279_v35, %v12759_v40  ;;  %v4416_v4 = vsel %vm736_vm0, %v11132_v62, 0.0  ;;  %v12767_v35 = vld [vmem:[#allocation23_spill] sm:$0xff] }
 0x6a3   : > { %4417 = vadd.xlane.f32.xlu1 %v4416_v4  ;;  %v11147_v42 = vadd.f32 %v4271_v31, %v12760_v11  ;;  %v4410_v2 = vsel %vm736_vm0, %v11139_v12, 0.0  ;;  %v12768_v31 = vld [vmem:[#allocation22_spill] sm:$0xff] }
 0x6a4   : > { %v4419_v3 = vsel %vm736_vm0, %v11142_v19, 0.0 }
 0x6a5   : > { %v7707_v26 = vpop.f32.mrb[128].mxu0  ;;  %4420 = vadd.xlane.f32.xlu0 %v4419_v3  ;;  %v4413_v44 = vsel %vm736_vm0, %v11147_v42, 0.0 }
 0x6a6   : > { %v4292_v57 = vadd.f32 %v7707_v26, %v11033_v33  ;;  %v4283_v7 = vpop.f32.mrb[129].mxu0 }
 0x6a7   : > { %v4284_v8 = vadd.f32 %v11033_v33, %v4283_v7  ;;  %v7708_v29 = vpop.f32.mrb[130].mxu0  ;;  %4411 = vadd.xlane.f32.xlu1 %v4410_v2  ;;  %v12769_v2 = vld [vmem:[#allocation28_spill] sm:$0xff] }
 0x6a8   : > { %v11156_v49 = vadd.f32 %v4292_v57, %v12761_v34  ;;  %v4295_v52 = vadd.f32 %v7708_v29, %v11033_v33  ;;  %v4286_v27 = vpop.f32.mrb[131].mxu0 }
 0x6a9   : > { %v4287_v38 = vadd.f32 %v11033_v33, %v4286_v27  ;;  %4414 = vadd.xlane.f32.xlu0 %v4413_v44  ;;  %v11163_v14 = vadd.f32 %v4284_v8, %v12762_v13  ;;  %v12770_v44 = vld [vmem:[#allocation21_spill] sm:$0xff]  ;;  %v12771_v13 = vld [vmem:[#allocation27_spill] sm:$0xff] }
 0x6aa   : > { %v11166_v0 = vadd.f32 %v4295_v52, %v12763_v1  ;;  %v4428_v51 = vsel %vm736_vm0, %v11156_v49, 0.0 }
 0x6ab   : > { %4429 = vadd.xlane.f32.xlu1 %v4428_v51  ;;  %v11171_v46 = vadd.f32 %v4287_v38, %v12764_v16  ;;  %v4422_v61 = vsel %vm736_vm0, %v11163_v14, 0.0  ;;  %v12772_v16 = vld [vmem:[#allocation25_spill] sm:$0xff] }
 0x6ac   : > { %v4431_v60 = vsel %vm736_vm0, %v11166_v0, 0.0 }
 0x6ad   : > { %v7711_v32 = vpop.f32.mrb[132].mxu0  ;;  %4432 = vadd.xlane.f32.xlu0 %v4431_v60  ;;  %v4425_v48 = vsel %vm736_vm0, %v11171_v46, 0.0 }
 0x6ae   : > { %v4308_v41 = vadd.f32 %v7711_v32, %v11033_v33  ;;  %v4299_v5 = vpop.f32.mrb[133].mxu0 }
 0x6af   : > { %v4300_v17 = vadd.f32 %v11033_v33, %v4299_v5  ;;  %v7712_v50 = vpop.f32.mrb[134].mxu0  ;;  %4423 = vadd.xlane.f32.xlu1 %v4422_v61  ;;  %v11227_v5 = vpop.permute.xlu1 %8294 }
 0x6b0   : > { %v11180_v23 = vadd.f32 %v4308_v41, %v12765_v45  ;;  %v4311_v28 = vadd.f32 %v7712_v50, %v11033_v33  ;;  %v4302_v21 = vpop.f32.mrb[135].mxu0  ;;  %v11229_v61 = vpop.permute.xlu0 %8289 }
 0x6b1   : > { %v4303_v24 = vadd.f32 %v11033_v33, %v4302_v21  ;;  %4426 = vadd.xlane.f32.xlu0 %v4425_v48  ;;  %v11187_v6 = vadd.f32 %v4300_v17, %v12766_v36 }
 0x6b2   : > { %v11190_v10 = vadd.f32 %v4311_v28, %v12767_v35  ;;  %v4440_v39 = vsel %vm736_vm0, %v11180_v23, 0.0 }
 0x6b3   : > { %4441 = vadd.xlane.f32.xlu1 %v4440_v39  ;;  %v11195_v9 = vadd.f32 %v4303_v24, %v12768_v31  ;;  %v4434_v26 = vsel %vm736_vm0, %v11187_v6, 0.0 }
 0x6b4   : > { %v4443_v40 = vsel %vm736_vm0, %v11190_v10, 0.0 }
 0x6b5   : > { %v7715_v4 = vpop.f32.mrb[136].mxu0  ;;  %4444 = vadd.xlane.f32.xlu0 %v4443_v40  ;;  %v4437_v52 = vsel %vm736_vm0, %v11195_v9, 0.0 }
 0x6b6   : > { %v4324_v11 = vadd.f32 %v7715_v4, %v11033_v33  ;;  %v4315_v3 = vpop.f32.mrb[137].mxu0 }
 0x6b7   : > { %v4316_v57 = vadd.f32 %v11033_v33, %v4315_v3  ;;  %v7716_v7 = vpop.f32.mrb[138].mxu0  ;;  %4435 = vadd.xlane.f32.xlu1 %v4434_v26 }
 0x6b8   : > { %v11204_v8 = vadd.f32 %v4324_v11, %v12769_v2  ;;  %v4327_v29 = vadd.f32 %v7716_v7, %v11033_v33  ;;  %v4318_v34 = vpop.f32.mrb[139].mxu0 }
 0x6b9   : > { %v4319_v27 = vadd.f32 %v11033_v33, %v4318_v34  ;;  %4438 = vadd.xlane.f32.xlu0 %v4437_v52  ;;  %v11211_v38 = vadd.f32 %v4316_v57, %v12770_v44 }
 0x6ba   : > { %v11214_v1 = vadd.f32 %v4327_v29, %v12771_v13  ;;  %v4452_v51 = vsel %vm736_vm0, %v11204_v8, 0.0 }
 0x6bb   : > { %4453 = vadd.xlane.f32.xlu1 %v4452_v51  ;;  %v11219_v60 = vadd.f32 %v4319_v27, %v12772_v16  ;;  %v4446_v33 = vsel %vm736_vm0, %v11211_v38, 0.0 }
 0x6bc   : > { %v4455_v32 = vsel %vm736_vm0, %v11214_v1, 0.0 }
 0x6bd   : > { %4456 = vadd.xlane.f32.xlu0 %v4455_v32  ;;  %v4449_v41 = vsel %vm736_vm0, %v11219_v60, 0.0 }
 0x6bf   : > { %4447 = vadd.xlane.f32.xlu1 %v4446_v33 }
 0x6c1   : > { %4450 = vadd.xlane.f32.xlu0 %v4449_v41 }
 0x710   : > { %v4370_v17 = vpop.xlane.xlu1 %4369 }
 0x711   : > { %v4461_v50 = vmul.f32 0.03125, %v4370_v17 }
 0x712   : > { %v4373_v45 = vpop.xlane.xlu0 %4372 }
 0x713   : > { %v11232_v28 = vsub.f32 %v11038_v53, %v4461_v50  ;;  %v4462_v21 = vmul.f32 0.03125, %v4373_v45 }
 0x714   : > { %v4364_v48 = vpop.xlane.xlu1 %4363 }
 0x715   : > { %v11235_v24 = vsub.f32 %v11046_v43, %v4462_v21  ;;  %v4459_v36 = vmul.f32 0.03125, %v4364_v48  ;;  %v4525_v35 = vmul.f32 %v11232_v28, %v11232_v28 }
 0x716   : > { %v4367_v39 = vpop.xlane.xlu0 %4366 }
 0x717   : > { %v11240_v31 = vsub.f32 %v11043_v30, %v4459_v36  ;;  %v4460_v40 = vmul.f32 0.03125, %v4367_v39  ;;  %v4561_v4 = vsel %vm736_vm0, %v4525_v35, 0.0  ;;  %v4526_v53 = vmul.f32 %v11235_v24, %v11235_v24 }
 0x718   : > { %v4382_v11 = vpop.xlane.xlu1 %4381  ;;  %4562 = vadd.xlane.f32.xlu1 %v4561_v4 }
 0x719   : > { %v11246_v3 = vsub.f32 %v11051_v18, %v4460_v40  ;;  %v4465_v43 = vmul.f32 0.03125, %v4382_v11  ;;  %v4564_v26 = vsel %vm736_vm0, %v4526_v53, 0.0  ;;  %v4523_v57 = vmul.f32 %v11240_v31, %v11240_v31 }
 0x71a   : > { %4565 = vadd.xlane.f32.xlu0 %v4564_v26  ;;  %v4385_v30 = vpop.xlane.xlu0 %4384 }
 0x71b   : > { %v11252_v7 = vsub.f32 %v11060_v55, %v4465_v43  ;;  %v4466_v2 = vmul.f32 0.03125, %v4385_v30  ;;  %v4555_v29 = vsel %vm736_vm0, %v4523_v57, 0.0  ;;  %v4524_v34 = vmul.f32 %v11246_v3, %v11246_v3 }
 0x71c   : > { %v4376_v52 = vpop.xlane.xlu1 %4375  ;;  %4556 = vadd.xlane.f32.xlu1 %v4555_v29 }
 0x71d   : > { %v11258_v18 = vsub.f32 %v11070_v25, %v4466_v2  ;;  %v4463_v27 = vmul.f32 0.03125, %v4376_v52  ;;  %v4558_v44 = vsel %vm736_vm0, %v4524_v34, 0.0  ;;  %v4529_v13 = vmul.f32 %v11252_v7, %v11252_v7 }
 0x71e   : > { %4559 = vadd.xlane.f32.xlu0 %v4558_v44  ;;  %v4379_v55 = vpop.xlane.xlu0 %4378 }
 0x71f   : > { %v11264_v51 = vsub.f32 %v11067_v56, %v4463_v27  ;;  %v4464_v16 = vmul.f32 0.03125, %v4379_v55  ;;  %v4573_v32 = vsel %vm736_vm0, %v4529_v13, 0.0  ;;  %v4530_v33 = vmul.f32 %v11258_v18, %v11258_v18 }
 0x720   : > { %v4394_v41 = vpop.xlane.xlu1 %4393  ;;  %4574 = vadd.xlane.f32.xlu1 %v4573_v32 }
 0x721   : > { %v11270_v25 = vsub.f32 %v11075_v15, %v4464_v16  ;;  %v4469_v17 = vmul.f32 0.03125, %v4394_v41  ;;  %v4576_v50 = vsel %vm736_vm0, %v4530_v33, 0.0  ;;  %v4527_v45 = vmul.f32 %v11264_v51, %v11264_v51 }
 0x722   : > { %4577 = vadd.xlane.f32.xlu0 %v4576_v50  ;;  %v4397_v56 = vpop.xlane.xlu0 %4396 }
 0x723   : > { %v11276_v21 = vsub.f32 %v11084_v58, %v4469_v17  ;;  %v4470_v48 = vmul.f32 0.03125, %v4397_v56  ;;  %v4567_v36 = vsel %vm736_vm0, %v4527_v45, 0.0  ;;  %v4528_v35 = vmul.f32 %v11270_v25, %v11270_v25 }
 0x724   : > { %4568 = vadd.xlane.f32.xlu1 %v4567_v36  ;;  %v4388_v15 = vpop.xlane.xlu1 %4387 }
 0x725   : > { %v11282_v39 = vsub.f32 %v11094_v63, %v4470_v48  ;;  %v4467_v40 = vmul.f32 0.03125, %v4388_v15  ;;  %v4570_v4 = vsel %vm736_vm0, %v4528_v35, 0.0  ;;  %v4533_v53 = vmul.f32 %v11276_v21, %v11276_v21 }
 0x726   : > { %4571 = vadd.xlane.f32.xlu0 %v4570_v4  ;;  %v4391_v58 = vpop.xlane.xlu0 %4390 }
 0x727   : > { %v11288_v11 = vsub.f32 %v11091_v47, %v4467_v40  ;;  %v4468_v43 = vmul.f32 0.03125, %v4391_v58  ;;  %v4585_v26 = vsel %vm736_vm0, %v4533_v53, 0.0  ;;  %v4534_v57 = vmul.f32 %v11282_v39, %v11282_v39 }
 0x728   : > { %4586 = vadd.xlane.f32.xlu1 %v4585_v26  ;;  %v4406_v63 = vpop.xlane.xlu1 %4405 }
 0x729   : > { %v11294_v30 = vsub.f32 %v11099_v22, %v4468_v43  ;;  %v4473_v2 = vmul.f32 0.03125, %v4406_v63  ;;  %v4588_v29 = vsel %vm736_vm0, %v4534_v57, 0.0  ;;  %v4531_v34 = vmul.f32 %v11288_v11, %v11288_v11 }
 0x72a   : > { %4589 = vadd.xlane.f32.xlu0 %v4588_v29  ;;  %v4409_v47 = vpop.xlane.xlu0 %4408 }
 0x72b   : > { %v11300_v52 = vsub.f32 %v11108_v20, %v4473_v2  ;;  %v4474_v27 = vmul.f32 0.03125, %v4409_v47  ;;  %v4579_v44 = vsel %vm736_vm0, %v4531_v34, 0.0  ;;  %v4532_v13 = vmul.f32 %v11294_v30, %v11294_v30 }
 0x72c   : > { %4580 = vadd.xlane.f32.xlu1 %v4579_v44  ;;  %v4400_v22 = vpop.xlane.xlu1 %4399 }
 0x72d   : > { %v11306_v55 = vsub.f32 %v11118_v54, %v4474_v27  ;;  %v4471_v16 = vmul.f32 0.03125, %v4400_v22  ;;  %v4582_v32 = vsel %vm736_vm0, %v4532_v13, 0.0  ;;  %v4537_v33 = vmul.f32 %v11300_v52, %v11300_v52 }
 0x72e   : > { %4583 = vadd.xlane.f32.xlu0 %v4582_v32  ;;  %v4403_v20 = vpop.xlane.xlu0 %4402 }
 0x72f   : > { %v11312_v41 = vsub.f32 %v11115_v37, %v4471_v16  ;;  %v4472_v17 = vmul.f32 0.03125, %v4403_v20  ;;  %v4597_v50 = vsel %vm736_vm0, %v4537_v33, 0.0  ;;  %v4538_v45 = vmul.f32 %v11306_v55, %v11306_v55 }
 0x730   : > { %4598 = vadd.xlane.f32.xlu1 %v4597_v50  ;;  %v4418_v54 = vpop.xlane.xlu1 %4417 }
 0x731   : > { %v11318_v56 = vsub.f32 %v11123_v59, %v4472_v17  ;;  %v4477_v48 = vmul.f32 0.03125, %v4418_v54  ;;  %v4600_v36 = vsel %vm736_vm0, %v4538_v45, 0.0  ;;  %v4535_v35 = vmul.f32 %v11312_v41, %v11312_v41 }
 0x732   : > { %4601 = vadd.xlane.f32.xlu0 %v4600_v36  ;;  %v4421_v37 = vpop.xlane.xlu0 %4420 }
 0x733   : > { %v11324_v15 = vsub.f32 %v11132_v62, %v4477_v48  ;;  %v4478_v40 = vmul.f32 0.03125, %v4421_v37  ;;  %v4591_v4 = vsel %vm736_vm0, %v4535_v35, 0.0  ;;  %v4536_v53 = vmul.f32 %v11318_v56, %v11318_v56 }
 0x734   : > { %4592 = vadd.xlane.f32.xlu1 %v4591_v4  ;;  %v4412_v59 = vpop.xlane.xlu1 %4411 }
 0x735   : > { %v11330_v58 = vsub.f32 %v11142_v19, %v4478_v40  ;;  %v4475_v43 = vmul.f32 0.03125, %v4412_v59  ;;  %v4594_v26 = vsel %vm736_vm0, %v4536_v53, 0.0  ;;  %v4541_v57 = vmul.f32 %v11324_v15, %v11324_v15 }
 0x736   : > { %4595 = vadd.xlane.f32.xlu0 %v4594_v26  ;;  %v4415_v62 = vpop.xlane.xlu0 %4414 }
 0x737   : > { %v11336_v63 = vsub.f32 %v11139_v12, %v4475_v43  ;;  %v4476_v2 = vmul.f32 0.03125, %v4415_v62  ;;  %v4609_v29 = vsel %vm736_vm0, %v4541_v57, 0.0  ;;  %v4542_v34 = vmul.f32 %v11330_v58, %v11330_v58 }
 0x738   : > { %4610 = vadd.xlane.f32.xlu1 %v4609_v29  ;;  %v4430_v19 = vpop.xlane.xlu1 %4429 }
 0x739   : > { %v11342_v47 = vsub.f32 %v11147_v42, %v4476_v2  ;;  %v4481_v27 = vmul.f32 0.03125, %v4430_v19  ;;  %v4612_v44 = vsel %vm736_vm0, %v4542_v34, 0.0  ;;  %v4539_v13 = vmul.f32 %v11336_v63, %v11336_v63 }
 0x73a   : > { %4613 = vadd.xlane.f32.xlu0 %v4612_v44  ;;  %v4433_v12 = vpop.xlane.xlu0 %4432 }
 0x73b   : > { %v11348_v22 = vsub.f32 %v11156_v49, %v4481_v27  ;;  %v4482_v16 = vmul.f32 0.03125, %v4433_v12  ;;  %v4603_v32 = vsel %vm736_vm0, %v4539_v13, 0.0  ;;  %v4540_v33 = vmul.f32 %v11342_v47, %v11342_v47 }
 0x73c   : > { %4604 = vadd.xlane.f32.xlu1 %v4603_v32  ;;  %v4424_v42 = vpop.xlane.xlu1 %4423 }
 0x73d   : > { %v11354_v20 = vsub.f32 %v11166_v0, %v4482_v16  ;;  %v4479_v17 = vmul.f32 0.03125, %v4424_v42  ;;  %v4606_v50 = vsel %vm736_vm0, %v4540_v33, 0.0  ;;  %v4545_v45 = vmul.f32 %v11348_v22, %v11348_v22 }
 0x73e   : > { %4607 = vadd.xlane.f32.xlu0 %v4606_v50  ;;  %v4427_v49 = vpop.xlane.xlu0 %4426 }
 0x73f   : > { %v11360_v54 = vsub.f32 %v11163_v14, %v4479_v17  ;;  %v4480_v48 = vmul.f32 0.03125, %v4427_v49  ;;  %v4621_v36 = vsel %vm736_vm0, %v4545_v45, 0.0  ;;  %v4546_v35 = vmul.f32 %v11354_v20, %v11354_v20 }
 0x740   : > { %4622 = vadd.xlane.f32.xlu1 %v4621_v36  ;;  %v4442_v0 = vpop.xlane.xlu1 %4441 }
 0x741   : > { %v11366_v37 = vsub.f32 %v11171_v46, %v4480_v48  ;;  %v4485_v40 = vmul.f32 0.03125, %v4442_v0  ;;  %v4624_v4 = vsel %vm736_vm0, %v4546_v35, 0.0  ;;  %v4543_v53 = vmul.f32 %v11360_v54, %v11360_v54 }
 0x742   : > { %4625 = vadd.xlane.f32.xlu0 %v4624_v4  ;;  %v4445_v14 = vpop.xlane.xlu0 %4444 }
 0x743   : > { %v11372_v59 = vsub.f32 %v11180_v23, %v4485_v40  ;;  %v4486_v43 = vmul.f32 0.03125, %v4445_v14  ;;  %v4615_v26 = vsel %vm736_vm0, %v4543_v53, 0.0  ;;  %v4544_v57 = vmul.f32 %v11366_v37, %v11366_v37 }
 0x744   : > { %4616 = vadd.xlane.f32.xlu1 %v4615_v26  ;;  %v4436_v46 = vpop.xlane.xlu1 %4435 }
 0x745   : > { %v11378_v62 = vsub.f32 %v11190_v10, %v4486_v43  ;;  %v4483_v2 = vmul.f32 0.03125, %v4436_v46  ;;  %v4618_v29 = vsel %vm736_vm0, %v4544_v57, 0.0  ;;  %v4549_v34 = vmul.f32 %v11372_v59, %v11372_v59 }
 0x746   : > { %4619 = vadd.xlane.f32.xlu0 %v4618_v29  ;;  %v4439_v23 = vpop.xlane.xlu0 %4438 }
 0x747   : > { %v11384_v19 = vsub.f32 %v11187_v6, %v4483_v2  ;;  %v4484_v27 = vmul.f32 0.03125, %v4439_v23  ;;  %v4633_v44 = vsel %vm736_vm0, %v4549_v34, 0.0  ;;  %v4550_v13 = vmul.f32 %v11378_v62, %v11378_v62 }
 0x748   : > { %4634 = vadd.xlane.f32.xlu1 %v4633_v44  ;;  %v4454_v10 = vpop.xlane.xlu1 %4453 }
 0x749   : > { %v11390_v12 = vsub.f32 %v11195_v9, %v4484_v27  ;;  %v4489_v16 = vmul.f32 0.03125, %v4454_v10  ;;  %v4636_v32 = vsel %vm736_vm0, %v4550_v13, 0.0  ;;  %v4547_v33 = vmul.f32 %v11384_v19, %v11384_v19  ;;  %v8793_v9 = vld [vmem:[%s12645_s16 + $0x80] sm:$0xff]  }
 0x74a   : > { %4637 = vadd.xlane.f32.xlu0 %v4636_v32  ;;  %v4457_v6 = vpop.xlane.xlu0 %4456  ;;  %7717 = vmatprep.subr.bf16.mxu0 %v8793_v9 }
 0x74b   : > { %v11396_v42 = vsub.f32 %v11204_v8, %v4489_v16  ;;  %v4490_v17 = vmul.f32 0.03125, %v4457_v6  ;;  %v4627_v50 = vsel %vm736_vm0, %v4547_v33, 0.0  ;;  %v4548_v45 = vmul.f32 %v11390_v12, %v11390_v12  ;;  %7718 = vmatpush3.bf16.msra.mxu0 %v8793_v9 }
 0x74c   : > { %4628 = vadd.xlane.f32.xlu1 %v4627_v50  ;;  %v4448_v49 = vpop.xlane.xlu1 %4447 }
 0x74d   : > { %v11405_v48 = vsub.f32 %v11214_v1, %v4490_v17  ;;  %v4487_v36 = vmul.f32 0.03125, %v4448_v49  ;;  %v4630_v35 = vsel %vm736_vm0, %v4548_v45, 0.0  ;;  %v4553_v8 = vmul.f32 %v11396_v42, %v11396_v42  ;;  %v8794_v1 = vld [vmem:[%s12645_s16 + $0x88] sm:$0xff]  }
 0x74e   : > { %4631 = vadd.xlane.f32.xlu0 %v4630_v35  ;;  %v4451_v0 = vpop.xlane.xlu0 %4450  ;;  %7719 = vmatprep.subr.bf16.mxu0 %v8794_v1  ;;  %v8795_v35 = vld [vmem:[%s12645_s16 + $0x40] sm:$0xff]  }
 0x74f   : > { %v11411_v40 = vsub.f32 %v11211_v38, %v4487_v36  ;;  %v4488_v4 = vmul.f32 0.03125, %v4451_v0  ;;  %v4554_v53 = vmul.f32 %v11405_v48, %v11405_v48  ;;  %v4645_v43 = vsel %vm736_vm0, %v4553_v8, 0.0  ;;  %7720 = vmatpush3.bf16.msra.mxu0 %v8794_v1  ;;  %7357 = vmatprep.subr.bf16.mxu1 %v8795_v35  ;;  %v11435_v1 = vld [vmem:[%s12643_s14] ss:$0 sm:$0xff] }
 0x751   : > { %v11419_v14 = vsub.f32 %v11219_v60, %v4488_v4  ;;  %v4648_v26 = vsel %vm736_vm0, %v4554_v53, 0.0  ;;  %v4551_v57 = vmul.f32 %v11411_v40, %v11411_v40 }
 0x752   : > { %4646 = vadd.xlane.f32.xlu0 %v4645_v43  ;;  %4649 = vadd.xlane.f32.xlu1 %v4648_v26 }
 0x753   : > { %v4552_v38 = vmul.f32 %v11419_v14, %v11419_v14  ;;  %v4639_v46 = vsel %vm736_vm0, %v4551_v57, 0.0 }
 0x755   : > { %v4642_v2 = vsel %vm736_vm0, %v4552_v38, 0.0 }
 0x756   : > { %4640 = vadd.xlane.f32.xlu0 %v4639_v46  ;;  %4643 = vadd.xlane.f32.xlu1 %v4642_v2  ;;  %v8796_v46 = vld [vmem:[%s12645_s16] sm:$0xff]   ;;  %v8797_v2 = vld [vmem:[%s12645_s16 + $0x48] sm:$0xff]  }
 0x757   : > { %7358 = vmatpush3.bf16.msra.mxu1 %v8796_v46 }
 0x758   : > { %7359 = vmatprep.subr.bf16.mxu1 %v8797_v2 }
 0x7a5   : > { %v4563_v60 = vpop.xlane.xlu1 %4562 }
 0x7a6   : > { %v4653_v29 = vmul.f32 0.03125, %v4563_v60 }
 0x7a7   : > { %v4566_v34 = vpop.xlane.xlu0 %4565 }
 0x7a8   : > { %v4685_v23 = vadd.f32 1e-05, %v4653_v29  ;;  %v4654_v27 = vmul.f32 0.03125, %v4566_v34  ;;  %v11447_v29 = vld [vmem:[%s12644_s15] ss:$0 sm:$0xff] }
 0x7a9   : > { %v4557_v44 = vpop.xlane.xlu1 %4556 }
 0x7aa   : > { %8941 = vrsqrt.f32 %v4685_v23  ;;  %v4686_v13 = vadd.f32 1e-05, %v4654_v27  ;;  %v4651_v10 = vmul.f32 0.03125, %v4557_v44 }
 0x7ab   : > { %v4560_v16 = vpop.xlane.xlu0 %4559 }
 0x7ac   : > { %8943 = vrsqrt.f32 %v4686_v13  ;;  %v4683_v32 = vadd.f32 1e-05, %v4651_v10  ;;  %v4652_v33 = vmul.f32 0.03125, %v4560_v16 }
 0x7ad   : > { %v4575_v6 = vpop.xlane.xlu1 %4574 }
 0x7ae   : > { %8945 = vrsqrt.f32 %v4683_v32  ;;  %v4684_v17 = vadd.f32 1e-05, %v4652_v33  ;;  %v4657_v50 = vmul.f32 0.03125, %v4575_v6 }
 0x7af   : > { %v4578_v45 = vpop.xlane.xlu0 %4577 }
 0x7b0   : > { %8947 = vrsqrt.f32 %v4684_v17  ;;  %v4689_v9 = vadd.f32 1e-05, %v4657_v50  ;;  %v4658_v49 = vmul.f32 0.03125, %v4578_v45  ;;  %v8798_v50 = vld [vmem:[%s12645_s16 + $0x8] sm:$0xff]  }
 0x7b1   : > { %v4569_v36 = vpop.xlane.xlu1 %4568  ;;  %7360 = vmatpush3.bf16.msra.mxu1 %v8798_v50 }
 0x7b2   : > { %8949 = vrsqrt.f32 %v4689_v9  ;;  %v4690_v8 = vadd.f32 1e-05, %v4658_v49  ;;  %v4655_v0 = vmul.f32 0.03125, %v4569_v36 }
 0x7b3   : > { %v4572_v4 = vpop.xlane.xlu0 %4571 }
 0x7b4   : > { %v8942_v53 = vpop.eup %8941  ;;  %8951 = vrsqrt.f32 %v4690_v8  ;;  %v4687_v43 = vadd.f32 1e-05, %v4655_v0  ;;  %v4656_v26 = vmul.f32 0.03125, %v4572_v4 }
 0x7b5   : > { %v4749_v57 = vmul.f32 %v8942_v53, %v11232_v28  ;;  %v4587_v38 = vpop.xlane.xlu1 %4586  ;;  %v8799_v53 = vld [vmem:[%s12645_s16 + $0x50] sm:$0xff]  }
 0x7b6   : > { %v8944_v60 = vpop.eup %8943  ;;  %8953 = vrsqrt.f32 %v4687_v43  ;;  %v4688_v34 = vadd.f32 1e-05, %v4656_v26  ;;  %v4661_v23 = vmul.f32 0.03125, %v4587_v38  ;;  %7361 = vmatprep.subr.bf16.mxu1 %v8799_v53 }
 0x7b7   : > { %v4788_v28 = vmul.f32 %v11435_v1, %v4749_v57  ;;  %v4750_v27 = vmul.f32 %v8944_v60, %v11235_v24  ;;  %v4590_v44 = vpop.xlane.xlu0 %4589 }
 0x7b8   : > { %v8946_v13 = vpop.eup %8945  ;;  %8955 = vrsqrt.f32 %v4688_v34  ;;  %v4693_v10 = vadd.f32 1e-05, %v4661_v23  ;;  %v4662_v16 = vmul.f32 0.03125, %v4590_v44 }
 0x7b9   : > { %v4827_v32 = vadd.f32 %v11447_v29, %v4788_v28  ;;  %v4789_v33 = vmul.f32 %v11435_v1, %v4750_v27  ;;  %v4747_v6 = vmul.f32 %v8946_v13, %v11240_v31  ;;  %v4581_v17 = vpop.xlane.xlu1 %4580 }
 0x7ba   : > { %v8948_v45 = vpop.eup %8947  ;;  %8957 = vrsqrt.f32 %v4693_v10  ;;  %v4694_v24 = vadd.f32 1e-05, %v4662_v16  ;;  %v4659_v9 = vmul.f32 0.03125, %v4581_v17  ;;  %v8801_v10 = vld [vmem:[%s12645_s16 + $0x58] sm:$0xff]  }
 0x7bb   : > { %4913 = vst.msk [vmem:[#allocation2 + $0x31] sm:$0xff] %vm736_vm0, %v4827_v32  ;;  %v4828_v49 = vadd.f32 %v11447_v29, %v4789_v33  ;;  %v4786_v36 = vmul.f32 %v11435_v1, %v4747_v6  ;;  %v4748_v35 = vmul.f32 %v8948_v45, %v11246_v3  ;;  %v4584_v8 = vpop.xlane.xlu0 %4583  ;;  %v8800_v3 = vld [vmem:[%s12645_s16 + $0x10] sm:$0xff]  }
 0x7bc   : > { %v8950_v31 = vpop.eup %8949  ;;  %8959 = vrsqrt.f32 %v4694_v24  ;;  %v4691_v0 = vadd.f32 1e-05, %v4659_v9  ;;  %v4660_v4 = vmul.f32 0.03125, %v4584_v8  ;;  %7362 = vmatpush3.bf16.msra.mxu1 %v8800_v3 }
 0x7bd   : > { %4914 = vst.msk [vmem:[#allocation2 + $0x39] sm:$0xff] %vm736_vm0, %v4828_v49  ;;  %v4825_v43 = vadd.f32 %v11447_v29, %v4786_v36  ;;  %v4787_v26 = vmul.f32 %v11435_v1, %v4748_v35  ;;  %v4753_v57 = vmul.f32 %v8950_v31, %v11252_v7  ;;  %v4599_v38 = vpop.xlane.xlu1 %4598  ;;  %7363 = vmatprep.subr.bf16.mxu1 %v8801_v10 }
 0x7be   : > { %v8952_v46 = vpop.eup %8951  ;;  %8961 = vrsqrt.f32 %v4691_v0  ;;  %v4692_v2 = vadd.f32 1e-05, %v4660_v4  ;;  %v4665_v60 = vmul.f32 0.03125, %v4599_v38 }
 0x7bf   : > { %4911 = vst.msk [vmem:[#allocation2 + $0x19] sm:$0xff] %vm736_vm0, %v4825_v43  ;;  %v4826_v34 = vadd.f32 %v11447_v29, %v4787_v26  ;;  %v4792_v23 = vmul.f32 %v11435_v1, %v4753_v57  ;;  %v4754_v28 = vmul.f32 %v8952_v46, %v11258_v18  ;;  %v4602_v27 = vpop.xlane.xlu0 %4601  ;;  %v8802_v18 = vld [vmem:[%s12645_s16 + $0x18] sm:$0xff]   ;;  %v8803_v46 = vld [vmem:[%s12645_s16 + $0x60] sm:$0xff]  }
 0x7c0   : > { %v8954_v7 = vpop.eup %8953  ;;  %8963 = vrsqrt.f32 %v4692_v2  ;;  %v4697_v44 = vadd.f32 1e-05, %v4665_v60  ;;  %v4666_v13 = vmul.f32 0.03125, %v4602_v27  ;;  %7364 = vmatpush3.bf16.msra.mxu1 %v8802_v18 }
 0x7c1   : > { %4912 = vst.msk [vmem:[#allocation2 + $0x21] sm:$0xff] %vm736_vm0, %v4826_v34  ;;  %v4831_v16 = vadd.f32 %v11447_v29, %v4792_v23  ;;  %v4793_v32 = vmul.f32 %v11435_v1, %v4754_v28  ;;  %v4751_v33 = vmul.f32 %v8954_v7, %v11264_v51  ;;  %v4593_v6 = vpop.xlane.xlu1 %4592  ;;  %7365 = vmatprep.subr.bf16.mxu1 %v8803_v46 }
 0x7c2   : > { %v8956_v17 = vpop.eup %8955  ;;  %8965 = vrsqrt.f32 %v4697_v44  ;;  %v4698_v50 = vadd.f32 1e-05, %v4666_v13  ;;  %v4663_v45 = vmul.f32 0.03125, %v4593_v6  ;;  %v11495_v38 = vld [vmem:[#allocation2 + $0x31] sm:$0xff] }
 0x7c3   : > { %4917 = vst.msk [vmem:[#allocation2 + $0x61] sm:$0xff] %vm736_vm0, %v4831_v16  ;;  %v4832_v24 = vadd.f32 %v11447_v29, %v4793_v32  ;;  %v4790_v9 = vmul.f32 %v11435_v1, %v4751_v33  ;;  %v4752_v49 = vmul.f32 %v8956_v17, %v11270_v25  ;;  %v4596_v36 = vpop.xlane.xlu0 %4595  ;;  %v5135_v28 = vld [vmem:[#allocation2 + $0x30] sm:$0xff] }
 0x7c4   : > { %v8958_v51 = vpop.eup %8957  ;;  %8967 = vrsqrt.f32 %v4698_v50  ;;  %v4695_v35 = vadd.f32 1e-05, %v4663_v45  ;;  %v4664_v8 = vmul.f32 0.03125, %v4596_v36  ;;  %v5199_v31 = vld [vmem:[#allocation2 + $0x32] sm:$0xff]  ;;  %v5200_v0 = vld [vmem:[#allocation2 + $0x3a] sm:$0xff]  ;;  %v8805_v50 = vld [vmem:[%s12645_s16 + $0x68] sm:$0xff]  }
 0x7c5   : > { %v11489_v4 = vld [vmem:[#allocation2 + $0x39] sm:$0xff]  ;;  %4918 = vst.msk [vmem:[#allocation2 + $0x69] sm:$0xff] %vm736_vm0, %v4832_v24  ;;  %v4829_v53 = vadd.f32 %v11447_v29, %v4790_v9  ;;  %v4791_v43 = vmul.f32 %v11435_v1, %v4752_v49  ;;  %v4757_v26 = vmul.f32 %v8958_v51, %v11276_v21  ;;  %v4611_v57 = vpop.xlane.xlu1 %4610  ;;  %v6193_v25 = vpack.c.bf16 %v5200_v0, %v5199_v31  ;;  %v8806_v36 = vld [vmem:[%s12645_s16 + $0x28] sm:$0xff]  }
 0x7c6   : > { %v5136_v3 = vld [vmem:[#allocation2 + $0x38] sm:$0xff]  ;;  %v8960_v2 = vpop.eup %8959  ;;  %8969 = vrsqrt.f32 %v4695_v35  ;;  %v4696_v60 = vadd.f32 1e-05, %v4664_v8  ;;  %v4669_v34 = vmul.f32 0.03125, %v4611_v57  ;;  %v11502_v23 = vpack.i.bf16 %v11489_v4, %v11495_v38  ;;  %v8804_v21 = vld [vmem:[%s12645_s16 + $0x20] sm:$0xff]  }
 0x7c7   : > { %4915 = vst.msk [vmem:[#allocation2 + $0x49] sm:$0xff] %vm736_vm0, %v4829_v53  ;;  %v4830_v27 = vadd.f32 %v11447_v29, %v4791_v43  ;;  %v4796_v7 = vmul.f32 %v11435_v1, %v4757_v26  ;;  %v4758_v44 = vmul.f32 %v8960_v2, %v11282_v39  ;;  %7721 = vmatprep.mubr.msk.bf16.mxu0 %vm736_vm0, %v6193_v25  ;;  %v4614_v10 = vpop.xlane.xlu0 %4613 }
 0x7c8   : > { %v8298_v13 = vpack.i.bf16 %v5136_v3, %v5135_v28  ;;  %v8962_v16 = vpop.eup %8961  ;;  %8971 = vrsqrt.f32 %v4696_v60  ;;  %v4701_v32 = vadd.f32 1e-05, %v4669_v34  ;;  %8304 = vrot.lane.b32.xlu0 %v11502_v23, %s9110_s1  ;;  %v4670_v33 = vmul.f32 0.03125, %v4614_v10  ;;  %7366 = vmatpush3.bf16.msra.mxu1 %v8804_v21  ;;  %v8807_v60 = vld [vmem:[%s12645_s16 + $0x70] sm:$0xff]  }
 0x7c9   : > { %4916 = vst.msk [vmem:[#allocation2 + $0x51] sm:$0xff] %vm736_vm0, %v4830_v27  ;;  %v4835_v6 = vadd.f32 %v11447_v29, %v4796_v7  ;;  %v4797_v18 = vmul.f32 %v11435_v1, %v4758_v44  ;;  %v4755_v39 = vmul.f32 %v8962_v16, %v11288_v11  ;;  %v4605_v17 = vpop.xlane.xlu1 %4604  ;;  %v11522_v49 = vpack.i.bf16 %v5200_v0, %v5199_v31 }
 0x7ca   : > { %8299 = vrot.lane.b32.xlu1 %v8298_v13, %s12694_s2  ;;  %v8964_v45 = vpop.eup %8963  ;;  %8973 = vrsqrt.f32 %v4701_v32  ;;  %v4702_v24 = vadd.f32 1e-05, %v4670_v33  ;;  %v4667_v9 = vmul.f32 0.03125, %v4605_v17  ;;  %7367 = vmatprep.subr.bf16.mxu1 %v8805_v50  ;;  %v5139_v0 = vld [vmem:[#allocation2 + $0x60] sm:$0xff] }
 0x7cb   : > { %4921 = vst.msk [vmem:[#allocation2 + $0x91] sm:$0xff] %vm736_vm0, %v4835_v6  ;;  %v4836_v11 = vadd.f32 %v11447_v29, %v4797_v18  ;;  %v4794_v51 = vmul.f32 %v11435_v1, %v4755_v39  ;;  %v4756_v35 = vmul.f32 %v8964_v45, %v11294_v30  ;;  %v4608_v8 = vpop.xlane.xlu0 %4607  ;;  %v11552_v10 = vld [vmem:[#allocation2 + $0x61] sm:$0xff] }
 0x7cc   : > { %v8966_v53 = vpop.eup %8965  ;;  %8975 = vrsqrt.f32 %v4702_v24  ;;  %v4699_v43 = vadd.f32 1e-05, %v4667_v9  ;;  %8309 = vrot.lane.b32.xlu0 %v11522_v49, %s12695_s22  ;;  %v4668_v31 = vmul.f32 0.03125, %v4608_v8  ;;  %v5140_v26 = vld [vmem:[#allocation2 + $0x68] sm:$0xff]  ;;  %7368 = vmatpush3.bf16.msra.mxu1 %v8806_v36 }
 0x7cd   : > { %4922 = vst.msk [vmem:[#allocation2 + $0x99] sm:$0xff] %vm736_vm0, %v4836_v11  ;;  %v4833_v57 = vadd.f32 %v11447_v29, %v4794_v51  ;;  %v4795_v25 = vmul.f32 %v11435_v1, %v4756_v35  ;;  %v4761_v3 = vmul.f32 %v8966_v53, %v11300_v52  ;;  %v4623_v30 = vpop.xlane.xlu1 %4622  ;;  %v11538_v46 = vpack.i.bf16 %v5140_v26, %v5139_v0  ;;  %v11540_v2 = vld [vmem:[#allocation2 + $0x69] sm:$0xff]  ;;  %v8809_v53 = vld [vmem:[%s12645_s16 + $0x78] sm:$0xff]  }
 0x7ce   : > { %8314 = vrot.lane.b32.xlu1 %v8298_v13, %s9110_s1  ;;  %v8968_v34 = vpop.eup %8967  ;;  %8977 = vrsqrt.f32 %v4699_v43  ;;  %v4700_v28 = vadd.f32 1e-05, %v4668_v31  ;;  %v4673_v21 = vmul.f32 0.03125, %v4623_v30  ;;  %v8808_v52 = vld [vmem:[%s12645_s16 + $0x30] sm:$0xff]   ;;  %v5203_v16 = vld [vmem:[#allocation2 + $0x62] sm:$0xff]  ;;  %7369 = vmatprep.subr.bf16.mxu1 %v8807_v60  ;;  %v11558_v39 = vpack.i.bf16 %v11540_v2, %v11552_v10  ;;  %v8810_v0 = vld [vmem:[%s12645_s16 + $0x38] sm:$0xff]  }
 0x7cf   : > { %4919 = vst.msk [vmem:[#allocation2 + $0x79] sm:$0xff] %vm736_vm0, %v4833_v57  ;;  %v4834_v27 = vadd.f32 %v11447_v29, %v4795_v25  ;;  %v4800_v7 = vmul.f32 %v11435_v1, %v4761_v3  ;;  %v4762_v44 = vmul.f32 %v8968_v34, %v11306_v55  ;;  %v4626_v13 = vpop.xlane.xlu0 %4625  ;;  %v5204_v32 = vld [vmem:[#allocation2 + $0x6a] sm:$0xff]  ;;  %v5103_v3 = vld [vmem:[#allocation2 + $0x1a] sm:$0xff]  ;;  %v5104_v30 = vld [vmem:[#allocation2 + $0x22] sm:$0xff] }
 0x7d0   : > { %v8970_v33 = vpop.eup %8969  ;;  %8979 = vrsqrt.f32 %v4700_v28  ;;  %v4705_v6 = vadd.f32 1e-05, %v4673_v21  ;;  %8349 = vrot.lane.b32.xlu0 %v11538_v46, %s12694_s2  ;;  %v4674_v18 = vmul.f32 0.03125, %v4626_v13  ;;  %v11560_v17 = vld [vmem:[#allocation2 + $0x4a] sm:$0xff]  ;;  %v11562_v55 = vld [vmem:[#allocation2 + $0x52] sm:$0xff]  ;;  %v6199_v8 = vpack.c.bf16 %v5204_v32, %v5203_v16  ;;  %7370 = vmatpush3.bf16.msra.mxu1 %v8808_v52 }
 0x7d1   : > { %4920 = vst.msk [vmem:[#allocation2 + $0x81] sm:$0xff] %vm736_vm0, %v4834_v27  ;;  %v4839_v50 = vadd.f32 %v11447_v29, %v4800_v7  ;;  %v4801_v45 = vmul.f32 %v11435_v1, %v4762_v44  ;;  %v4759_v24 = vmul.f32 %v8970_v33, %v11312_v41  ;;  %v4617_v9 = vpop.xlane.xlu1 %4616  ;;  %v6196_v36 = vpack.c.bf16 %v11562_v55, %v11560_v17  ;;  %v5138_v21 = vld [vmem:[#allocation2 + $0x50] sm:$0xff] }
 0x7d2   : > { %8319 = vrot.lane.b32.xlu1 %v11502_v23, %s12695_s22  ;;  %v8972_v11 = vpop.eup %8971  ;;  %8981 = vrsqrt.f32 %v4705_v6  ;;  %v4706_v51 = vadd.f32 1e-05, %v4674_v18  ;;  %v4671_v35 = vmul.f32 0.03125, %v4617_v9  ;;  %v11592_v44 = vpack.i.bf16 %v5204_v32, %v5203_v16  ;;  %7371 = vmatprep.subr.bf16.mxu1 %v8809_v53  ;;  %v5137_v18 = vld [vmem:[#allocation2 + $0x48] sm:$0xff]  ;;  %v11606_v9 = vld [vmem:[#allocation2 + $0x20] sm:$0xff] }
 0x7d3   : > { %4925 = vst.msk [vmem:[#allocation2 + $0xc1] sm:$0xff] %vm736_vm0, %v4839_v50  ;;  %v4840_v41 = vadd.f32 %v11447_v29, %v4801_v45  ;;  %v4798_v23 = vmul.f32 %v11435_v1, %v4759_v24  ;;  %v4760_v43 = vmul.f32 %v8972_v11, %v11318_v56  ;;  %7722 = vmatmul.mubr.msk.bf16.vlgmr.msra.gmra.mrb[140].mxu0 %vm736_vm0, %v6196_v36  ;;  %v4620_v31 = vpop.xlane.xlu0 %4619 }
 0x7d4   : > { %v8974_v26 = vpop.eup %8973  ;;  %8983 = vrsqrt.f32 %v4706_v51  ;;  %v4703_v57 = vadd.f32 1e-05, %v4671_v35  ;;  %8354 = vrot.lane.b32.xlu0 %v11558_v39, %s9110_s1  ;;  %v4672_v25 = vmul.f32 0.03125, %v4620_v31  ;;  %7725 = vmatprep.mubr.msk.bf16.mxu0 %vm736_vm0, %v6199_v8  ;;  %v11598_v6 = vpack.i.bf16 %v5104_v30, %v5103_v3  ;;  %v11600_v50 = vld [vmem:[#allocation2 + $0x92] sm:$0xff]  ;;  %v11602_v45 = vld [vmem:[#allocation2 + $0x9a] sm:$0xff] }
 0x7d5   : > { %4926 = vst.msk [vmem:[#allocation2 + $0xc9] sm:$0xff] %vm736_vm0, %v4840_v41  ;;  %v4837_v56 = vadd.f32 %v11447_v29, %v4798_v23  ;;  %v4799_v60 = vmul.f32 %v11435_v1, %v4760_v43  ;;  %v4765_v34 = vmul.f32 %v8974_v26, %v11324_v15  ;;  %v4635_v28 = vpop.xlane.xlu1 %4634  ;;  %7372 = vmatpush3.bf16.msra.mxu1 %v8810_v0  ;;  %v11622_v0 = vld [vmem:[#allocation2 + $0x18] sm:$0xff] }
 0x7d6   : > { %8324 = vrot.lane.b32.xlu1 %v11522_v49, %s12694_s2  ;;  %v8976_v52 = vpop.eup %8975  ;;  %8985 = vrsqrt.f32 %v4703_v57  ;;  %v4704_v27 = vadd.f32 1e-05, %v4672_v25  ;;  %v4677_v7 = vmul.f32 0.03125, %v4635_v28  ;;  %v11608_v36 = vpack.i.bf16 %v5138_v21, %v5137_v18  ;;  %v11638_v21 = vld [vmem:[#allocation2 + $0x21] sm:$0xff] }
 0x7d7   : > { %4923 = vst.msk [vmem:[#allocation2 + $0xa9] sm:$0xff] %vm736_vm0, %v4837_v56  ;;  %v4838_v13 = vadd.f32 %v11447_v29, %v4799_v60  ;;  %v4804_v33 = vmul.f32 %v11435_v1, %v4765_v34  ;;  %v4766_v15 = vmul.f32 %v8976_v52, %v11330_v58  ;;  %v4638_v49 = vpop.xlane.xlu0 %4637  ;;  %v6205_v26 = vpack.c.bf16 %v11602_v45, %v11600_v50  ;;  %v11633_v56 = vld [vmem:[#allocation2 + $0x51] sm:$0xff] }
 0x7d8   : > { %v8978_v16 = vpop.eup %8977  ;;  %8987 = vrsqrt.f32 %v4704_v27  ;;  %v4709_v32 = vadd.f32 1e-05, %v4677_v7  ;;  %8359 = vrot.lane.b32.xlu0 %v11592_v44, %s12695_s22  ;;  %v4678_v24 = vmul.f32 0.03125, %v4638_v49  ;;  %v11610_v58 = vld [vmem:[#allocation2 + $0x7a] sm:$0xff]  ;;  %v11612_v11 = vld [vmem:[#allocation2 + $0x82] sm:$0xff]  ;;  %v8333_v3 = vpack.i.bf16 %v11606_v9, %v11622_v0 }
 0x7d9   : > { %4924 = vst.msk [vmem:[#allocation2 + $0xb1] sm:$0xff] %vm736_vm0, %v4838_v13  ;;  %v4843_v51 = vadd.f32 %v11447_v29, %v4804_v33  ;;  %v4805_v35 = vmul.f32 %v11435_v1, %v4766_v15  ;;  %v4763_v8 = vmul.f32 %v8978_v16, %v11336_v63  ;;  %v4629_v53 = vpop.xlane.xlu1 %4628  ;;  %v6202_v41 = vpack.c.bf16 %v11612_v11, %v11610_v58  ;;  %v11645_v7 = vld [vmem:[#allocation2 + $0x49] sm:$0xff]  ;;  %v11647_v15 = vld [vmem:[#allocation2 + $0x19] sm:$0xff] }
 0x7da   : > { %8329 = vrot.lane.b32.xlu1 %v11598_v6, %s12695_s22  ;;  %v8980_v23 = vpop.eup %8979  ;;  %8989 = vrsqrt.f32 %v4709_v32  ;;  %v4710_v43 = vadd.f32 1e-05, %v4678_v24  ;;  %v4675_v31 = vmul.f32 0.03125, %v4629_v53  ;;  %v11651_v49 = vpack.i.bf16 %v11633_v56, %v11645_v7 }
 0x7db   : > { %4929 = vst.msk [vmem:[#allocation2 + $0xf1] sm:$0xff] %vm736_vm0, %v4843_v51  ;;  %v4844_v63 = vadd.f32 %v11447_v29, %v4805_v35  ;;  %v4802_v57 = vmul.f32 %v11435_v1, %v4763_v8  ;;  %v4764_v25 = vmul.f32 %v8980_v23, %v11342_v47  ;;  %7726 = vmatmul.mubr.msk.bf16.gmra.mrb[144].mxu0 %vm736_vm0, %v6202_v41  ;;  %v4632_v30 = vpop.xlane.xlu0 %4631 }
 0x7dc   : > { %v8982_v60 = vpop.eup %8981  ;;  %8991 = vrsqrt.f32 %v4710_v43  ;;  %v4707_v34 = vadd.f32 1e-05, %v4675_v31  ;;  %8379 = vrot.lane.b32.xlu0 %v11608_v36, %s12694_s2  ;;  %v4676_v28 = vmul.f32 0.03125, %v4632_v30  ;;  %7729 = vmatprep.mubr.msk.bf16.mxu0 %vm736_vm0, %v6205_v26  ;;  %v8338_v24 = vpack.i.bf16 %v11638_v21, %v11647_v15  ;;  %v11659_v35 = vld [vmem:[#allocation2 + $0xc2] sm:$0xff]  ;;  %v11661_v8 = vld [vmem:[#allocation2 + $0xca] sm:$0xff] }
 0x7dd   : > { %4930 = vst.msk [vmem:[#allocation2 + $0xf9] sm:$0xff] %vm736_vm0, %v4844_v63  ;;  %v4841_v47 = vadd.f32 %v11447_v29, %v4802_v57  ;;  %v4803_v52 = vmul.f32 %v11435_v1, %v4764_v25  ;;  %v4769_v27 = vmul.f32 %v8982_v60, %v11348_v22  ;;  %v11678_v60 = vpack.i.bf16 %v11562_v55, %v11560_v17 }
 0x7de   : > { %8334 = vrot.lane.b32.xlu1 %v8333_v3, %s9110_s1  ;;  %v8984_v13 = vpop.eup %8983  ;;  %8993 = vrsqrt.f32 %v4707_v34  ;;  %v4708_v33 = vadd.f32 1e-05, %v4676_v28  ;;  %v6211_v34 = vpack.c.bf16 %v11661_v8, %v11659_v35 }
 0x7df   : > { %4927 = vst.msk [vmem:[#allocation2 + $0xd9] sm:$0xff] %vm736_vm0, %v4841_v47  ;;  %v4842_v18 = vadd.f32 %v11447_v29, %v4803_v52  ;;  %v4808_v16 = vmul.f32 %v11435_v1, %v4769_v27  ;;  %v4770_v22 = vmul.f32 %v8984_v13, %v11354_v20  ;;  %v4650_v32 = vpop.xlane.xlu1 %4649  ;;  %v4647_v51 = vpop.xlane.xlu0 %4646  ;;  %v5144_v13 = vld [vmem:[#allocation2 + $0x98] sm:$0xff] }
 0x7e0   : > { %v8986_v53 = vpop.eup %8985  ;;  %8995 = vrsqrt.f32 %v4708_v33  ;;  %v4682_v41 = vmul.f32 0.03125, %v4650_v32  ;;  %8384 = vrot.lane.b32.xlu0 %v11651_v49, %s9110_s1  ;;  %v4681_v23 = vmul.f32 0.03125, %v4647_v51  ;;  %v11665_v43 = vld [vmem:[#allocation2 + $0xaa] sm:$0xff]  ;;  %v11667_v31 = vld [vmem:[#allocation2 + $0xb2] sm:$0xff] }
 0x7e1   : > { %4928 = vst.msk [vmem:[#allocation2 + $0xe1] sm:$0xff] %vm736_vm0, %v4842_v18  ;;  %v4847_v20 = vadd.f32 %v11447_v29, %v4808_v16  ;;  %v4809_v26 = vmul.f32 %v11435_v1, %v4770_v22  ;;  %v4767_v63 = vmul.f32 %v8986_v53, %v11360_v54  ;;  %v6208_v57 = vpack.c.bf16 %v11667_v31, %v11665_v43  ;;  %v5143_v22 = vld [vmem:[#allocation2 + $0x90] sm:$0xff] }
 0x7e2   : > { %8339 = vrot.lane.b32.xlu1 %v8338_v24, %s12695_s22  ;;  %v8988_v25 = vpop.eup %8987  ;;  %v4714_v3 = vadd.f32 1e-05, %v4682_v41  ;;  %v4713_v30 = vadd.f32 1e-05, %v4681_v23  ;;  %v11696_v53 = vpack.i.bf16 %v5144_v13, %v5143_v22 }
 0x7e3   : > { %4933 = vst.msk [vmem:[#allocation2 + $0x121] sm:$0xff] %vm736_vm0, %v4847_v20  ;;  %v4848_v28 = vadd.f32 %v11447_v29, %v4809_v26  ;;  %v4806_v54 = vmul.f32 %v11435_v1, %v4767_v63  ;;  %v4768_v47 = vmul.f32 %v8988_v25, %v11366_v37  ;;  %v4644_v52 = vpop.xlane.xlu1 %4643  ;;  %7730 = vmatmul.mubr.msk.bf16.gmra.mrb[148].mxu0 %vm736_vm0, %v6208_v57  ;;  %v4641_v27 = vpop.xlane.xlu0 %4640  ;;  %v11702_v26 = vld [vmem:[#allocation2 + $0x99] sm:$0xff] }
 0x7e4   : > { %v8990_v33 = vpop.eup %8989  ;;  %8997 = vrsqrt.f32 %v4714_v3  ;;  %v4680_v17 = vmul.f32 0.03125, %v4644_v52  ;;  %8389 = vrot.lane.b32.xlu0 %v11678_v60, %s12695_s22  ;;  %v4679_v55 = vmul.f32 0.03125, %v4641_v27  ;;  %7733 = vmatprep.mubr.msk.bf16.mxu0 %vm736_vm0, %v6211_v34  ;;  %v11708_v25 = vld [vmem:[#allocation2 + $0xfa] sm:$0xff]  ;;  %v11716_v34 = vld [vmem:[#allocation2 + $0x91] sm:$0xff] }
 0x7e5   : > { %4934 = vst.msk [vmem:[#allocation2 + $0x129] sm:$0xff] %vm736_vm0, %v4848_v28  ;;  %v4845_v18 = vadd.f32 %v11447_v29, %v4806_v54  ;;  %v4807_v37 = vmul.f32 %v11435_v1, %v4768_v47  ;;  %v4773_v16 = vmul.f32 %v8990_v33, %v11372_v59  ;;  %8999 = vrsqrt.f32 %v4713_v30  ;;  %v11704_v59 = vld [vmem:[#allocation2 + $0xf2] sm:$0xff] }
 0x7e6   : > { %8344 = vrot.lane.b32.xlu1 %v11598_v6, %s12694_s2  ;;  %v8992_v32 = vpop.eup %8991  ;;  %v4712_v24 = vadd.f32 1e-05, %v4680_v17  ;;  %v4711_v51 = vadd.f32 1e-05, %v4679_v55  ;;  %v11720_v54 = vpack.i.bf16 %v11702_v26, %v11716_v34 }
 0x7e7   : > { %4931 = vst.msk [vmem:[#allocation2 + $0x109] sm:$0xff] %vm736_vm0, %v4845_v18  ;;  %v4846_v41 = vadd.f32 %v11447_v29, %v4807_v37  ;;  %v4812_v23 = vmul.f32 %v11435_v1, %v4773_v16  ;;  %v4774_v20 = vmul.f32 %v8992_v32, %v11378_v62  ;;  %v11741_v37 = vpack.i.bf16 %v11602_v45, %v11600_v50  ;;  %v5141_v45 = vld [vmem:[#allocation2 + $0x78] sm:$0xff] }
 0x7e8   : > { %v8994_v63 = vpop.eup %8993  ;;  %9001 = vrsqrt.f32 %v4712_v24  ;;  %8409 = vrot.lane.b32.xlu0 %v11696_v53, %s12694_s2  ;;  %v5213_v6 = vld [vmem:[#allocation2 + $0xda] sm:$0xff]  ;;  %v5214_v57 = vld [vmem:[#allocation2 + $0xe2] sm:$0xff] }
 0x7e9   : > { %4932 = vst.msk [vmem:[#allocation2 + $0x111] sm:$0xff] %vm736_vm0, %v4846_v41  ;;  %v4851_v3 = vadd.f32 %v11447_v29, %v4812_v23  ;;  %v4813_v30 = vmul.f32 %v11435_v1, %v4774_v20  ;;  %v4771_v62 = vmul.f32 %v8994_v63, %v11384_v19  ;;  %9003 = vrsqrt.f32 %v4711_v51  ;;  %v5142_v51 = vld [vmem:[#allocation2 + $0x80] sm:$0xff] }
 0x7ea   : > { %8364 = vrot.lane.b32.xlu1 %v11538_v46, %s9110_s1  ;;  %v8996_v28 = vpop.eup %8995  ;;  %v6214_v47 = vpack.c.bf16 %v5214_v57, %v5213_v6  ;;  %v11722_v52 = vpack.i.bf16 %v5214_v57, %v5213_v6  ;;  %v6217_v46 = vpack.c.bf16 %v11708_v25, %v11704_v59 }
 0x7eb   : > { %4937 = vst.msk [vmem:[#allocation2 + $0x151] sm:$0xff] %vm736_vm0, %v4851_v3  ;;  %v4852_v27 = vadd.f32 %v11447_v29, %v4813_v30  ;;  %v4810_v19 = vmul.f32 %v11435_v1, %v4771_v62  ;;  %v4772_v13 = vmul.f32 %v8996_v28, %v11390_v12  ;;  %v11762_v28 = vld [vmem:[#allocation2 + $0x81] sm:$0xff] }
 0x7ec   : > { %8414 = vrot.lane.b32.xlu0 %v11720_v54, %s9110_s1  ;;  %7734 = vmatmul.mubr.msk.bf16.gmra.mrb[152].mxu0 %vm736_vm0, %v6214_v47  ;;  %v5219_v33 = vld [vmem:[#allocation2 + $0x122] sm:$0xff]  ;;  %v5220_v17 = vld [vmem:[#allocation2 + $0x12a] sm:$0xff] }
 0x7ed   : > { %4938 = vst.msk [vmem:[#allocation2 + $0x159] sm:$0xff] %vm736_vm0, %v4852_v27  ;;  %v4849_v55 = vadd.f32 %v11447_v29, %v4810_v19  ;;  %v4811_v18 = vmul.f32 %v11435_v1, %v4772_v13  ;;  %7737 = vmatprep.mubr.msk.bf16.mxu0 %vm736_vm0, %v6217_v46  ;;  %v11743_v16 = vpack.i.bf16 %v5220_v17, %v5219_v33 }
 0x7ee   : > { %8369 = vrot.lane.b32.xlu1 %v11558_v39, %s12695_s22  ;;  %v8998_v12 = vpop.eup %8997  ;;  %v6223_v62 = vpack.c.bf16 %v5220_v17, %v5219_v33 }
 0x7ef   : > { %v9000_v22 = vpop.eup %8999  ;;  %4935 = vst.msk [vmem:[#allocation2 + $0x139] sm:$0xff] %vm736_vm0, %v4849_v55  ;;  %v4850_v32 = vadd.f32 %v11447_v29, %v4811_v18  ;;  %v4778_v24 = vmul.f32 %v8998_v12, %v11405_v48 }
 0x7f0   : > { %v4777_v41 = vmul.f32 %v9000_v22, %v11396_v42  ;;  %8419 = vrot.lane.b32.xlu0 %v11741_v37, %s12695_s22  ;;  %v5217_v39 = vld [vmem:[#allocation2 + $0x10a] sm:$0xff]  ;;  %v5218_v23 = vld [vmem:[#allocation2 + $0x112] sm:$0xff]  ;;  %v11758_v42 = vpack.i.bf16 %v5142_v51, %v5141_v45  ;;  %v8448_v22 = vpack.i.bf16 %v11612_v11, %v11610_v58 }
 0x7f1   : > { %4936 = vst.msk [vmem:[#allocation2 + $0x141] sm:$0xff] %vm736_vm0, %v4850_v32  ;;  %v4817_v50 = vmul.f32 %v11435_v1, %v4778_v24  ;;  %v6220_v20 = vpack.c.bf16 %v5218_v23, %v5217_v39  ;;  %v11755_v63 = vpack.i.bf16 %v5218_v23, %v5217_v39  ;;  %v5148_v24 = vld [vmem:[#allocation2 + $0xc8] sm:$0xff] }
 0x7f2   : > { %8374 = vrot.lane.b32.xlu1 %v11592_v44, %s12694_s2  ;;  %v9002_v48 = vpop.eup %9001  ;;  %v4816_v6 = vmul.f32 %v11435_v1, %v4777_v41  ;;  %v11804_v11 = vld [vmem:[#allocation2 + $0xc9] sm:$0xff]  ;;  %v11811_v23 = vld [vmem:[#allocation2 + $0xc1] sm:$0xff] }
 0x7f3   : > { %v9004_v57 = vpop.eup %9003  ;;  %v4856_v3 = vadd.f32 %v11447_v29, %v4817_v50  ;;  %v4776_v30 = vmul.f32 %v9002_v48, %v11419_v14  ;;  %v11774_v14 = vld [vmem:[#allocation2 + $0x79] sm:$0xff]  ;;  %v8473_v50 = vpack.i.bf16 %v11804_v11, %v11811_v23 }
 0x7f4   : > { %v4855_v47 = vadd.f32 %v11447_v29, %v4816_v6  ;;  %v4775_v44 = vmul.f32 %v9004_v57, %v11411_v40  ;;  %8439 = vrot.lane.b32.xlu0 %v11758_v42, %s12694_s2  ;;  %7738 = vmatmul.mubr.msk.bf16.gmra.mrb[156].mxu0 %vm736_vm0, %v6220_v20  ;;  %v5223_v27 = vld [vmem:[#allocation2 + $0x152] sm:$0xff]  ;;  %v5224_v19 = vld [vmem:[#allocation2 + $0x15a] sm:$0xff]  ;;  %v8443_v46 = vpack.i.bf16 %v11762_v28, %v11774_v14  ;;  %v5145_v57 = vld [vmem:[#allocation2 + $0xa8] sm:$0xff] }
 0x7f5   : > { %4942 = vst.msk [vmem:[#allocation2 + $0x189] sm:$0xff] %vm736_vm0, %v4856_v3  ;;  %v4815_v13 = vmul.f32 %v11435_v1, %v4776_v30  ;;  %7741 = vmatprep.mubr.msk.bf16.mxu0 %vm736_vm0, %v6223_v62  ;;  %v11780_v33 = vpack.i.bf16 %v5224_v19, %v5223_v27  ;;  %v6229_v32 = vpack.c.bf16 %v5224_v19, %v5223_v27  ;;  %v5146_v6 = vld [vmem:[#allocation2 + $0xb0] sm:$0xff]  ;;  %v5149_v19 = vld [vmem:[#allocation2 + $0xd8] sm:$0xff] }
 0x7f6   : > { %8394 = vrot.lane.b32.xlu1 %v11608_v36, %s9110_s1  ;;  %4941 = vst.msk [vmem:[#allocation2 + $0x181] sm:$0xff] %vm736_vm0, %v4855_v47  ;;  %v4814_v40 = vmul.f32 %v11435_v1, %v4775_v44  ;;  %v8498_v3 = vpack.i.bf16 %v5146_v6, %v5145_v57  ;;  %v5178_v30 = vld [vmem:[#allocation2 + $0xb1] sm:$0xff]  ;;  %v5184_v44 = vld [vmem:[#allocation2 + $0xf9] sm:$0xff] }
 0x7f7   : > { %v4854_v17 = vadd.f32 %v11447_v29, %v4815_v13 }
 0x7f8   : > { %v4853_v55 = vadd.f32 %v11447_v29, %v4814_v40  ;;  %8444 = vrot.lane.b32.xlu0 %v8443_v46, %s9110_s1  ;;  %v5221_v36 = vld [vmem:[#allocation2 + $0x13a] sm:$0xff]  ;;  %v5222_v18 = vld [vmem:[#allocation2 + $0x142] sm:$0xff] }
 0x7f9   : > { %4940 = vst.msk [vmem:[#allocation2 + $0x171] sm:$0xff] %vm736_vm0, %v4854_v17  ;;  %v6226_v12 = vpack.c.bf16 %v5222_v18, %v5221_v36  ;;  %v11788_v1 = vpack.i.bf16 %v5222_v18, %v5221_v36  ;;  %v5182_v40 = vld [vmem:[#allocation2 + $0xe1] sm:$0xff]  ;;  %v5188_v36 = vld [vmem:[#allocation2 + $0x129] sm:$0xff] }
 0x7fa   : > { %8399 = vrot.lane.b32.xlu1 %v11651_v49, %s12695_s22  ;;  %4939 = vst.msk [vmem:[#allocation2 + $0x169] sm:$0xff] %vm736_vm0, %v4853_v55  ;;  %v5147_v49 = vld [vmem:[#allocation2 + $0xc0] sm:$0xff]  ;;  %v5156_v55 = vld [vmem:[#allocation2 + $0x128] sm:$0xff] }
 0x7fb   : > { %v8468_v41 = vpack.i.bf16 %v5148_v24, %v5147_v49  ;;  %v5187_v18 = vld [vmem:[#allocation2 + $0x121] sm:$0xff] }
 0x7fc   : > { %8449 = vrot.lane.b32.xlu0 %v8448_v22, %s12695_s22  ;;  %7742 = vmatmul.mubr.msk.bf16.gmra.mrb[160].mxu0 %vm736_vm0, %v6226_v12  ;;  %v11795_v29 = vld [vmem:[#allocation2 + $0x18a] sm:$0xff]  ;;  %v8593_v12 = vpack.i.bf16 %v5188_v36, %v5187_v18 }
 0x7fd   : > { %7745 = vmatprep.mubr.msk.bf16.mxu0 %vm736_vm0, %v6229_v32  ;;  %v11800_v51 = vld [vmem:[#allocation2 + $0x182] sm:$0xff] }
 0x7fe   : > { %8404 = vrot.lane.b32.xlu1 %v11678_v60, %s12694_s2  ;;  %v8733_v58 = vpack.i.bf16 %v11795_v29, %v11800_v51  ;;  %v6235_v48 = vpack.c.bf16 %v11795_v29, %v11800_v51  ;;  %v5153_v32 = vld [vmem:[#allocation2 + $0x108] sm:$0xff] }
 0x800   : > { %8469 = vrot.lane.b32.xlu0 %v8468_v41, %s12694_s2  ;;  %v11807_v39 = vld [vmem:[#allocation2 + $0x172] sm:$0xff] }
 0x801   : > { %v11813_v60 = vld [vmem:[#allocation2 + $0x16a] sm:$0xff] }
 0x802   : > { %8424 = vrot.lane.b32.xlu1 %v11696_v53, %s9110_s1  ;;  %v6232_v45 = vpack.c.bf16 %v11807_v39, %v11813_v60  ;;  %v8728_v20 = vpack.i.bf16 %v11807_v39, %v11813_v60  ;;  %v8478_v53 = vpack.i.bf16 %v11661_v8, %v11659_v35  ;;  %v8508_v35 = vpack.i.bf16 %v11667_v31, %v11665_v43  ;;  %v5152_v8 = vld [vmem:[#allocation2 + $0xf8] sm:$0xff]  ;;  %v5150_v31 = vld [vmem:[#allocation2 + $0xe0] sm:$0xff] }
 0x803   : > { %v8538_v43 = vpack.i.bf16 %v11708_v25, %v11704_v59  ;;  %v8558_v13 = vpack.i.bf16 %v5150_v31, %v5149_v19  ;;  %v5155_v59 = vld [vmem:[#allocation2 + $0x120] sm:$0xff]  ;;  %v8297_v19 = vunpack.i.h.bf16 %v11227_v5 }
 0x804   : > { %8474 = vrot.lane.b32.xlu0 %v8473_v50, %s9110_s1  ;;  %7746 = vmatmul.mubr.msk.bf16.gmra.mrb[164].mxu0 %vm736_vm0, %v6232_v45  ;;  %v8588_v25 = vpack.i.bf16 %v5156_v55, %v5155_v59  ;;  %v5185_v45 = vld [vmem:[#allocation2 + $0x109] sm:$0xff] }
 0x805   : > { %7749 = vmatprep.mubr.msk.bf16.mxu0 %vm736_vm0, %v6235_v48 }
 0x806   : > { %8429 = vrot.lane.b32.xlu1 %v11720_v54, %s12695_s22  ;;  %v5177_v54 = vld [vmem:[#allocation2 + $0xa9] sm:$0xff] }
 0x807   : > { %v8503_v62 = vpack.i.bf16 %v5178_v30, %v5177_v54  ;;  %v5160_v30 = vld [vmem:[#allocation2 + $0x158] sm:$0xff]  ;;  %v5159_v54 = vld [vmem:[#allocation2 + $0x150] sm:$0xff] }
 0x808   : > { %8479 = vrot.lane.b32.xlu0 %v8478_v53, %s12695_s22 }
 0x80a   : > { %8434 = vrot.lane.b32.xlu1 %v11741_v37, %s12694_s2  ;;  %v5151_v37 = vld [vmem:[#allocation2 + $0xf0] sm:$0xff] }
 0x80b   : > { %v8528_v47 = vpack.i.bf16 %v5152_v8, %v5151_v37  ;;  %v5192_v37 = vld [vmem:[#allocation2 + $0x159] sm:$0xff] }
 0x80c   : > { %8499 = vrot.lane.b32.xlu0 %v8498_v3, %s12694_s2 }
 0x80e   : > { %8454 = vrot.lane.b32.xlu1 %v11758_v42, %s9110_s1  ;;  %v5183_v42 = vld [vmem:[#allocation2 + $0xf1] sm:$0xff] }
 0x80f   : > { %v8533_v27 = vpack.i.bf16 %v5184_v44, %v5183_v42  ;;  %v8291_v44 = vunpack.i.l.bf16 %v11229_v61  ;;  %v4943_v42 = vld [vmem:[#allocation2] sm:$0xff] }
 0x810   : > { %8504 = vrot.lane.b32.xlu0 %v8503_v62, %s9110_s1 }
 0x812   : > { %8459 = vrot.lane.b32.xlu1 %v8443_v46, %s12695_s22  ;;  %v5181_v46 = vld [vmem:[#allocation2 + $0xd9] sm:$0xff] }
 0x813   : > { %v8563_v17 = vpack.i.bf16 %v5182_v40, %v5181_v46 }
 0x814   : > { %8509 = vrot.lane.b32.xlu0 %v8508_v35, %s12695_s22 }
 0x816   : > { %8464 = vrot.lane.b32.xlu1 %v8448_v22, %s12694_s2  ;;  %v5154_v22 = vld [vmem:[#allocation2 + $0x110] sm:$0xff] }
 0x817   : > { %v11864_v49 = vpack.i.bf16 %v5154_v22, %v5153_v32 }
 0x818   : > { %8529 = vrot.lane.b32.xlu0 %v8528_v47, %s12694_s2 }
 0x81a   : > { %8484 = vrot.lane.b32.xlu1 %v8468_v41, %s9110_s1 }
 0x81c   : > { %8534 = vrot.lane.b32.xlu0 %v8533_v27, %s9110_s1 }
 0x81e   : > { %8489 = vrot.lane.b32.xlu1 %v8473_v50, %s12695_s22  ;;  %v5186_v50 = vld [vmem:[#allocation2 + $0x111] sm:$0xff] }
 0x820   : > { %8539 = vrot.lane.b32.xlu0 %v8538_v43, %s12695_s22 }
 0x822   : > { %8494 = vrot.lane.b32.xlu1 %v8478_v53, %s12694_s2  ;;  %v11871_v53 = vpack.i.bf16 %v5186_v50, %v5185_v45 }
 0x824   : > { %8559 = vrot.lane.b32.xlu0 %v8558_v13, %s12694_s2 }
 0x826   : > { %8514 = vrot.lane.b32.xlu1 %v8498_v3, %s9110_s1 }
 0x828   : > { %8564 = vrot.lane.b32.xlu0 %v8563_v17, %s9110_s1 }
 0x82a   : > { %8519 = vrot.lane.b32.xlu1 %v8503_v62, %s12695_s22 }
 0x82c   : > { %8569 = vrot.lane.b32.xlu0 %v11722_v52, %s12695_s22 }
 0x82e   : > { %8524 = vrot.lane.b32.xlu1 %v8508_v35, %s12694_s2  ;;  %v11888_v35 = vpack.i.bf16 %v5160_v30, %v5159_v54 }
 0x830   : > { %8589 = vrot.lane.b32.xlu0 %v8588_v25, %s12694_s2 }
 0x832   : > { %8544 = vrot.lane.b32.xlu1 %v8528_v47, %s9110_s1  ;;  %v8292_v47 = vunpack.i.h.bf16 %v11229_v61  ;;  %v5999_v61 = vsel %vm736_vm0, %v4943_v42, %v8291_v44 }
 0x834   : > { %8594 = vrot.lane.b32.xlu0 %v8593_v12, %s9110_s1 }
 0x836   : > { %8549 = vrot.lane.b32.xlu1 %v8533_v27, %s12695_s22  ;;  %v4944_v27 = vld [vmem:[#allocation2 + $0x8] sm:$0xff] }
 0x837   : > { %v6000_v46 = vsel %vm736_vm0, %v4944_v27, %v8292_v47  ;;  %v5158_v47 = vld [vmem:[#allocation2 + $0x140] sm:$0xff] }
 0x838   : > { %8599 = vrot.lane.b32.xlu0 %v11743_v16, %s12695_s22  ;;  %v6032_v42 = vsel %vm1914_vm2, %v6000_v46, %v8297_v19 }
 0x83a   : > { %8554 = vrot.lane.b32.xlu1 %v8538_v43, %s12694_s2  ;;  %v8305_v24 = vpop.permute.xlu0 %8304 }
 0x83b   : > { %v8307_v36 = vunpack.i.h.bf16 %v8305_v24  ;;  %v8306_v18 = vunpack.i.l.bf16 %v8305_v24 }
 0x83c   : > { %v8300_v41 = vpop.permute.xlu1 %8299  ;;  %8619 = vrot.lane.b32.xlu0 %v11864_v49, %s12694_s2 }
 0x83d   : > { %v8302_v59 = vunpack.i.h.bf16 %v8300_v41 }
 0x83e   : > { %8574 = vrot.lane.b32.xlu1 %v8558_v13, %s9110_s1  ;;  %v11869_v48 = vpop.permute.xlu0 %8309  ;;  %v8296_v13 = vunpack.i.l.bf16 %v11227_v5 }
 0x83f   : > { %v8312_v22 = vunpack.i.h.bf16 %v11869_v48  ;;  %v8311_v5 = vunpack.i.l.bf16 %v11869_v48 }
 0x840   : > { %v11873_v6 = vpop.permute.xlu1 %8314  ;;  %8624 = vrot.lane.b32.xlu0 %v11871_v53, %s9110_s1 }
 0x842   : > { %8579 = vrot.lane.b32.xlu1 %v8563_v17, %s12695_s22  ;;  %v11878_v57 = vpop.permute.xlu0 %8349 }
 0x844   : > { %v11880_v3 = vpop.permute.xlu1 %8319  ;;  %8629 = vrot.lane.b32.xlu0 %v11755_v63, %s12695_s22 }
 0x846   : > { %8584 = vrot.lane.b32.xlu1 %v11722_v52, %s12694_s2  ;;  %v11886_v62 = vpop.permute.xlu0 %8354  ;;  %v5191_v52 = vld [vmem:[#allocation2 + $0x151] sm:$0xff] }
 0x847   : > { %v11899_v31 = vpack.i.bf16 %v5192_v37, %v5191_v52  ;;  %v5157_v52 = vld [vmem:[#allocation2 + $0x138] sm:$0xff] }
 0x848   : > { %v11890_v8 = vpop.permute.xlu1 %8324  ;;  %8649 = vrot.lane.b32.xlu0 %v11888_v35, %s12694_s2 }
 0x84a   : > { %8604 = vrot.lane.b32.xlu1 %v8588_v25, %s9110_s1  ;;  %v11897_v43 = vpop.permute.xlu0 %8359  ;;  %v8301_v25 = vunpack.i.l.bf16 %v8300_v41 }
 0x84c   : > { %v8330_v40 = vpop.permute.xlu1 %8329  ;;  %8654 = vrot.lane.b32.xlu0 %v11899_v31, %s9110_s1 }
 0x84d   : > { %v8332_v17 = vunpack.i.h.bf16 %v8330_v40  ;;  %v8331_v55 = vunpack.i.l.bf16 %v8330_v40  ;;  %v6098_v40 = vsel %vm736_vm0, %v11489_v4, %v8312_v22 }
 0x84e   : > { %8609 = vrot.lane.b32.xlu1 %v8593_v12, %s12695_s22  ;;  %v8380_v45 = vpop.permute.xlu0 %8379 }
 0x84f   : > { %v6095_v32 = vsel %vm736_vm0, %v11647_v15, %v8331_v55  ;;  %v6096_v50 = vsel %vm736_vm0, %v11638_v21, %v8332_v17  ;;  %v8382_v54 = vunpack.i.h.bf16 %v8380_v45  ;;  %v8381_v37 = vunpack.i.l.bf16 %v8380_v45 }
 0x850   : > { %v8335_v30 = vpop.permute.xlu1 %8334  ;;  %v6127_v41 = vsel %vm1914_vm2, %v6095_v32, %v8301_v25  ;;  %v6128_v24 = vsel %vm1914_vm2, %v6096_v50, %v8302_v59  ;;  %8659 = vrot.lane.b32.xlu0 %v11780_v33, %s12695_s22  ;;  %v6031_v21 = vsel %vm1914_vm2, %v5999_v61, %v8296_v13  ;;  %v11928_v25 = vpack.i.bf16 %v5158_v47, %v5157_v52 }
 0x851   : > { %v8337_v12 = vunpack.i.h.bf16 %v8335_v30  ;;  %v8336_v44 = vunpack.i.l.bf16 %v8335_v30  ;;  %v6159_v48 = vsel %vm1947_vm3, %v6127_v41, %v8306_v18  ;;  %v6160_v15 = vsel %vm1947_vm3, %v6128_v24, %v8307_v36 }
 0x852   : > { %8614 = vrot.lane.b32.xlu1 %v11743_v16, %s12694_s2  ;;  %v6192_v27 = vpack.c.bf16 %v6160_v15, %v6159_v48  ;;  %v8385_v59 = vpop.permute.xlu0 %8384  ;;  %v6097_v13 = vsel %vm736_vm0, %v11495_v38, %v8311_v5  ;;  %v11932_v16 = vld [vmem:[#allocation2 + $0x141] sm:$0xff]  ;;  %v6130_v4 = vsel %vm1914_vm2, %v6098_v40, %v8382_v54  ;;  %v11940_v38 = vld [vmem:[#allocation2 + $0x139] sm:$0xff]  ;;  %v8317_v45 = vunpack.i.h.bf16 %v11873_v6 }
 0x853   : > { %v6063_v17 = vsel %vm1947_vm3, %v6031_v21, %v8336_v44  ;;  %v6064_v55 = vsel %vm1947_vm3, %v6032_v42, %v8337_v12  ;;  %v8387_v46 = vunpack.i.h.bf16 %v8385_v59  ;;  %v8386_v36 = vunpack.i.l.bf16 %v8385_v59 }
 0x854   : > { %v6191_v61 = vpack.c.bf16 %v6064_v55, %v6063_v17  ;;  %v8340_v19 = vpop.permute.xlu1 %8339  ;;  %6470 = vmatprep.mubr.bf16.mxu1 %v6192_v27  ;;  %v6129_v18 = vsel %vm1914_vm2, %v6097_v13, %v8381_v37  ;;  %8674 = vrot.lane.b32.xlu0 %v11928_v25, %s12694_s2  ;;  %v11947_v54 = vpack.i.bf16 %v11932_v16, %v11940_v38  ;;  %v8316_v41 = vunpack.i.l.bf16 %v11873_v6  ;;  %v5163_v13 = vld [vmem:[#allocation2 + $0x180] sm:$0xff] }
 0x855   : > { %v8342_v22 = vunpack.i.h.bf16 %v8340_v19  ;;  %v8341_v32 = vunpack.i.l.bf16 %v8340_v19  ;;  %v6161_v5 = vsel %vm1947_vm3, %v6129_v18, %v8386_v36  ;;  %v6162_v50 = vsel %vm1947_vm3, %v6130_v4, %v8387_v46 }
 0x856   : > { %8634 = vrot.lane.b32.xlu1 %v11864_v49, %s9110_s1  ;;  %6471 = vmatmul.mubr.bf16.vlgmr.msra.gmra.mrb[120].mxu1 %v6191_v61  ;;  %v8390_v30 = vpop.permute.xlu0 %8389  ;;  %v6195_v37 = vpack.c.bf16 %v6162_v50, %v6161_v5  ;;  %v8352_v24 = vunpack.i.h.bf16 %v11878_v57  ;;  %v8351_v44 = vunpack.i.l.bf16 %v11878_v57  ;;  %v8356_v48 = vunpack.i.l.bf16 %v11886_v62 }
 0x857   : > { %v8392_v47 = vunpack.i.h.bf16 %v8390_v30  ;;  %v8391_v12 = vunpack.i.l.bf16 %v8390_v30  ;;  %v6001_v42 = vsel %vm736_vm0, %v11622_v0, %v8341_v32  ;;  %v6002_v6 = vsel %vm736_vm0, %v11606_v9, %v8342_v22  ;;  %v5195_v22 = vld [vmem:[#allocation2 + $0x181] sm:$0xff]  ;;  %v5196_v32 = vld [vmem:[#allocation2 + $0x189] sm:$0xff] }
 0x858   : > { %v8345_v49 = vpop.permute.xlu1 %8344  ;;  %8679 = vrot.lane.b32.xlu0 %v11947_v54, %s9110_s1  ;;  %6478 = vmatprep.mubr.bf16.mxu1 %v6195_v37  ;;  %v8357_v9 = vunpack.i.h.bf16 %v11886_v62  ;;  %v8713_v5 = vpack.i.bf16 %v5196_v32, %v5195_v22  ;;  %v8322_v50 = vunpack.i.h.bf16 %v11880_v3  ;;  %v5161_v37 = vld [vmem:[#allocation2 + $0x168] sm:$0xff] }
 0x859   : > { %v8347_v15 = vunpack.i.h.bf16 %v8345_v49  ;;  %v8346_v21 = vunpack.i.l.bf16 %v8345_v49  ;;  %v6100_v27 = vsel %vm736_vm0, %v11633_v56, %v8392_v47  ;;  %v6099_v57 = vsel %vm736_vm0, %v11645_v7, %v8391_v12 }
 0x85a   : > { %8639 = vrot.lane.b32.xlu1 %v11871_v53, %s12695_s22  ;;  %v11967_v17 = vpop.permute.xlu0 %8409  ;;  %v6131_v0 = vsel %vm1914_vm2, %v6099_v57, %v8351_v44  ;;  %v6132_v55 = vsel %vm1914_vm2, %v6100_v27, %v8352_v24  ;;  %v5164_v53 = vld [vmem:[#allocation2 + $0x188] sm:$0xff]  ;;  %v8327_v24 = vunpack.i.h.bf16 %v11890_v8  ;;  %v8326_v49 = vunpack.i.l.bf16 %v11890_v8  ;;  %v9005_v44 = vld [vmem:[#allocation2 + $0x30] sm:$0xff] }
 0x85b   : > { %v6033_v52 = vsel %vm1914_vm2, %v6001_v42, %v8346_v21  ;;  %v6034_v40 = vsel %vm1914_vm2, %v6002_v6, %v8347_v15  ;;  %v6163_v19 = vsel %vm1947_vm3, %v6131_v0, %v8356_v48  ;;  %v6164_v46 = vsel %vm1947_vm3, %v6132_v55, %v8357_v9  ;;  %v9006_v48 = vld [vmem:[#allocation2 + $0x38] sm:$0xff]  ;;  %v12009_v6 = vld [vmem:[#allocation2 + $0x169] sm:$0xff] }
 0x85c   : > { %v11972_v59 = vpop.permute.xlu1 %8364  ;;  %v6065_v56 = vsel %vm1947_vm3, %v6033_v52, %v8316_v41  ;;  %v6066_v7 = vsel %vm1947_vm3, %v6034_v40, %v8317_v45  ;;  %8684 = vrot.lane.b32.xlu0 %v11788_v1, %s12695_s22  ;;  %v6198_v36 = vpack.c.bf16 %v6164_v46, %v6163_v19  ;;  %v11984_v18 = vpack.i.bf16 %v5164_v53, %v5163_v13  ;;  %v5162_v41 = vld [vmem:[#allocation2 + $0x170] sm:$0xff] }
 0x85d   : > { %v6194_v61 = vpack.c.bf16 %v6066_v7, %v6065_v56  ;;  %v8321_v45 = vunpack.i.l.bf16 %v11880_v3  ;;  %v12004_v12 = vpack.i.bf16 %v5162_v41, %v5161_v37  ;;  %v6004_v15 = vsel %vm736_vm0, %v9006_v48, %v8322_v50  ;;  %v12011_v8 = vld [vmem:[#allocation2 + $0x171] sm:$0xff] }
 0x85e   : > { %8644 = vrot.lane.b32.xlu1 %v11755_v63, %s12694_s2  ;;  %v11982_v62 = vpop.permute.xlu0 %8414  ;;  %v8361_v21 = vunpack.i.l.bf16 %v11897_v43  ;;  %v6036_v0 = vsel %vm1914_vm2, %v6004_v15, %v8327_v24  ;;  %v12023_v9 = vpack.i.bf16 %v12011_v8, %v12009_v6  ;;  %v8367_v37 = vunpack.i.h.bf16 %v11972_v59 }
 0x85f   : > { %6479 = vmatmul.mubr.bf16.gmra.mrb[124].mxu1 %v6194_v61  ;;  %v6003_v3 = vsel %vm736_vm0, %v9005_v44, %v8321_v45  ;;  %v8411_v41 = vunpack.i.l.bf16 %v11967_v17  ;;  %v4949_v44 = vld [vmem:[#allocation2 + $0x48] sm:$0xff] }
 0x860   : > { %v11986_v4 = vpop.permute.xlu1 %8369  ;;  %6486 = vmatprep.mubr.bf16.mxu1 %v6198_v36  ;;  %8709 = vrot.lane.b32.xlu0 %v11984_v18, %s12694_s2  ;;  %v6035_v40 = vsel %vm1914_vm2, %v6003_v3, %v8326_v49  ;;  %v6101_v13 = vsel %vm736_vm0, %v11552_v10, %v8361_v21  ;;  %v4950_v3 = vld [vmem:[#allocation2 + $0x50] sm:$0xff] }
 0x862   : > { %8664 = vrot.lane.b32.xlu1 %v11888_v35, %s9110_s1  ;;  %v11992_v63 = vpop.permute.xlu0 %8419  ;;  %v8362_v35 = vunpack.i.h.bf16 %v11897_v43 }
 0x864   : > { %v11996_v30 = vpop.permute.xlu1 %8374  ;;  %8714 = vrot.lane.b32.xlu0 %v8713_v5, %s9110_s1  ;;  %v6102_v43 = vsel %vm736_vm0, %v11540_v2, %v8362_v35  ;;  %v8412_v5 = vunpack.i.h.bf16 %v11967_v17 }
 0x866   : > { %8669 = vrot.lane.b32.xlu1 %v11899_v31, %s12695_s22  ;;  %v8440_v47 = vpop.permute.xlu0 %8439 }
 0x867   : > { %v8442_v57 = vunpack.i.h.bf16 %v8440_v47  ;;  %v8441_v52 = vunpack.i.l.bf16 %v8440_v47  ;;  %v8366_v47 = vunpack.i.l.bf16 %v11972_v59 }
 0x868   : > { %v8395_v42 = vpop.permute.xlu1 %8394  ;;  %8719 = vrot.lane.b32.xlu0 %v12004_v12, %s12694_s2 }
 0x869   : > { %v8397_v27 = vunpack.i.h.bf16 %v8395_v42  ;;  %v8396_v31 = vunpack.i.l.bf16 %v8395_v42  ;;  %v6134_v2 = vsel %vm1914_vm2, %v6102_v43, %v8442_v57 }
 0x86a   : > { %8689 = vrot.lane.b32.xlu1 %v11928_v25, %s9110_s1  ;;  %v8445_v55 = vpop.permute.xlu0 %8444  ;;  %v6133_v25 = vsel %vm1914_vm2, %v6101_v13, %v8441_v52  ;;  %v5197_v13 = vld [vmem:[#allocation2 + $0x199] sm:$0xff] }
 0x86b   : > { %v6067_v56 = vsel %vm1947_vm3, %v6035_v40, %v8396_v31  ;;  %v6068_v7 = vsel %vm1947_vm3, %v6036_v0, %v8397_v27  ;;  %v8447_v61 = vunpack.i.h.bf16 %v8445_v55  ;;  %v8446_v19 = vunpack.i.l.bf16 %v8445_v55  ;;  %v5165_v27 = vld [vmem:[#allocation2 + $0x198] sm:$0xff]  ;;  %v5166_v31 = vld [vmem:[#allocation2 + $0x1a0] sm:$0xff] }
 0x86c   : > { %v8400_v53 = vpop.permute.xlu1 %8399  ;;  %v6197_v46 = vpack.c.bf16 %v6068_v7, %v6067_v56  ;;  %8724 = vrot.lane.b32.xlu0 %v12023_v9, %s9110_s1  ;;  %v8738_v55 = vpack.i.bf16 %v5166_v31, %v5165_v27  ;;  %v5229_v56 = vld [vmem:[#allocation2 + $0x19a] sm:$0xff]  ;;  %v5230_v7 = vld [vmem:[#allocation2 + $0x1a2] sm:$0xff] }
 0x86d   : > { %v8402_v36 = vunpack.i.h.bf16 %v8400_v53  ;;  %v8401_v22 = vunpack.i.l.bf16 %v8400_v53  ;;  %v6165_v32 = vsel %vm1947_vm3, %v6133_v25, %v8446_v19  ;;  %v6166_v10 = vsel %vm1947_vm3, %v6134_v2, %v8447_v61  ;;  %v5198_v53 = vld [vmem:[#allocation2 + $0x1a1] sm:$0xff] }
 0x86e   : > { %8694 = vrot.lane.b32.xlu1 %v11947_v54, %s12695_s22  ;;  %6487 = vmatmul.mubr.bf16.gmra.mrb[128].mxu1 %v6197_v46  ;;  %v8450_v50 = vpop.permute.xlu0 %8449  ;;  %v6201_v45 = vpack.c.bf16 %v6166_v10, %v6165_v32  ;;  %v8416_v54 = vunpack.i.l.bf16 %v11982_v62  ;;  %v6238_v61 = vpack.c.bf16 %v5230_v7, %v5229_v56  ;;  %v8758_v51 = vpack.i.bf16 %v5198_v53, %v5197_v13  ;;  %v4954_v13 = vld [vmem:[#allocation2 + $0x80] sm:$0xff] }
 0x86f   : > { %v8452_v49 = vunpack.i.h.bf16 %v8450_v50  ;;  %v8451_v35 = vunpack.i.l.bf16 %v8450_v50  ;;  %v6005_v21 = vsel %vm736_vm0, %v4949_v44, %v8401_v22  ;;  %v6006_v17 = vsel %vm736_vm0, %v4950_v3, %v8402_v36  ;;  %v5037_v36 = vld [vmem:[#allocation2 + $0x16a] sm:$0xff]  ;;  %v5038_v22 = vld [vmem:[#allocation2 + $0x172] sm:$0xff] }
 0x870   : > { %v8405_v24 = vpop.permute.xlu1 %8404  ;;  %8729 = vrot.lane.b32.xlu0 %v8728_v20, %s12695_s22  ;;  %6494 = vmatprep.mubr.bf16.mxu1 %v6201_v45  ;;  %v8371_v25 = vunpack.i.l.bf16 %v11986_v4  ;;  %v8377_v32 = vunpack.i.h.bf16 %v11996_v30  ;;  %v8376_v10 = vunpack.i.l.bf16 %v11996_v30  ;;  %v8422_v50 = vunpack.i.h.bf16 %v11992_v63 }
 0x871   : > { %v8407_v48 = vunpack.i.h.bf16 %v8405_v24  ;;  %v8406_v15 = vunpack.i.l.bf16 %v8405_v24  ;;  %v6104_v42 = vsel %vm736_vm0, %v11762_v28, %v8452_v49  ;;  %v6103_v59 = vsel %vm736_vm0, %v11774_v14, %v8451_v35  ;;  %7750 = vmatmul.mubr.msk.bf16.gmra.mrb[168].mxu0 %vm736_vm0, %v6238_v61 }
 0x872   : > { %8699 = vrot.lane.b32.xlu1 %v11788_v1, %s12694_s2  ;;  %v12056_v60 = vpop.permute.xlu0 %8469  ;;  %v6135_v20 = vsel %vm1914_vm2, %v6103_v59, %v8411_v41  ;;  %v6136_v52 = vsel %vm1914_vm2, %v6104_v42, %v8412_v5  ;;  %v8417_v28 = vunpack.i.h.bf16 %v11982_v62  ;;  %v4952_v5 = vld [vmem:[#allocation2 + $0x68] sm:$0xff]  ;;  %v8421_v41 = vunpack.i.l.bf16 %v11992_v63 }
 0x873   : > { %v6037_v57 = vsel %vm1914_vm2, %v6005_v21, %v8406_v15  ;;  %v6038_v39 = vsel %vm1914_vm2, %v6006_v17, %v8407_v48  ;;  %v6167_v43 = vsel %vm1947_vm3, %v6135_v20, %v8416_v54  ;;  %v8753_v49 = vpack.i.bf16 %v5038_v22, %v5037_v36 }
 0x874   : > { %v12061_v40 = vpop.permute.xlu1 %8424  ;;  %v6069_v14 = vsel %vm1947_vm3, %v6037_v57, %v8366_v47  ;;  %v6070_v1 = vsel %vm1947_vm3, %v6038_v39, %v8367_v37  ;;  %8734 = vrot.lane.b32.xlu0 %v8733_v58, %s12695_s22  ;;  %v6168_v62 = vsel %vm1947_vm3, %v6136_v52, %v8417_v28  ;;  %v8372_v58 = vunpack.i.h.bf16 %v11986_v4 }
 0x875   : > { %v6200_v0 = vpack.c.bf16 %v6070_v1, %v6069_v14  ;;  %v6204_v46 = vpack.c.bf16 %v6168_v62, %v6167_v43  ;;  %v6106_v3 = vsel %vm736_vm0, %v11702_v26, %v8422_v50  ;;  %v6105_v21 = vsel %vm736_vm0, %v11716_v34, %v8421_v41  ;;  %v4953_v43 = vld [vmem:[#allocation2 + $0x78] sm:$0xff] }
 0x876   : > { %8704 = vrot.lane.b32.xlu1 %v11780_v33, %s12694_s2  ;;  %v12073_v19 = vpop.permute.xlu0 %8474  ;;  %v6008_v37 = vsel %vm736_vm0, %v4952_v5, %v8372_v58  ;;  %v8472_v34 = vunpack.i.h.bf16 %v12056_v60  ;;  %v8427_v1 = vunpack.i.h.bf16 %v12061_v40  ;;  %v8426_v62 = vunpack.i.l.bf16 %v12061_v40 }
 0x877   : > { %6495 = vmatmul.mubr.bf16.gmra.mrb[132].mxu1 %v6200_v0  ;;  %v8471_v0 = vunpack.i.l.bf16 %v12056_v60  ;;  %v8477_v5 = vunpack.i.h.bf16 %v12073_v19 }
 0x878   : > { %v12075_v29 = vpop.permute.xlu1 %8429  ;;  %6502 = vmatprep.mubr.bf16.mxu1 %v6204_v46  ;;  %8739 = vrot.lane.b32.xlu0 %v8738_v55, %s12694_s2  ;;  %v5083_v46 = vld [vmem:[#allocation2 + $0xa9] sm:$0xff] }
 0x87a   : > { %8744 = vrot.lane.b32.xlu1 %v12004_v12, %s9110_s1  ;;  %v12081_v33 = vpop.permute.xlu0 %8479  ;;  %v4951_v12 = vld [vmem:[#allocation2 + $0x60] sm:$0xff] }
 0x87b   : > { %v6007_v4 = vsel %vm736_vm0, %v4951_v12, %v8371_v25 }
 0x87c   : > { %v12085_v2 = vpop.permute.xlu1 %8434  ;;  %8759 = vrot.lane.b32.xlu0 %v8758_v51, %s9110_s1  ;;  %v6039_v44 = vsel %vm1914_vm2, %v6007_v4, %v8376_v10  ;;  %v5084_v51 = vld [vmem:[#allocation2 + $0xb1] sm:$0xff] }
 0x87e   : > { %8749 = vrot.lane.b32.xlu1 %v12023_v9, %s12695_s22  ;;  %v8500_v45 = vpop.permute.xlu0 %8499  ;;  %v6040_v9 = vsel %vm1914_vm2, %v6008_v37, %v8377_v32  ;;  %s9112_s22 = smov [#allocation3]  }
 0x87f   : > { %v8502_v54 = vunpack.i.h.bf16 %v8500_v45  ;;  %v8501_v30 = vunpack.i.l.bf16 %v8500_v45 }
 0x880   : > { %v8455_v24 = vpop.permute.xlu1 %8454 }
 0x881   : > { %v8457_v35 = vunpack.i.h.bf16 %v8455_v24  ;;  %v8456_v47 = vunpack.i.l.bf16 %v8455_v24  ;;  %v6137_v31 = vsel %vm1914_vm2, %v6105_v21, %v8501_v30  ;;  %v6138_v57 = vsel %vm1914_vm2, %v6106_v3, %v8502_v54 }
 0x882   : > { %8754 = vrot.lane.b32.xlu1 %v8753_v49, %s12694_s2  ;;  %v8505_v48 = vpop.permute.xlu0 %8504  ;;  %v8431_v30 = vunpack.i.l.bf16 %v12075_v29  ;;  %v8436_v3 = vunpack.i.l.bf16 %v12085_v2  ;;  %s596_s2 = sand.u32 1, %s9097_s28  }
 0x883   : > { %v6071_v15 = vsel %vm1947_vm3, %v6039_v44, %v8456_v47  ;;  %v6072_v63 = vsel %vm1947_vm3, %v6040_v9, %v8457_v35  ;;  %v8507_v42 = vunpack.i.h.bf16 %v8505_v48  ;;  %v8506_v59 = vunpack.i.l.bf16 %v8505_v48  ;;  %v4955_v48 = vld [vmem:[#allocation2 + $0x90] sm:$0xff]  ;;  %s6928_s29 = sshll.u32 %s596_s2, 8  ;;  %s12588_s0 = scalar_lea.sflag [#allocation4], %s596_s2 }
 0x884   : > { %v8460_v17 = vpop.permute.xlu1 %8459  ;;  %v6203_v27 = vpack.c.bf16 %v6072_v63, %v6071_v15  ;;  %v8437_v9 = vunpack.i.h.bf16 %v12085_v2  ;;  %v4956_v15 = vld [vmem:[#allocation2 + $0x98] sm:$0xff]  ;;  %v8482_v63 = vunpack.i.h.bf16 %v12081_v33  ;;  %s12412_s27 = scalar_lea.vmem [#allocation3], %s6928_s29 }
 0x885   : > { %v8462_v39 = vunpack.i.h.bf16 %v8460_v17  ;;  %v8461_v20 = vunpack.i.l.bf16 %v8460_v17  ;;  %v6169_v26 = vsel %vm1947_vm3, %v6137_v31, %v8506_v59  ;;  %v6170_v52 = vsel %vm1947_vm3, %v6138_v57, %v8507_v42  ;;  %s6838_s26 = sshll.u32 %s12412_s27, 4  ;;  %s12579_s26 = int_to_ptr.vmem [resolvable:$true] %s6838_s26 }
 0x886   : > { %8764 = vrot.lane.b32.xlu1 %v11984_v18, %s9110_s1  ;;  %6503 = vmatmul.mubr.bf16.gmra.mrb[136].mxu1 %v6203_v27  ;;  %v8510_v28 = vpop.permute.xlu0 %8509  ;;  %v6207_v14 = vpack.c.bf16 %v6170_v52, %v6169_v26  ;;  %v8476_v18 = vunpack.i.l.bf16 %v12073_v19  ;;  %v8432_v19 = vunpack.i.h.bf16 %v12075_v29  ;;  %v6011_v17 = vsel %vm736_vm0, %v4955_v48, %v8431_v30  ;;  %s9043_s25 = scalar_lea.vmem %s12579_s26, 4096  ;;  %s9047_s1 = sshll.u32 %s9112_s22, 4  ;;  %s9048_s1 = int_to_ptr.vmem [resolvable:$false] %s9047_s1 }
 0x887   : > { %v8512_v56 = vunpack.i.h.bf16 %v8510_v28  ;;  %v8511_v7 = vunpack.i.l.bf16 %v8510_v28  ;;  %v6009_v58 = vsel %vm736_vm0, %v4953_v43, %v8461_v20  ;;  %v6010_v25 = vsel %vm736_vm0, %v4954_v13, %v8462_v39  ;;  %p9044_p11 = scmp.ne.s32.totalorder %s12579_s26, %s9043_s25  ;;  %s9049_s29 = scalar_lea.vmem %s9048_s1, 8192 }
 0x888   : > { %v8465_v55 = vpop.permute.xlu1 %8464  ;;  %6510 = vmatprep.mubr.bf16.mxu1 %v6207_v14  ;;  %v6012_v42 = vsel %vm736_vm0, %v4956_v15, %v8432_v19  ;;  %v8481_v59 = vunpack.i.l.bf16 %v12081_v33  ;;  %v6043_v20 = vsel %vm1914_vm2, %v6011_v17, %v8436_v3  ;;  %v6110_v26 = vsel %vm736_vm0, %v11804_v11, %v8482_v63  ;;  %p9050_p0 = scmp.lt.s32.totalorder %s12579_s26, %s9048_s1  ;;  %p9051_p1 = scmp.lt.s32.totalorder %s9049_s29, %s9043_s25 }
 0x889   : > { %v8467_v53 = vunpack.i.h.bf16 %v8465_v55  ;;  %v8466_v61 = vunpack.i.l.bf16 %v8465_v55  ;;  %v6108_v60 = vsel %vm736_vm0, %v5084_v51, %v8512_v56  ;;  %v6107_v36 = vsel %vm736_vm0, %v5083_v46, %v8511_v7  ;;  %v4957_v51 = vld [vmem:[#allocation2 + $0xa8] sm:$0xff]  ;;  %p9045_p12 = pnand %p9044_p11, %p9248_p5 }
 0x88a   : > { %v12122_v32 = vpop.permute.xlu0 %8529  ;;  %v6139_v10 = vsel %vm1914_vm2, %v6107_v36, %v8471_v0  ;;  %v6140_v12 = vsel %vm1914_vm2, %v6108_v60, %v8472_v34  ;;  %v6044_v2 = vsel %vm1914_vm2, %v6012_v42, %v8437_v9  ;;  %v6109_v33 = vsel %vm736_vm0, %v11811_v23, %v8481_v59  ;;  %p9052_p2 = por %p9051_p1, %p9050_p0 }
 0x88b   : > { %v6041_v22 = vsel %vm1914_vm2, %v6009_v58, %v8466_v61  ;;  %v6042_v40 = vsel %vm1914_vm2, %v6010_v25, %v8467_v53  ;;  %v6171_v41 = vsel %vm1947_vm3, %v6139_v10, %v8476_v18  ;;  %v6172_v24 = vsel %vm1947_vm3, %v6140_v12, %v8477_v5  ;;  %v5087_v5 = vld [vmem:[#allocation2 + $0xd9] sm:$0xff]  ;;  %p9046_p13 = pneg %p9045_p12 }
 0x88c   : > { %v12127_v50 = vpop.permute.xlu1 %8484  ;;  %v6073_v45 = vsel %vm1947_vm3, %v6041_v22, %v8426_v62  ;;  %v6074_v4 = vsel %vm1947_vm3, %v6042_v40, %v8427_v1  ;;  %v6210_v35 = vpack.c.bf16 %v6172_v24, %v6171_v41  ;;  %v8532_v13 = vunpack.i.h.bf16 %v12122_v32  ;;  %v4958_v40 = vld [vmem:[#allocation2 + $0xb0] sm:$0xff] }
 0x88d   : > { %v6206_v37 = vpack.c.bf16 %v6074_v4, %v6073_v45  ;;  %v8487_v23 = vunpack.i.h.bf16 %v12127_v50  ;;  %v8531_v46 = vunpack.i.l.bf16 %v12122_v32  ;;  %v8486_v36 = vunpack.i.l.bf16 %v12127_v50  ;;  %v5088_v45 = vld [vmem:[#allocation2 + $0xe1] sm:$0xff]  ;;  %p9053_p3 = pnand %p9052_p2, %p9046_p13 }
 0x88e   : > { %v12133_v49 = vpop.permute.xlu0 %8534 }
 0x88f   : > { %6511 = vmatmul.mubr.bf16.gmra.mrb[140].mxu1 %v6206_v37  ;;  %v8536_v22 = vunpack.i.l.bf16 %v12133_v49  ;;  %v8537_v9 = vunpack.i.h.bf16 %v12133_v49 }
 0x890   : > { %v12135_v47 = vpop.permute.xlu1 %8489  ;;  %6518 = vmatprep.mubr.bf16.mxu1 %v6210_v35 }
 0x892   : > { %v12137_v54 = vpop.permute.xlu0 %8539 }
 0x894   : > { %v12141_v44 = vpop.permute.xlu1 %8494 }
 0x896   : > { %v8560_v21 = vpop.permute.xlu0 %8559 }
 0x897   : > { %v8562_v57 = vunpack.i.h.bf16 %v8560_v21  ;;  %v8561_v39 = vunpack.i.l.bf16 %v8560_v21 }
 0x898   : > { %v8515_v27 = vpop.permute.xlu1 %8514 }
 0x899   : > { %v8517_v31 = vunpack.i.h.bf16 %v8515_v27  ;;  %v8516_v29 = vunpack.i.l.bf16 %v8515_v27  ;;  %v6141_v55 = vsel %vm1914_vm2, %v6109_v33, %v8561_v39  ;;  %v6142_v56 = vsel %vm1914_vm2, %v6110_v26, %v8562_v57  ;;  %v4960_v33 = vld [vmem:[#allocation2 + $0xc8] sm:$0xff] }
 0x89a   : > { %v8565_v52 = vpop.permute.xlu0 %8564 }
 0x89b   : > { %v6075_v34 = vsel %vm1947_vm3, %v6043_v20, %v8516_v29  ;;  %v6076_v28 = vsel %vm1947_vm3, %v6044_v2, %v8517_v31  ;;  %v8567_v1 = vunpack.i.h.bf16 %v8565_v52  ;;  %v8566_v0 = vunpack.i.l.bf16 %v8565_v52 }
 0x89c   : > { %v8520_v14 = vpop.permute.xlu1 %8519  ;;  %v6209_v43 = vpack.c.bf16 %v6076_v28, %v6075_v34  ;;  %v8492_v20 = vunpack.i.h.bf16 %v12135_v47  ;;  %v8491_v2 = vunpack.i.l.bf16 %v12135_v47  ;;  %v8497_v52 = vunpack.i.h.bf16 %v12141_v44  ;;  %v4959_v28 = vld [vmem:[#allocation2 + $0xc0] sm:$0xff] }
 0x89d   : > { %v8522_v7 = vunpack.i.h.bf16 %v8520_v14  ;;  %v8521_v62 = vunpack.i.l.bf16 %v8520_v14  ;;  %v6173_v11 = vsel %vm1947_vm3, %v6141_v55, %v8566_v0  ;;  %v6174_v18 = vsel %vm1947_vm3, %v6142_v56, %v8567_v1 }
 0x89e   : > { %6519 = vmatmul.mubr.bf16.gmra.mrb[144].mxu1 %v6209_v43  ;;  %v8570_v53 = vpop.permute.xlu0 %8569  ;;  %v6213_v61 = vpack.c.bf16 %v6174_v18, %v6173_v11  ;;  %v8496_v34 = vunpack.i.l.bf16 %v12141_v44  ;;  %v8542_v14 = vunpack.i.h.bf16 %v12137_v54  ;;  %v6015_v43 = vsel %vm736_vm0, %v4959_v28, %v8491_v2 }
 0x89f   : > { %v8572_v25 = vunpack.i.h.bf16 %v8570_v53  ;;  %v8571_v60 = vunpack.i.l.bf16 %v8570_v53  ;;  %v6013_v4 = vsel %vm736_vm0, %v4957_v51, %v8521_v62  ;;  %v6014_v37 = vsel %vm736_vm0, %v4958_v40, %v8522_v7  ;;  %v5089_v51 = vld [vmem:[#allocation2 + $0xf1] sm:$0xff] }
 0x8a0   : > { %v8525_v58 = vpop.permute.xlu1 %8524  ;;  %6526 = vmatprep.mubr.bf16.mxu1 %v6213_v61  ;;  %v6016_v55 = vsel %vm736_vm0, %v4960_v33, %v8492_v20  ;;  %v8541_v56 = vunpack.i.l.bf16 %v12137_v54  ;;  %v6047_v53 = vsel %vm1914_vm2, %v6015_v43, %v8496_v34  ;;  %v5091_v33 = vld [vmem:[#allocation2 + $0x109] sm:$0xff] }
 0x8a1   : > { %v8527_v10 = vunpack.i.h.bf16 %v8525_v58  ;;  %v8526_v12 = vunpack.i.l.bf16 %v8525_v58  ;;  %v6112_v32 = vsel %vm736_vm0, %v5088_v45, %v8572_v25  ;;  %v6111_v41 = vsel %vm736_vm0, %v5087_v5, %v8571_v60 }
 0x8a2   : > { %v12172_v35 = vpop.permute.xlu0 %8589  ;;  %v6143_v19 = vsel %vm1914_vm2, %v6111_v41, %v8531_v46  ;;  %v6144_v30 = vsel %vm1914_vm2, %v6112_v32, %v8532_v13  ;;  %v6048_v61 = vsel %vm1914_vm2, %v6016_v55, %v8497_v52  ;;  %v4962_v52 = vld [vmem:[#allocation2 + $0xe0] sm:$0xff] }
 0x8a3   : > { %v6045_v24 = vsel %vm1914_vm2, %v6013_v4, %v8526_v12  ;;  %v6046_v50 = vsel %vm1914_vm2, %v6014_v37, %v8527_v10  ;;  %v6175_v21 = vsel %vm1947_vm3, %v6143_v19, %v8536_v22  ;;  %v6176_v17 = vsel %vm1947_vm3, %v6144_v30, %v8537_v9 }
 0x8a4   : > { %v12177_v3 = vpop.permute.xlu1 %8544  ;;  %v6077_v48 = vsel %vm1947_vm3, %v6045_v24, %v8486_v36  ;;  %v6078_v15 = vsel %vm1947_vm3, %v6046_v50, %v8487_v23  ;;  %v6216_v59 = vpack.c.bf16 %v6176_v17, %v6175_v21  ;;  %v5090_v23 = vld [vmem:[#allocation2 + $0xf9] sm:$0xff]  ;;  %v6113_v36 = vsel %vm736_vm0, %v5089_v51, %v8541_v56 }
 0x8a5   : > { %v6212_v63 = vpack.c.bf16 %v6078_v15, %v6077_v48  ;;  %v6114_v58 = vsel %vm736_vm0, %v5090_v23, %v8542_v14  ;;  %v8592_v24 = vunpack.i.h.bf16 %v12172_v35  ;;  %v8547_v9 = vunpack.i.h.bf16 %v12177_v3  ;;  %v4961_v15 = vld [vmem:[#allocation2 + $0xd8] sm:$0xff] }
 0x8a6   : > { %v12183_v42 = vpop.permute.xlu0 %8594  ;;  %v12185_v27 = vpop.f32.mrb[140].mxu0  ;;  %v8591_v48 = vunpack.i.l.bf16 %v12172_v35  ;;  %v8546_v20 = vunpack.i.l.bf16 %v12177_v3  ;;  %v5092_v14 = vld [vmem:[#allocation2 + $0x111] sm:$0xff] }
 0x8a7   : > { %6527 = vmatmul.mubr.bf16.gmra.mrb[148].mxu1 %v6212_v63  ;;  %v12189_v49 = vpop.f32.mrb[141].mxu0  ;;  %v8596_v2 = vunpack.i.l.bf16 %v12183_v42 }
 0x8a8   : > { %v12187_v31 = vpop.permute.xlu1 %8549  ;;  %6534 = vmatprep.mubr.bf16.mxu1 %v6216_v59  ;;  %v12191_v29 = vpop.f32.mrb[142].mxu0 }
 0x8a9   : > { %v12193_v57 = vpop.f32.mrb[143].mxu0 }
 0x8aa   : > { %v12195_v39 = vpop.permute.xlu0 %8599 }
 0x8ac   : > { %v12199_v26 = vpop.permute.xlu1 %8554 }
 0x8ae   : > { %v8620_v1 = vpop.permute.xlu0 %8619  ;;  %v12204_v0 = vpop.f32.mrb[144].mxu0 }
 0x8af   : > { %v12209_v7 = vpop.f32.mrb[145].mxu0  ;;  %v8622_v18 = vunpack.i.h.bf16 %v8620_v1  ;;  %v8621_v44 = vunpack.i.l.bf16 %v8620_v1 }
 0x8b0   : > { %v8575_v47 = vpop.permute.xlu1 %8574  ;;  %v12211_v13 = vpop.f32.mrb[146].mxu0 }
 0x8b1   : > { %v8577_v62 = vunpack.i.h.bf16 %v8575_v47  ;;  %v8576_v11 = vunpack.i.l.bf16 %v8575_v47  ;;  %v12215_v46 = vpop.f32.mrb[147].mxu0  ;;  %v6145_v5 = vsel %vm1914_vm2, %v6113_v36, %v8621_v44  ;;  %v6146_v45 = vsel %vm1914_vm2, %v6114_v58, %v8622_v18 }
 0x8b2   : > { %v8625_v54 = vpop.permute.xlu0 %8624 }
 0x8b3   : > { %v6079_v25 = vsel %vm1947_vm3, %v6047_v53, %v8576_v11  ;;  %v6080_v60 = vsel %vm1947_vm3, %v6048_v61, %v8577_v62  ;;  %v8627_v40 = vunpack.i.h.bf16 %v8625_v54  ;;  %v8626_v10 = vunpack.i.l.bf16 %v8625_v54 }
 0x8b4   : > { %v8580_v22 = vpop.permute.xlu1 %8579  ;;  %v6215_v12 = vpack.c.bf16 %v6080_v60, %v6079_v25  ;;  %v8597_v53 = vunpack.i.h.bf16 %v12183_v42 }
 0x8b5   : > { %v8582_v4 = vunpack.i.h.bf16 %v8580_v22  ;;  %v8581_v37 = vunpack.i.l.bf16 %v8580_v22  ;;  %v6177_v32 = vsel %vm1947_vm3, %v6145_v5, %v8626_v10  ;;  %v6178_v41 = vsel %vm1947_vm3, %v6146_v45, %v8627_v40 }
 0x8b6   : > { %6535 = vmatmul.mubr.bf16.gmra.mrb[152].mxu1 %v6215_v12  ;;  %v8630_v50 = vpop.permute.xlu0 %8629  ;;  %v12226_v19 = vpop.f32.mrb[148].mxu0  ;;  %v6219_v30 = vpack.c.bf16 %v6178_v41, %v6177_v32  ;;  %v8552_v45 = vunpack.i.h.bf16 %v12187_v31  ;;  %v8557_v32 = vunpack.i.h.bf16 %v12199_v26  ;;  %v8556_v41 = vunpack.i.l.bf16 %v12199_v26 }
 0x8b7   : > { %v8632_v21 = vunpack.i.h.bf16 %v8630_v50  ;;  %v8631_v17 = vunpack.i.l.bf16 %v8630_v50  ;;  %v12230_v59 = vpop.f32.mrb[149].mxu0  ;;  %v6017_v35 = vsel %vm736_vm0, %v4961_v15, %v8581_v37  ;;  %v6018_v43 = vsel %vm736_vm0, %v4962_v52, %v8582_v4  ;;  %v4964_v50 = vld [vmem:[#allocation2 + $0xf8] sm:$0xff] }
 0x8b8   : > { %v8585_v63 = vpop.permute.xlu1 %8584  ;;  %6542 = vmatprep.mubr.bf16.mxu1 %v6219_v30  ;;  %v12234_v1 = vpop.f32.mrb[150].mxu0  ;;  %v8551_v4 = vunpack.i.l.bf16 %v12187_v31  ;;  %v8602_v30 = vunpack.i.h.bf16 %v12195_v39  ;;  %v6020_v15 = vsel %vm736_vm0, %v4964_v50, %v8552_v45 }
 0x8b9   : > { %v8587_v34 = vunpack.i.h.bf16 %v8585_v63  ;;  %v8586_v28 = vunpack.i.l.bf16 %v8585_v63  ;;  %v6116_v55 = vsel %vm736_vm0, %v5092_v14, %v8632_v21  ;;  %v6115_v56 = vsel %vm736_vm0, %v5091_v33, %v8631_v17  ;;  %v12240_v47 = vpop.f32.mrb[151].mxu0  ;;  %v5094_v33 = vld [vmem:[#allocation2 + $0x129] sm:$0xff] }
 0x8ba   : > { %v12244_v11 = vpop.permute.xlu0 %8649  ;;  %v6147_v18 = vsel %vm1914_vm2, %v6115_v56, %v8591_v48  ;;  %v6148_v44 = vsel %vm1914_vm2, %v6116_v55, %v8592_v24  ;;  %v4963_v24 = vld [vmem:[#allocation2 + $0xf0] sm:$0xff]  ;;  %v8601_v63 = vunpack.i.l.bf16 %v12195_v39 }
 0x8bb   : > { %v6049_v3 = vsel %vm1914_vm2, %v6017_v35, %v8586_v28  ;;  %v6050_v62 = vsel %vm1914_vm2, %v6018_v43, %v8587_v34  ;;  %v6179_v54 = vsel %vm1947_vm3, %v6147_v18, %v8596_v2  ;;  %v6180_v25 = vsel %vm1947_vm3, %v6148_v44, %v8597_v53  ;;  %v5093_v35 = vld [vmem:[#allocation2 + $0x121] sm:$0xff] }
 0x8bc   : > { %v12249_v61 = vpop.permute.xlu1 %8604  ;;  %v6081_v23 = vsel %vm1947_vm3, %v6049_v3, %v8546_v20  ;;  %v6082_v51 = vsel %vm1947_vm3, %v6050_v62, %v8547_v9  ;;  %v6222_v36 = vpack.c.bf16 %v6180_v25, %v6179_v54  ;;  %v6019_v48 = vsel %vm736_vm0, %v4963_v24, %v8551_v4 }
 0x8bd   : > { %v6218_v58 = vpack.c.bf16 %v6082_v51, %v6081_v23  ;;  %v6051_v26 = vsel %vm1914_vm2, %v6019_v48, %v8556_v41  ;;  %v6052_v28 = vsel %vm1914_vm2, %v6020_v15, %v8557_v32  ;;  %v6118_v43 = vsel %vm736_vm0, %v5094_v33, %v8602_v30 }
 0x8be   : > { %v12255_v60 = vpop.permute.xlu0 %8654  ;;  %v6117_v62 = vsel %vm736_vm0, %v5093_v35, %v8601_v63  ;;  %v8652_v4 = vunpack.i.h.bf16 %v12244_v11  ;;  %v8607_v24 = vunpack.i.h.bf16 %v12249_v61  ;;  %v8651_v50 = vunpack.i.l.bf16 %v12244_v11 }
 0x8bf   : > { %6543 = vmatmul.mubr.bf16.gmra.mrb[156].mxu1 %v6218_v58  ;;  %v12259_v40 = vpop.f32.mrb[152].mxu0  ;;  %v8606_v63 = vunpack.i.l.bf16 %v12249_v61 }
 0x8c0   : > { %v12257_v22 = vpop.permute.xlu1 %8609  ;;  %6550 = vmatprep.mubr.bf16.mxu1 %v6222_v36  ;;  %v12261_v42 = vpop.f32.mrb[153].mxu0 }
 0x8c1   : > { %v12263_v10 = vpop.f32.mrb[154].mxu0 }
 0x8c2   : > { %v12265_v12 = vpop.f32.mrb[155].mxu0  ;;  %v12267_v5 = vpop.permute.xlu0 %8659 }
 0x8c4   : > { %v12271_v37 = vpop.permute.xlu1 %8614 }
 0x8c6   : > { %v8675_v9 = vpop.permute.xlu0 %8674 }
 0x8c7   : > { %v12279_v17 = vpop.f32.mrb[156].mxu0  ;;  %v8677_v2 = vunpack.i.h.bf16 %v8675_v9  ;;  %v8676_v52 = vunpack.i.l.bf16 %v8675_v9 }
 0x8c8   : > { %v8635_v21 = vpop.permute.xlu1 %8634  ;;  %v12281_v34 = vpop.f32.mrb[157].mxu0 }
 0x8c9   : > { %v8637_v31 = vunpack.i.h.bf16 %v8635_v21  ;;  %v8636_v20 = vunpack.i.l.bf16 %v8635_v21  ;;  %v12285_v14 = vpop.f32.mrb[158].mxu0  ;;  %v6149_v51 = vsel %vm1914_vm2, %v6117_v62, %v8676_v52  ;;  %v6150_v58 = vsel %vm1914_vm2, %v6118_v43, %v8677_v2 }
 0x8ca   : > { %v12288_v39 = vpop.f32.mrb[159].mxu0  ;;  %v8680_v55 = vpop.permute.xlu0 %8679  ;;  %v8656_v21 = vunpack.i.l.bf16 %v12255_v60 }
 0x8cb   : > { %v6083_v56 = vsel %vm1947_vm3, %v6051_v26, %v8636_v20  ;;  %v6084_v3 = vsel %vm1947_vm3, %v6052_v28, %v8637_v31  ;;  %v8682_v44 = vunpack.i.h.bf16 %v8680_v55  ;;  %v8681_v53 = vunpack.i.l.bf16 %v8680_v55  ;;  %v4965_v31 = vld [vmem:[#allocation2 + $0x108] sm:$0xff]  ;;  %v4966_v20 = vld [vmem:[#allocation2 + $0x110] sm:$0xff] }
 0x8cc   : > { %v8640_v18 = vpop.permute.xlu1 %8639  ;;  %v6221_v23 = vpack.c.bf16 %v6084_v3, %v6083_v56 }
 0x8cd   : > { %v8642_v54 = vunpack.i.h.bf16 %v8640_v18  ;;  %v8641_v25 = vunpack.i.l.bf16 %v8640_v18  ;;  %v6181_v36 = vsel %vm1947_vm3, %v6149_v51, %v8681_v53  ;;  %v6182_v45 = vsel %vm1947_vm3, %v6150_v58, %v8682_v44 }
 0x8ce   : > { %6551 = vmatmul.mubr.bf16.gmra.mrb[160].mxu1 %v6221_v23  ;;  %v8685_v32 = vpop.permute.xlu0 %8684  ;;  %v6225_v41 = vpack.c.bf16 %v6182_v45, %v6181_v36  ;;  %v8657_v44 = vunpack.i.h.bf16 %v12255_v60  ;;  %v8612_v36 = vunpack.i.h.bf16 %v12257_v22  ;;  %v8611_v45 = vunpack.i.l.bf16 %v12257_v22 }
 0x8cf   : > { %v8687_v9 = vunpack.i.h.bf16 %v8685_v32  ;;  %v8686_v48 = vunpack.i.l.bf16 %v8685_v32  ;;  %v12300_v15 = vpop.f32.mrb[160].mxu0  ;;  %v6021_v28 = vsel %vm736_vm0, %v4965_v31, %v8641_v25  ;;  %v6022_v11 = vsel %vm736_vm0, %v4966_v20, %v8642_v54 }
 0x8d0   : > { %v8645_v30 = vpop.permute.xlu1 %8644  ;;  %6558 = vmatprep.mubr.bf16.mxu1 %v6225_v41  ;;  %v12304_v26 = vpop.f32.mrb[161].mxu0  ;;  %v8617_v41 = vunpack.i.h.bf16 %v12271_v37  ;;  %v8661_v20 = vunpack.i.l.bf16 %v12267_v5 }
 0x8d1   : > { %v8647_v2 = vunpack.i.h.bf16 %v8645_v30  ;;  %v8646_v52 = vunpack.i.l.bf16 %v8645_v30  ;;  %v6120_v33 = vsel %vm736_vm0, %v11932_v16, %v8687_v9  ;;  %v6119_v35 = vsel %vm736_vm0, %v11940_v38, %v8686_v48  ;;  %v12312_v61 = vpop.f32.mrb[162].mxu0  ;;  %v4967_v30 = vld [vmem:[#allocation2 + $0x120] sm:$0xff]  ;;  %v4968_v9 = vld [vmem:[#allocation2 + $0x128] sm:$0xff] }
 0x8d2   : > { %v12316_v56 = vpop.f32.mrb[163].mxu0  ;;  %v12318_v3 = vpop.permute.xlu0 %8709  ;;  %v6151_v62 = vsel %vm1914_vm2, %v6119_v35, %v8651_v50  ;;  %v6152_v18 = vsel %vm1914_vm2, %v6120_v33, %v8652_v4  ;;  %v8662_v48 = vunpack.i.h.bf16 %v12267_v5  ;;  %v6024_v31 = vsel %vm736_vm0, %v4968_v9, %v8612_v36 }
 0x8d3   : > { %v6053_v43 = vsel %vm1914_vm2, %v6021_v28, %v8646_v52  ;;  %v6054_v55 = vsel %vm1914_vm2, %v6022_v11, %v8647_v2  ;;  %v6183_v51 = vsel %vm1947_vm3, %v6151_v62, %v8656_v21  ;;  %v6184_v58 = vsel %vm1947_vm3, %v6152_v18, %v8657_v44 }
 0x8d4   : > { %v12323_v16 = vpop.permute.xlu1 %8664  ;;  %v6085_v38 = vsel %vm1947_vm3, %v6053_v43, %v8606_v63  ;;  %v6086_v53 = vsel %vm1947_vm3, %v6054_v55, %v8607_v24  ;;  %v6228_v25 = vpack.c.bf16 %v6184_v58, %v6183_v51  ;;  %v8616_v24 = vunpack.i.l.bf16 %v12271_v37  ;;  %v5098_v43 = vld [vmem:[#allocation2 + $0x159] sm:$0xff]  ;;  %v5097_v55 = vld [vmem:[#allocation2 + $0x151] sm:$0xff] }
 0x8d5   : > { %v6224_v23 = vpack.c.bf16 %v6086_v53, %v6085_v38  ;;  %v6023_v21 = vsel %vm736_vm0, %v4967_v30, %v8611_v45  ;;  %v6056_v35 = vsel %vm1914_vm2, %v6024_v31, %v8617_v41  ;;  %v6122_v62 = vsel %vm736_vm0, %v5098_v43, %v8662_v48 }
 0x8d6   : > { %v12329_v54 = vpop.permute.xlu0 %8714  ;;  %v6055_v33 = vsel %vm1914_vm2, %v6023_v21, %v8616_v24  ;;  %v6121_v5 = vsel %vm736_vm0, %v5097_v55, %v8661_v20  ;;  %v8712_v9 = vunpack.i.h.bf16 %v12318_v3  ;;  %v8711_v48 = vunpack.i.l.bf16 %v12318_v3 }
 0x8d7   : > { %6559 = vmatmul.mubr.bf16.gmra.mrb[164].mxu1 %v6224_v23  ;;  %v12335_v4 = vpop.f32.mrb[164].mxu0  ;;  %v8667_v31 = vunpack.i.h.bf16 %v12323_v16  ;;  %v8666_v20 = vunpack.i.l.bf16 %v12323_v16 }
 0x8d8   : > { %v12333_v60 = vpop.permute.xlu1 %8669  ;;  %6566 = vmatprep.mubr.bf16.mxu1 %v6228_v25  ;;  %v12337_v32 = vpop.f32.mrb[165].mxu0 }
 0x8d9   : > { %v12341_v50 = vpop.f32.mrb[166].mxu0 }
 0x8da   : > { %v12344_v63 = vpop.f32.mrb[167].mxu0  ;;  %v8720_v22 = vpop.permute.xlu0 %8719 }
 0x8db   : > { %v8722_v11 = vunpack.i.h.bf16 %v8720_v22  ;;  %v8721_v37 = vunpack.i.l.bf16 %v8720_v22 }
 0x8dc   : > { %v8690_v2 = vpop.permute.xlu1 %8689 }
 0x8dd   : > { %v8692_v52 = vunpack.i.h.bf16 %v8690_v2  ;;  %v8691_v28 = vunpack.i.l.bf16 %v8690_v2  ;;  %v6153_v25 = vsel %vm1914_vm2, %v6121_v5, %v8721_v37  ;;  %v6154_v36 = vsel %vm1914_vm2, %v6122_v62, %v8722_v11 }
 0x8de   : > { %v8725_v18 = vpop.permute.xlu0 %8724  ;;  %v8717_v11 = vunpack.i.h.bf16 %v12329_v54  ;;  %v8716_v37 = vunpack.i.l.bf16 %v12329_v54 }
 0x8df   : > { %v6087_v44 = vsel %vm1947_vm3, %v6055_v33, %v8691_v28  ;;  %v6088_v38 = vsel %vm1947_vm3, %v6056_v35, %v8692_v52  ;;  %v8727_v23 = vunpack.i.h.bf16 %v8725_v18  ;;  %v8726_v51 = vunpack.i.l.bf16 %v8725_v18  ;;  %v4969_v33 = vld [vmem:[#allocation2 + $0x138] sm:$0xff]  ;;  %v4970_v35 = vld [vmem:[#allocation2 + $0x140] sm:$0xff] }
 0x8e0   : > { %v8695_v53 = vpop.permute.xlu1 %8694  ;;  %v6227_v58 = vpack.c.bf16 %v6088_v38, %v6087_v44 }
 0x8e1   : > { %v8697_v45 = vunpack.i.h.bf16 %v8695_v53  ;;  %v8696_v41 = vunpack.i.l.bf16 %v8695_v53  ;;  %v6185_v24 = vsel %vm1947_vm3, %v6153_v25, %v8726_v51  ;;  %v6186_v30 = vsel %vm1947_vm3, %v6154_v36, %v8727_v23 }
 0x8e2   : > { %6567 = vmatmul.mubr.bf16.gmra.mrb[168].mxu1 %v6227_v58  ;;  %v8730_v22 = vpop.permute.xlu0 %8729  ;;  %v6231_v21 = vpack.c.bf16 %v6186_v30, %v6185_v24  ;;  %v8672_v23 = vunpack.i.h.bf16 %v12333_v60  ;;  %v8671_v51 = vunpack.i.l.bf16 %v12333_v60  ;;  %v4971_v30 = vld [vmem:[#allocation2 + $0x150] sm:$0xff] }
 0x8e3   : > { %v8732_v52 = vunpack.i.h.bf16 %v8730_v22  ;;  %v8731_v28 = vunpack.i.l.bf16 %v8730_v22  ;;  %v6025_v3 = vsel %vm736_vm0, %v4969_v33, %v8696_v41  ;;  %v6026_v62 = vsel %vm736_vm0, %v4970_v35, %v8697_v45 }
 0x8e4   : > { %v8700_v2 = vpop.permute.xlu1 %8699  ;;  %6574 = vmatprep.mubr.bf16.mxu1 %v6231_v21  ;;  %v6027_v60 = vsel %vm736_vm0, %v4971_v30, %v8671_v51 }
 0x8e5   : > { %v8702_v43 = vunpack.i.h.bf16 %v8700_v2  ;;  %v8701_v55 = vunpack.i.l.bf16 %v8700_v2  ;;  %v6124_v18 = vsel %vm736_vm0, %v12011_v8, %v8732_v52  ;;  %v6123_v16 = vsel %vm736_vm0, %v12009_v6, %v8731_v28 }
 0x8e6   : > { %v8735_v54 = vpop.permute.xlu0 %8734  ;;  %v6155_v5 = vsel %vm1914_vm2, %v6123_v16, %v8711_v48  ;;  %v6156_v53 = vsel %vm1914_vm2, %v6124_v18, %v8712_v9  ;;  %v4972_v48 = vld [vmem:[#allocation2 + $0x158] sm:$0xff]  ;;  %v9008_v16 = vld [vmem:[#allocation2 + $0x181] sm:$0xff] }
 0x8e7   : > { %v6057_v44 = vsel %vm1914_vm2, %v6025_v3, %v8701_v55  ;;  %v6058_v38 = vsel %vm1914_vm2, %v6026_v62, %v8702_v43  ;;  %v6187_v6 = vsel %vm1947_vm3, %v6155_v5, %v8716_v37  ;;  %v6188_v24 = vsel %vm1947_vm3, %v6156_v53, %v8717_v11  ;;  %v9007_v43 = vld [vmem:[#allocation2 + $0x189] sm:$0xff] }
 0x8e8   : > { %v8705_v58 = vpop.permute.xlu1 %8704  ;;  %v6089_v25 = vsel %vm1947_vm3, %v6057_v44, %v8666_v20  ;;  %v6090_v8 = vsel %vm1947_vm3, %v6058_v38, %v8667_v31  ;;  %v8737_v22 = vunpack.i.h.bf16 %v8735_v54  ;;  %v6234_v21 = vpack.c.bf16 %v6188_v24, %v6187_v6 }
 0x8e9   : > { %v6230_v36 = vpack.c.bf16 %v6090_v8, %v6089_v25  ;;  %v8707_v45 = vunpack.i.h.bf16 %v8705_v58  ;;  %v8706_v41 = vunpack.i.l.bf16 %v8705_v58  ;;  %v6028_v2 = vsel %vm736_vm0, %v4972_v48, %v8672_v23  ;;  %v9009_v48 = vld [vmem:[#allocation2 + $0x168] sm:$0xff] }
 0x8ea   : > { %v8740_v9 = vpop.permute.xlu0 %8739  ;;  %v8736_v20 = vunpack.i.l.bf16 %v8735_v54  ;;  %v6126_v55 = vsel %vm736_vm0, %v9007_v43, %v8737_v22 }
 0x8eb   : > { %6575 = vmatmul.mubr.bf16.gmra.mrb[172].mxu1 %v6230_v36  ;;  %v8742_v33 = vunpack.i.h.bf16 %v8740_v9  ;;  %v8741_v37 = vunpack.i.l.bf16 %v8740_v9  ;;  %v6060_v35 = vsel %vm1914_vm2, %v6028_v2, %v8707_v45  ;;  %v6059_v11 = vsel %vm1914_vm2, %v6027_v60, %v8706_v41  ;;  %v9010_v9 = vld [vmem:[#allocation2 + $0x170] sm:$0xff] }
 0x8ec   : > { %v8745_v52 = vpop.permute.xlu1 %8744  ;;  %6582 = vmatprep.mubr.bf16.mxu1 %v6234_v21  ;;  %v6125_v44 = vsel %vm736_vm0, %v9008_v16, %v8736_v20 }
 0x8ed   : > { %v8747_v31 = vunpack.i.h.bf16 %v8745_v52  ;;  %v8746_v28 = vunpack.i.l.bf16 %v8745_v52  ;;  %v6157_v23 = vsel %vm1914_vm2, %v6125_v44, %v8741_v37  ;;  %v6158_v51 = vsel %vm1914_vm2, %v6126_v55, %v8742_v33 }
 0x8ee   : > { %v8760_v3 = vpop.permute.xlu0 %8759 }
 0x8ef   : > { %v6091_v62 = vsel %vm1947_vm3, %v6059_v11, %v8746_v28  ;;  %v6092_v18 = vsel %vm1947_vm3, %v6060_v35, %v8747_v31  ;;  %v8762_v54 = vunpack.i.h.bf16 %v8760_v3  ;;  %v8761_v5 = vunpack.i.l.bf16 %v8760_v3  ;;  %v12403_v35 = vld [vmem:[%s12646_s17] ss:$0 sm:$0xff] }
 0x8f0   : > { %v8750_v38 = vpop.permute.xlu1 %8749  ;;  %v6233_v53 = vpack.c.bf16 %v6092_v18, %v6091_v62 }
 0x8f1   : > { %v6189_v58 = vsel %vm1947_vm3, %v6157_v23, %v8761_v5  ;;  %v6190_v25 = vsel %vm1947_vm3, %v6158_v51, %v8762_v54  ;;  %v8752_v6 = vunpack.i.h.bf16 %v8750_v38  ;;  %v8751_v45 = vunpack.i.l.bf16 %v8750_v38  ;;  %v9011_v38 = vld [vmem:[%s9399_s18] sm:$0xff]  ;;  %v9012_v23 = vld [vmem:[%s9399_s18 + $0x8] sm:$0xff] }
 0x8f2   : > { %v6237_v8 = vpack.c.bf16 %v6190_v25, %v6189_v58 }
 0x8f3   : > { %6583 = vmatmul.mubr.bf16.gmra.mrb[176].mxu1 %v6233_v53  ;;  %v6029_v22 = vsel %vm736_vm0, %v9009_v48, %v8751_v45  ;;  %v6030_v21 = vsel %vm736_vm0, %v9010_v9, %v8752_v6  ;;  %v9014_v48 = vld [vmem:[%s9399_s18 + $0x18] sm:$0xff] }
 0x8f4   : > { %v8755_v36 = vpop.permute.xlu1 %8754  ;;  %6590 = vmatprep.mubr.bf16.mxu1 %v6237_v8 }
 0x8f5   : > { %v8757_v41 = vunpack.i.h.bf16 %v8755_v36  ;;  %v8756_v24 = vunpack.i.l.bf16 %v8755_v36 }
 0x8f7   : > { %v6061_v20 = vsel %vm1914_vm2, %v6029_v22, %v8756_v24  ;;  %v6062_v52 = vsel %vm1914_vm2, %v6030_v21, %v8757_v41  ;;  %v9013_v41 = vld [vmem:[%s9399_s18 + $0x10] sm:$0xff] }
 0x8f8   : > { %v8765_v30 = vpop.permute.xlu1 %8764 }
 0x8f9   : > { %v8767_v60 = vunpack.i.h.bf16 %v8765_v30  ;;  %v8766_v2 = vunpack.i.l.bf16 %v8765_v30 }
 0x8fb   : > { %v6093_v31 = vsel %vm1947_vm3, %v6061_v20, %v8766_v2  ;;  %v6094_v28 = vsel %vm1947_vm3, %v6062_v52, %v8767_v60 }
 0x8fc   : > { %v6236_v33 = vpack.c.bf16 %v6094_v28, %v6093_v31  ;;  %v9015_v28 = vld [vmem:[%s9399_s18 + $0x20] sm:$0xff] }
 0x8fe   : > { %6591 = vmatmul.mubr.bf16.gmra.mrb[180].mxu1 %v6236_v33 }
 0x929   : > { %v7373_v37 = vpop.f32.mrb[120].mxu1 }
 0x92a   : > { %v7374_v11 = vpop.f32.mrb[121].mxu1 }
 0x92b   : > { %v7375_v43 = vadd.f32 %v7374_v11, %v7373_v37  ;;  %v7376_v55 = vpop.f32.mrb[122].mxu1 }
 0x92c   : > { %v7377_v3 = vpop.f32.mrb[123].mxu1 }
 0x92d   : > { %v6473_v62 = vadd.f32 %v7375_v43, %v12403_v35  ;;  %v7378_v18 = vadd.f32 %v7377_v3, %v7376_v55  ;;  %v9016_v43 = vld [vmem:[%s9399_s18 + $0x28] sm:$0xff] }
 0x92f   : > { %v6634_v16 = vadd.f32 %v12189_v49, %v6473_v62  ;;  %v6476_v44 = vadd.f32 %v7378_v18, %v12403_v35 }
 0x931   : > { %v6760_v54 = vadd.f32 %v9011_v38, %v6634_v16  ;;  %v6637_v5 = vadd.f32 %v12193_v57, %v6476_v44 }
 0x932   : > { %v7379_v53 = vpop.f32.mrb[124].mxu1 }
 0x933   : > { %6792 = vst.msk [vmem:[%s12412_s27] sm:$0xff] %vm736_vm0, %v6760_v54  ;;  %v6761_v51 = vadd.f32 %v9012_v23, %v6637_v5  ;;  %v7380_v49 = vpop.f32.mrb[125].mxu1 }
 0x934   : > { %v7381_v58 = vadd.f32 %v7380_v49, %v7379_v53  ;;  %v7382_v25 = vpop.f32.mrb[126].mxu1 }
 0x935   : > { %6793 = vst.msk [vmem:[%s12412_s27 + $0x8] sm:$0xff] %vm736_vm0, %v6761_v51  ;;  %v7383_v8 = vpop.f32.mrb[127].mxu1  ;;  %v9017_v51 = vld [vmem:[%s9399_s18 + $0x30] sm:$0xff] }
 0x936   : > { %v6481_v57 = vadd.f32 %v7381_v58, %v12403_v35  ;;  %v7384_v36 = vadd.f32 %v7383_v8, %v7382_v25  ;;  %v9018_v25 = vld [vmem:[%s9399_s18 + $0x38] sm:$0xff] }
 0x938   : > { %v6642_v6 = vadd.f32 %v12185_v27, %v6481_v57  ;;  %v6484_v45 = vadd.f32 %v7384_v36, %v12403_v35 }
 0x93a   : > { %v6762_v24 = vadd.f32 %v9013_v41, %v6642_v6  ;;  %v6645_v30 = vadd.f32 %v12191_v29, %v6484_v45 }
 0x93c   : > { %6794 = vst.msk [vmem:[%s12412_s27 + $0x10] sm:$0xff] %vm736_vm0, %v6762_v24  ;;  %v6763_v22 = vadd.f32 %v9014_v48, %v6645_v30  ;;  %v9019_v48 = vld [vmem:[%s9399_s18 + $0x40] sm:$0xff] }
 0x93e   : > { %6795 = vst.msk [vmem:[%s12412_s27 + $0x18] sm:$0xff] %vm736_vm0, %v6763_v22 }
 0x941   : > { %v7385_v9 = vpop.f32.mrb[128].mxu1 }
 0x942   : > { %v7386_v21 = vpop.f32.mrb[129].mxu1 }
 0x943   : > { %v7387_v60 = vadd.f32 %v7386_v21, %v7385_v9  ;;  %v7388_v2 = vpop.f32.mrb[130].mxu1 }
 0x944   : > { %v7389_v27 = vpop.f32.mrb[131].mxu1  ;;  %v12437_v62 = vpop.f32.mrb[168].mxu0 }
 0x945   : > { %v6489_v20 = vadd.f32 %v7387_v60, %v12403_v35  ;;  %v7390_v52 = vadd.f32 %v7389_v27, %v7388_v2  ;;  %v9020_v60 = vld [vmem:[%s9399_s18 + $0x48] sm:$0xff] }
 0x947   : > { %v6650_v31 = vadd.f32 %v12209_v7, %v6489_v20  ;;  %v6492_v29 = vadd.f32 %v7390_v52, %v12403_v35  ;;  %v12439_v7 = vpop.f32.mrb[169].mxu0 }
 0x949   : > { %v6764_v33 = vadd.f32 %v9015_v28, %v6650_v31  ;;  %v6653_v37 = vadd.f32 %v12215_v46, %v6492_v29  ;;  %v12443_v46 = vpop.f32.mrb[170].mxu0 }
 0x94a   : > { %v7391_v11 = vpop.f32.mrb[132].mxu1  ;;  %v12446_v5 = vpop.f32.mrb[171].mxu0 }
 0x94b   : > { %6796 = vst.msk [vmem:[%s12412_s27 + $0x20] sm:$0xff] %vm736_vm0, %v6764_v33  ;;  %v6765_v55 = vadd.f32 %v9016_v43, %v6653_v37  ;;  %v7392_v3 = vpop.f32.mrb[133].mxu1  ;;  %v9021_v33 = vld [vmem:[%s9399_s18 + $0x50] sm:$0xff]  ;;  %v9022_v43 = vld [vmem:[%s9399_s18 + $0x58] sm:$0xff] }
 0x94c   : > { %v7393_v18 = vadd.f32 %v7392_v3, %v7391_v11  ;;  %v7394_v16 = vpop.f32.mrb[134].mxu1 }
 0x94d   : > { %6797 = vst.msk [vmem:[%s12412_s27 + $0x28] sm:$0xff] %vm736_vm0, %v6765_v55  ;;  %v7395_v44 = vpop.f32.mrb[135].mxu1 }
 0x94e   : > { %v6497_v38 = vadd.f32 %v7393_v18, %v12403_v35  ;;  %v7396_v54 = vadd.f32 %v7395_v44, %v7394_v16 }
 0x950   : > { %v6658_v53 = vadd.f32 %v12204_v0, %v6497_v38  ;;  %v6500_v23 = vadd.f32 %v7396_v54, %v12403_v35 }
 0x952   : > { %v6766_v49 = vadd.f32 %v9017_v51, %v6658_v53  ;;  %v6661_v58 = vadd.f32 %v12211_v13, %v6500_v23  ;;  %v9023_v23 = vld [vmem:[%s9399_s18 + $0x60] sm:$0xff] }
 0x954   : > { %6798 = vst.msk [vmem:[%s12412_s27 + $0x30] sm:$0xff] %vm736_vm0, %v6766_v49  ;;  %v6767_v8 = vadd.f32 %v9018_v25, %v6661_v58  ;;  %v9024_v25 = vld [vmem:[%s9399_s18 + $0x68] sm:$0xff] }
 0x956   : > { %6799 = vst.msk [vmem:[%s12412_s27 + $0x38] sm:$0xff] %vm736_vm0, %v6767_v8 }
 0x959   : > { %v7397_v57 = vpop.f32.mrb[136].mxu1 }
 0x95a   : > { %v7398_v36 = vpop.f32.mrb[137].mxu1 }
 0x95b   : > { %v7399_v6 = vadd.f32 %v7398_v36, %v7397_v57  ;;  %v7400_v45 = vpop.f32.mrb[138].mxu1 }
 0x95c   : > { %v7401_v0 = vpop.f32.mrb[139].mxu1 }
 0x95d   : > { %v6505_v41 = vadd.f32 %v7399_v6, %v12403_v35  ;;  %v7402_v24 = vadd.f32 %v7401_v0, %v7400_v45 }
 0x95f   : > { %v6666_v30 = vadd.f32 %v12230_v59, %v6505_v41  ;;  %v6508_v13 = vadd.f32 %v7402_v24, %v12403_v35  ;;  %v9025_v24 = vld [vmem:[%s9399_s18 + $0x70] sm:$0xff] }
 0x961   : > { %v6768_v22 = vadd.f32 %v9019_v48, %v6666_v30  ;;  %v6669_v9 = vadd.f32 %v12240_v47, %v6508_v13  ;;  %v9026_v48 = vld [vmem:[%s9399_s18 + $0x78] sm:$0xff] }
 0x962   : > { %v7403_v21 = vpop.f32.mrb[140].mxu1 }
 0x963   : > { %6800 = vst.msk [vmem:[%s12412_s27 + $0x40] sm:$0xff] %vm736_vm0, %v6768_v22  ;;  %v6769_v2 = vadd.f32 %v9020_v60, %v6669_v9  ;;  %v7404_v27 = vpop.f32.mrb[141].mxu1 }
 0x964   : > { %v7405_v20 = vadd.f32 %v7404_v27, %v7403_v21  ;;  %v7406_v52 = vpop.f32.mrb[142].mxu1 }
 0x965   : > { %6801 = vst.msk [vmem:[%s12412_s27 + $0x48] sm:$0xff] %vm736_vm0, %v6769_v2  ;;  %v7407_v59 = vpop.f32.mrb[143].mxu1 }
 0x966   : > { %v6513_v31 = vadd.f32 %v7405_v20, %v12403_v35  ;;  %v7408_v29 = vadd.f32 %v7407_v59, %v7406_v52  ;;  %v9027_v59 = vld [vmem:[%s9399_s18 + $0x80] sm:$0xff] }
 0x968   : > { %v6674_v28 = vadd.f32 %v12226_v19, %v6513_v31  ;;  %v6516_v47 = vadd.f32 %v7408_v29, %v12403_v35 }
 0x96a   : > { %v6770_v37 = vadd.f32 %v9021_v33, %v6674_v28  ;;  %v6677_v11 = vadd.f32 %v12234_v1, %v6516_v47  ;;  %v9028_v47 = vld [vmem:[%s9399_s18 + $0x88] sm:$0xff] }
 0x96c   : > { %6802 = vst.msk [vmem:[%s12412_s27 + $0x50] sm:$0xff] %vm736_vm0, %v6770_v37  ;;  %v6771_v55 = vadd.f32 %v9022_v43, %v6677_v11 }
 0x96e   : > { %6803 = vst.msk [vmem:[%s12412_s27 + $0x58] sm:$0xff] %vm736_vm0, %v6771_v55 }
 0x971   : > { %v7409_v3 = vpop.f32.mrb[144].mxu1 }
 0x972   : > { %v7410_v18 = vpop.f32.mrb[145].mxu1 }
 0x973   : > { %v7411_v16 = vadd.f32 %v7410_v18, %v7409_v3  ;;  %v7412_v44 = vpop.f32.mrb[146].mxu1 }
 0x974   : > { %v7413_v19 = vpop.f32.mrb[147].mxu1 }
 0x975   : > { %v6521_v38 = vadd.f32 %v7411_v16, %v12403_v35  ;;  %v7414_v54 = vadd.f32 %v7413_v19, %v7412_v44  ;;  %v9029_v16 = vld [vmem:[%s9399_s18 + $0x90] sm:$0xff] }
 0x977   : > { %v6682_v53 = vadd.f32 %v12261_v42, %v6521_v38  ;;  %v6524_v1 = vadd.f32 %v7414_v54, %v12403_v35  ;;  %v9030_v38 = vld [vmem:[%s9399_s18 + $0x98] sm:$0xff] }
 0x979   : > { %v6772_v51 = vadd.f32 %v9023_v23, %v6682_v53  ;;  %v6685_v49 = vadd.f32 %v12265_v12, %v6524_v1 }
 0x97a   : > { %v7415_v58 = vpop.f32.mrb[148].mxu1 }
 0x97b   : > { %6804 = vst.msk [vmem:[%s12412_s27 + $0x60] sm:$0xff] %vm736_vm0, %v6772_v51  ;;  %v6773_v8 = vadd.f32 %v9024_v25, %v6685_v49  ;;  %v7416_v57 = vpop.f32.mrb[149].mxu1 }
 0x97c   : > { %v7417_v36 = vadd.f32 %v7416_v57, %v7415_v58  ;;  %v7418_v6 = vpop.f32.mrb[150].mxu1 }
 0x97d   : > { %6805 = vst.msk [vmem:[%s12412_s27 + $0x68] sm:$0xff] %vm736_vm0, %v6773_v8  ;;  %v7419_v42 = vpop.f32.mrb[151].mxu1  ;;  %v9031_v8 = vld [vmem:[%s9399_s18 + $0xa0] sm:$0xff] }
 0x97e   : > { %v6529_v45 = vadd.f32 %v7417_v36, %v12403_v35  ;;  %v7420_v0 = vadd.f32 %v7419_v42, %v7418_v6  ;;  %v9032_v42 = vld [vmem:[%s9399_s18 + $0xa8] sm:$0xff] }
 0x980   : > { %v6690_v41 = vadd.f32 %v12259_v40, %v6529_v45  ;;  %v6532_v12 = vadd.f32 %v7420_v0, %v12403_v35 }
 0x982   : > { %v6774_v30 = vadd.f32 %v9025_v24, %v6690_v41  ;;  %v6693_v13 = vadd.f32 %v12263_v10, %v6532_v12 }
 0x984   : > { %6806 = vst.msk [vmem:[%s12412_s27 + $0x70] sm:$0xff] %vm736_vm0, %v6774_v30  ;;  %v6775_v22 = vadd.f32 %v9026_v48, %v6693_v13  ;;  %v9033_v48 = vld [vmem:[%s9399_s18 + $0xb0] sm:$0xff] }
 0x986   : > { %6807 = vst.msk [vmem:[%s12412_s27 + $0x78] sm:$0xff] %vm736_vm0, %v6775_v22 }
 0x989   : > { %v7421_v9 = vpop.f32.mrb[152].mxu1 }
 0x98a   : > { %v7422_v21 = vpop.f32.mrb[153].mxu1 }
 0x98b   : > { %v7423_v60 = vadd.f32 %v7422_v21, %v7421_v9  ;;  %v7424_v2 = vpop.f32.mrb[154].mxu1  ;;  %v9034_v21 = vld [vmem:[%s9399_s18 + $0xb8] sm:$0xff] }
 0x98c   : > { %v7425_v40 = vpop.f32.mrb[155].mxu1 }
 0x98d   : > { %v6537_v27 = vadd.f32 %v7423_v60, %v12403_v35  ;;  %v7426_v20 = vadd.f32 %v7425_v40, %v7424_v2 }
 0x98f   : > { %v6698_v52 = vadd.f32 %v12281_v34, %v6537_v27  ;;  %v6540_v10 = vadd.f32 %v7426_v20, %v12403_v35 }
 0x991   : > { %v6776_v31 = vadd.f32 %v9027_v59, %v6698_v52  ;;  %v6701_v29 = vadd.f32 %v12288_v39, %v6540_v10 }
 0x992   : > { %v7427_v28 = vpop.f32.mrb[156].mxu1 }
 0x993   : > { %6808 = vst.msk [vmem:[%s12412_s27 + $0x80] sm:$0xff] %vm736_vm0, %v6776_v31  ;;  %v6777_v33 = vadd.f32 %v9028_v47, %v6701_v29  ;;  %v7428_v37 = vpop.f32.mrb[157].mxu1  ;;  %v9035_v31 = vld [vmem:[%s9399_s18 + $0xc0] sm:$0xff] }
 0x994   : > { %v7429_v11 = vadd.f32 %v7428_v37, %v7427_v28  ;;  %v7430_v43 = vpop.f32.mrb[158].mxu1 }
 0x995   : > { %6809 = vst.msk [vmem:[%s12412_s27 + $0x88] sm:$0xff] %vm736_vm0, %v6777_v33  ;;  %v7431_v34 = vpop.f32.mrb[159].mxu1  ;;  %v9036_v33 = vld [vmem:[%s9399_s18 + $0xc8] sm:$0xff] }
 0x996   : > { %v6545_v55 = vadd.f32 %v7429_v11, %v12403_v35  ;;  %v7432_v3 = vadd.f32 %v7431_v34, %v7430_v43 }
 0x998   : > { %v6706_v18 = vadd.f32 %v12279_v17, %v6545_v55  ;;  %v6548_v39 = vadd.f32 %v7432_v3, %v12403_v35 }
 0x99a   : > { %v6778_v44 = vadd.f32 %v9029_v16, %v6706_v18  ;;  %v6709_v19 = vadd.f32 %v12285_v14, %v6548_v39  ;;  %v9037_v39 = vld [vmem:[%s9399_s18 + $0xd0] sm:$0xff] }
 0x99c   : > { %6810 = vst.msk [vmem:[%s12412_s27 + $0x90] sm:$0xff] %vm736_vm0, %v6778_v44  ;;  %v6779_v54 = vadd.f32 %v9030_v38, %v6709_v19 }
 0x99e   : > { %6811 = vst.msk [vmem:[%s12412_s27 + $0x98] sm:$0xff] %vm736_vm0, %v6779_v54  ;;  %v9038_v54 = vld [vmem:[%s9399_s18 + $0xd8] sm:$0xff] }
 0x9a1   : > { %v7433_v53 = vpop.f32.mrb[160].mxu1 }
 0x9a2   : > { %v7434_v1 = vpop.f32.mrb[161].mxu1 }
 0x9a3   : > { %v7435_v23 = vadd.f32 %v7434_v1, %v7433_v53  ;;  %v7436_v51 = vpop.f32.mrb[162].mxu1 }
 0x9a4   : > { %v7437_v17 = vpop.f32.mrb[163].mxu1 }
 0x9a5   : > { %v6553_v49 = vadd.f32 %v7435_v23, %v12403_v35  ;;  %v7438_v58 = vadd.f32 %v7437_v17, %v7436_v51 }
 0x9a7   : > { %v6714_v25 = vadd.f32 %v12304_v26, %v6553_v49  ;;  %v6556_v14 = vadd.f32 %v7438_v58, %v12403_v35  ;;  %v9039_v58 = vld [vmem:[%s9399_s18 + $0xe0] sm:$0xff] }
 0x9a9   : > { %v6780_v57 = vadd.f32 %v9031_v8, %v6714_v25  ;;  %v6717_v36 = vadd.f32 %v12316_v56, %v6556_v14  ;;  %v9040_v8 = vld [vmem:[%s9399_s18 + $0xe8] sm:$0xff] }
 0x9aa   : > { %v7439_v6 = vpop.f32.mrb[164].mxu1 }
 0x9ab   : > { %6812 = vst.msk [vmem:[%s12412_s27 + $0xa0] sm:$0xff] %vm736_vm0, %v6780_v57  ;;  %v6781_v45 = vadd.f32 %v9032_v42, %v6717_v36  ;;  %v7440_v0 = vpop.f32.mrb[165].mxu1 }
 0x9ac   : > { %v7441_v41 = vadd.f32 %v7440_v0, %v7439_v6  ;;  %v7442_v12 = vpop.f32.mrb[166].mxu1 }
 0x9ad   : > { %6813 = vst.msk [vmem:[%s12412_s27 + $0xa8] sm:$0xff] %vm736_vm0, %v6781_v45  ;;  %v7443_v26 = vpop.f32.mrb[167].mxu1 }
 0x9ae   : > { %v6561_v24 = vadd.f32 %v7441_v41, %v12403_v35  ;;  %v7444_v30 = vadd.f32 %v7443_v26, %v7442_v12  ;;  %v9041_v26 = vld [vmem:[%s9399_s18 + $0xf0] sm:$0xff] }
 0x9b0   : > { %v6722_v13 = vadd.f32 %v12300_v15, %v6561_v24  ;;  %v6564_v56 = vadd.f32 %v7444_v30, %v12403_v35 }
 0x9b2   : > { %v6782_v22 = vadd.f32 %v9033_v48, %v6722_v13  ;;  %v6725_v9 = vadd.f32 %v12312_v61, %v6564_v56 }
 0x9b4   : > { %6814 = vst.msk [vmem:[%s12412_s27 + $0xb0] sm:$0xff] %vm736_vm0, %v6782_v22  ;;  %v6783_v60 = vadd.f32 %v9034_v21, %v6725_v9 }
 0x9b5   : > { %v7445_v2 = vpop.f32.mrb[168].mxu1 }
 0x9b6   : > { %6815 = vst.msk [vmem:[%s12412_s27 + $0xb8] sm:$0xff] %vm736_vm0, %v6783_v60  ;;  %v7446_v40 = vpop.f32.mrb[169].mxu1 }
 0x9b7   : > { %v7447_v27 = vadd.f32 %v7446_v40, %v7445_v2  ;;  %v7448_v20 = vpop.f32.mrb[170].mxu1 }
 0x9b8   : > { %v7449_v15 = vpop.f32.mrb[171].mxu1 }
 0x9b9   : > { %v6569_v52 = vadd.f32 %v7447_v27, %v12403_v35  ;;  %v7450_v10 = vadd.f32 %v7449_v15, %v7448_v20 }
 0x9bb   : > { %v6730_v59 = vadd.f32 %v12337_v32, %v6569_v52  ;;  %v6572_v61 = vadd.f32 %v7450_v10, %v12403_v35 }
 0x9bd   : > { %v6784_v29 = vadd.f32 %v9035_v31, %v6730_v59  ;;  %v6733_v28 = vadd.f32 %v12344_v63, %v6572_v61 }
 0x9be   : > { %v7451_v47 = vpop.f32.mrb[172].mxu1 }
 0x9bf   : > { %6816 = vst.msk [vmem:[%s12412_s27 + $0xc0] sm:$0xff] %vm736_vm0, %v6784_v29  ;;  %v6785_v37 = vadd.f32 %v9036_v33, %v6733_v28  ;;  %v7452_v11 = vpop.f32.mrb[173].mxu1 }
 0x9c0   : > { %v7453_v43 = vadd.f32 %v7452_v11, %v7451_v47  ;;  %v7454_v34 = vpop.f32.mrb[174].mxu1 }
 0x9c1   : > { %6817 = vst.msk [vmem:[%s12412_s27 + $0xc8] sm:$0xff] %vm736_vm0, %v6785_v37  ;;  %v7455_v32 = vpop.f32.mrb[175].mxu1 }
 0x9c2   : > { %v6577_v55 = vadd.f32 %v7453_v43, %v12403_v35  ;;  %v7456_v3 = vadd.f32 %v7455_v32, %v7454_v34 }
 0x9c4   : > { %v6738_v18 = vadd.f32 %v12335_v4, %v6577_v55  ;;  %v6580_v63 = vadd.f32 %v7456_v3, %v12403_v35 }
 0x9c6   : > { %v6786_v16 = vadd.f32 %v9037_v39, %v6738_v18  ;;  %v6741_v44 = vadd.f32 %v12341_v50, %v6580_v63  ;;  %v7457_v19 = vpop.f32.mrb[176].mxu1 }
 0x9c7   : > { %v7458_v38 = vpop.f32.mrb[177].mxu1 }
 0x9c8   : > { %6818 = vst.msk [vmem:[%s12412_s27 + $0xd0] sm:$0xff] %vm736_vm0, %v6786_v16  ;;  %v6787_v53 = vadd.f32 %v9038_v54, %v6741_v44  ;;  %v7459_v1 = vadd.f32 %v7458_v38, %v7457_v19  ;;  %v7460_v23 = vpop.f32.mrb[178].mxu1 }
 0x9c9   : > { %v7461_v51 = vpop.f32.mrb[179].mxu1 }
 0x9ca   : > { %6819 = vst.msk [vmem:[%s12412_s27 + $0xd8] sm:$0xff] %vm736_vm0, %v6787_v53  ;;  %v7462_v4 = vadd.f32 %v7461_v51, %v7460_v23  ;;  %v6585_v17 = vadd.f32 %v7459_v1, %v12403_v35 }
 0x9cc   : > { %v6746_v49 = vadd.f32 %v12439_v7, %v6585_v17  ;;  %v6588_v50 = vadd.f32 %v7462_v4, %v12403_v35 }
 0x9ce   : > { %v6788_v25 = vadd.f32 %v9039_v58, %v6746_v49  ;;  %v6749_v14 = vadd.f32 %v12446_v5, %v6588_v50 }
 0x9d0   : > { %6820 = vst.msk [vmem:[%s12412_s27 + $0xe0] sm:$0xff] %vm736_vm0, %v6788_v25  ;;  %v6789_v57 = vadd.f32 %v9040_v8, %v6749_v14 }
 0x9d1   : > { %v7463_v36 = vpop.f32.mrb[180].mxu1 }
 0x9d2   : > { %6821 = vst.msk [vmem:[%s12412_s27 + $0xe8] sm:$0xff] %vm736_vm0, %v6789_v57  ;;  %v7464_v6 = vpop.f32.mrb[181].mxu1 }
 0x9d3   : > { %v7465_v7 = vadd.f32 %v7464_v6, %v7463_v36  ;;  %v7466_v42 = vpop.f32.mrb[182].mxu1 }
 0x9d4   : > { %v7467_v45 = vpop.f32.mrb[183].mxu1 }
 0x9d5   : > { %v6593_v0 = vadd.f32 %v7465_v7, %v12403_v35  ;;  %v7468_v41 = vadd.f32 %v7467_v45, %v7466_v42 }
 0x9d7   : > { %v6754_v5 = vadd.f32 %v12437_v62, %v6593_v0  ;;  %v6596_v12 = vadd.f32 %v7468_v41, %v12403_v35  ;;  %v9042_v62 = vld [vmem:[%s9399_s18 + $0xf8] sm:$0xff] }
 0x9d9   : > { %v6790_v24 = vadd.f32 %v9041_v26, %v6754_v5  ;;  %v6757_v30 = vadd.f32 %v12443_v46, %v6596_v12 }
 0x9db   : > { %6822 = vst.msk [vmem:[%s12412_s27 + $0xf0] sm:$0xff] %vm736_vm0, %v6790_v24  ;;  %v6791_v35 = vadd.f32 %v9042_v62, %v6757_v30 }
 0x9dd   : > { %6823 = vst.msk [vmem:[%s12412_s27 + $0xf8] sm:$0xff] %vm736_vm0, %v6791_v35 }
 0x9de   : > { %9056 = shalt.err (!%p9053_p3)
}
 0x9df   : > { %s9057_s18 = scalar_lea.hbm %s12577_s24, 4096  ;;  %s9061_s23 = scalar_lea.hbm %s12774_s21, 8192 }
 0x9e0   : > { %p9058_p4 = scmp.ne.s32.totalorder %s12577_s24, %s9057_s18  ;;  %p9062_p9 = scmp.lt.u32.totalorder %s12577_s24, %s12774_s21 }
 0x9e1   : > { %p9063_p10 = scmp.lt.u32.totalorder %s9061_s23, %s9057_s18  ;;  %p9065_p12 = scmp.lt.u32.totalorder %s9057_s18, %s12577_s24 }
 0x9e2   : > { %p9059_p7 = pnand %p9058_p4, %p9248_p5 }
 0x9e3   : > { %p9064_p11 = por %p9063_p10, %p9062_p9 }
 0x9e4   : > { %p9060_p8 = pneg %p9059_p7 }
 0x9e5   : > { %p9066_p13 = por %p9065_p12, %p9064_p11 }
 0x9e7   : > { %p9067_p0 = pnand %p9066_p13, %p9060_p8 }
 0x9e9   : > { %9070 = shalt.err (!%p9067_p0)
}
 0x9ea   : > { %s9113_s25 = smov 128   ;;  %s9114_s22 = smov 8  }
 0x9eb   : > { %7762 = dma.vmem_to_hbm [thread:$0]  (%p9248_p5), %s12579_s26, 4096, %s12577_s24, %s12588_s0, %s9113_s25, %s9113_s25, %s9114_s22  }
 0x9ec PF: > { %s12775_s1 = sld [smem:[#allocation8_spill]]  ;;  %s12776_s29 = sld [smem:[#allocation6_spill]] }
 0x9f2   : > { %p7768_p1 = scmp.ge.s32.totalorder %s12775_s1, 2  ;;  %s6853_s27 = sand.u32 1, %s12776_s29  }
 0x9f3   : > { %s6854_s18 = scalar_lea.sflag [#allocation4], %s6853_s27 }
 0x9f4   : > { %p7765_p2 = pnand %p7768_p1, %p9252_p6 }
 0x9f6   : > { %9088 = dma.done.wait (!%p7765_p2), %s6854_s18, 4096  }
 0x9f7   : > { %9090 = vsyncadd (!%p7765_p2), %s6854_s18, 4294963200  ;;  %s12778_s30 = sld [smem:[#allocation9_spill]]  ;;  %s12779_s23 = sld [smem:[#allocation7_spill]] }
 0x9f8   : > { %s12780_s29 = sld [smem:[#allocation10_spill]]  ;;  %s12781_s27 = smov %s9097_s28 }
 0x9fd   : > { %p28_p3 = scmp.ge.s32.totalorder %s12778_s30, 4   ;;  %s12782_s28 = smov %s12779_s23 }
 0x9ff   :  { %30 = sbr.rel (!%p28_p3) target bundleno = 8 (0x8), region = 135 }
 0xa06   :  { %6859 = vsyncpa [#allocation4], 1 }
 0xa07   :  { %6861 = vsyncpa [#allocation4 + $0x1], 1 }

</bundles_post_ra>
